<compile_context>
chip_gen: v5e
topology: v5e:2x2
jax: 0.10.0
libtpu: 0.0.40
codegen_flags: <defaults>
</compile_context>

<pallas_src>
import numpy as np
import jax
import jax.numpy as jnp
from jax.experimental import pallas as pl
from jax.experimental.pallas import tpu as pltpu

FILTERS = 128
IN_C = 16
H = W = 4
CONV_KERNELS = [(4, 1), (1, 4), (2, 2), (3, 3), (4, 4)]
IN_FLAT = IN_C * H * W                 # 256
HIDDEN = 2816                          # 512 + 512 + 1152 + 512 + 128
FC1, FC2, OUT = 512, 128, 4
OUT_PAD = 128                          # lane-dense output width (slice to 4 outside)


# ---------------------------------------------------------------- Pallas kernel
def cnn256_kernel(x_ref, wc_ref, bc_ref, w1_ref, b1_ref, w2_ref, b2_ref,
                  w3_ref, b3_ref, out_ref):
    f32 = jnp.float32
    bf16 = jnp.bfloat16

    # conv1..conv5 lowered to one dense bf16 matmul (f32 accumulate) + bias + ReLU
    x = x_ref[...].astype(bf16)                                   # (TB, 256)
    h = jnp.dot(x, wc_ref[...], preferred_element_type=f32) + bc_ref[...]
    h = jnp.maximum(h, 0.0)                                        # (TB, 2816) f32

    # fc1 + ReLU
    h1 = jnp.dot(h.astype(bf16), w1_ref[...],
                 preferred_element_type=f32) + b1_ref[...]
    h1 = jnp.maximum(h1, 0.0)                                      # (TB, 512)

    # fc2 + ReLU
    h2 = jnp.dot(h1.astype(bf16), w2_ref[...],
                 preferred_element_type=f32) + b2_ref[...]
    h2 = jnp.maximum(h2, 0.0)                                      # (TB, 128)

    # fc3 (no activation); padded to 128 lanes for dense stores
    out_ref[...] = jnp.dot(h2.astype(bf16), w3_ref[...],
                           preferred_element_type=f32) + b3_ref[...]


# ------------------------------------------------------- conv -> dense scatter
def build_dense_conv(conv_params):
    """Scatter the 5 (OIHW) conv kernels into a (256, 2816) matrix.

    Column ordering matches torch:  off_i + c*(OH*OW) + oh*OW + ow.
    Row ordering matches NCHW flatten of x:  ic*16 + ih*4 + iw.
    """
    Wbig = np.zeros((IN_FLAT, HIDDEN), dtype=np.float32)
    bbig = np.zeros((HIDDEN,), dtype=np.float32)
    off = 0
    for (w, b) in conv_params:
        w = np.asarray(w)
        b = np.asarray(b)
        C, IC, KH, KW = w.shape
        OH, OW = H - KH + 1, W - KW + 1
        P = OH * OW
        for ic in range(IC):
            for kh in range(KH):
                for kw in range(KW):
                    for oh in range(OH):
                        for ow in range(OW):
                            in_flat = ic * (H * W) + (oh + kh) * W + (ow + kw)
                            feat = off + np.arange(C) * P + oh * OW + ow
                            Wbig[in_flat, feat] += w[:, ic, kh, kw]
        bbig[off:off + C * P] = np.repeat(b, P)
        off += C * P
    assert off == HIDDEN
    return Wbig, bbig


# ------------------------------------------------------------------ parameters
def init_params(key):
    keys = jax.random.split(key, 16)
    k = iter(keys)

    def rnd(shape, fan_in):
        return (jax.random.normal(next(k), shape, dtype=jnp.float32)
                / np.sqrt(fan_in)).astype(jnp.float32)

    convs = []
    for (kh, kw) in CONV_KERNELS:
        w = rnd((FILTERS, IN_C, kh, kw), IN_C * kh * kw)
        b = rnd((FILTERS,), IN_C * kh * kw)
        convs.append((w, b))

    fc1_w = rnd((FC1, HIDDEN), HIDDEN)
    fc1_b = rnd((FC1,), HIDDEN)
    fc2_w = rnd((FC2, FC1), FC1)
    fc2_b = rnd((FC2,), FC1)
    fc3_w = rnd((OUT, FC2), FC2)
    fc3_b = rnd((OUT,), FC2)

    torch_params = dict(convs=convs, fc1_w=fc1_w, fc1_b=fc1_b,
                        fc2_w=fc2_w, fc2_b=fc2_b, fc3_w=fc3_w, fc3_b=fc3_b)

    # kernel-side parameters: dense conv matrix, transposed FC weights (bf16),
    # 2-D f32 biases, fc3 padded to 128 output lanes.
    Wc, bc = build_dense_conv(convs)
    w3_pad = np.zeros((FC2, OUT_PAD), dtype=np.float32)
    w3_pad[:, :OUT] = np.asarray(fc3_w).T
    b3_pad = np.zeros((OUT_PAD,), dtype=np.float32)
    b3_pad[:OUT] = np.asarray(fc3_b)

    kernel_params = dict(
        wc=jnp.asarray(Wc).astype(jnp.bfloat16),
        bc=jnp.asarray(bc)[None, :],
        w1t=jnp.asarray(fc1_w).T.astype(jnp.bfloat16),
        b1=jnp.asarray(fc1_b)[None, :],
        w2t=jnp.asarray(fc2_w).T.astype(jnp.bfloat16),
        b2=jnp.asarray(fc2_b)[None, :],
        w3t=jnp.asarray(w3_pad).astype(jnp.bfloat16),
        b3=jnp.asarray(b3_pad)[None, :],
    )
    return torch_params, kernel_params


# --------------------------------------------------------------------- wrapper
def cnn256_forward(x_nchw, kp, tb=None):
    B = x_nchw.shape[0]
    x_flat = x_nchw.reshape(B, IN_FLAT).astype(jnp.float32)   # NCHW flatten (glue)

    # Batch tile: 256 rows at scale (good MXU M), >=8 and padded for small B.
    if tb is None:
        tb = 256 if B >= 256 else max(8, ((B + 7) // 8) * 8)
    b_pad = pl.cdiv(B, tb) * tb
    if b_pad != B:
        x_flat = jnp.pad(x_flat, ((0, b_pad - B), (0, 0)))
    grid = (b_pad // tb,)

    def const(shape):
        # weights/biases: same block every grid step -> stay resident in VMEM
        return pl.BlockSpec(shape, lambda i: (0, 0))

    in_specs = [
        pl.BlockSpec((tb, IN_FLAT), lambda i: (i, 0)),   # x tile (double-buffered)
        const((IN_FLAT, HIDDEN)), const((1, HIDDEN)),    # conv-as-dense W, b
        const((HIDDEN, FC1)), const((1, FC1)),           # fc1
        const((FC1, FC2)), const((1, FC2)),              # fc2
        const((FC2, OUT_PAD)), const((1, OUT_PAD)),      # fc3 (padded to 128)
    ]

    weight_bytes = 2 * (IN_FLAT * HIDDEN + HIDDEN * FC1 + FC1 * FC2 + FC2 * OUT_PAD) \
        + 4 * (HIDDEN + FC1 + FC2 + OUT_PAD)
    flops = 2 * b_pad * (IN_FLAT * HIDDEN + HIDDEN * FC1 + FC1 * FC2 + FC2 * OUT_PAD)
    bytes_accessed = weight_bytes + 4 * b_pad * (IN_FLAT + OUT_PAD)

    out = pl.pallas_call(
        cnn256_kernel,
        out_shape=jax.ShapeDtypeStruct((b_pad, OUT_PAD), jnp.float32),
        grid=grid,
        in_specs=in_specs,
        out_specs=pl.BlockSpec((tb, OUT_PAD), lambda i: (i, 0)),
        compiler_params=pltpu.CompilerParams(
            dimension_semantics=("parallel",),
            vmem_limit_bytes=48 * 1024 * 1024),          # v7x-safe (64 MiB physical)
        cost_estimate=pl.CostEstimate(flops=flops, transcendentals=0,
                                      bytes_accessed=bytes_accessed),
    )(x_flat, kp["wc"], kp["bc"], kp["w1t"], kp["b1"],
      kp["w2t"], kp["b2"], kp["w3t"], kp["b3"])

    return out[:B, :OUT]


# ---------------------------------------------------------- pure-JAX references
def reference_forward_f32(x, tp):
    """Torch-faithful full-f32 forward (HIGHEST precision)."""
    hp = jax.lax.Precision.HIGHEST
    outs = []
    for (w, b) in tp["convs"]:
        y = jax.lax.conv_general_dilated(
            x, w, window_strides=(1, 1), padding="VALID",
            dimension_numbers=("NCHW", "OIHW", "NCHW"), precision=hp)
        y = jnp.maximum(y + b[None, :, None, None], 0.0)
        outs.append(y.reshape(x.shape[0], -1))            # torch .view(B, -1)
    h = jnp.concatenate(outs, axis=1)                     # torch.cat(..., 1)
    h1 = jnp.maximum(jnp.dot(h, tp["fc1_w"].T, precision=hp) + tp["fc1_b"], 0.0)
    h2 = jnp.maximum(jnp.dot(h1, tp["fc2_w"].T, precision=hp) + tp["fc2_b"], 0.0)
    return jnp.dot(h2, tp["fc3_w"].T, precision=hp) + tp["fc3_b"]


def reference_forward_bf16(x, tp):
    """Same graph with dot/conv operands rounded to bf16 (f32 accumulation) —
    bit-matches the kernel's mixed-precision policy for a tight check."""
    hp = jax.lax.Precision.HIGHEST
    rt = lambda a: a.astype(jnp.bfloat16).astype(jnp.float32)
    outs = []
    xr = rt(x)
    for (w, b) in tp["convs"]:
        y = jax.lax.conv_general_dilated(
            xr, rt(w), window_strides=(1, 1), padding="VALID",
            dimension_numbers=("NCHW", "OIHW", "NCHW"), precision=hp)
        y = jnp.maximum(y + b[None, :, None, None], 0.0)
        outs.append(y.reshape(x.shape[0], -1))
    h = jnp.concatenate(outs, axis=1)
    h1 = jnp.maximum(jnp.dot(rt(h), rt(tp["fc1_w"]).T, precision=hp) + tp["fc1_b"], 0.0)
    h2 = jnp.maximum(jnp.dot(rt(h1), rt(tp["fc2_w"]).T, precision=hp) + tp["fc2_b"], 0.0)
    return jnp.dot(rt(h2), rt(tp["fc3_w"]).T, precision=hp) + tp["fc3_b"]


# ------------------------------------------------------------------------ main
if __name__ == "__main__":
    key = jax.random.PRNGKey(0)
    key_x, key_p = jax.random.split(key)

    B = 2
    x = jax.random.normal(key_x, (B, IN_C, H, W), dtype=jnp.float32)

    torch_params, kernel_params = init_params(key_p)

    out = cnn256_forward(x, kernel_params)
    out = jax.block_until_ready(out)
    assert out.shape == (B, OUT) and out.dtype == jnp.float32

    # Tight check: reference with the same bf16-operand / f32-accumulate policy.
    ref_bf16 = jax.block_until_ready(reference_forward_bf16(x, torch_params))
    np.testing.assert_allclose(np.asarray(out), np.asarray(ref_bf16),
                               rtol=1e-3, atol=1e-3)

    # Loose semantic check against the full-f32 torch-style forward.
    ref_f32 = jax.block_until_ready(reference_forward_f32(x, torch_params))
    np.testing.assert_allclose(np.asarray(out), np.asarray(ref_f32),
                               rtol=3e-2, atol=3e-2)

    print("KERNEL_OK")
</pallas_src>

<mosaic_0001>
module attributes {stable_mosaic.version = 11 : i64} {
  func.func @cnn256_kernel(%arg0: i32, %arg1: memref<8x256xf32, #tpu.memory_space<vmem>>, %arg2: memref<256x2816xbf16, #tpu.memory_space<vmem>>, %arg3: memref<1x2816xf32, #tpu.memory_space<vmem>>, %arg4: memref<2816x512xbf16, #tpu.memory_space<vmem>>, %arg5: memref<1x512xf32, #tpu.memory_space<vmem>>, %arg6: memref<512x128xbf16, #tpu.memory_space<vmem>>, %arg7: memref<1x128xf32, #tpu.memory_space<vmem>>, %arg8: memref<128x128xbf16, #tpu.memory_space<vmem>>, %arg9: memref<1x128xf32, #tpu.memory_space<vmem>>, %arg10: memref<8x128xf32, #tpu.memory_space<vmem>>) attributes {dimension_semantics = [#tpu.dimension_semantics<parallel>], iteration_bounds = array<i64: 1>, scalar_prefetch = 0 : i64, scratch_operands = 0 : i64, tpu.core_type = #tpu.core_type<tc>, window_params = [{transform_indices = @transform_0, window_bounds = array<i64: 8, 256>}, {pipeline_mode = #tpu.pipeline_mode<synchronous>, transform_indices = @transform_1, window_bounds = array<i64: 256, 2816>}, {pipeline_mode = #tpu.pipeline_mode<synchronous>, transform_indices = @transform_2, window_bounds = array<i64: 1, 2816>}, {pipeline_mode = #tpu.pipeline_mode<synchronous>, transform_indices = @transform_3, window_bounds = array<i64: 2816, 512>}, {pipeline_mode = #tpu.pipeline_mode<synchronous>, transform_indices = @transform_4, window_bounds = array<i64: 1, 512>}, {pipeline_mode = #tpu.pipeline_mode<synchronous>, transform_indices = @transform_5, window_bounds = array<i64: 512, 128>}, {pipeline_mode = #tpu.pipeline_mode<synchronous>, transform_indices = @transform_6, window_bounds = array<i64: 1, 128>}, {pipeline_mode = #tpu.pipeline_mode<synchronous>, transform_indices = @transform_7, window_bounds = array<i64: 128, 128>}, {pipeline_mode = #tpu.pipeline_mode<synchronous>, transform_indices = @transform_8, window_bounds = array<i64: 1, 128>}, {transform_indices = @transform_9, window_bounds = array<i64: 8, 128>}]} {
    %c0 = arith.constant 0 : index
    %c0_0 = arith.constant 0 : index
    %0 = vector.load %arg1[%c0, %c0_0] : memref<8x256xf32, #tpu.memory_space<vmem>>, vector<8x256xf32>
    %1 = arith.truncf %0 : vector<8x256xf32> to vector<8x256xbf16>
    %c0_1 = arith.constant 0 : index
    %c0_2 = arith.constant 0 : index
    %2 = vector.load %arg2[%c0_1, %c0_2] : memref<256x2816xbf16, #tpu.memory_space<vmem>>, vector<256x2816xbf16>
    %cst = arith.constant dense<0.000000e+00> : vector<8x2816xf32>
    %3 = tpu.matmul %1, %2, %cst {dimension_numbers = #tpu.dot_dimension_numbers<[1], [0], [0], [1], [0, 0, 1, 1], [], []>} : vector<8x256xbf16>, vector<256x2816xbf16>, vector<8x2816xf32> -> vector<8x2816xf32>
    %c0_3 = arith.constant 0 : index
    %c0_4 = arith.constant 0 : index
    %4 = vector.load %arg3[%c0_3, %c0_4] : memref<1x2816xf32, #tpu.memory_space<vmem>>, vector<1x2816xf32>
    %5 = vector.broadcast %4 : vector<1x2816xf32> to vector<8x2816xf32>
    %6 = arith.addf %3, %5 : vector<8x2816xf32>
    %cst_5 = arith.constant 0.000000e+00 : f32
    %7 = vector.broadcast %cst_5 : f32 to vector<8x2816xf32>
    %8 = arith.maximumf %6, %7 : vector<8x2816xf32>
    %9 = arith.truncf %8 : vector<8x2816xf32> to vector<8x2816xbf16>
    %c0_6 = arith.constant 0 : index
    %c0_7 = arith.constant 0 : index
    %10 = vector.load %arg4[%c0_6, %c0_7] : memref<2816x512xbf16, #tpu.memory_space<vmem>>, vector<2816x512xbf16>
    %cst_8 = arith.constant dense<0.000000e+00> : vector<8x512xf32>
    %11 = tpu.matmul %9, %10, %cst_8 {dimension_numbers = #tpu.dot_dimension_numbers<[1], [0], [0], [1], [0, 0, 1, 1], [], []>} : vector<8x2816xbf16>, vector<2816x512xbf16>, vector<8x512xf32> -> vector<8x512xf32>
    %c0_9 = arith.constant 0 : index
    %c0_10 = arith.constant 0 : index
    %12 = vector.load %arg5[%c0_9, %c0_10] : memref<1x512xf32, #tpu.memory_space<vmem>>, vector<1x512xf32>
    %13 = vector.broadcast %12 : vector<1x512xf32> to vector<8x512xf32>
    %14 = arith.addf %11, %13 : vector<8x512xf32>
    %cst_11 = arith.constant 0.000000e+00 : f32
    %15 = vector.broadcast %cst_11 : f32 to vector<8x512xf32>
    %16 = arith.maximumf %14, %15 : vector<8x512xf32>
    %17 = arith.truncf %16 : vector<8x512xf32> to vector<8x512xbf16>
    %c0_12 = arith.constant 0 : index
    %c0_13 = arith.constant 0 : index
    %18 = vector.load %arg6[%c0_12, %c0_13] : memref<512x128xbf16, #tpu.memory_space<vmem>>, vector<512x128xbf16>
    %cst_14 = arith.constant dense<0.000000e+00> : vector<8x128xf32>
    %19 = tpu.matmul %17, %18, %cst_14 {dimension_numbers = #tpu.dot_dimension_numbers<[1], [0], [0], [1], [0, 0, 1, 1], [], []>} : vector<8x512xbf16>, vector<512x128xbf16>, vector<8x128xf32> -> vector<8x128xf32>
    %c0_15 = arith.constant 0 : index
    %c0_16 = arith.constant 0 : index
    %20 = vector.load %arg7[%c0_15, %c0_16] : memref<1x128xf32, #tpu.memory_space<vmem>>, vector<1x128xf32>
    %21 = vector.broadcast %20 : vector<1x128xf32> to vector<8x128xf32>
    %22 = arith.addf %19, %21 : vector<8x128xf32>
    %cst_17 = arith.constant 0.000000e+00 : f32
    %23 = vector.broadcast %cst_17 : f32 to vector<8x128xf32>
    %24 = arith.maximumf %22, %23 : vector<8x128xf32>
    %25 = arith.truncf %24 : vector<8x128xf32> to vector<8x128xbf16>
    %c0_18 = arith.constant 0 : index
    %c0_19 = arith.constant 0 : index
    %26 = vector.load %arg8[%c0_18, %c0_19] : memref<128x128xbf16, #tpu.memory_space<vmem>>, vector<128x128xbf16>
    %cst_20 = arith.constant dense<0.000000e+00> : vector<8x128xf32>
    %27 = tpu.matmul %25, %26, %cst_20 {dimension_numbers = #tpu.dot_dimension_numbers<[1], [0], [0], [1], [0, 0, 1, 1], [], []>} : vector<8x128xbf16>, vector<128x128xbf16>, vector<8x128xf32> -> vector<8x128xf32>
    %c0_21 = arith.constant 0 : index
    %c0_22 = arith.constant 0 : index
    %28 = vector.load %arg9[%c0_21, %c0_22] : memref<1x128xf32, #tpu.memory_space<vmem>>, vector<1x128xf32>
    %29 = vector.broadcast %28 : vector<1x128xf32> to vector<8x128xf32>
    %30 = arith.addf %27, %29 : vector<8x128xf32>
    %c0_23 = arith.constant 0 : index
    %c0_24 = arith.constant 0 : index
    %31 = vector.load %arg10[%c0_23, %c0_24] : memref<8x128xf32, #tpu.memory_space<vmem>>, vector<8x128xf32>
    tpu.vector_store %arg10[%c0_23, %c0_24], %30 {strides = array<i32>} : memref<8x128xf32, #tpu.memory_space<vmem>>, vector<8x128xf32>,
    return
  }
  func.func @transform_0(%arg0: i32) -> (i32, i32) {
    %c0_i32 = arith.constant 0 : i32
    %c0_i32_0 = arith.constant 0 : i32
    return %arg0, %c0_i32 : i32, i32
  }
  func.func @transform_1(%arg0: i32) -> (i32, i32) {
    %c0_i32 = arith.constant 0 : i32
    %c0_i32_0 = arith.constant 0 : i32
    %c0_i32_1 = arith.constant 0 : i32
    return %c0_i32, %c0_i32_0 : i32, i32
  }
  func.func @transform_2(%arg0: i32) -> (i32, i32) {
    %c0_i32 = arith.constant 0 : i32
    %c0_i32_0 = arith.constant 0 : i32
    %c0_i32_1 = arith.constant 0 : i32
    return %c0_i32, %c0_i32_0 : i32, i32
  }
  func.func @transform_3(%arg0: i32) -> (i32, i32) {
    %c0_i32 = arith.constant 0 : i32
    %c0_i32_0 = arith.constant 0 : i32
    %c0_i32_1 = arith.constant 0 : i32
    return %c0_i32, %c0_i32_0 : i32, i32
  }
  func.func @transform_4(%arg0: i32) -> (i32, i32) {
    %c0_i32 = arith.constant 0 : i32
    %c0_i32_0 = arith.constant 0 : i32
    %c0_i32_1 = arith.constant 0 : i32
    return %c0_i32, %c0_i32_0 : i32, i32
  }
  func.func @transform_5(%arg0: i32) -> (i32, i32) {
    %c0_i32 = arith.constant 0 : i32
    %c0_i32_0 = arith.constant 0 : i32
    %c0_i32_1 = arith.constant 0 : i32
    return %c0_i32, %c0_i32_0 : i32, i32
  }
  func.func @transform_6(%arg0: i32) -> (i32, i32) {
    %c0_i32 = arith.constant 0 : i32
    %c0_i32_0 = arith.constant 0 : i32
    %c0_i32_1 = arith.constant 0 : i32
    return %c0_i32, %c0_i32_0 : i32, i32
  }
  func.func @transform_7(%arg0: i32) -> (i32, i32) {
    %c0_i32 = arith.constant 0 : i32
    %c0_i32_0 = arith.constant 0 : i32
    %c0_i32_1 = arith.constant 0 : i32
    return %c0_i32, %c0_i32_0 : i32, i32
  }
  func.func @transform_8(%arg0: i32) -> (i32, i32) {
    %c0_i32 = arith.constant 0 : i32
    %c0_i32_0 = arith.constant 0 : i32
    %c0_i32_1 = arith.constant 0 : i32
    return %c0_i32, %c0_i32_0 : i32, i32
  }
  func.func @transform_9(%arg0: i32) -> (i32, i32) {
    %c0_i32 = arith.constant 0 : i32
    %c0_i32_0 = arith.constant 0 : i32
    return %arg0, %c0_i32 : i32, i32
  }
}

</mosaic_0001>

<bundles_post_ra>
// kernel: tpu_custom_call.1
= control target key start
LH: loop header
LB: loop body
LE: loop exit
PB: predicated region body
PF: predicated region fallthrough
CT: control target
= control target key end

     0   :  { %14 = vsyncpa [#allocation3], 0  ;;  %s14943_s0 = inlined_call_operand.hbm [shape: f32[8,256], index: 0, kind: input, shape index: {}]   ;;  %s14944_s1 = inlined_call_operand.hbm [shape: bf16[256,2816], index: 1, kind: input, shape index: {}]   ;;  %s14945_s2 = inlined_call_operand.hbm [shape: f32[1,2816], index: 2, kind: input, shape index: {}]   ;;  %s14946_s3 = inlined_call_operand.hbm [shape: bf16[2816,512], index: 3, kind: input, shape index: {}]   ;;  %s14947_s4 = inlined_call_operand.hbm [shape: f32[1,512], index: 4, kind: input, shape index: {}]   ;;  %s14948_s5 = inlined_call_operand.hbm [shape: bf16[512,128], index: 5, kind: input, shape index: {}]   ;;  %s14949_s6 = inlined_call_operand.hbm [shape: f32[1,128], index: 6, kind: input, shape index: {}]   ;;  %s14950_s7 = inlined_call_operand.hbm [shape: bf16[128,128], index: 7, kind: input, shape index: {}]   ;;  %s14951_s8 = inlined_call_operand.hbm [shape: f32[1,128], index: 8, kind: input, shape index: {}]   ;;  %s14952_s9 = inlined_call_operand.hbm [shape: f32[8,128], index: 9, kind: output, shape index: {}]  }
   0x1   :  { %15 = vsyncpa [#allocation6], 0 }
   0x2   :  { %16 = vsyncpa [#allocation9], 0 }
   0x3   :  { %17 = vsyncpa [#allocation12], 0 }
   0x4   :  { %18 = vsyncpa [#allocation15], 0  ;;  %s35_s11 = sshll.u32 %s14944_s1, 4  ;;  %s36_s11 = int_to_ptr.hbm [resolvable:$true] %s35_s11 }
   0x5   :  { %19 = vsyncpa [#allocation4], 0  ;;  %s14501_s12 = smov [#allocation5]   ;;  %s59_s16 = sshll.u32 %s14946_s3, 4  ;;  %s60_s16 = int_to_ptr.hbm [resolvable:$true] %s59_s16 }
   0x6   :  { %s37_s13 = sshll.u32 %s14501_s12, 4  ;;  %s14502_s17 = smov 1408   ;;  %s38_s13 = int_to_ptr.vmem [resolvable:$true] %s37_s13 }
   0x7   :  { %s14503_s18 = smov 88   ;;  %s14504_s19 = smov [#allocation8]  }
   0x8   :  { %43 = dma.hbm_to_vmem [thread:$0]  %s36_s11, 45056, %s38_s13, [#allocation6], %s14502_s17, %s14502_s17, %s14503_s18  }
   0x9   :  { %s61_s20 = sshll.u32 %s14504_s19, 4  ;;  %s14505_s21 = smov 256   ;;  %s62_s20 = int_to_ptr.vmem [resolvable:$true] %s61_s20 }
   0xa   :  { %s14506_s22 = smov 16   ;;  %s83_s24 = sshll.u32 %s14948_s5, 4  ;;  %s84_s24 = int_to_ptr.hbm [resolvable:$true] %s83_s24 }
   0xb   :  { %67 = dma.hbm_to_vmem [thread:$0]  %s60_s16, 90112, %s62_s20, [#allocation9], %s14505_s21, %s14505_s21, %s14506_s22  }
   0xc   :  { %s14507_s25 = smov [#allocation11]   ;;  %s107_s28 = sshll.u32 %s14950_s7, 4  ;;  %s108_s28 = int_to_ptr.hbm [resolvable:$true] %s107_s28 }
   0xd   :  { %s85_s26 = sshll.u32 %s14507_s25, 4  ;;  %s14508_s29 = smov 64   ;;  %s86_s26 = int_to_ptr.vmem [resolvable:$true] %s85_s26 }
   0xe   :  { %s14509_s30 = smov 4   ;;  %s14510_s10 = smov [#allocation14]  }
   0xf   :  { %91 = dma.hbm_to_vmem [thread:$0]  %s84_s24, 4096, %s86_s26, [#allocation12], %s14508_s29, %s14508_s29, %s14509_s30  }
  0x10   :  { %s109_s11 = sshll.u32 %s14510_s10, 4  ;;  %s25_s14 = sshll.u32 %s14943_s0, 4  ;;  %s110_s11 = int_to_ptr.vmem [resolvable:$true] %s109_s11  ;;  %s26_s14 = int_to_ptr.hbm [resolvable:$true] %s25_s14 }
  0x11   :  { %115 = dma.hbm_to_vmem [thread:$0]  %s108_s28, 1024, %s110_s11, [#allocation15], %s14508_s29, %s14508_s29, %s14509_s30  }
  0x12   :  { %s49_s16 = sshll.u32 %s14945_s2, 4  ;;  %s14511_s17 = smov [#allocation2]   ;;  %s50_s16 = int_to_ptr.hbm [resolvable:$true] %s49_s16 }
  0x13   :  { %s27_s18 = sshll.u32 %s14511_s17, 4  ;;  %s14512_s7 = smov [#allocation7]   ;;  %s28_s18 = int_to_ptr.vmem [resolvable:$true] %s27_s18 }
  0x14   :  { %30 = dma.hbm_to_vmem [thread:$0]  %s26_s14, 256, %s28_s18, [#allocation3]  }
  0x15   :  { %s51_s19 = sshll.u32 %s14512_s7, 4  ;;  %s73_s22 = sshll.u32 %s14947_s4, 4  ;;  %s52_s19 = int_to_ptr.vmem [resolvable:$true] %s51_s19  ;;  %s74_s22 = int_to_ptr.hbm [resolvable:$true] %s73_s22 }
  0x16   :  { %54 = dma.hbm_to_vmem [thread:$0]  %s50_s16, 352, %s52_s19, [#allocation6]  }
  0x17   :  { %s97_s23 = sshll.u32 %s14949_s6, 4  ;;  %s14513_s24 = smov [#allocation10]   ;;  %s98_s23 = int_to_ptr.hbm [resolvable:$true] %s97_s23 }
  0x18   :  { %s75_s2 = sshll.u32 %s14513_s24, 4  ;;  %s14514_s25 = smov [#allocation13]   ;;  %s76_s2 = int_to_ptr.vmem [resolvable:$true] %s75_s2 }
  0x19   :  { %78 = dma.hbm_to_vmem [thread:$0]  %s74_s22, 64, %s76_s2, [#allocation9]  }
  0x1a   :  { %s99_s26 = sshll.u32 %s14514_s25, 4  ;;  %s121_s28 = sshll.u32 %s14951_s8, 4  ;;  %s100_s26 = int_to_ptr.vmem [resolvable:$true] %s99_s26  ;;  %s122_s28 = int_to_ptr.hbm [resolvable:$true] %s121_s28 }
  0x1b   :  { %102 = dma.hbm_to_vmem [thread:$0]  %s98_s23, 16, %s100_s26, [#allocation12]  }
  0x1c   :  { %s14515_s4 = smov [#allocation16]  }
  0x1d   :  { %s123_s29 = sshll.u32 %s14515_s4, 4  ;;  %s124_s29 = int_to_ptr.vmem [resolvable:$true] %s123_s29 }
  0x1e   :  { %126 = dma.hbm_to_vmem [thread:$0]  %s122_s28, 16, %s124_s29, [#allocation15]  }
  0x1f   :  { %14489 = dma.done.wait [#allocation3], 256  }
  0x20   :  { %14490 = vsyncadd [#allocation3], 4294967040 }
  0x21   :  { %14491 = dma.done.wait [#allocation6], 45408  }
  0x22   :  { %14492 = vsyncadd [#allocation6], 4294921888 }
  0x23   :  { %14493 = dma.done.wait [#allocation9], 90176  }
  0x24   :  { %14494 = vsyncadd [#allocation9], 4294877120 }
  0x25   :  { %14495 = dma.done.wait [#allocation12], 4112  }
  0x26   :  { %14496 = vsyncadd [#allocation12], 4294963184 }
  0x27   :  { %14497 = dma.done.wait [#allocation15], 1040  }
  0x28   :  { %14498 = vsyncadd [#allocation15], 4294966256  ;;  %v9366_v0 = vld [vmem:[#allocation5 + $0x4d0] sm:$0xf]  ;;  %v13297_v1 = vld [vmem:[#allocation5 + $0x524] sm:$0xf0] }
  0x29   :  { %v10070_v2 = vld [vmem:[#allocation5 + $0xa50] sm:$0xf]  ;;  %v9367_v3 = vor.u32 %v13297_v1, %v9366_v0  ;;  %v13473_v4 = vld [vmem:[#allocation5 + $0xaa4] sm:$0xf0]  ;;  %v13286_v5 = vld [vmem:[#allocation5 + $0x4d4] sm:$0xf] }
  0x2a   :  { %v9368_v6 = vld [vmem:[#allocation5 + $0x528] sm:$0xf0]  ;;  %v10071_v7 = vor.u32 %v13473_v4, %v10070_v2  ;;  %v13462_v9 = vld [vmem:[#allocation5 + $0xa54] sm:$0xf]  ;;  %v9278_v11 = vld [vmem:[#allocation5 + $0x420] sm:$0xf] }
  0x2b   :  { %v9371_v8 = vor.u32 %v13286_v5, %v9368_v6  ;;  %v10072_v10 = vld [vmem:[#allocation5 + $0xaa8] sm:$0xf0]  ;;  %2329 = vmatpush.bf16.msra.mxu0 %v9367_v3  ;;  %v13275_v13 = vld [vmem:[#allocation5 + $0x474] sm:$0xf0]  ;;  %v9982_v14 = vld [vmem:[#allocation5 + $0x9a0] sm:$0xf] }
  0x2c   :  { %v10075_v12 = vor.u32 %v13462_v9, %v10072_v10  ;;  %v13451_v15 = vld [vmem:[#allocation5 + $0x9f4] sm:$0xf0]  ;;  %2342 = vmatpush.bf16.msra.mxu1 %v10071_v7  ;;  %v9279_v16 = vor.u32 %v13275_v13, %v9278_v11  ;;  %v13264_v18 = vld [vmem:[#allocation5 + $0x424] sm:$0xf]  ;;  %v9280_v19 = vld [vmem:[#allocation5 + $0x478] sm:$0xf0] }
  0x2d   :  { %2355 = vmatpush.bf16.msra.mxu2 %v9371_v8  ;;  %v9983_v17 = vor.u32 %v13451_v15, %v9982_v14  ;;  %v13440_v20 = vld [vmem:[#allocation5 + $0x9a4] sm:$0xf]  ;;  %v9283_v21 = vor.u32 %v13264_v18, %v9280_v19  ;;  %v9984_v22 = vld [vmem:[#allocation5 + $0x9f8] sm:$0xf0]  ;;  %v9190_v23 = vld [vmem:[#allocation5 + $0x370] sm:$0xf] }
  0x2e   :  { %2368 = vmatpush.bf16.msra.mxu3 %v10075_v12  ;;  %v13253_v24 = vld [vmem:[#allocation5 + $0x3c4] sm:$0xf0]  ;;  %v9987_v25 = vor.u32 %v13440_v20, %v9984_v22  ;;  %v9894_v26 = vld [vmem:[#allocation5 + $0x8f0] sm:$0xf]  ;;  %v13242_v28 = vld [vmem:[#allocation5 + $0x374] sm:$0xf] }
  0x2f   :  { %v13429_v27 = vld [vmem:[#allocation5 + $0x944] sm:$0xf0]  ;;  %2330 = vmatpush.bf16.msra.mxu0 %v9279_v16  ;;  %v9191_v29 = vor.u32 %v13253_v24, %v9190_v23  ;;  %v9192_v30 = vld [vmem:[#allocation5 + $0x3c8] sm:$0xf0]  ;;  %v13418_v31 = vld [vmem:[#allocation5 + $0x8f4] sm:$0xf] }
  0x30   :  { %v9896_v32 = vld [vmem:[#allocation5 + $0x948] sm:$0xf0]  ;;  %2343 = vmatpush.bf16.msra.mxu1 %v9983_v17  ;;  %v9895_v33 = vor.u32 %v13429_v27, %v9894_v26  ;;  %v9195_v34 = vor.u32 %v13242_v28, %v9192_v30  ;;  %v9102_v35 = vld [vmem:[#allocation5 + $0x2c0] sm:$0xf]  ;;  %v13231_v36 = vld [vmem:[#allocation5 + $0x314] sm:$0xf0] }
  0x31   :  { %2356 = vmatpush.bf16.msra.mxu2 %v9283_v21  ;;  %v9806_v37 = vld [vmem:[#allocation5 + $0x840] sm:$0xf]  ;;  %v9899_v38 = vor.u32 %v13418_v31, %v9896_v32  ;;  %v13407_v39 = vld [vmem:[#allocation5 + $0x894] sm:$0xf0]  ;;  %v13220_v40 = vld [vmem:[#allocation5 + $0x2c4] sm:$0xf]  ;;  %v9103_v44 = vor.u32 %v13231_v36, %v9102_v35 }
  0x32   :  { %2369 = vmatpush.bf16.msra.mxu3 %v9987_v25  ;;  %v9104_v41 = vld [vmem:[#allocation5 + $0x318] sm:$0xf0]  ;;  %v13396_v42 = vld [vmem:[#allocation5 + $0x844] sm:$0xf]  ;;  %v9807_v45 = vor.u32 %v13407_v39, %v9806_v37  ;;  %v9014_v47 = vld [vmem:[#allocation5 + $0x210] sm:$0xf] }
  0x33   :  { %v9808_v43 = vld [vmem:[#allocation5 + $0x898] sm:$0xf0]  ;;  %2331 = vmatpush.bf16.msra.mxu0 %v9191_v29  ;;  %v9107_v46 = vor.u32 %v13220_v40, %v9104_v41  ;;  %v13209_v48 = vld [vmem:[#allocation5 + $0x264] sm:$0xf0]  ;;  %v9718_v49 = vld [vmem:[#allocation5 + $0x790] sm:$0xf] }
  0x34   :  { %2344 = vmatpush.bf16.msra.mxu1 %v9895_v33  ;;  %v9811_v50 = vor.u32 %v13396_v42, %v9808_v43  ;;  %v13385_v51 = vld [vmem:[#allocation5 + $0x7e4] sm:$0xf0]  ;;  %v13198_v52 = vld [vmem:[#allocation5 + $0x214] sm:$0xf]  ;;  %v9016_v53 = vld [vmem:[#allocation5 + $0x268] sm:$0xf0]  ;;  %v9015_v56 = vor.u32 %v13209_v48, %v9014_v47 }
  0x35   :  { %2357 = vmatpush.bf16.msra.mxu2 %v9195_v34  ;;  %v13374_v54 = vld [vmem:[#allocation5 + $0x794] sm:$0xf]  ;;  %v9720_v55 = vld [vmem:[#allocation5 + $0x7e8] sm:$0xf0]  ;;  %v9719_v57 = vor.u32 %v13385_v51, %v9718_v49  ;;  %v9019_v58 = vor.u32 %v13198_v52, %v9016_v53  ;;  %v8926_v59 = vld [vmem:[#allocation5 + $0x160] sm:$0xf] }
  0x36   :  { %2370 = vmatpush.bf16.msra.mxu3 %v9899_v38  ;;  %v13187_v60 = vld [vmem:[#allocation5 + $0x1b4] sm:$0xf0]  ;;  %v9630_v61 = vld [vmem:[#allocation5 + $0x6e0] sm:$0xf]  ;;  %v9723_v62 = vor.u32 %v13374_v54, %v9720_v55  ;;  %v13176_v0 = vld [vmem:[#allocation5 + $0x164] sm:$0xf] }
  0x37   :  { %2332 = vmatpush.bf16.msra.mxu0 %v9103_v44  ;;  %v13363_v63 = vld [vmem:[#allocation5 + $0x734] sm:$0xf0]  ;;  %v8928_v1 = vld [vmem:[#allocation5 + $0x1b8] sm:$0xf0]  ;;  %v13352_v2 = vld [vmem:[#allocation5 + $0x6e4] sm:$0xf]  ;;  %v8927_v4 = vor.u32 %v13187_v60, %v8926_v59 }
  0x38   :  { %2345 = vmatpush.bf16.msra.mxu1 %v9807_v45  ;;  %v9632_v3 = vld [vmem:[#allocation5 + $0x738] sm:$0xf0]  ;;  %v9631_v5 = vor.u32 %v13363_v63, %v9630_v61  ;;  %v8931_v6 = vor.u32 %v13176_v0, %v8928_v1  ;;  %v8838_v7 = vld [vmem:[#allocation5 + $0xb0] sm:$0xf]  ;;  %v13165_v8 = vld [vmem:[#allocation5 + $0x104] sm:$0xf0] }
  0x39   :  { %2358 = vmatpush.bf16.msra.mxu2 %v9107_v46  ;;  %v9542_v9 = vld [vmem:[#allocation5 + $0x630] sm:$0xf]  ;;  %v9635_v10 = vor.u32 %v13352_v2, %v9632_v3  ;;  %v13341_v11 = vld [vmem:[#allocation5 + $0x684] sm:$0xf0]  ;;  %v13154_v12 = vld [vmem:[#allocation5 + $0xb4] sm:$0xf]  ;;  %v8839_v16 = vor.u32 %v13165_v8, %v8838_v7 }
  0x3a   :  { %2371 = vmatpush.bf16.msra.mxu3 %v9811_v50  ;;  %v8840_v13 = vld [vmem:[#allocation5 + $0x108] sm:$0xf0]  ;;  %v13330_v14 = vld [vmem:[#allocation5 + $0x634] sm:$0xf]  ;;  %v8750_v17 = vld [vmem:[#allocation5] sm:$0xf]  ;;  %v9543_v19 = vor.u32 %v13341_v11, %v9542_v9 }
  0x3b   :  { %2333 = vmatpush.bf16.msra.mxu0 %v9015_v56  ;;  %v9544_v15 = vld [vmem:[#allocation5 + $0x688] sm:$0xf0]  ;;  %v13143_v18 = vld [vmem:[#allocation5 + $0x54] sm:$0xf0]  ;;  %v8843_v20 = vor.u32 %v13154_v12, %v8840_v13  ;;  %v9454_v21 = vld [vmem:[#allocation5 + $0x580] sm:$0xf] }
  0x3c   :  { %2346 = vmatpush.bf16.msra.mxu1 %v9719_v57  ;;  %v13319_v22 = vld [vmem:[#allocation5 + $0x5d4] sm:$0xf0]  ;;  %v13132_v23 = vld [vmem:[#allocation5 + $0x4] sm:$0xf]  ;;  %v9547_v24 = vor.u32 %v13330_v14, %v9544_v15  ;;  %v8752_v25 = vld [vmem:[#allocation5 + $0x58] sm:$0xf0]  ;;  %v8751_v31 = vor.u32 %v13143_v18, %v8750_v17 }
  0x3d   :  { %2359 = vmatpush.bf16.msra.mxu2 %v9019_v58  ;;  %v13308_v26 = vld [vmem:[#allocation5 + $0x584] sm:$0xf]  ;;  %v9456_v27 = vld [vmem:[#allocation5 + $0x5d8] sm:$0xf0]  ;;  %v9374_v28 = vld [vmem:[#allocation5 + $0x4d8] sm:$0xf]  ;;  %v9455_v35 = vor.u32 %v13319_v22, %v9454_v21  ;;  %v8755_v36 = vor.u32 %v13132_v23, %v8752_v25 }
  0x3e   :  { %2372 = vmatpush.bf16.msra.mxu3 %v9723_v62  ;;  %v13298_v29 = vld [vmem:[#allocation5 + $0x52c] sm:$0xf0]  ;;  %v10078_v30 = vld [vmem:[#allocation5 + $0xa58] sm:$0xf]  ;;  %v13287_v33 = vld [vmem:[#allocation5 + $0x4dc] sm:$0xf]  ;;  %v9459_v39 = vor.u32 %v13308_v26, %v9456_v27 }
  0x3f   :  { %2334 = vmatpush.bf16.msra.mxu0 %v8927_v4  ;;  %v13474_v32 = vld [vmem:[#allocation5 + $0xaac] sm:$0xf0]  ;;  %v9376_v34 = vld [vmem:[#allocation5 + $0x530] sm:$0xf0]  ;;  %v13463_v37 = vld [vmem:[#allocation5 + $0xa5c] sm:$0xf]  ;;  %v9375_v40 = vor.u32 %v13298_v29, %v9374_v28 }
  0x40   :  { %2347 = vmatpush.bf16.msra.mxu1 %v9631_v5  ;;  %v10080_v38 = vld [vmem:[#allocation5 + $0xab0] sm:$0xf0]  ;;  %v10079_v41 = vor.u32 %v13474_v32, %v10078_v30  ;;  %v9379_v42 = vor.u32 %v13287_v33, %v9376_v34  ;;  %v9286_v43 = vld [vmem:[#allocation5 + $0x428] sm:$0xf]  ;;  %v13276_v44 = vld [vmem:[#allocation5 + $0x47c] sm:$0xf0] }
  0x41   :  { %2360 = vmatpush.bf16.msra.mxu2 %v8931_v6  ;;  %v9990_v45 = vld [vmem:[#allocation5 + $0x9a8] sm:$0xf]  ;;  %v10083_v46 = vor.u32 %v13463_v37, %v10080_v38  ;;  %v13452_v47 = vld [vmem:[#allocation5 + $0x9fc] sm:$0xf0]  ;;  %v13265_v48 = vld [vmem:[#allocation5 + $0x42c] sm:$0xf]  ;;  %v9287_v52 = vor.u32 %v13276_v44, %v9286_v43 }
  0x42   :  { %2373 = vmatpush.bf16.msra.mxu3 %v9635_v10  ;;  %v9288_v49 = vld [vmem:[#allocation5 + $0x480] sm:$0xf0]  ;;  %v13441_v50 = vld [vmem:[#allocation5 + $0x9ac] sm:$0xf]  ;;  %v9198_v53 = vld [vmem:[#allocation5 + $0x378] sm:$0xf]  ;;  %v9991_v54 = vor.u32 %v13452_v47, %v9990_v45 }
  0x43   :  { %2335 = vmatpush.bf16.msra.mxu0 %v8839_v16  ;;  %v9992_v51 = vld [vmem:[#allocation5 + $0xa00] sm:$0xf0]  ;;  %v9291_v55 = vor.u32 %v13265_v48, %v9288_v49  ;;  %v13254_v56 = vld [vmem:[#allocation5 + $0x3cc] sm:$0xf0]  ;;  %v9902_v57 = vld [vmem:[#allocation5 + $0x8f8] sm:$0xf] }
  0x44   :  { %2348 = vmatpush.bf16.msra.mxu1 %v9543_v19  ;;  %v13430_v58 = vld [vmem:[#allocation5 + $0x94c] sm:$0xf0]  ;;  %v9995_v59 = vor.u32 %v13441_v50, %v9992_v51  ;;  %v13243_v60 = vld [vmem:[#allocation5 + $0x37c] sm:$0xf]  ;;  %v9200_v61 = vld [vmem:[#allocation5 + $0x3d0] sm:$0xf0]  ;;  %v9199_v0 = vor.u32 %v13254_v56, %v9198_v53 }
  0x45   :  { %2361 = vmatpush.bf16.msra.mxu2 %v8843_v20  ;;  %v13419_v62 = vld [vmem:[#allocation5 + $0x8fc] sm:$0xf]  ;;  %v9904_v63 = vld [vmem:[#allocation5 + $0x950] sm:$0xf0]  ;;  %v9903_v1 = vor.u32 %v13430_v58, %v9902_v57  ;;  %v9203_v4 = vor.u32 %v13243_v60, %v9200_v61  ;;  %v9110_v5 = vld [vmem:[#allocation5 + $0x2c8] sm:$0xf] }
  0x46   :  { %2374 = vmatpush.bf16.msra.mxu3 %v9547_v24  ;;  %v163_v2 = vld [vmem:[#allocation2] sm:$0xff]  ;;  %v164_v3 = vld [vmem:[#allocation2 + $0x8] sm:$0xff]  ;;  %v13232_v6 = vld [vmem:[#allocation5 + $0x31c] sm:$0xf0]  ;;  %v9907_v10 = vor.u32 %v13419_v62, %v9904_v63  ;;  %s14516_s6 = smov [#allocation17]   ;;  %s8734_s11 = sshll.u32 %s14952_s9, 4  ;;  %s8735_s11 = int_to_ptr.hbm [resolvable:$true] %s8734_s11 }
  0x47   :  { %2336 = vmatpush.bf16.msra.mxu0 %v8751_v31  ;;  %v9814_v7 = vld [vmem:[#allocation5 + $0x848] sm:$0xf]  ;;  %v14594_v8 = vpack.c.bf16 %v163_v2, %v163_v2  ;;  %v14596_v9 = vpack.c.bf16 %v164_v3, %v164_v3  ;;  %v13408_v11 = vld [vmem:[#allocation5 + $0x89c] sm:$0xf0]  ;;  %v13221_v12 = vld [vmem:[#allocation5 + $0x2cc] sm:$0xf]  ;;  %v9111_v16 = vor.u32 %v13232_v6, %v9110_v5 }
  0x48   :  { %2349 = vmatpush.bf16.msra.mxu1 %v9455_v35  ;;  %v9112_v13 = vld [vmem:[#allocation5 + $0x320] sm:$0xf0]  ;;  %v13397_v14 = vld [vmem:[#allocation5 + $0x84c] sm:$0xf]  ;;  %v9815_v17 = vor.u32 %v13408_v11, %v9814_v7  ;;  %v9022_v19 = vld [vmem:[#allocation5 + $0x218] sm:$0xf] }
  0x49   :  { %2362 = vmatpush.bf16.msra.mxu2 %v8755_v36  ;;  %v9816_v15 = vld [vmem:[#allocation5 + $0x8a0] sm:$0xf0]  ;;  %v9115_v18 = vor.u32 %v13221_v12, %v9112_v13  ;;  %v13210_v20 = vld [vmem:[#allocation5 + $0x26c] sm:$0xf0]  ;;  %v9726_v21 = vld [vmem:[#allocation5 + $0x798] sm:$0xf] }
  0x4a   :  { %2375 = vmatpush.bf16.msra.mxu3 %v9459_v39  ;;  %2337 = vmatmul.bf16.vlgmr.msra.gmra.mxu0 %v14594_v8  ;;  %v9819_v22 = vor.u32 %v13397_v14, %v9816_v15  ;;  %v13386_v23 = vld [vmem:[#allocation5 + $0x7ec] sm:$0xf0]  ;;  %v13199_v24 = vld [vmem:[#allocation5 + $0x21c] sm:$0xf]  ;;  %v9024_v25 = vld [vmem:[#allocation5 + $0x270] sm:$0xf0]  ;;  %v9023_v28 = vor.u32 %v13210_v20, %v9022_v19 }
  0x4b   :  { %2381 = vmatpush.bf16.msrb.mxu0 %v9375_v40  ;;  %2350 = vmatmul.bf16.vlgmr.msra.gmra.mxu1 %v14596_v9  ;;  %v13375_v26 = vld [vmem:[#allocation5 + $0x79c] sm:$0xf]  ;;  %v9728_v27 = vld [vmem:[#allocation5 + $0x7f0] sm:$0xf0]  ;;  %v9727_v29 = vor.u32 %v13386_v23, %v9726_v21  ;;  %v9027_v30 = vor.u32 %v13199_v24, %v9024_v25  ;;  %v8934_v31 = vld [vmem:[#allocation5 + $0x168] sm:$0xf] }
  0x4c   :  { %2394 = vmatpush.bf16.msrb.mxu1 %v10079_v41  ;;  %2363 = vmatmul.bf16.vlgmr.msra.gmra.mxu2 %v14594_v8  ;;  %v13188_v32 = vld [vmem:[#allocation5 + $0x1bc] sm:$0xf0]  ;;  %v9638_v33 = vld [vmem:[#allocation5 + $0x6e8] sm:$0xf]  ;;  %v9731_v34 = vor.u32 %v13375_v26, %v9728_v27  ;;  %v13177_v36 = vld [vmem:[#allocation5 + $0x16c] sm:$0xf] }
  0x4d   :  { %2407 = vmatpush.bf16.msrb.mxu2 %v9379_v42  ;;  %2376 = vmatmul.bf16.vlgmr.msra.gmra.mxu3 %v14596_v9  ;;  %v13364_v35 = vld [vmem:[#allocation5 + $0x73c] sm:$0xf0]  ;;  %v8936_v37 = vld [vmem:[#allocation5 + $0x1c0] sm:$0xf0]  ;;  %v13353_v38 = vld [vmem:[#allocation5 + $0x6ec] sm:$0xf]  ;;  %v8935_v40 = vor.u32 %v13188_v32, %v8934_v31 }
  0x4e   :  { %2420 = vmatpush.bf16.msrb.mxu3 %v10083_v46  ;;  %v9640_v39 = vld [vmem:[#allocation5 + $0x740] sm:$0xf0]  ;;  %v9639_v41 = vor.u32 %v13364_v35, %v9638_v33  ;;  %v8939_v42 = vor.u32 %v13177_v36, %v8936_v37  ;;  %v8846_v43 = vld [vmem:[#allocation5 + $0xb8] sm:$0xf]  ;;  %v13166_v44 = vld [vmem:[#allocation5 + $0x10c] sm:$0xf0] }
  0x4f   :  { %2382 = vmatpush.bf16.msrb.mxu0 %v9287_v52  ;;  %v9550_v45 = vld [vmem:[#allocation5 + $0x638] sm:$0xf]  ;;  %v9643_v46 = vor.u32 %v13353_v38, %v9640_v39  ;;  %v13342_v47 = vld [vmem:[#allocation5 + $0x68c] sm:$0xf0]  ;;  %v13155_v48 = vld [vmem:[#allocation5 + $0xbc] sm:$0xf]  ;;  %v8847_v52 = vor.u32 %v13166_v44, %v8846_v43 }
  0x50   :  { %2395 = vmatpush.bf16.msrb.mxu1 %v9991_v54  ;;  %v8848_v49 = vld [vmem:[#allocation5 + $0x110] sm:$0xf0]  ;;  %v13331_v50 = vld [vmem:[#allocation5 + $0x63c] sm:$0xf]  ;;  %v8758_v53 = vld [vmem:[#allocation5 + $0x8] sm:$0xf] }
  0x51   :  { %2408 = vmatpush.bf16.msrb.mxu2 %v9291_v55  ;;  %v9552_v51 = vld [vmem:[#allocation5 + $0x690] sm:$0xf0]  ;;  %v13144_v54 = vld [vmem:[#allocation5 + $0x5c] sm:$0xf0]  ;;  %v9551_v55 = vor.u32 %v13342_v47, %v9550_v45  ;;  %v8851_v56 = vor.u32 %v13155_v48, %v8848_v49  ;;  %v9462_v57 = vld [vmem:[#allocation5 + $0x588] sm:$0xf] }
  0x52   :  { %2421 = vmatpush.bf16.msrb.mxu3 %v9995_v59  ;;  %v13320_v58 = vld [vmem:[#allocation5 + $0x5dc] sm:$0xf0]  ;;  %v13133_v59 = vld [vmem:[#allocation5 + $0xc] sm:$0xf]  ;;  %v9555_v60 = vor.u32 %v13331_v50, %v9552_v51  ;;  %v8760_v61 = vld [vmem:[#allocation5 + $0x60] sm:$0xf0]  ;;  %v8759_v3 = vor.u32 %v13144_v54, %v8758_v53 }
  0x53   :  { %2383 = vmatpush.bf16.msrb.mxu0 %v9199_v0  ;;  %v13309_v62 = vld [vmem:[#allocation5 + $0x58c] sm:$0xf]  ;;  %v9464_v63 = vld [vmem:[#allocation5 + $0x5e0] sm:$0xf0]  ;;  %v9382_v0 = vld [vmem:[#allocation5 + $0x4e0] sm:$0xf]  ;;  %v9463_v7 = vor.u32 %v13320_v58, %v9462_v57 }
  0x54   :  { %2396 = vmatpush.bf16.msrb.mxu1 %v9903_v1  ;;  %v13299_v1 = vld [vmem:[#allocation5 + $0x534] sm:$0xf0]  ;;  %v10086_v2 = vld [vmem:[#allocation5 + $0xa60] sm:$0xf]  ;;  %v13288_v5 = vld [vmem:[#allocation5 + $0x4e4] sm:$0xf]  ;;  %v9467_v13 = vor.u32 %v13309_v62, %v9464_v63 }
  0x55   :  { %2409 = vmatpush.bf16.msrb.mxu2 %v9203_v4  ;;  %v13475_v4 = vld [vmem:[#allocation5 + $0xab4] sm:$0xf0]  ;;  %v9384_v6 = vld [vmem:[#allocation5 + $0x538] sm:$0xf0]  ;;  %v13464_v11 = vld [vmem:[#allocation5 + $0xa64] sm:$0xf]  ;;  %v9383_v14 = vor.u32 %v13299_v1, %v9382_v0 }
  0x56   :  { %2422 = vmatpush.bf16.msrb.mxu3 %v9907_v10  ;;  %v8763_v10 = vor.u32 %v13133_v59, %v8760_v61  ;;  %v10088_v12 = vld [vmem:[#allocation5 + $0xab8] sm:$0xf0]  ;;  %v10087_v15 = vor.u32 %v13475_v4, %v10086_v2  ;;  %v9998_v19 = vld [vmem:[#allocation5 + $0x9b0] sm:$0xf]  ;;  %v13453_v21 = vld [vmem:[#allocation5 + $0xa04] sm:$0xf0] }
  0x57   :  { %2384 = vmatpush.bf16.msrb.mxu0 %v9111_v16  ;;  %v9387_v16 = vor.u32 %v13288_v5, %v9384_v6  ;;  %v10091_v20 = vor.u32 %v13464_v11, %v10088_v12  ;;  %v9296_v23 = vld [vmem:[#allocation5 + $0x488] sm:$0xf0]  ;;  %v13442_v24 = vld [vmem:[#allocation5 + $0x9b4] sm:$0xf]  ;;  %v9999_v27 = vor.u32 %v13453_v21, %v9998_v19  ;;  %v9910_v31 = vld [vmem:[#allocation5 + $0x900] sm:$0xf] }
  0x58   :  { %2397 = vmatpush.bf16.msrb.mxu1 %v9815_v17  ;;  %v9294_v17 = vld [vmem:[#allocation5 + $0x430] sm:$0xf]  ;;  %v10000_v25 = vld [vmem:[#allocation5 + $0xa08] sm:$0xf0]  ;;  %v13431_v33 = vld [vmem:[#allocation5 + $0x954] sm:$0xf0] }
  0x59   :  { %2410 = vmatpush.bf16.msrb.mxu2 %v9115_v18  ;;  %v13277_v18 = vld [vmem:[#allocation5 + $0x484] sm:$0xf0]  ;;  %v10003_v32 = vor.u32 %v13442_v24, %v10000_v25  ;;  %v9208_v35 = vld [vmem:[#allocation5 + $0x3d8] sm:$0xf0]  ;;  %v13420_v36 = vld [vmem:[#allocation5 + $0x904] sm:$0xf]  ;;  %v9911_v39 = vor.u32 %v13431_v33, %v9910_v31 }
  0x5a   :  { %2423 = vmatpush.bf16.msrb.mxu3 %v9819_v22  ;;  %v13266_v22 = vld [vmem:[#allocation5 + $0x434] sm:$0xf]  ;;  %v9295_v26 = vor.u32 %v13277_v18, %v9294_v17  ;;  %v9912_v37 = vld [vmem:[#allocation5 + $0x958] sm:$0xf0]  ;;  %v9822_v43 = vld [vmem:[#allocation5 + $0x850] sm:$0xf] }
  0x5b   :  { %2385 = vmatpush.bf16.msrb.mxu0 %v9023_v28  ;;  %v9299_v28 = vor.u32 %v13266_v22, %v9296_v23  ;;  %v9915_v44 = vor.u32 %v13420_v36, %v9912_v37  ;;  %v13409_v45 = vld [vmem:[#allocation5 + $0x8a4] sm:$0xf0]  ;;  %v9120_v47 = vld [vmem:[#allocation5 + $0x328] sm:$0xf0]  ;;  %v13398_v48 = vld [vmem:[#allocation5 + $0x854] sm:$0xf] }
  0x5c   :  { %2398 = vmatpush.bf16.msrb.mxu1 %v9727_v29  ;;  %v9206_v29 = vld [vmem:[#allocation5 + $0x380] sm:$0xf]  ;;  %v9824_v49 = vld [vmem:[#allocation5 + $0x8a8] sm:$0xf0]  ;;  %v9823_v51 = vor.u32 %v13409_v45, %v9822_v43  ;;  %v13211_v54 = vld [vmem:[#allocation5 + $0x274] sm:$0xf0] }
  0x5d   :  { %2411 = vmatpush.bf16.msrb.mxu2 %v9027_v30  ;;  %v13255_v30 = vld [vmem:[#allocation5 + $0x3d4] sm:$0xf0]  ;;  %v9030_v53 = vld [vmem:[#allocation5 + $0x220] sm:$0xf]  ;;  %v13200_v58 = vld [vmem:[#allocation5 + $0x224] sm:$0xf] }
  0x5e   :  { %2424 = vmatpush.bf16.msrb.mxu3 %v9731_v34  ;;  %v13244_v34 = vld [vmem:[#allocation5 + $0x384] sm:$0xf]  ;;  %v9207_v38 = vor.u32 %v13255_v30, %v9206_v29  ;;  %v13387_v57 = vld [vmem:[#allocation5 + $0x7f4] sm:$0xf0]  ;;  %v9032_v59 = vld [vmem:[#allocation5 + $0x278] sm:$0xf0]  ;;  %v9031_v62 = vor.u32 %v13211_v54, %v9030_v53 }
  0x5f   :  { %2386 = vmatpush.bf16.msrb.mxu0 %v8935_v40  ;;  %v9211_v40 = vor.u32 %v13244_v34, %v9208_v35  ;;  %v9736_v61 = vld [vmem:[#allocation5 + $0x7f8] sm:$0xf0]  ;;  %v8942_v63 = vld [vmem:[#allocation5 + $0x170] sm:$0xf]  ;;  %v9035_v1 = vor.u32 %v13200_v58, %v9032_v59  ;;  %v13189_v2 = vld [vmem:[#allocation5 + $0x1c4] sm:$0xf0] }
  0x60   :  { %2399 = vmatpush.bf16.msrb.mxu1 %v9639_v41  ;;  %v9118_v41 = vld [vmem:[#allocation5 + $0x2d0] sm:$0xf]  ;;  %v13365_v4 = vld [vmem:[#allocation5 + $0x744] sm:$0xf0]  ;;  %v13178_v6 = vld [vmem:[#allocation5 + $0x174] sm:$0xf]  ;;  %v8943_v12 = vor.u32 %v13189_v2, %v8942_v63 }
  0x61   :  { %2412 = vmatpush.bf16.msrb.mxu2 %v8939_v42  ;;  %v13233_v42 = vld [vmem:[#allocation5 + $0x324] sm:$0xf0]  ;;  %v9648_v11 = vld [vmem:[#allocation5 + $0x748] sm:$0xf0]  ;;  %v9558_v17 = vld [vmem:[#allocation5 + $0x640] sm:$0xf] }
  0x62   :  { %2425 = vmatpush.bf16.msrb.mxu3 %v9643_v46  ;;  %v13222_v46 = vld [vmem:[#allocation5 + $0x2d4] sm:$0xf]  ;;  %v9119_v50 = vor.u32 %v13233_v42, %v9118_v41  ;;  %v13343_v19 = vld [vmem:[#allocation5 + $0x694] sm:$0xf0]  ;;  %v8856_v21 = vld [vmem:[#allocation5 + $0x118] sm:$0xf0] }
  0x63   :  { %2387 = vmatpush.bf16.msrb.mxu0 %v8847_v52  ;;  %v9123_v52 = vor.u32 %v13222_v46, %v9120_v47  ;;  %v13332_v22 = vld [vmem:[#allocation5 + $0x644] sm:$0xf]  ;;  %v9560_v23 = vld [vmem:[#allocation5 + $0x698] sm:$0xf0]  ;;  %v8766_v25 = vld [vmem:[#allocation5 + $0x10] sm:$0xf] }
  0x64   :  { %2400 = vmatpush.bf16.msrb.mxu1 %v9551_v55  ;;  %v9734_v55 = vld [vmem:[#allocation5 + $0x7a0] sm:$0xf]  ;;  %v9470_v29 = vld [vmem:[#allocation5 + $0x590] sm:$0xf]  ;;  %v13321_v30 = vld [vmem:[#allocation5 + $0x5e4] sm:$0xf0] }
  0x65   :  { %2413 = vmatpush.bf16.msrb.mxu2 %v8851_v56  ;;  %v9827_v56 = vor.u32 %v13398_v48, %v9824_v49  ;;  %v9735_v0 = vor.u32 %v13387_v57, %v9734_v55  ;;  %v13134_v31 = vld [vmem:[#allocation5 + $0x14] sm:$0xf]  ;;  %v8768_v33 = vld [vmem:[#allocation5 + $0x68] sm:$0xf0]  ;;  %v9390_v36 = vld [vmem:[#allocation5 + $0x4e8] sm:$0xf]  ;;  %v9471_v43 = vor.u32 %v13321_v30, %v9470_v29 }
  0x66   :  { %2426 = vmatpush.bf16.msrb.mxu3 %v9555_v60  ;;  %v13376_v60 = vld [vmem:[#allocation5 + $0x7a4] sm:$0xf]  ;;  %v13310_v34 = vld [vmem:[#allocation5 + $0x594] sm:$0xf]  ;;  %v9472_v35 = vld [vmem:[#allocation5 + $0x5e8] sm:$0xf0] }
  0x67   :  { %2388 = vmatpush.bf16.msrb.mxu0 %v8759_v3  ;;  %v9646_v3 = vld [vmem:[#allocation5 + $0x6f0] sm:$0xf]  ;;  %v9739_v5 = vor.u32 %v13376_v60, %v9736_v61  ;;  %v13300_v37 = vld [vmem:[#allocation5 + $0x53c] sm:$0xf0]  ;;  %v13289_v41 = vld [vmem:[#allocation5 + $0x4ec] sm:$0xf]  ;;  %v9475_v47 = vor.u32 %v13310_v34, %v9472_v35 }
  0x68   :  { %2401 = vmatpush.bf16.msrb.mxu1 %v9463_v7  ;;  %v8944_v7 = vld [vmem:[#allocation5 + $0x1c8] sm:$0xf0]  ;;  %v9392_v42 = vld [vmem:[#allocation5 + $0x540] sm:$0xf0]  ;;  %v9391_v48 = vor.u32 %v13300_v37, %v9390_v36  ;;  %v10006_v53 = vld [vmem:[#allocation5 + $0x9b8] sm:$0xf] }
  0x69   :  { %2414 = vmatpush.bf16.msrb.mxu2 %v8763_v10  ;;  %v13354_v10 = vld [vmem:[#allocation5 + $0x6f4] sm:$0xf]  ;;  %v13465_v45 = vld [vmem:[#allocation5 + $0xa6c] sm:$0xf]  ;;  %v10096_v46 = vld [vmem:[#allocation5 + $0xac0] sm:$0xf0] }
  0x6a   :  { %2427 = vmatpush.bf16.msrb.mxu3 %v9467_v13  ;;  %2389 = vmatmul.bf16.vlgmr.msrb.gmra.mxu0 %v14594_v8  ;;  %v9647_v13 = vor.u32 %v13365_v4, %v9646_v3  ;;  %v9651_v18 = vor.u32 %v13354_v10, %v9648_v11  ;;  %v10099_v54 = vor.u32 %v13465_v45, %v10096_v46  ;;  %v13454_v55 = vld [vmem:[#allocation5 + $0xa0c] sm:$0xf0]  ;;  %v9304_v57 = vld [vmem:[#allocation5 + $0x490] sm:$0xf0]  ;;  %v13443_v58 = vld [vmem:[#allocation5 + $0x9bc] sm:$0xf] }
  0x6b   :  { %2433 = vmatpush.bf16.msra.mxu0 %v9383_v14  ;;  %2402 = vmatmul.bf16.vlgmr.msrb.gmra.mxu1 %v14596_v9  ;;  %v8947_v14 = vor.u32 %v13178_v6, %v8944_v7  ;;  %v10008_v59 = vld [vmem:[#allocation5 + $0xa10] sm:$0xf0]  ;;  %v10007_v61 = vor.u32 %v13454_v55, %v10006_v53  ;;  %v9214_v63 = vld [vmem:[#allocation5 + $0x388] sm:$0xf]  ;;  %v13432_v3 = vld [vmem:[#allocation5 + $0x95c] sm:$0xf0] }
  0x6c   :  { %2446 = vmatpush.bf16.msra.mxu1 %v10087_v15  ;;  %2415 = vmatmul.bf16.vlgmr.msrb.gmra.mxu2 %v14594_v8  ;;  %v8854_v15 = vld [vmem:[#allocation5 + $0xc0] sm:$0xf]  ;;  %v10011_v2 = vor.u32 %v13443_v58, %v10008_v59  ;;  %v13245_v4 = vld [vmem:[#allocation5 + $0x38c] sm:$0xf]  ;;  %v9920_v7 = vld [vmem:[#allocation5 + $0x960] sm:$0xf0] }
  0x6d   :  { %2459 = vmatpush.bf16.msra.mxu2 %v9387_v16  ;;  %2428 = vmatmul.bf16.vlgmr.msrb.gmra.mxu3 %v14596_v9  ;;  %v13167_v16 = vld [vmem:[#allocation5 + $0x114] sm:$0xf0]  ;;  %v13421_v6 = vld [vmem:[#allocation5 + $0x90c] sm:$0xf]  ;;  %v13388_v29 = vld [vmem:[#allocation5 + $0x7fc] sm:$0xf0] }
  0x6e   :  { %2472 = vmatpush.bf16.msra.mxu3 %v10091_v20  ;;  %v13156_v20 = vld [vmem:[#allocation5 + $0xc4] sm:$0xf]  ;;  %v8855_v24 = vor.u32 %v13167_v16, %v8854_v15  ;;  %v9830_v15 = vld [vmem:[#allocation5 + $0x858] sm:$0xf]  ;;  %v9923_v16 = vor.u32 %v13421_v6, %v9920_v7  ;;  %v13201_v30 = vld [vmem:[#allocation5 + $0x22c] sm:$0xf] }
  0x6f   :  { %2434 = vmatpush.bf16.msra.mxu0 %v9295_v26  ;;  %v13145_v26 = vld [vmem:[#allocation5 + $0x64] sm:$0xf0]  ;;  %v8950_v37 = vld [vmem:[#allocation5 + $0x178] sm:$0xf]  ;;  %v9656_v45 = vld [vmem:[#allocation5 + $0x750] sm:$0xf0] }
  0x70   :  { %2447 = vmatpush.bf16.msra.mxu1 %v9999_v27  ;;  %v9559_v27 = vor.u32 %v13343_v19, %v9558_v17  ;;  %v13410_v17 = vld [vmem:[#allocation5 + $0x8ac] sm:$0xf0]  ;;  %v9128_v19 = vld [vmem:[#allocation5 + $0x330] sm:$0xf0]  ;;  %v13344_v53 = vld [vmem:[#allocation5 + $0x69c] sm:$0xf0] }
  0x71   :  { %2460 = vmatpush.bf16.msra.mxu2 %v9299_v28  ;;  %v8859_v28 = vor.u32 %v13156_v20, %v8856_v21  ;;  %v13399_v20 = vld [vmem:[#allocation5 + $0x85c] sm:$0xf]  ;;  %v9832_v21 = vld [vmem:[#allocation5 + $0x8b0] sm:$0xf0]  ;;  %v8864_v55 = vld [vmem:[#allocation5 + $0x120] sm:$0xf0] }
  0x72   :  { %2473 = vmatpush.bf16.msra.mxu3 %v10003_v32  ;;  %v9563_v32 = vor.u32 %v13332_v22, %v9560_v23  ;;  %v9831_v23 = vor.u32 %v13410_v17, %v9830_v15  ;;  %v8774_v59 = vld [vmem:[#allocation5 + $0x18] sm:$0xf]  ;;  %v9398_v6 = vld [vmem:[#allocation5 + $0x4f0] sm:$0xf]  ;;  %v13301_v7 = vld [vmem:[#allocation5 + $0x544] sm:$0xf0] }
  0x73   :  { %2435 = vmatpush.bf16.msra.mxu0 %v9207_v38  ;;  %v10094_v38 = vld [vmem:[#allocation5 + $0xa68] sm:$0xf]  ;;  %v13466_v17 = vld [vmem:[#allocation5 + $0xa74] sm:$0xf]  ;;  %s8732_s8 = sshll.u32 %s14516_s6, 4  ;;  %s8733_s8 = int_to_ptr.vmem [resolvable:$true] %s8732_s8 }
  0x74   :  { %2448 = vmatpush.bf16.msra.mxu1 %v9911_v39  ;;  %v8767_v39 = vor.u32 %v13145_v26, %v8766_v25  ;;  %v9038_v25 = vld [vmem:[#allocation5 + $0x228] sm:$0xf]  ;;  %v13212_v26 = vld [vmem:[#allocation5 + $0x27c] sm:$0xf0] }
  0x75   :  { %2461 = vmatpush.bf16.msra.mxu2 %v9211_v40  ;;  %v13476_v40 = vld [vmem:[#allocation5 + $0xabc] sm:$0xf0]  ;;  %v9039_v34 = vor.u32 %v13212_v26, %v9038_v25 }
  0x76   :  { %2474 = vmatpush.bf16.msra.mxu3 %v9915_v44  ;;  %v8771_v44 = vor.u32 %v13134_v31, %v8768_v33  ;;  %v10095_v49 = vor.u32 %v13476_v40, %v10094_v38  ;;  %v9040_v31 = vld [vmem:[#allocation5 + $0x280] sm:$0xf0]  ;;  %v13190_v38 = vld [vmem:[#allocation5 + $0x1cc] sm:$0xf0]  ;;  %v10014_v25 = vld [vmem:[#allocation5 + $0x9c0] sm:$0xf] }
  0x77   :  { %2436 = vmatpush.bf16.msra.mxu0 %v9119_v50  ;;  %v9395_v50 = vor.u32 %v13289_v41, %v9392_v42  ;;  %v9744_v33 = vld [vmem:[#allocation5 + $0x800] sm:$0xf0]  ;;  %v9043_v36 = vor.u32 %v13201_v30, %v9040_v31  ;;  %v13366_v41 = vld [vmem:[#allocation5 + $0x74c] sm:$0xf0]  ;;  %v13179_v42 = vld [vmem:[#allocation5 + $0x17c] sm:$0xf]  ;;  %v8951_v46 = vor.u32 %v13190_v38, %v8950_v37 }
  0x78   :  { %2449 = vmatpush.bf16.msra.mxu1 %v9823_v51  ;;  %v9302_v51 = vld [vmem:[#allocation5 + $0x438] sm:$0xf]  ;;  %v13444_v30 = vld [vmem:[#allocation5 + $0x9c4] sm:$0xf]  ;;  %v10016_v31 = vld [vmem:[#allocation5 + $0xa18] sm:$0xf0] }
  0x79   :  { %2462 = vmatpush.bf16.msra.mxu2 %v9123_v52  ;;  %v13278_v52 = vld [vmem:[#allocation5 + $0x48c] sm:$0xf0]  ;;  %v10019_v38 = vor.u32 %v13444_v30, %v10016_v31  ;;  %v8782_v31 = vld [vmem:[#allocation5 + $0x20] sm:$0xf] }
  0x7a   :  { %2475 = vmatpush.bf16.msra.mxu3 %v9827_v56  ;;  %v13267_v56 = vld [vmem:[#allocation5 + $0x43c] sm:$0xf]  ;;  %v9303_v60 = vor.u32 %v13278_v52, %v9302_v51  ;;  %v9566_v51 = vld [vmem:[#allocation5 + $0x648] sm:$0xf]  ;;  %v9926_v37 = vld [vmem:[#allocation5 + $0x910] sm:$0xf] }
  0x7b   :  { %2437 = vmatpush.bf16.msra.mxu0 %v9031_v62  ;;  %v9307_v62 = vor.u32 %v13267_v56, %v9304_v57  ;;  %v13333_v56 = vld [vmem:[#allocation5 + $0x64c] sm:$0xf]  ;;  %v9568_v57 = vld [vmem:[#allocation5 + $0x6a0] sm:$0xf0] }
  0x7c   :  { %2450 = vmatpush.bf16.msra.mxu1 %v9735_v0  ;;  %v13256_v0 = vld [vmem:[#allocation5 + $0x3dc] sm:$0xf0] }
  0x7d   :  { %2463 = vmatpush.bf16.msra.mxu2 %v9035_v1  ;;  %v9918_v1 = vld [vmem:[#allocation5 + $0x908] sm:$0xf]  ;;  %v9215_v10 = vor.u32 %v13256_v0, %v9214_v63  ;;  %v9478_v63 = vld [vmem:[#allocation5 + $0x598] sm:$0xf]  ;;  %v13322_v0 = vld [vmem:[#allocation5 + $0x5ec] sm:$0xf0] }
  0x7e   :  { %2476 = vmatpush.bf16.msra.mxu3 %v9739_v5  ;;  %v9216_v5 = vld [vmem:[#allocation5 + $0x3e0] sm:$0xf0]  ;;  %v9919_v11 = vor.u32 %v13432_v3, %v9918_v1  ;;  %v13135_v1 = vld [vmem:[#allocation5 + $0x1c] sm:$0xf]  ;;  %v8776_v3 = vld [vmem:[#allocation5 + $0x70] sm:$0xf0]  ;;  %v9479_v15 = vor.u32 %v13322_v0, %v9478_v63 }
  0x7f   :  { %2438 = vmatpush.bf16.msra.mxu0 %v8943_v12  ;;  %v9219_v12 = vor.u32 %v13245_v4, %v9216_v5  ;;  %v13311_v4 = vld [vmem:[#allocation5 + $0x59c] sm:$0xf]  ;;  %v9480_v5 = vld [vmem:[#allocation5 + $0x5f0] sm:$0xf0]  ;;  %v13389_v63 = vld [vmem:[#allocation5 + $0x804] sm:$0xf0] }
  0x80   :  { %2451 = vmatpush.bf16.msra.mxu1 %v9647_v13  ;;  %v9126_v13 = vld [vmem:[#allocation5 + $0x2d8] sm:$0xf]  ;;  %v13202_v0 = vld [vmem:[#allocation5 + $0x234] sm:$0xf] }
  0x81   :  { %2464 = vmatpush.bf16.msra.mxu2 %v8947_v14  ;;  %v13234_v14 = vld [vmem:[#allocation5 + $0x32c] sm:$0xf0] }
  0x82   :  { %2477 = vmatpush.bf16.msra.mxu3 %v9651_v18  ;;  %v13223_v18 = vld [vmem:[#allocation5 + $0x2dc] sm:$0xf]  ;;  %v9127_v22 = vor.u32 %v13234_v14, %v9126_v13  ;;  %v13290_v13 = vld [vmem:[#allocation5 + $0x4f4] sm:$0xf]  ;;  %v9400_v14 = vld [vmem:[#allocation5 + $0x548] sm:$0xf0] }
  0x83   :  { %2439 = vmatpush.bf16.msra.mxu0 %v8855_v24  ;;  %v9131_v24 = vor.u32 %v13223_v18, %v9128_v19  ;;  %v10104_v18 = vld [vmem:[#allocation5 + $0xac8] sm:$0xf0]  ;;  %v9483_v19 = vor.u32 %v13311_v4, %v9480_v5 }
  0x84   :  { %2452 = vmatpush.bf16.msra.mxu1 %v9559_v27  ;;  %v9742_v27 = vld [vmem:[#allocation5 + $0x7a8] sm:$0xf]  ;;  %v10107_v26 = vor.u32 %v13466_v17, %v10104_v18  ;;  %v9664_v17 = vld [vmem:[#allocation5 + $0x758] sm:$0xf0] }
  0x85   :  { %2465 = vmatpush.bf16.msra.mxu2 %v8859_v28  ;;  %v9835_v28 = vor.u32 %v13399_v20, %v9832_v21  ;;  %v9743_v35 = vor.u32 %v13388_v29, %v9742_v27  ;;  %v9399_v20 = vor.u32 %v13301_v7, %v9398_v6  ;;  %v13455_v27 = vld [vmem:[#allocation5 + $0xa14] sm:$0xf0]  ;;  %v9312_v29 = vld [vmem:[#allocation5 + $0x498] sm:$0xf0]  ;;  %v8958_v7 = vld [vmem:[#allocation5 + $0x180] sm:$0xf] }
  0x86   :  { %2478 = vmatpush.bf16.msra.mxu3 %v9563_v32  ;;  %v13377_v32 = vld [vmem:[#allocation5 + $0x7ac] sm:$0xf] }
  0x87   :  { %2440 = vmatpush.bf16.msra.mxu0 %v8767_v39  ;;  %v9654_v39 = vld [vmem:[#allocation5 + $0x6f8] sm:$0xf]  ;;  %v9747_v40 = vor.u32 %v13377_v32, %v9744_v33  ;;  %v10015_v33 = vor.u32 %v13455_v27, %v10014_v25  ;;  %v13345_v25 = vld [vmem:[#allocation5 + $0x6a4] sm:$0xf0]  ;;  %v8872_v27 = vld [vmem:[#allocation5 + $0x128] sm:$0xf0] }
  0x88   :  { %2453 = vmatpush.bf16.msra.mxu1 %v9471_v43  ;;  %v8952_v43 = vld [vmem:[#allocation5 + $0x1d0] sm:$0xf0] }
  0x89   :  { %2466 = vmatpush.bf16.msra.mxu2 %v8771_v44  ;;  %v13355_v44 = vld [vmem:[#allocation5 + $0x6fc] sm:$0xf] }
  0x8a   :  { %2479 = vmatpush.bf16.msra.mxu3 %v9475_v47  ;;  %2441 = vmatmul.bf16.vlgmr.msra.gmra.mxu0 %v14594_v8  ;;  %v9655_v47 = vor.u32 %v13366_v41, %v9654_v39  ;;  %v9659_v52 = vor.u32 %v13355_v44, %v9656_v45  ;;  %v13433_v39 = vld [vmem:[#allocation5 + $0x964] sm:$0xf0]  ;;  %v9224_v41 = vld [vmem:[#allocation5 + $0x3e8] sm:$0xf0] }
  0x8b   :  { %2485 = vmatpush.bf16.msrb.mxu0 %v9391_v48  ;;  %2454 = vmatmul.bf16.vlgmr.msra.gmra.mxu1 %v14596_v9  ;;  %v8955_v48 = vor.u32 %v13179_v42, %v8952_v43  ;;  %v13422_v42 = vld [vmem:[#allocation5 + $0x914] sm:$0xf]  ;;  %v9928_v43 = vld [vmem:[#allocation5 + $0x968] sm:$0xf0]  ;;  %v9927_v45 = vor.u32 %v13433_v39, %v9926_v37  ;;  %v13136_v37 = vld [vmem:[#allocation5 + $0x24] sm:$0xf] }
  0x8c   :  { %2498 = vmatpush.bf16.msrb.mxu1 %v10095_v49  ;;  %2467 = vmatmul.bf16.vlgmr.msra.gmra.mxu2 %v14594_v8  ;;  %v8862_v49 = vld [vmem:[#allocation5 + $0xc8] sm:$0xf]  ;;  %v8784_v39 = vld [vmem:[#allocation5 + $0x78] sm:$0xf0] }
  0x8d   :  { %2511 = vmatpush.bf16.msrb.mxu2 %v9395_v50  ;;  %2480 = vmatmul.bf16.vlgmr.msra.gmra.mxu3 %v14596_v9  ;;  %v13168_v50 = vld [vmem:[#allocation5 + $0x11c] sm:$0xf0] }
  0x8e   :  { %2524 = vmatpush.bf16.msrb.mxu3 %v10099_v54  ;;  %v13157_v54 = vld [vmem:[#allocation5 + $0xcc] sm:$0xf]  ;;  %v8863_v58 = vor.u32 %v13168_v50, %v8862_v49  ;;  %v9838_v49 = vld [vmem:[#allocation5 + $0x860] sm:$0xf]  ;;  %v9931_v50 = vor.u32 %v13422_v42, %v9928_v43  ;;  %v9406_v42 = vld [vmem:[#allocation5 + $0x4f8] sm:$0xf] }
  0x8f   :  { %2486 = vmatpush.bf16.msrb.mxu0 %v9303_v60  ;;  %v13146_v60 = vld [vmem:[#allocation5 + $0x6c] sm:$0xf0] }
  0x90   :  { %2499 = vmatpush.bf16.msrb.mxu1 %v10007_v61  ;;  %v9567_v61 = vor.u32 %v13344_v53, %v9566_v51  ;;  %v13411_v51 = vld [vmem:[#allocation5 + $0x8b4] sm:$0xf0]  ;;  %v9136_v53 = vld [vmem:[#allocation5 + $0x338] sm:$0xf0]  ;;  %v13302_v43 = vld [vmem:[#allocation5 + $0x54c] sm:$0xf0] }
  0x91   :  { %2512 = vmatpush.bf16.msrb.mxu2 %v9307_v62  ;;  %v8867_v62 = vor.u32 %v13157_v54, %v8864_v55  ;;  %v13400_v54 = vld [vmem:[#allocation5 + $0x864] sm:$0xf]  ;;  %v9840_v55 = vld [vmem:[#allocation5 + $0x8b8] sm:$0xf0] }
  0x92   :  { %2525 = vmatpush.bf16.msrb.mxu3 %v10011_v2  ;;  %v9571_v2 = vor.u32 %v13333_v56, %v9568_v57  ;;  %v9839_v57 = vor.u32 %v13411_v51, %v9838_v49  ;;  %v13467_v51 = vld [vmem:[#allocation5 + $0xa7c] sm:$0xf] }
  0x93   :  { %2487 = vmatpush.bf16.msrb.mxu0 %v9215_v10  ;;  %v10102_v10 = vld [vmem:[#allocation5 + $0xa70] sm:$0xf] }
  0x94   :  { %2500 = vmatpush.bf16.msrb.mxu1 %v9919_v11  ;;  %v8775_v11 = vor.u32 %v13146_v60, %v8774_v59  ;;  %v9046_v59 = vld [vmem:[#allocation5 + $0x230] sm:$0xf]  ;;  %v13213_v60 = vld [vmem:[#allocation5 + $0x284] sm:$0xf0] }
  0x95   :  { %2513 = vmatpush.bf16.msrb.mxu2 %v9219_v12  ;;  %v13477_v12 = vld [vmem:[#allocation5 + $0xac4] sm:$0xf0]  ;;  %v9047_v4 = vor.u32 %v13213_v60, %v9046_v59 }
  0x96   :  { %2526 = vmatpush.bf16.msrb.mxu3 %v9923_v16  ;;  %v8779_v16 = vor.u32 %v13135_v1, %v8776_v3  ;;  %v10103_v21 = vor.u32 %v13477_v12, %v10102_v10  ;;  %v9048_v1 = vld [vmem:[#allocation5 + $0x288] sm:$0xf0]  ;;  %v13191_v10 = vld [vmem:[#allocation5 + $0x1d4] sm:$0xf0]  ;;  %v10022_v59 = vld [vmem:[#allocation5 + $0x9c8] sm:$0xf] }
  0x97   :  { %2488 = vmatpush.bf16.msrb.mxu0 %v9127_v22  ;;  %v9403_v22 = vor.u32 %v13290_v13, %v9400_v14  ;;  %v9752_v3 = vld [vmem:[#allocation5 + $0x808] sm:$0xf0]  ;;  %v9051_v6 = vor.u32 %v13202_v0, %v9048_v1  ;;  %v13367_v13 = vld [vmem:[#allocation5 + $0x754] sm:$0xf0]  ;;  %v13180_v14 = vld [vmem:[#allocation5 + $0x184] sm:$0xf]  ;;  %v8959_v18 = vor.u32 %v13191_v10, %v8958_v7 }
  0x98   :  { %2501 = vmatpush.bf16.msrb.mxu1 %v9831_v23  ;;  %v9310_v23 = vld [vmem:[#allocation5 + $0x440] sm:$0xf]  ;;  %v13445_v0 = vld [vmem:[#allocation5 + $0x9cc] sm:$0xf]  ;;  %v10024_v1 = vld [vmem:[#allocation5 + $0xa20] sm:$0xf0] }
  0x99   :  { %2514 = vmatpush.bf16.msrb.mxu2 %v9131_v24  ;;  %v13279_v24 = vld [vmem:[#allocation5 + $0x494] sm:$0xf0]  ;;  %v10027_v10 = vor.u32 %v13445_v0, %v10024_v1 }
  0x9a   :  { %2527 = vmatpush.bf16.msrb.mxu3 %v9835_v28  ;;  %v13268_v28 = vld [vmem:[#allocation5 + $0x444] sm:$0xf]  ;;  %v9311_v32 = vor.u32 %v13279_v24, %v9310_v23  ;;  %v9574_v23 = vld [vmem:[#allocation5 + $0x650] sm:$0xf]  ;;  %v9934_v7 = vld [vmem:[#allocation5 + $0x918] sm:$0xf] }
  0x9b   :  { %2489 = vmatpush.bf16.msrb.mxu0 %v9039_v34  ;;  %v9315_v34 = vor.u32 %v13268_v28, %v9312_v29  ;;  %v13334_v28 = vld [vmem:[#allocation5 + $0x654] sm:$0xf]  ;;  %v9576_v29 = vld [vmem:[#allocation5 + $0x6a8] sm:$0xf0]  ;;  %v9582_v0 = vld [vmem:[#allocation5 + $0x658] sm:$0xf] }
  0x9c   :  { %2502 = vmatpush.bf16.msrb.mxu1 %v9743_v35  ;;  %v9222_v35 = vld [vmem:[#allocation5 + $0x390] sm:$0xf] }
  0x9d   :  { %2515 = vmatpush.bf16.msrb.mxu2 %v9043_v36  ;;  %v13257_v36 = vld [vmem:[#allocation5 + $0x3e4] sm:$0xf0] }
  0x9e   :  { %2528 = vmatpush.bf16.msrb.mxu3 %v9747_v40  ;;  %v13246_v40 = vld [vmem:[#allocation5 + $0x394] sm:$0xf]  ;;  %v9223_v44 = vor.u32 %v13257_v36, %v9222_v35  ;;  %v9486_v35 = vld [vmem:[#allocation5 + $0x5a0] sm:$0xf]  ;;  %v13323_v36 = vld [vmem:[#allocation5 + $0x5f4] sm:$0xf0] }
  0x9f   :  { %2490 = vmatpush.bf16.msrb.mxu0 %v8951_v46  ;;  %v9227_v46 = vor.u32 %v13246_v40, %v9224_v41  ;;  %v13312_v40 = vld [vmem:[#allocation5 + $0x5a4] sm:$0xf]  ;;  %v9488_v41 = vld [vmem:[#allocation5 + $0x5f8] sm:$0xf0]  ;;  %v9487_v49 = vor.u32 %v13323_v36, %v9486_v35 }
  0xa0   :  { %2503 = vmatpush.bf16.msrb.mxu1 %v9655_v47  ;;  %v9134_v47 = vld [vmem:[#allocation5 + $0x2e0] sm:$0xf] }
  0xa1   :  { %2516 = vmatpush.bf16.msrb.mxu2 %v8955_v48  ;;  %v13235_v48 = vld [vmem:[#allocation5 + $0x334] sm:$0xf0] }
  0xa2   :  { %2529 = vmatpush.bf16.msrb.mxu3 %v9659_v52  ;;  %v13224_v52 = vld [vmem:[#allocation5 + $0x2e4] sm:$0xf]  ;;  %v9135_v56 = vor.u32 %v13235_v48, %v9134_v47  ;;  %v13291_v47 = vld [vmem:[#allocation5 + $0x4fc] sm:$0xf]  ;;  %v9408_v48 = vld [vmem:[#allocation5 + $0x550] sm:$0xf0] }
  0xa3   :  { %2491 = vmatpush.bf16.msrb.mxu0 %v8863_v58  ;;  %v9139_v58 = vor.u32 %v13224_v52, %v9136_v53  ;;  %v10112_v52 = vld [vmem:[#allocation5 + $0xad0] sm:$0xf0]  ;;  %v9491_v53 = vor.u32 %v13312_v40, %v9488_v41  ;;  %v13379_v40 = vld [vmem:[#allocation5 + $0x7bc] sm:$0xf] }
  0xa4   :  { %2504 = vmatpush.bf16.msrb.mxu1 %v9567_v61  ;;  %v9750_v61 = vld [vmem:[#allocation5 + $0x7b0] sm:$0xf]  ;;  %v10115_v60 = vor.u32 %v13467_v51, %v10112_v52  ;;  %v9760_v41 = vld [vmem:[#allocation5 + $0x810] sm:$0xf0]  ;;  %v13368_v51 = vld [vmem:[#allocation5 + $0x75c] sm:$0xf0] }
  0xa5   :  { %2517 = vmatpush.bf16.msrb.mxu2 %v8867_v62  ;;  %v9843_v62 = vor.u32 %v13400_v54, %v9840_v55  ;;  %v9751_v5 = vor.u32 %v13389_v63, %v9750_v61  ;;  %v9407_v54 = vor.u32 %v13302_v43, %v9406_v42  ;;  %v13456_v61 = vld [vmem:[#allocation5 + $0xa1c] sm:$0xf0]  ;;  %v9320_v63 = vld [vmem:[#allocation5 + $0x4a0] sm:$0xf0]  ;;  %v13181_v52 = vld [vmem:[#allocation5 + $0x18c] sm:$0xf] }
  0xa6   :  { %2530 = vmatpush.bf16.msrb.mxu3 %v9571_v2  ;;  %v13378_v2 = vld [vmem:[#allocation5 + $0x7b4] sm:$0xf] }
  0xa7   :  { %2492 = vmatpush.bf16.msrb.mxu0 %v8775_v11  ;;  %v9662_v11 = vld [vmem:[#allocation5 + $0x700] sm:$0xf]  ;;  %v9755_v12 = vor.u32 %v13378_v2, %v9752_v3  ;;  %v10023_v3 = vor.u32 %v13456_v61, %v10022_v59 }
  0xa8   :  { %2505 = vmatpush.bf16.msrb.mxu1 %v9479_v15  ;;  %v8960_v15 = vld [vmem:[#allocation5 + $0x1d8] sm:$0xf0] }
  0xa9   :  { %2518 = vmatpush.bf16.msrb.mxu2 %v8779_v16  ;;  %v13356_v16 = vld [vmem:[#allocation5 + $0x704] sm:$0xf] }
  0xaa   :  { %2531 = vmatpush.bf16.msrb.mxu3 %v9483_v19  ;;  %2493 = vmatmul.bf16.vlgmr.msrb.gmra.mxu0 %v14594_v8  ;;  %v9663_v19 = vor.u32 %v13367_v13, %v9662_v11  ;;  %v9667_v24 = vor.u32 %v13356_v16, %v9664_v17  ;;  %v13434_v11 = vld [vmem:[#allocation5 + $0x96c] sm:$0xf0]  ;;  %v9232_v13 = vld [vmem:[#allocation5 + $0x3f0] sm:$0xf0]  ;;  %v9142_v17 = vld [vmem:[#allocation5 + $0x2e8] sm:$0xf] }
  0xab   :  { %2537 = vmatpush.bf16.msra.mxu0 %v9399_v20  ;;  %2506 = vmatmul.bf16.vlgmr.msrb.gmra.mxu1 %v14596_v9  ;;  %v8963_v20 = vor.u32 %v13180_v14, %v8960_v15  ;;  %v13423_v14 = vld [vmem:[#allocation5 + $0x91c] sm:$0xf]  ;;  %v9936_v15 = vld [vmem:[#allocation5 + $0x970] sm:$0xf0] }
  0xac   :  { %2550 = vmatpush.bf16.msra.mxu1 %v10103_v21  ;;  %2519 = vmatmul.bf16.vlgmr.msrb.gmra.mxu2 %v14594_v8  ;;  %v8870_v21 = vld [vmem:[#allocation5 + $0xd0] sm:$0xf] }
  0xad   :  { %2563 = vmatpush.bf16.msra.mxu2 %v9403_v22  ;;  %2532 = vmatmul.bf16.vlgmr.msrb.gmra.mxu3 %v14596_v9  ;;  %v13169_v22 = vld [vmem:[#allocation5 + $0x124] sm:$0xf0] }
  0xae   :  { %2576 = vmatpush.bf16.msra.mxu3 %v10107_v26  ;;  %v13158_v26 = vld [vmem:[#allocation5 + $0xd4] sm:$0xf]  ;;  %v8871_v30 = vor.u32 %v13169_v22, %v8870_v21  ;;  %v9846_v21 = vld [vmem:[#allocation5 + $0x868] sm:$0xf]  ;;  %v13412_v22 = vld [vmem:[#allocation5 + $0x8bc] sm:$0xf0] }
  0xaf   :  { %2538 = vmatpush.bf16.msra.mxu0 %v9311_v32  ;;  %v13147_v32 = vld [vmem:[#allocation5 + $0x74] sm:$0xf0] }
  0xb0   :  { %2551 = vmatpush.bf16.msra.mxu1 %v10015_v33  ;;  %v9575_v33 = vor.u32 %v13345_v25, %v9574_v23  ;;  %v9939_v23 = vor.u32 %v13423_v14, %v9936_v15  ;;  %v9144_v25 = vld [vmem:[#allocation5 + $0x340] sm:$0xf0]  ;;  %v13148_v14 = vld [vmem:[#allocation5 + $0x7c] sm:$0xf0] }
  0xb1   :  { %2564 = vmatpush.bf16.msra.mxu2 %v9315_v34  ;;  %v8875_v34 = vor.u32 %v13158_v26, %v8872_v27  ;;  %v14618_v26 = vld [vmem:[#allocation7] sm:$0xff]  ;;  %v13401_v27 = vld [vmem:[#allocation5 + $0x86c] sm:$0xf] }
  0xb2   :  { %2577 = vmatpush.bf16.msra.mxu3 %v10019_v38  ;;  %v9579_v38 = vor.u32 %v13334_v28, %v9576_v29  ;;  %v9848_v28 = vld [vmem:[#allocation5 + $0x8c0] sm:$0xf0]  ;;  %v525_v35 = vperm.slane %v14618_v26, 0 }
  0xb3   :  { %2539 = vmatpush.bf16.msra.mxu0 %v9223_v44  ;;  %v10110_v44 = vld [vmem:[#allocation5 + $0xa78] sm:$0xf]  ;;  %v9851_v36 = vor.u32 %v13401_v27, %v9848_v28  ;;  %v9414_v27 = vld [vmem:[#allocation5 + $0x500] sm:$0xf] }
  0xb4   :  { %2552 = vmatpush.bf16.msra.mxu1 %v9927_v45  ;;  %v8783_v45 = vor.u32 %v13147_v32, %v8782_v31  ;;  %v9847_v31 = vor.u32 %v13412_v22, %v9846_v21  ;;  %v13303_v28 = vld [vmem:[#allocation5 + $0x554] sm:$0xf0] }
  0xb5   :  { %2565 = vmatpush.bf16.msra.mxu2 %v9227_v46  ;;  %v13478_v46 = vld [vmem:[#allocation5 + $0xacc] sm:$0xf0] }
  0xb6   :  { %2578 = vmatpush.bf16.msra.mxu3 %v9931_v50  ;;  %v8787_v50 = vor.u32 %v13136_v37, %v8784_v39  ;;  %v10111_v55 = vor.u32 %v13478_v46, %v10110_v44  ;;  %v13390_v37 = vld [vmem:[#allocation5 + $0x80c] sm:$0xf0]  ;;  %v9056_v39 = vld [vmem:[#allocation5 + $0x290] sm:$0xf0]  ;;  %v8966_v46 = vld [vmem:[#allocation5 + $0x188] sm:$0xf] }
  0xb7   :  { %2540 = vmatpush.bf16.msra.mxu0 %v9135_v56  ;;  %v9411_v56 = vor.u32 %v13291_v47, %v9408_v48  ;;  %v13192_v47 = vld [vmem:[#allocation5 + $0x1dc] sm:$0xf0]  ;;  %v9670_v48 = vld [vmem:[#allocation5 + $0x708] sm:$0xf] }
  0xb8   :  { %2553 = vmatpush.bf16.msra.mxu1 %v9839_v57  ;;  %v9318_v57 = vld [vmem:[#allocation5 + $0x448] sm:$0xf] }
  0xb9   :  { %2566 = vmatpush.bf16.msra.mxu2 %v9139_v58  ;;  %v13280_v58 = vld [vmem:[#allocation5 + $0x49c] sm:$0xf0] }
  0xba   :  { %2579 = vmatpush.bf16.msra.mxu3 %v9843_v62  ;;  %v13269_v62 = vld [vmem:[#allocation5 + $0x44c] sm:$0xf]  ;;  %v9319_v2 = vor.u32 %v13280_v58, %v9318_v57  ;;  %v526_v57 = vperm.slane %v14618_v26, 1  ;;  %v8967_v58 = vor.u32 %v13192_v47, %v8966_v46  ;;  %v10030_v46 = vld [vmem:[#allocation5 + $0x9d0] sm:$0xf] }
  0xbb   :  { %2541 = vmatpush.bf16.msra.mxu0 %v9047_v4  ;;  %v9323_v4 = vor.u32 %v13269_v62, %v9320_v63  ;;  %v8878_v62 = vld [vmem:[#allocation5 + $0xd8] sm:$0xf]  ;;  %v13170_v63 = vld [vmem:[#allocation5 + $0x12c] sm:$0xf0] }
  0xbc   :  { %2554 = vmatpush.bf16.msra.mxu1 %v9751_v5  ;;  %v9230_v5 = vld [vmem:[#allocation5 + $0x398] sm:$0xf] }
  0xbd   :  { %2567 = vmatpush.bf16.msra.mxu2 %v9051_v6  ;;  %v13258_v6 = vld [vmem:[#allocation5 + $0x3ec] sm:$0xf0] }
  0xbe   :  { %2580 = vmatpush.bf16.msra.mxu3 %v9755_v12  ;;  %v13247_v12 = vld [vmem:[#allocation5 + $0x39c] sm:$0xf]  ;;  %v9231_v16 = vor.u32 %v13258_v6, %v9230_v5 }
  0xbf   :  { %2542 = vmatpush.bf16.msra.mxu0 %v8959_v18  ;;  %v9935_v18 = vor.u32 %v13434_v11, %v9934_v7  ;;  %v13335_v6 = vld [vmem:[#allocation5 + $0x65c] sm:$0xf]  ;;  %v9584_v7 = vld [vmem:[#allocation5 + $0x6b0] sm:$0xf0] }
  0xc0   :  { %2555 = vmatpush.bf16.msra.mxu1 %v9663_v19  ;;  %v9235_v19 = vor.u32 %v13247_v12, %v9232_v13  ;;  %v8879_v12 = vor.u32 %v13170_v63, %v8878_v62  ;;  %v8790_v13 = vld [vmem:[#allocation5 + $0x28] sm:$0xf]  ;;  %v9587_v22 = vor.u32 %v13335_v6, %v9584_v7  ;;  %v13435_v62 = vld [vmem:[#allocation5 + $0x974] sm:$0xf0]  ;;  %v13248_v63 = vld [vmem:[#allocation5 + $0x3a4] sm:$0xf] }
  0xc1   :  { %2568 = vmatpush.bf16.msra.mxu2 %v8963_v20  ;;  %v13236_v20 = vld [vmem:[#allocation5 + $0x33c] sm:$0xf0]  ;;  %v13237_v7 = vld [vmem:[#allocation5 + $0x344] sm:$0xf0] }
  0xc2   :  { %2581 = vmatpush.bf16.msra.mxu3 %v9667_v24  ;;  %v13225_v24 = vld [vmem:[#allocation5 + $0x2ec] sm:$0xf]  ;;  %v9143_v29 = vor.u32 %v13236_v20, %v9142_v17 }
  0xc3   :  { %2543 = vmatpush.bf16.msra.mxu0 %v8871_v30  ;;  %v9054_v30 = vld [vmem:[#allocation5 + $0x238] sm:$0xf]  ;;  %v9147_v32 = vor.u32 %v13225_v24, %v9144_v25  ;;  %v13137_v20 = vld [vmem:[#allocation5 + $0x2c] sm:$0xf]  ;;  %v9496_v25 = vld [vmem:[#allocation5 + $0x600] sm:$0xf0] }
  0xc4   :  { %2556 = vmatpush.bf16.msra.mxu1 %v9575_v33  ;;  %v13214_v33 = vld [vmem:[#allocation5 + $0x28c] sm:$0xf0]  ;;  %v13313_v24 = vld [vmem:[#allocation5 + $0x5ac] sm:$0xf] }
  0xc5   :  { %2569 = vmatpush.bf16.msra.mxu2 %v8875_v34  ;;  %v9758_v34 = vld [vmem:[#allocation5 + $0x7b8] sm:$0xf]  ;;  %v9055_v42 = vor.u32 %v13214_v33, %v9054_v30  ;;  %v13292_v33 = vld [vmem:[#allocation5 + $0x504] sm:$0xf] }
  0xc6   :  { %2582 = vmatpush.bf16.msra.mxu3 %v9579_v38  ;;  %v13203_v38 = vld [vmem:[#allocation5 + $0x23c] sm:$0xf]  ;;  %v9759_v44 = vor.u32 %v13390_v37, %v9758_v34  ;;  %v13468_v37 = vld [vmem:[#allocation5 + $0xa84] sm:$0xf] }
  0xc7   :  { %2544 = vmatpush.bf16.msra.mxu0 %v8783_v45  ;;  %v2338_v43 = vpop.f32.mrf.mxu0  ;;  %v9059_v45 = vor.u32 %v13203_v38, %v9056_v39  ;;  %v9416_v34 = vld [vmem:[#allocation5 + $0x558] sm:$0xf0]  ;;  %v9499_v39 = vor.u32 %v13313_v24, %v9496_v25  ;;  %v13215_v24 = vld [vmem:[#allocation5 + $0x294] sm:$0xf0]  ;;  %v9766_v25 = vld [vmem:[#allocation5 + $0x7c0] sm:$0xf] }
  0xc8   :  { %2557 = vmatpush.bf16.msra.mxu1 %v9487_v49  ;;  %v2339_v49 = vadd.f32 %v2338_v43, %v525_v35  ;;  %v10120_v38 = vld [vmem:[#allocation5 + $0xad8] sm:$0xf0]  ;;  %v9419_v43 = vor.u32 %v13292_v33, %v9416_v34  ;;  %v528_v33 = vperm.slane %v14618_v26, 3  ;;  %v13380_v34 = vld [vmem:[#allocation5 + $0x7c4] sm:$0xf] }
  0xc9   :  { %2570 = vmatpush.bf16.msra.mxu2 %v8787_v50  ;;  %v9763_v50 = vor.u32 %v13379_v40, %v9760_v41  ;;  %v9415_v40 = vor.u32 %v13303_v28, %v9414_v27  ;;  %v13391_v27 = vld [vmem:[#allocation5 + $0x814] sm:$0xf0] }
  0xca   :  { %2583 = vmatpush.bf16.msra.mxu3 %v9491_v53  ;;  %2545 = vmatmul.bf16.vlgmr.msra.gmra.mxu0 %v14594_v8  ;;  %v8968_v53 = vld [vmem:[#allocation5 + $0x1e0] sm:$0xf0] }
  0xcb   :  { %2589 = vmatpush.bf16.msrb.mxu0 %v9407_v54  ;;  %2558 = vmatmul.bf16.vlgmr.msra.gmra.mxu1 %v14596_v9  ;;  %v13357_v54 = vld [vmem:[#allocation5 + $0x70c] sm:$0xf]  ;;  %v8971_v61 = vor.u32 %v13181_v52, %v8968_v53  ;;  %v13446_v52 = vld [vmem:[#allocation5 + $0x9d4] sm:$0xf] }
  0xcc   :  { %2602 = vmatpush.bf16.msrb.mxu1 %v10111_v55  ;;  %2571 = vmatmul.bf16.vlgmr.msra.gmra.mxu2 %v14594_v8  ;;  %v9672_v55 = vld [vmem:[#allocation5 + $0x760] sm:$0xf0]  ;;  %v10032_v53 = vld [vmem:[#allocation5 + $0xa28] sm:$0xf0] }
  0xcd   :  { %2615 = vmatpush.bf16.msrb.mxu2 %v9411_v56  ;;  %2584 = vmatmul.bf16.vlgmr.msra.gmra.mxu3 %v14596_v9  ;;  %v2351_v56 = vpop.f32.mrf.mxu1  ;;  %v9675_v1 = vor.u32 %v13357_v54, %v9672_v55 }
  0xce   :  { %2628 = vmatpush.bf16.msrb.mxu3 %v10115_v60  ;;  %v14622_v59 = vadd.f32 %v2351_v56, %v2339_v49  ;;  %v9671_v60 = vor.u32 %v13368_v51, %v9670_v48  ;;  %v10123_v48 = vor.u32 %v13468_v37, %v10120_v38  ;;  %v13457_v49 = vld [vmem:[#allocation5 + $0xa24] sm:$0xf0]  ;;  %v9328_v51 = vld [vmem:[#allocation5 + $0x4a8] sm:$0xf0]  ;;  %v9767_v38 = vor.u32 %v13391_v27, %v9766_v25  ;;  %v13480_v25 = vld [vmem:[#allocation5 + $0xadc] sm:$0xf0] }
  0xcf   :  { %2590 = vmatpush.bf16.msrb.mxu0 %v9319_v2  ;;  %v13346_v2 = vld [vmem:[#allocation5 + $0x6ac] sm:$0xf0]  ;;  %v2364_v5 = vpop.f32.mrf.mxu2  ;;  %v2340_v15 = vpop.f32.mrf.mxu0  ;;  %v10031_v55 = vor.u32 %v13457_v49, %v10030_v46  ;;  %v13182_v46 = vld [vmem:[#allocation5 + $0x194] sm:$0xf]  ;;  %v13293_v27 = vld [vmem:[#allocation5 + $0x50c] sm:$0xf] }
  0xd0   :  { %2603 = vmatpush.bf16.msrb.mxu1 %v10023_v3  ;;  %v13159_v3 = vld [vmem:[#allocation5 + $0xdc] sm:$0xf]  ;;  %v2377_v11 = vpop.f32.mrf.mxu3  ;;  %v9152_v15 = vld [vmem:[#allocation5 + $0x348] sm:$0xf0] }
  0xd1   :  { %2616 = vmatpush.bf16.msrb.mxu2 %v9323_v4  ;;  %v8880_v4 = vld [vmem:[#allocation5 + $0x130] sm:$0xf0] }
  0xd2   :  { %2629 = vmatpush.bf16.msrb.mxu3 %v10027_v10  ;;  %v2365_v10 = vadd.f32 %v2364_v5, %v526_v57  ;;  %v8883_v17 = vor.u32 %v13159_v3, %v8880_v4  ;;  %v9238_v57 = vld [vmem:[#allocation5 + $0x3a0] sm:$0xf]  ;;  %v9150_v4 = vld [vmem:[#allocation5 + $0x2f0] sm:$0xf] }
  0xd3   :  { %2591 = vmatpush.bf16.msrb.mxu0 %v9231_v16  ;;  %v9583_v16 = vor.u32 %v13346_v2, %v9582_v0  ;;  %v9240_v0 = vld [vmem:[#allocation5 + $0x3f8] sm:$0xf0] }
  0xd4   :  { %2604 = vmatpush.bf16.msrb.mxu1 %v9935_v18  ;;  %v9494_v18 = vld [vmem:[#allocation5 + $0x5a8] sm:$0xf]  ;;  %v14624_v21 = vadd.f32 %v2377_v11, %v2365_v10  ;;  %v9944_v2 = vld [vmem:[#allocation5 + $0x978] sm:$0xf0]  ;;  %v9243_v6 = vor.u32 %v13248_v63, %v9240_v0  ;;  %v9854_v10 = vld [vmem:[#allocation5 + $0x870] sm:$0xf] }
  0xd5   :  { %2617 = vmatpush.bf16.msrb.mxu2 %v9235_v19  ;;  %v13324_v19 = vld [vmem:[#allocation5 + $0x5fc] sm:$0xf0]  ;;  %v2353_v30 = vpop.f32.mrf.mxu1  ;;  %v527_v11 = vperm.slane %v14618_v26, 2  ;;  %v13347_v63 = vld [vmem:[#allocation5 + $0x6b4] sm:$0xf0] }
  0xd6   :  { %2630 = vmatpush.bf16.msrb.mxu3 %v9939_v23  ;;  %v8792_v23 = vld [vmem:[#allocation5 + $0x80] sm:$0xf0]  ;;  %v9495_v35 = vor.u32 %v13324_v19, %v9494_v18  ;;  %v9151_v18 = vor.u32 %v13237_v7, %v9150_v4  ;;  %v9062_v19 = vld [vmem:[#allocation5 + $0x240] sm:$0xf] }
  0xd7   :  { %2592 = vmatpush.bf16.msrb.mxu0 %v9143_v29  ;;  %v10118_v29 = vld [vmem:[#allocation5 + $0xa80] sm:$0xf]  ;;  %v2366_v41 = vpop.f32.mrf.mxu2  ;;  %v9063_v37 = vor.u32 %v13215_v24, %v9062_v19  ;;  %v13160_v0 = vld [vmem:[#allocation5 + $0xe4] sm:$0xf] }
  0xd8   :  { %2605 = vmatpush.bf16.msrb.mxu1 %v9847_v31  ;;  %v8791_v31 = vor.u32 %v13148_v14, %v8790_v13  ;;  %v2379_v47 = vpop.f32.mrf.mxu3  ;;  %v13413_v13 = vld [vmem:[#allocation5 + $0x8c4] sm:$0xf0]  ;;  %v13226_v14 = vld [vmem:[#allocation5 + $0x2f4] sm:$0xf] }
  0xd9   :  { %2618 = vmatpush.bf16.msrb.mxu2 %v9147_v32  ;;  %v13479_v32 = vld [vmem:[#allocation5 + $0xad4] sm:$0xf0]  ;;  %v13193_v41 = vld [vmem:[#allocation5 + $0x1e4] sm:$0xf0]  ;;  %v8976_v47 = vld [vmem:[#allocation5 + $0x1e8] sm:$0xf0] }
  0xda   :  { %2631 = vmatpush.bf16.msrb.mxu3 %v9851_v36  ;;  %v8795_v36 = vor.u32 %v13137_v20, %v8792_v23  ;;  %v9155_v23 = vor.u32 %v13226_v14, %v9152_v15 }
  0xdb   :  { %2593 = vmatpush.bf16.msrb.mxu0 %v9055_v42  ;;  %v10119_v42 = vor.u32 %v13479_v32, %v10118_v29  ;;  %v9064_v32 = vld [vmem:[#allocation5 + $0x298] sm:$0xf0] }
  0xdc   :  { %2606 = vmatpush.bf16.msrb.mxu1 %v9759_v44  ;;  %v9326_v44 = vld [vmem:[#allocation5 + $0x450] sm:$0xf] }
  0xdd   :  { %2619 = vmatpush.bf16.msrb.mxu2 %v9059_v45  ;;  %v13281_v45 = vld [vmem:[#allocation5 + $0x4a4] sm:$0xf0] }
  0xde   :  { %2632 = vmatpush.bf16.msrb.mxu3 %v9763_v50  ;;  %v13270_v50 = vld [vmem:[#allocation5 + $0x454] sm:$0xf]  ;;  %v9327_v54 = vor.u32 %v13281_v45, %v9326_v44  ;;  %v13369_v45 = vld [vmem:[#allocation5 + $0x764] sm:$0xf0] }
  0xdf   :  { %2594 = vmatpush.bf16.msrb.mxu0 %v8967_v58  ;;  %v9331_v56 = vor.u32 %v13270_v50, %v9328_v51  ;;  %v13259_v58 = vld [vmem:[#allocation5 + $0x3f4] sm:$0xf0]  ;;  %v13358_v50 = vld [vmem:[#allocation5 + $0x714] sm:$0xf]  ;;  %v9680_v51 = vld [vmem:[#allocation5 + $0x768] sm:$0xf0] }
  0xe0   :  { %2607 = vmatpush.bf16.msrb.mxu1 %v9671_v60  ;;  %v9942_v60 = vld [vmem:[#allocation5 + $0x920] sm:$0xf]  ;;  %v9239_v3 = vor.u32 %v13259_v58, %v9238_v57  ;;  %v13171_v58 = vld [vmem:[#allocation5 + $0x134] sm:$0xf0] }
  0xe1   :  { %2620 = vmatpush.bf16.msrb.mxu2 %v8971_v61  ;;  %v10035_v61 = vor.u32 %v13446_v52, %v10032_v53  ;;  %v9943_v5 = vor.u32 %v13435_v62, %v9942_v60  ;;  %v8886_v57 = vld [vmem:[#allocation5 + $0xe0] sm:$0xf]  ;;  %v9683_v62 = vor.u32 %v13358_v50, %v9680_v51  ;;  %v9246_v50 = vld [vmem:[#allocation5 + $0x3a8] sm:$0xf] }
  0xe2   :  { %2633 = vmatpush.bf16.msrb.mxu3 %v9675_v1  ;;  %v13424_v1 = vld [vmem:[#allocation5 + $0x924] sm:$0xf]  ;;  %v9590_v60 = vld [vmem:[#allocation5 + $0x660] sm:$0xf]  ;;  %v8887_v4 = vor.u32 %v13171_v58, %v8886_v57  ;;  %v13425_v58 = vld [vmem:[#allocation5 + $0x92c] sm:$0xf] }
  0xe3   :  { %2595 = vmatpush.bf16.msrb.mxu0 %v8879_v12  ;;  %v9947_v12 = vor.u32 %v13424_v1, %v9944_v2  ;;  %v8888_v1 = vld [vmem:[#allocation5 + $0x138] sm:$0xf0]  ;;  %v13336_v2 = vld [vmem:[#allocation5 + $0x664] sm:$0xf]  ;;  %v9591_v7 = vor.u32 %v13347_v63, %v9590_v60  ;;  %v13260_v51 = vld [vmem:[#allocation5 + $0x3fc] sm:$0xf0] }
  0xe4   :  { %2608 = vmatpush.bf16.msrb.mxu1 %v9583_v16  ;;  %v13402_v16 = vld [vmem:[#allocation5 + $0x874] sm:$0xf]  ;;  %v9248_v57 = vld [vmem:[#allocation5 + $0x400] sm:$0xf0] }
  0xe5   :  { %2621 = vmatpush.bf16.msrb.mxu2 %v8883_v17  ;;  %v9856_v17 = vld [vmem:[#allocation5 + $0x8c8] sm:$0xf0]  ;;  %v9952_v60 = vld [vmem:[#allocation5 + $0x980] sm:$0xf0] }
  0xe6   :  { %2634 = vmatpush.bf16.msrb.mxu3 %v9587_v22  ;;  %v9855_v22 = vor.u32 %v13413_v13, %v9854_v10  ;;  %v9859_v30 = vor.u32 %v13402_v16, %v9856_v17  ;;  %v8891_v10 = vor.u32 %v13160_v0, %v8888_v1  ;;  %v13138_v13 = vld [vmem:[#allocation5 + $0x34] sm:$0xf]  ;;  %v8800_v16 = vld [vmem:[#allocation5 + $0x88] sm:$0xf0]  ;;  %v13238_v1 = vld [vmem:[#allocation5 + $0x34c] sm:$0xf0] }
  0xe7   :  { %2596 = vmatpush.bf16.msrb.mxu0 %v8791_v31  ;;  %v2390_v20 = vpop.f32.mrf.mxu0  ;;  %v13204_v31 = vld [vmem:[#allocation5 + $0x244] sm:$0xf]  ;;  %v13314_v17 = vld [vmem:[#allocation5 + $0x5b4] sm:$0xf] }
  0xe8   :  { %2609 = vmatpush.bf16.msrb.mxu1 %v9495_v35  ;;  %v2391_v28 = vadd.f32 %v2390_v20, %v527_v11  ;;  %v2403_v29 = vpop.f32.mrf.mxu1  ;;  %v9768_v35 = vld [vmem:[#allocation5 + $0x818] sm:$0xf0]  ;;  %v9502_v11 = vld [vmem:[#allocation5 + $0x5b0] sm:$0xf]  ;;  %v9422_v20 = vld [vmem:[#allocation5 + $0x508] sm:$0xf] }
  0xe9   :  { %2622 = vmatpush.bf16.msrb.mxu2 %v8795_v36  ;;  %v9771_v44 = vor.u32 %v13380_v34, %v9768_v35 }
  0xea   :  { %2635 = vmatpush.bf16.msrb.mxu3 %v9499_v39  ;;  %2597 = vmatmul.bf16.vlgmr.msrb.gmra.mxu0 %v14594_v8  ;;  %v14632_v36 = vadd.f32 %v2403_v29, %v2391_v28  ;;  %v9067_v39 = vor.u32 %v13204_v31, %v9064_v32  ;;  %v9424_v28 = vld [vmem:[#allocation5 + $0x560] sm:$0xf0]  ;;  %v13469_v31 = vld [vmem:[#allocation5 + $0xa8c] sm:$0xf] }
  0xeb   :  { %2641 = vmatpush.bf16.msra.mxu0 %v9415_v40  ;;  %2610 = vmatmul.bf16.vlgmr.msrb.gmra.mxu1 %v14596_v9  ;;  %v8974_v40 = vld [vmem:[#allocation5 + $0x190] sm:$0xf]  ;;  %v10128_v32 = vld [vmem:[#allocation5 + $0xae0] sm:$0xf0] }
  0xec   :  { %2654 = vmatpush.bf16.msra.mxu1 %v10119_v42  ;;  %2623 = vmatmul.bf16.vlgmr.msrb.gmra.mxu2 %v14594_v8  ;;  %v9678_v42 = vld [vmem:[#allocation5 + $0x710] sm:$0xf]  ;;  %v8975_v52 = vor.u32 %v13193_v41, %v8974_v40  ;;  %v10038_v40 = vld [vmem:[#allocation5 + $0x9d8] sm:$0xf]  ;;  %v10131_v41 = vor.u32 %v13469_v31, %v10128_v32 }
  0xed   :  { %2667 = vmatpush.bf16.msra.mxu2 %v9419_v43  ;;  %2636 = vmatmul.bf16.vlgmr.msrb.gmra.mxu3 %v14596_v9 }
  0xee   :  { %2680 = vmatpush.bf16.msra.mxu3 %v10123_v48 }
  0xef   :  { %2642 = vmatpush.bf16.msra.mxu0 %v9327_v54  ;;  %v2416_v43 = vpop.f32.mrf.mxu2  ;;  %v2392_v54 = vpop.f32.mrf.mxu0 }
  0xf0   :  { %2655 = vmatpush.bf16.msra.mxu1 %v10031_v55  ;;  %v2417_v48 = vadd.f32 %v2416_v43, %v528_v33  ;;  %v2429_v49 = vpop.f32.mrf.mxu3  ;;  %v9679_v55 = vor.u32 %v13369_v45, %v9678_v42  ;;  %v13458_v42 = vld [vmem:[#allocation5 + $0xa2c] sm:$0xf0]  ;;  %v13271_v43 = vld [vmem:[#allocation5 + $0x45c] sm:$0xf] }
  0xf1   :  { %2668 = vmatpush.bf16.msra.mxu2 %v9331_v56  ;;  %v8979_v56 = vor.u32 %v13182_v46, %v8976_v47  ;;  %v13447_v45 = vld [vmem:[#allocation5 + $0x9dc] sm:$0xf]  ;;  %v10040_v46 = vld [vmem:[#allocation5 + $0xa30] sm:$0xf0] }
  0xf2   :  { %2681 = vmatpush.bf16.msra.mxu3 %v10035_v61  ;;  %v14634_v53 = vadd.f32 %v2429_v49, %v2417_v48  ;;  %v2405_v61 = vpop.f32.mrf.mxu1  ;;  %v10039_v48 = vor.u32 %v13458_v42, %v10038_v40  ;;  %v10043_v54 = vor.u32 %v13447_v45, %v10040_v46  ;;  %v13370_v40 = vld [vmem:[#allocation5 + $0x76c] sm:$0xf0]  ;;  %v8984_v42 = vld [vmem:[#allocation5 + $0x1f0] sm:$0xf0]  ;;  %v13359_v45 = vld [vmem:[#allocation5 + $0x71c] sm:$0xf] }
  0xf3   :  { %2643 = vmatpush.bf16.msra.mxu0 %v9239_v3  ;;  %v9592_v3 = vld [vmem:[#allocation5 + $0x6b8] sm:$0xf0]  ;;  %v9247_v61 = vor.u32 %v13260_v51, %v9246_v50  ;;  %v9688_v46 = vld [vmem:[#allocation5 + $0x770] sm:$0xf0] }
  0xf4   :  { %2656 = vmatpush.bf16.msra.mxu1 %v9943_v5  ;;  %v8798_v5 = vld [vmem:[#allocation5 + $0x30] sm:$0xf]  ;;  %v9595_v15 = vor.u32 %v13336_v2, %v9592_v3  ;;  %v9862_v2 = vld [vmem:[#allocation5 + $0x878] sm:$0xf]  ;;  %v529_v3 = vperm.slane %v14618_v26, 4 }
  0xf5   :  { %2669 = vmatpush.bf16.msra.mxu2 %v9243_v6  ;;  %v13149_v6 = vld [vmem:[#allocation5 + $0x84] sm:$0xf0] }
  0xf6   :  { %2682 = vmatpush.bf16.msra.mxu3 %v9947_v12  ;;  %v13325_v12 = vld [vmem:[#allocation5 + $0x604] sm:$0xf0]  ;;  %v8799_v24 = vor.u32 %v13149_v6, %v8798_v5  ;;  %v13414_v5 = vld [vmem:[#allocation5 + $0x8cc] sm:$0xf0]  ;;  %v13227_v6 = vld [vmem:[#allocation5 + $0x2fc] sm:$0xf] }
  0xf7   :  { %2644 = vmatpush.bf16.msra.mxu0 %v9151_v18  ;;  %v2418_v14 = vpop.f32.mrf.mxu2  ;;  %v9504_v18 = vld [vmem:[#allocation5 + $0x608] sm:$0xf0]  ;;  %v9503_v29 = vor.u32 %v13325_v12, %v9502_v11  ;;  %v9864_v11 = vld [vmem:[#allocation5 + $0x8d0] sm:$0xf0] }
  0xf8   :  { %2657 = vmatpush.bf16.msra.mxu1 %v9855_v22  ;;  %v2431_v19 = vpop.f32.mrf.mxu3  ;;  %v13304_v22 = vld [vmem:[#allocation5 + $0x55c] sm:$0xf0]  ;;  %v9507_v33 = vor.u32 %v13314_v17, %v9504_v18  ;;  %v9774_v18 = vld [vmem:[#allocation5 + $0x7c8] sm:$0xf] }
  0xf9   :  { %2670 = vmatpush.bf16.msra.mxu2 %v9155_v23  ;;  %v10126_v23 = vld [vmem:[#allocation5 + $0xa88] sm:$0xf]  ;;  %v9423_v34 = vor.u32 %v13304_v22, %v9422_v20  ;;  %v13216_v17 = vld [vmem:[#allocation5 + $0x29c] sm:$0xf0] }
  0xfa   :  { %2683 = vmatpush.bf16.msra.mxu3 %v9859_v30  ;;  %v8803_v30 = vor.u32 %v13138_v13, %v8800_v16  ;;  %v10127_v35 = vor.u32 %v13480_v25, %v10126_v23  ;;  %v9070_v13 = vld [vmem:[#allocation5 + $0x248] sm:$0xf]  ;;  %v13392_v19 = vld [vmem:[#allocation5 + $0x81c] sm:$0xf0]  ;;  %v9072_v25 = vld [vmem:[#allocation5 + $0x2a0] sm:$0xf0] }
  0xfb   :  { %2645 = vmatpush.bf16.msra.mxu0 %v9063_v37  ;;  %v9427_v37 = vor.u32 %v13293_v27, %v9424_v28  ;;  %v530_v27 = vperm.slane %v14618_v26, 5  ;;  %v13381_v28 = vld [vmem:[#allocation5 + $0x7cc] sm:$0xf]  ;;  %v9071_v31 = vor.u32 %v13216_v17, %v9070_v13  ;;  %v9775_v32 = vor.u32 %v13392_v19, %v9774_v18  ;;  %v13315_v13 = vld [vmem:[#allocation5 + $0x5bc] sm:$0xf] }
  0xfc   :  { %2658 = vmatpush.bf16.msra.mxu1 %v9767_v38  ;;  %v9334_v38 = vld [vmem:[#allocation5 + $0x458] sm:$0xf]  ;;  %v13305_v17 = vld [vmem:[#allocation5 + $0x564] sm:$0xf0]  ;;  %v10134_v18 = vld [vmem:[#allocation5 + $0xa90] sm:$0xf] }
  0xfd   :  { %2671 = vmatpush.bf16.msra.mxu2 %v9067_v39  ;;  %v13282_v39 = vld [vmem:[#allocation5 + $0x4ac] sm:$0xf0] }
  0xfe   :  { %2684 = vmatpush.bf16.msra.mxu3 %v9771_v44  ;;  %v9336_v44 = vld [vmem:[#allocation5 + $0x4b0] sm:$0xf0]  ;;  %v9335_v47 = vor.u32 %v13282_v39, %v9334_v38 }
  0xff   :  { %2646 = vmatpush.bf16.msra.mxu0 %v8975_v52  ;;  %v9339_v49 = vor.u32 %v13271_v43, %v9336_v44  ;;  %v9950_v52 = vld [vmem:[#allocation5 + $0x928] sm:$0xf] }
 0x100   :  { %2659 = vmatpush.bf16.msra.mxu1 %v9679_v55  ;;  %v13436_v55 = vld [vmem:[#allocation5 + $0x97c] sm:$0xf0] }
 0x101   :  { %2672 = vmatpush.bf16.msra.mxu2 %v8979_v56  ;;  %v13249_v56 = vld [vmem:[#allocation5 + $0x3ac] sm:$0xf]  ;;  %v9951_v63 = vor.u32 %v13436_v55, %v9950_v52  ;;  %v8894_v52 = vld [vmem:[#allocation5 + $0xe8] sm:$0xf] }
 0x102   :  { %2685 = vmatpush.bf16.msra.mxu3 %v9683_v62  ;;  %v9158_v62 = vld [vmem:[#allocation5 + $0x2f8] sm:$0xf]  ;;  %v9251_v0 = vor.u32 %v13249_v56, %v9248_v57  ;;  %v9598_v55 = vld [vmem:[#allocation5 + $0x668] sm:$0xf]  ;;  %v9691_v57 = vor.u32 %v13359_v45, %v9688_v46 }
 0x103   :  { %2647 = vmatpush.bf16.msra.mxu0 %v8887_v4  ;;  %v9955_v4 = vor.u32 %v13425_v58, %v9952_v60  ;;  %v9159_v12 = vor.u32 %v13238_v1, %v9158_v62  ;;  %v13348_v58 = vld [vmem:[#allocation5 + $0x6bc] sm:$0xf0]  ;;  %v13161_v60 = vld [vmem:[#allocation5 + $0xec] sm:$0xf]  ;;  %v8806_v1 = vld [vmem:[#allocation5 + $0x38] sm:$0xf] }
 0x104   :  { %2660 = vmatpush.bf16.msra.mxu1 %v9591_v7  ;;  %v9160_v7 = vld [vmem:[#allocation5 + $0x350] sm:$0xf0]  ;;  %v13337_v62 = vld [vmem:[#allocation5 + $0x66c] sm:$0xf] }
 0x105   :  { %2673 = vmatpush.bf16.msra.mxu2 %v8891_v10  ;;  %v13403_v10 = vld [vmem:[#allocation5 + $0x87c] sm:$0xf]  ;;  %v9163_v16 = vor.u32 %v13227_v6, %v9160_v7  ;;  %v13326_v6 = vld [vmem:[#allocation5 + $0x60c] sm:$0xf0] }
 0x106   :  { %2686 = vmatpush.bf16.msra.mxu3 %v9595_v15  ;;  %v9863_v15 = vor.u32 %v13414_v5, %v9862_v2  ;;  %v9867_v23 = vor.u32 %v13403_v10, %v9864_v11  ;;  %v13150_v2 = vld [vmem:[#allocation5 + $0x8c] sm:$0xf0]  ;;  %v9510_v5 = vld [vmem:[#allocation5 + $0x5b8] sm:$0xf]  ;;  %v13139_v7 = vld [vmem:[#allocation5 + $0x3c] sm:$0xf] }
 0x107   :  { %2648 = vmatpush.bf16.msra.mxu0 %v8799_v24  ;;  %v2442_v14 = vpop.f32.mrf.mxu0  ;;  %v13205_v24 = vld [vmem:[#allocation5 + $0x24c] sm:$0xf]  ;;  %v8807_v19 = vor.u32 %v13150_v2, %v8806_v1  ;;  %v531_v1 = vperm.slane %v14618_v26, 6 }
 0x108   :  { %2661 = vmatpush.bf16.msra.mxu1 %v9503_v29  ;;  %v2443_v20 = vadd.f32 %v2442_v14, %v529_v3  ;;  %v2455_v22 = vpop.f32.mrf.mxu1  ;;  %v9776_v29 = vld [vmem:[#allocation5 + $0x820] sm:$0xf0]  ;;  %v9599_v3 = vor.u32 %v13348_v58, %v9598_v55  ;;  %v9512_v14 = vld [vmem:[#allocation5 + $0x610] sm:$0xf0]  ;;  %v9256_v55 = vld [vmem:[#allocation5 + $0x408] sm:$0xf0] }
 0x109   :  { %2674 = vmatpush.bf16.msra.mxu2 %v8803_v30  ;;  %v9779_v39 = vor.u32 %v13381_v28, %v9776_v29  ;;  %v10136_v28 = vld [vmem:[#allocation5 + $0xae8] sm:$0xf0]  ;;  %v9515_v29 = vor.u32 %v13315_v13, %v9512_v14 }
 0x10a   :  { %2687 = vmatpush.bf16.msra.mxu3 %v9507_v33  ;;  %2649 = vmatmul.bf16.vlgmr.msra.gmra.mxu0 %v14594_v8  ;;  %v14642_v30 = vadd.f32 %v2455_v22, %v2443_v20  ;;  %v9075_v33 = vor.u32 %v13205_v24, %v9072_v25  ;;  %v13481_v20 = vld [vmem:[#allocation5 + $0xae4] sm:$0xf0]  ;;  %v13294_v22 = vld [vmem:[#allocation5 + $0x514] sm:$0xf]  ;;  %v9511_v24 = vor.u32 %v13326_v6, %v9510_v5  ;;  %v9168_v5 = vld [vmem:[#allocation5 + $0x358] sm:$0xf0] }
 0x10b   :  { %2693 = vmatpush.bf16.msrb.mxu0 %v9423_v34  ;;  %2662 = vmatmul.bf16.vlgmr.msra.gmra.mxu1 %v14596_v9  ;;  %v8982_v34 = vld [vmem:[#allocation5 + $0x198] sm:$0xf]  ;;  %v13404_v6 = vld [vmem:[#allocation5 + $0x884] sm:$0xf] }
 0x10c   :  { %2706 = vmatpush.bf16.msrb.mxu1 %v10127_v35  ;;  %2675 = vmatmul.bf16.vlgmr.msra.gmra.mxu2 %v14594_v8  ;;  %v13194_v35 = vld [vmem:[#allocation5 + $0x1ec] sm:$0xf0] }
 0x10d   :  { %2719 = vmatpush.bf16.msrb.mxu2 %v9427_v37  ;;  %2688 = vmatmul.bf16.vlgmr.msra.gmra.mxu3 %v14596_v9  ;;  %v9686_v37 = vld [vmem:[#allocation5 + $0x718] sm:$0xf] }
 0x10e   :  { %2732 = vmatpush.bf16.msrb.mxu3 %v10131_v41  ;;  %v13183_v41 = vld [vmem:[#allocation5 + $0x19c] sm:$0xf]  ;;  %v9687_v50 = vor.u32 %v13370_v40, %v9686_v37  ;;  %v10046_v37 = vld [vmem:[#allocation5 + $0x9e0] sm:$0xf]  ;;  %v13272_v40 = vld [vmem:[#allocation5 + $0x464] sm:$0xf] }
 0x10f   :  { %2694 = vmatpush.bf16.msrb.mxu0 %v9335_v47  ;;  %v2468_v38 = vpop.f32.mrf.mxu2  ;;  %v8983_v47 = vor.u32 %v13194_v35, %v8982_v34  ;;  %v8987_v51 = vor.u32 %v13183_v41, %v8984_v42  ;;  %v9342_v34 = vld [vmem:[#allocation5 + $0x460] sm:$0xf]  ;;  %v13283_v35 = vld [vmem:[#allocation5 + $0x4b4] sm:$0xf0]  ;;  %v9344_v41 = vld [vmem:[#allocation5 + $0x4b8] sm:$0xf0] }
 0x110   :  { %2707 = vmatpush.bf16.msrb.mxu1 %v10039_v48  ;;  %v2469_v43 = vadd.f32 %v2468_v38, %v530_v27  ;;  %v2481_v44 = vpop.f32.mrf.mxu3  ;;  %v2457_v56 = vpop.f32.mrf.mxu1  ;;  %v13470_v27 = vld [vmem:[#allocation5 + $0xa94] sm:$0xf]  ;;  %v13448_v42 = vld [vmem:[#allocation5 + $0x9e4] sm:$0xf]  ;;  %v9347_v46 = vor.u32 %v13272_v40, %v9344_v41  ;;  %v8992_v41 = vld [vmem:[#allocation5 + $0x1f8] sm:$0xf0] }
 0x111   :  { %2720 = vmatpush.bf16.msrb.mxu2 %v9339_v49  ;;  %v2444_v49 = vpop.f32.mrf.mxu0  ;;  %v10139_v38 = vor.u32 %v13470_v27, %v10136_v28  ;;  %v13426_v56 = vld [vmem:[#allocation5 + $0x934] sm:$0xf]  ;;  %v9784_v27 = vld [vmem:[#allocation5 + $0x828] sm:$0xf0]  ;;  %v13184_v40 = vld [vmem:[#allocation5 + $0x1a4] sm:$0xf] }
 0x112   :  { %2733 = vmatpush.bf16.msrb.mxu3 %v10043_v54  ;;  %v14644_v48 = vadd.f32 %v2481_v44, %v2469_v43  ;;  %v13172_v54 = vld [vmem:[#allocation5 + $0x13c] sm:$0xf0]  ;;  %v10048_v43 = vld [vmem:[#allocation5 + $0xa38] sm:$0xf0]  ;;  %v9343_v44 = vor.u32 %v13283_v35, %v9342_v34  ;;  %v13261_v49 = vld [vmem:[#allocation5 + $0x404] sm:$0xf0] }
 0x113   :  { %2695 = vmatpush.bf16.msrb.mxu0 %v9247_v61  ;;  %v8896_v61 = vld [vmem:[#allocation5 + $0x140] sm:$0xf0]  ;;  %v13195_v34 = vld [vmem:[#allocation5 + $0x1f4] sm:$0xf0]  ;;  %v9694_v35 = vld [vmem:[#allocation5 + $0x720] sm:$0xf] }
 0x114   :  { %2708 = vmatpush.bf16.msrb.mxu1 %v9951_v63  ;;  %v9600_v63 = vld [vmem:[#allocation5 + $0x6c0] sm:$0xf0] }
 0x115   :  { %2721 = vmatpush.bf16.msrb.mxu2 %v9251_v0  ;;  %v8895_v0 = vor.u32 %v13172_v54, %v8894_v52  ;;  %v9603_v11 = vor.u32 %v13337_v62, %v9600_v63  ;;  %v13437_v52 = vld [vmem:[#allocation5 + $0x984] sm:$0xf0]  ;;  %v13250_v54 = vld [vmem:[#allocation5 + $0x3b4] sm:$0xf]  ;;  %v13239_v63 = vld [vmem:[#allocation5 + $0x354] sm:$0xf0] }
 0x116   :  { %2734 = vmatpush.bf16.msrb.mxu3 %v9955_v4  ;;  %v8899_v4 = vor.u32 %v13161_v60, %v8896_v61  ;;  %v9166_v60 = vld [vmem:[#allocation5 + $0x300] sm:$0xf]  ;;  %v9259_v62 = vor.u32 %v13250_v54, %v9256_v55  ;;  %v9606_v54 = vld [vmem:[#allocation5 + $0x670] sm:$0xf] }
 0x117   :  { %2696 = vmatpush.bf16.msrb.mxu0 %v9159_v12  ;;  %v2470_v10 = vpop.f32.mrf.mxu2  ;;  %v8808_v12 = vld [vmem:[#allocation5 + $0x90] sm:$0xf0] }
 0x118   :  { %2709 = vmatpush.bf16.msrb.mxu1 %v9863_v15  ;;  %v2483_v15 = vpop.f32.mrf.mxu3  ;;  %v8811_v25 = vor.u32 %v13139_v7, %v8808_v12  ;;  %v9872_v7 = vld [vmem:[#allocation5 + $0x8d8] sm:$0xf0]  ;;  %v9167_v10 = vor.u32 %v13239_v63, %v9166_v60  ;;  %v8904_v60 = vld [vmem:[#allocation5 + $0x148] sm:$0xf0] }
 0x119   :  { %2722 = vmatpush.bf16.msrb.mxu2 %v9163_v16  ;;  %v9430_v16 = vld [vmem:[#allocation5 + $0x510] sm:$0xf]  ;;  %v13217_v15 = vld [vmem:[#allocation5 + $0x2a4] sm:$0xf0] }
 0x11a   :  { %2735 = vmatpush.bf16.msrb.mxu3 %v9867_v23  ;;  %v9432_v23 = vld [vmem:[#allocation5 + $0x568] sm:$0xf0] }
 0x11b   :  { %2697 = vmatpush.bf16.msrb.mxu0 %v9071_v31  ;;  %v9431_v31 = vor.u32 %v13305_v17, %v9430_v16  ;;  %v9782_v16 = vld [vmem:[#allocation5 + $0x7d0] sm:$0xf]  ;;  %v13393_v17 = vld [vmem:[#allocation5 + $0x824] sm:$0xf0] }
 0x11c   :  { %2710 = vmatpush.bf16.msrb.mxu1 %v9775_v32  ;;  %v10135_v32 = vor.u32 %v13481_v20, %v10134_v18  ;;  %v9875_v20 = vor.u32 %v13404_v6, %v9872_v7  ;;  %v13140_v6 = vld [vmem:[#allocation5 + $0x44] sm:$0xf] }
 0x11d   :  { %2723 = vmatpush.bf16.msrb.mxu2 %v9075_v33  ;;  %v9435_v33 = vor.u32 %v13294_v22, %v9432_v23  ;;  %v13206_v22 = vld [vmem:[#allocation5 + $0x254] sm:$0xf]  ;;  %v9080_v23 = vld [vmem:[#allocation5 + $0x2a8] sm:$0xf0] }
 0x11e   :  { %2736 = vmatpush.bf16.msrb.mxu3 %v9779_v39  ;;  %v13459_v39 = vld [vmem:[#allocation5 + $0xa34] sm:$0xf0] }
 0x11f   :  { %2698 = vmatpush.bf16.msrb.mxu0 %v8983_v47  ;;  %v10047_v45 = vor.u32 %v13459_v39, %v10046_v37  ;;  %v9254_v47 = vld [vmem:[#allocation5 + $0x3b0] sm:$0xf]  ;;  %v13371_v39 = vld [vmem:[#allocation5 + $0x774] sm:$0xf0] }
 0x120   :  { %2711 = vmatpush.bf16.msrb.mxu1 %v9687_v50  ;;  %v9958_v50 = vld [vmem:[#allocation5 + $0x930] sm:$0xf]  ;;  %v9255_v58 = vor.u32 %v13261_v49, %v9254_v47  ;;  %v9695_v49 = vor.u32 %v13371_v39, %v9694_v35  ;;  %v13284_v35 = vld [vmem:[#allocation5 + $0x4bc] sm:$0xf0] }
 0x121   :  { %2724 = vmatpush.bf16.msrb.mxu2 %v8987_v51  ;;  %v10051_v51 = vor.u32 %v13448_v42, %v10048_v43  ;;  %v9959_v61 = vor.u32 %v13437_v52, %v9958_v50  ;;  %v13360_v43 = vld [vmem:[#allocation5 + $0x724] sm:$0xf]  ;;  %v8995_v50 = vor.u32 %v13184_v40, %v8992_v41  ;;  %v13173_v52 = vld [vmem:[#allocation5 + $0x144] sm:$0xf0]  ;;  %v13460_v39 = vld [vmem:[#allocation5 + $0xa3c] sm:$0xf0] }
 0x122   :  { %2737 = vmatpush.bf16.msrb.mxu3 %v9691_v57  ;;  %v9960_v57 = vld [vmem:[#allocation5 + $0x988] sm:$0xf0]  ;;  %v9352_v41 = vld [vmem:[#allocation5 + $0x4c0] sm:$0xf0] }
 0x123   :  { %2699 = vmatpush.bf16.msrb.mxu0 %v8895_v0  ;;  %v9870_v0 = vld [vmem:[#allocation5 + $0x880] sm:$0xf]  ;;  %v9963_v2 = vor.u32 %v13426_v56, %v9960_v57  ;;  %v13349_v57 = vld [vmem:[#allocation5 + $0x6c4] sm:$0xf0]  ;;  %v13273_v40 = vld [vmem:[#allocation5 + $0x46c] sm:$0xf] }
 0x124   :  { %2712 = vmatpush.bf16.msrb.mxu1 %v9599_v3  ;;  %v13415_v3 = vld [vmem:[#allocation5 + $0x8d4] sm:$0xf0] }
 0x125   :  { %2725 = vmatpush.bf16.msrb.mxu2 %v8899_v4  ;;  %v13228_v4 = vld [vmem:[#allocation5 + $0x304] sm:$0xf]  ;;  %v9871_v13 = vor.u32 %v13415_v3, %v9870_v0  ;;  %v8814_v0 = vld [vmem:[#allocation5 + $0x40] sm:$0xf] }
 0x126   :  { %2738 = vmatpush.bf16.msrb.mxu3 %v9603_v11  ;;  %v9078_v11 = vld [vmem:[#allocation5 + $0x250] sm:$0xf]  ;;  %v9171_v14 = vor.u32 %v13228_v4, %v9168_v5  ;;  %v9518_v4 = vld [vmem:[#allocation5 + $0x5c0] sm:$0xf]  ;;  %v13327_v5 = vld [vmem:[#allocation5 + $0x614] sm:$0xf0] }
 0x127   :  { %2700 = vmatpush.bf16.msrb.mxu0 %v8807_v19  ;;  %v2494_v12 = vpop.f32.mrf.mxu0 }
 0x128   :  { %2713 = vmatpush.bf16.msrb.mxu1 %v9511_v24  ;;  %v2495_v18 = vadd.f32 %v2494_v12, %v531_v1  ;;  %v2507_v19 = vpop.f32.mrf.mxu1  ;;  %v532_v24 = vperm.slane %v14618_v26, 7  ;;  %v13151_v1 = vld [vmem:[#allocation5 + $0x94] sm:$0xf0]  ;;  %v13316_v12 = vld [vmem:[#allocation5 + $0x5c4] sm:$0xf] }
 0x129   :  { %2726 = vmatpush.bf16.msrb.mxu2 %v8811_v25  ;;  %v13382_v25 = vld [vmem:[#allocation5 + $0x7d4] sm:$0xf] }
 0x12a   :  { %2739 = vmatpush.bf16.msrb.mxu3 %v9515_v29  ;;  %2701 = vmatmul.bf16.vlgmr.msrb.gmra.mxu0 %v14594_v8  ;;  %v14652_v28 = vadd.f32 %v2507_v19, %v2495_v18  ;;  %v9079_v29 = vor.u32 %v13217_v15, %v9078_v11  ;;  %v8816_v11 = vld [vmem:[#allocation5 + $0x98] sm:$0xf0]  ;;  %v9438_v15 = vld [vmem:[#allocation5 + $0x518] sm:$0xf]  ;;  %v8815_v18 = vor.u32 %v13151_v1, %v8814_v0  ;;  %v13482_v19 = vld [vmem:[#allocation5 + $0xaec] sm:$0xf0] }
 0x12b   :  { %2745 = vmatpush.bf16.msra.mxu0 %v9431_v31  ;;  %2714 = vmatmul.bf16.vlgmr.msrb.gmra.mxu1 %v14596_v9  ;;  %v9783_v31 = vor.u32 %v13393_v17, %v9782_v16  ;;  %v13306_v16 = vld [vmem:[#allocation5 + $0x56c] sm:$0xf0]  ;;  %v10142_v17 = vld [vmem:[#allocation5 + $0xa98] sm:$0xf]  ;;  %v13240_v0 = vld [vmem:[#allocation5 + $0x35c] sm:$0xf0] }
 0x12c   :  { %2758 = vmatpush.bf16.msra.mxu1 %v10135_v32  ;;  %2727 = vmatmul.bf16.vlgmr.msrb.gmra.mxu2 %v14594_v8  ;;  %v9083_v32 = vor.u32 %v13206_v22, %v9080_v23  ;;  %v9440_v22 = vld [vmem:[#allocation5 + $0x570] sm:$0xf0]  ;;  %v9519_v23 = vor.u32 %v13327_v5, %v9518_v4  ;;  %v9878_v1 = vld [vmem:[#allocation5 + $0x888] sm:$0xf]  ;;  %v13416_v4 = vld [vmem:[#allocation5 + $0x8dc] sm:$0xf0] }
 0x12d   :  { %2771 = vmatpush.bf16.msra.mxu2 %v9435_v33  ;;  %2740 = vmatmul.bf16.vlgmr.msrb.gmra.mxu3 %v14596_v9  ;;  %v8990_v33 = vld [vmem:[#allocation5 + $0x1a0] sm:$0xf]  ;;  %v13229_v5 = vld [vmem:[#allocation5 + $0x30c] sm:$0xf] }
 0x12e   :  { %2784 = vmatpush.bf16.msra.mxu3 %v10139_v38  ;;  %v9787_v38 = vor.u32 %v13382_v25, %v9784_v27  ;;  %v13471_v25 = vld [vmem:[#allocation5 + $0xa9c] sm:$0xf]  ;;  %v10144_v27 = vld [vmem:[#allocation5 + $0xaf0] sm:$0xf0] }
 0x12f   :  { %2746 = vmatpush.bf16.msra.mxu0 %v9343_v44  ;;  %v2520_v37 = vpop.f32.mrf.mxu2  ;;  %v9696_v44 = vld [vmem:[#allocation5 + $0x778] sm:$0xf0]  ;;  %v2496_v47 = vpop.f32.mrf.mxu0 }
 0x130   :  { %2759 = vmatpush.bf16.msra.mxu1 %v10047_v45  ;;  %v2521_v26 = vadd.f32 %v2520_v37, %v532_v24  ;;  %v2533_v42 = vpop.f32.mrf.mxu3  ;;  %v8991_v45 = vor.u32 %v13195_v34, %v8990_v33  ;;  %v2509_v55 = vpop.f32.mrf.mxu1  ;;  %v9699_v56 = vor.u32 %v13360_v43, %v9696_v44  ;;  %v8819_v24 = vor.u32 %v13140_v6, %v8816_v11  ;;  %v9350_v34 = vld [vmem:[#allocation5 + $0x468] sm:$0xf]  ;;  %v9262_v44 = vld [vmem:[#allocation5 + $0x3b8] sm:$0xf]  ;;  %v9176_v6 = vld [vmem:[#allocation5 + $0x360] sm:$0xf0] }
 0x131   :  { %2772 = vmatpush.bf16.msra.mxu2 %v9347_v46  ;;  %v10054_v37 = vld [vmem:[#allocation5 + $0x9e8] sm:$0xf]  ;;  %v9351_v43 = vor.u32 %v13284_v35, %v9350_v34  ;;  %v9355_v47 = vor.u32 %v13273_v40, %v9352_v41  ;;  %v9264_v55 = vld [vmem:[#allocation5 + $0x410] sm:$0xf0]  ;;  %v13372_v41 = vld [vmem:[#allocation5 + $0x77c] sm:$0xf0] }
 0x132   :  { %2785 = vmatpush.bf16.msra.mxu3 %v10051_v51  ;;  %v14654_v46 = vadd.f32 %v2533_v42, %v2521_v26  ;;  %v8902_v51 = vld [vmem:[#allocation5 + $0xf0] sm:$0xf]  ;;  %v13449_v26 = vld [vmem:[#allocation5 + $0x9ec] sm:$0xf]  ;;  %v10056_v42 = vld [vmem:[#allocation5 + $0xa40] sm:$0xf0] }
 0x133   :  { %2747 = vmatpush.bf16.msra.mxu0 %v9255_v58  ;;  %v13162_v58 = vld [vmem:[#allocation5 + $0xf4] sm:$0xf]  ;;  %v8903_v63 = vor.u32 %v13173_v52, %v8902_v51  ;;  %v13438_v51 = vld [vmem:[#allocation5 + $0x98c] sm:$0xf0]  ;;  %v10059_v52 = vor.u32 %v13449_v26, %v10056_v42  ;;  %v8998_v35 = vld [vmem:[#allocation5 + $0x1a8] sm:$0xf] }
 0x134   :  { %2760 = vmatpush.bf16.msra.mxu1 %v9959_v61  ;;  %v13338_v61 = vld [vmem:[#allocation5 + $0x674] sm:$0xf]  ;;  %v8907_v3 = vor.u32 %v13162_v58, %v8904_v60  ;;  %v13185_v26 = vld [vmem:[#allocation5 + $0x1ac] sm:$0xf]  ;;  %v9000_v42 = vld [vmem:[#allocation5 + $0x200] sm:$0xf0] }
 0x135   :  { %2773 = vmatpush.bf16.msra.mxu2 %v9259_v62  ;;  %v9608_v62 = vld [vmem:[#allocation5 + $0x6c8] sm:$0xf0]  ;;  %v9968_v58 = vld [vmem:[#allocation5 + $0x990] sm:$0xf0] }
 0x136   :  { %2786 = vmatpush.bf16.msra.mxu3 %v9963_v2  ;;  %v9607_v2 = vor.u32 %v13349_v57, %v9606_v54  ;;  %v13251_v54 = vld [vmem:[#allocation5 + $0x3bc] sm:$0xf] }
 0x137   :  { %2748 = vmatpush.bf16.msra.mxu0 %v9167_v10  ;;  %v2522_v7 = vpop.f32.mrf.mxu2  ;;  %v9611_v10 = vor.u32 %v13338_v61, %v9608_v62  ;;  %v13427_v57 = vld [vmem:[#allocation5 + $0x93c] sm:$0xf]  ;;  %v9174_v61 = vld [vmem:[#allocation5 + $0x308] sm:$0xf] }
 0x138   :  { %2761 = vmatpush.bf16.msra.mxu1 %v9871_v13  ;;  %v9520_v13 = vld [vmem:[#allocation5 + $0x618] sm:$0xf0]  ;;  %v13405_v7 = vld [vmem:[#allocation5 + $0x88c] sm:$0xf]  ;;  %v9175_v11 = vor.u32 %v13240_v0, %v9174_v61  ;;  %v8912_v0 = vld [vmem:[#allocation5 + $0x150] sm:$0xf0] }
 0x139   :  { %2774 = vmatpush.bf16.msra.mxu2 %v9171_v14  ;;  %v2535_v14 = vpop.f32.mrf.mxu3 }
 0x13a   :  { %2787 = vmatpush.bf16.msra.mxu3 %v9875_v20  ;;  %v13295_v20 = vld [vmem:[#allocation5 + $0x51c] sm:$0xf]  ;;  %v9879_v14 = vor.u32 %v13416_v4, %v9878_v1  ;;  %v8822_v4 = vld [vmem:[#allocation5 + $0x48] sm:$0xf] }
 0x13b   :  { %2749 = vmatpush.bf16.msra.mxu0 %v9079_v29  ;;  %v9523_v29 = vor.u32 %v13316_v12, %v9520_v13  ;;  %v9443_v33 = vor.u32 %v13295_v20, %v9440_v22  ;;  %v9086_v12 = vld [vmem:[#allocation5 + $0x258] sm:$0xf]  ;;  %v13339_v1 = vld [vmem:[#allocation5 + $0x67c] sm:$0xf] }
 0x13c   :  { %2762 = vmatpush.bf16.msra.mxu1 %v9783_v31  ;;  %v9439_v31 = vor.u32 %v13306_v16, %v9438_v15  ;;  %v9179_v15 = vor.u32 %v13229_v5, %v9176_v6  ;;  %v13218_v16 = vld [vmem:[#allocation5 + $0x2ac] sm:$0xf0]  ;;  %v13152_v5 = vld [vmem:[#allocation5 + $0x9c] sm:$0xf0] }
 0x13d   :  { %2775 = vmatpush.bf16.msra.mxu2 %v9083_v32  ;;  %v10143_v32 = vor.u32 %v13482_v19, %v10142_v17  ;;  %v9790_v17 = vld [vmem:[#allocation5 + $0x7d8] sm:$0xf] }
 0x13e   :  { %2788 = vmatpush.bf16.msra.mxu3 %v9787_v38  ;;  %v10147_v38 = vor.u32 %v13471_v25, %v10144_v27  ;;  %v13383_v27 = vld [vmem:[#allocation5 + $0x7dc] sm:$0xf] }
 0x13f   :  { %2750 = vmatpush.bf16.msra.mxu0 %v8991_v45  ;;  %v10055_v45 = vor.u32 %v13460_v39, %v10054_v37  ;;  %v13196_v37 = vld [vmem:[#allocation5 + $0x1fc] sm:$0xf0] }
 0x140   :  { %2763 = vmatpush.bf16.msra.mxu1 %v9695_v49  ;;  %v13262_v49 = vld [vmem:[#allocation5 + $0x40c] sm:$0xf0] }
 0x141   :  { %2776 = vmatpush.bf16.msra.mxu2 %v8995_v50  ;;  %v9966_v50 = vld [vmem:[#allocation5 + $0x938] sm:$0xf]  ;;  %v9263_v60 = vor.u32 %v13262_v49, %v9262_v44  ;;  %v8999_v49 = vor.u32 %v13196_v37, %v8998_v35 }
 0x142   :  { %2789 = vmatpush.bf16.msra.mxu3 %v9699_v56  ;;  %v14657_v56 = vld [vmem:[#allocation7 + $0x8] sm:$0xff]  ;;  %v9967_v62 = vor.u32 %v13438_v51, %v9966_v50 }
 0x143   :  { %2751 = vmatpush.bf16.msra.mxu0 %v8903_v63  ;;  %v9267_v63 = vor.u32 %v13251_v54, %v9264_v55  ;;  %v534_v25 = vperm.slane %v14657_v56, 1  ;;  %v9003_v54 = vor.u32 %v13185_v26, %v9000_v42  ;;  %v8910_v55 = vld [vmem:[#allocation5 + $0xf8] sm:$0xf]  ;;  %v10062_v26 = vld [vmem:[#allocation5 + $0x9f0] sm:$0xf] }
 0x144   :  { %2764 = vmatpush.bf16.msra.mxu1 %v9607_v2  ;;  %v533_v2 = vperm.slane %v14657_v56, 0 }
 0x145   :  { %2777 = vmatpush.bf16.msra.mxu2 %v8907_v3  ;;  %v9971_v3 = vor.u32 %v13427_v57, %v9968_v58  ;;  %v13174_v57 = vld [vmem:[#allocation5 + $0x14c] sm:$0xf0]  ;;  %v9614_v58 = vld [vmem:[#allocation5 + $0x678] sm:$0xf] }
 0x146   :  { %2790 = vmatpush.bf16.msra.mxu3 %v9611_v10  ;;  %v9880_v10 = vld [vmem:[#allocation5 + $0x8e0] sm:$0xf0] }
 0x147   :  { %2752 = vmatpush.bf16.msra.mxu0 %v8815_v18  ;;  %v2546_v13 = vpop.f32.mrf.mxu0  ;;  %v13394_v18 = vld [vmem:[#allocation5 + $0x82c] sm:$0xf0]  ;;  %v9883_v22 = vor.u32 %v13405_v7, %v9880_v10  ;;  %v9526_v10 = vld [vmem:[#allocation5 + $0x5c8] sm:$0xf] }
 0x148   :  { %2765 = vmatpush.bf16.msra.mxu1 %v9519_v23  ;;  %v2547_v19 = vadd.f32 %v2546_v13, %v533_v2  ;;  %v2559_v20 = vpop.f32.mrf.mxu1  ;;  %v13207_v23 = vld [vmem:[#allocation5 + $0x25c] sm:$0xf]  ;;  %v9616_v2 = vld [vmem:[#allocation5 + $0x6d0] sm:$0xf0] }
 0x149   :  { %2778 = vmatpush.bf16.msra.mxu2 %v8819_v24  ;;  %v9088_v24 = vld [vmem:[#allocation5 + $0x2b0] sm:$0xf0] }
 0x14a   :  { %2791 = vmatpush.bf16.msra.mxu3 %v9523_v29  ;;  %2753 = vmatmul.bf16.vlgmr.msra.gmra.mxu0 %v14594_v8  ;;  %v9792_v29 = vld [vmem:[#allocation5 + $0x830] sm:$0xf0]  ;;  %v9091_v34 = vor.u32 %v13207_v23, %v9088_v24  ;;  %v8823_v23 = vor.u32 %v13152_v5, %v8822_v4  ;;  %v13483_v24 = vld [vmem:[#allocation5 + $0xaf4] sm:$0xf0] }
 0x14b   :  { %2797 = vmatpush.bf16.msrb.mxu0 %v9439_v31  ;;  %2766 = vmatmul.bf16.vlgmr.msra.gmra.mxu1 %v14596_v9  ;;  %v14664_v31 = vadd.f32 %v2559_v20, %v2547_v19  ;;  %v9795_v40 = vor.u32 %v13383_v27, %v9792_v29  ;;  %v9446_v19 = vld [vmem:[#allocation5 + $0x520] sm:$0xf]  ;;  %v13307_v20 = vld [vmem:[#allocation5 + $0x574] sm:$0xf0]  ;;  %v9448_v27 = vld [vmem:[#allocation5 + $0x578] sm:$0xf0] }
 0x14c   :  { %2810 = vmatpush.bf16.msrb.mxu1 %v10143_v32  ;;  %2779 = vmatmul.bf16.vlgmr.msra.gmra.mxu2 %v14594_v8  ;;  %v9087_v32 = vor.u32 %v13218_v16, %v9086_v12  ;;  %v13141_v12 = vld [vmem:[#allocation5 + $0x4c] sm:$0xf]  ;;  %v9447_v37 = vor.u32 %v13307_v20, %v9446_v19 }
 0x14d   :  { %2823 = vmatpush.bf16.msrb.mxu2 %v9443_v33  ;;  %2792 = vmatmul.bf16.vlgmr.msra.gmra.mxu3 %v14596_v9  ;;  %v9791_v33 = vor.u32 %v13394_v18, %v9790_v17  ;;  %v13317_v16 = vld [vmem:[#allocation5 + $0x5cc] sm:$0xf]  ;;  %v9528_v17 = vld [vmem:[#allocation5 + $0x620] sm:$0xf0] }
 0x14e   :  { %2836 = vmatpush.bf16.msrb.mxu3 %v10147_v38  ;;  %v9702_v38 = vld [vmem:[#allocation5 + $0x728] sm:$0xf]  ;;  %v9531_v35 = vor.u32 %v13317_v16, %v9528_v17  ;;  %v9888_v16 = vld [vmem:[#allocation5 + $0x8e8] sm:$0xf0] }
 0x14f   :  { %2798 = vmatpush.bf16.msrb.mxu0 %v9351_v43  ;;  %v2572_v39 = vpop.f32.mrf.mxu2  ;;  %v2548_v51 = vpop.f32.mrf.mxu0 }
 0x150   :  { %2811 = vmatpush.bf16.msrb.mxu1 %v10055_v45  ;;  %v2573_v43 = vadd.f32 %v2572_v39, %v534_v25  ;;  %v2585_v44 = vpop.f32.mrf.mxu3  ;;  %v13361_v45 = vld [vmem:[#allocation5 + $0x72c] sm:$0xf]  ;;  %v13296_v25 = vld [vmem:[#allocation5 + $0x524] sm:$0xf] }
 0x151   :  { %2824 = vmatpush.bf16.msrb.mxu2 %v9355_v47  ;;  %v9704_v47 = vld [vmem:[#allocation5 + $0x780] sm:$0xf0]  ;;  %v9451_v39 = vor.u32 %v13296_v25, %v9448_v27  ;;  %v13395_v25 = vld [vmem:[#allocation5 + $0x834] sm:$0xf0] }
 0x152   :  { %2837 = vmatpush.bf16.msrb.mxu3 %v10059_v52  ;;  %v14666_v50 = vadd.f32 %v2585_v44, %v2573_v43  ;;  %v9703_v52 = vor.u32 %v13372_v41, %v9702_v38  ;;  %v9707_v61 = vor.u32 %v13361_v45, %v9704_v47  ;;  %v13285_v41 = vld [vmem:[#allocation5 + $0x4c4] sm:$0xf0]  ;;  %v13274_v44 = vld [vmem:[#allocation5 + $0x474] sm:$0xf]  ;;  %v9360_v45 = vld [vmem:[#allocation5 + $0x4c8] sm:$0xf0] }
 0x153   :  { %2799 = vmatpush.bf16.msrb.mxu0 %v9263_v60  ;;  %v2561_v60 = vpop.f32.mrf.mxu1  ;;  %v13461_v43 = vld [vmem:[#allocation5 + $0xa44] sm:$0xf0]  ;;  %v13450_v47 = vld [vmem:[#allocation5 + $0x9f4] sm:$0xf] }
 0x154   :  { %2812 = vmatpush.bf16.msrb.mxu1 %v9967_v62  ;;  %v13350_v62 = vld [vmem:[#allocation5 + $0x6cc] sm:$0xf0] }
 0x155   :  { %2825 = vmatpush.bf16.msrb.mxu2 %v9267_v63  ;;  %v13163_v63 = vld [vmem:[#allocation5 + $0xfc] sm:$0xf]  ;;  %v9615_v6 = vor.u32 %v13350_v62, %v9614_v58  ;;  %v9974_v58 = vld [vmem:[#allocation5 + $0x940] sm:$0xf]  ;;  %v13252_v62 = vld [vmem:[#allocation5 + $0x3c4] sm:$0xf] }
 0x156   :  { %2838 = vmatpush.bf16.msrb.mxu3 %v9971_v3  ;;  %v8911_v3 = vor.u32 %v13174_v57, %v8910_v55  ;;  %v8915_v7 = vor.u32 %v13163_v63, %v8912_v0  ;;  %v9270_v55 = vld [vmem:[#allocation5 + $0x3c0] sm:$0xf]  ;;  %v13263_v57 = vld [vmem:[#allocation5 + $0x414] sm:$0xf0]  ;;  %v9272_v63 = vld [vmem:[#allocation5 + $0x418] sm:$0xf0] }
 0x157   :  { %2800 = vmatpush.bf16.msrb.mxu0 %v9175_v11  ;;  %v13328_v11 = vld [vmem:[#allocation5 + $0x61c] sm:$0xf0]  ;;  %v2574_v13 = vpop.f32.mrf.mxu2  ;;  %v13428_v0 = vld [vmem:[#allocation5 + $0x944] sm:$0xf]  ;;  %v9275_v5 = vor.u32 %v13252_v62, %v9272_v63 }
 0x158   :  { %2813 = vmatpush.bf16.msrb.mxu1 %v9879_v14  ;;  %v9619_v14 = vor.u32 %v13339_v1, %v9616_v2  ;;  %v2587_v18 = vpop.f32.mrf.mxu3  ;;  %v9527_v29 = vor.u32 %v13328_v11, %v9526_v10  ;;  %v9976_v1 = vld [vmem:[#allocation5 + $0x998] sm:$0xf0]  ;;  %v9271_v2 = vor.u32 %v13263_v57, %v9270_v55  ;;  %v535_v10 = vperm.slane %v14657_v56, 2  ;;  %v13230_v13 = vld [vmem:[#allocation5 + $0x314] sm:$0xf] }
 0x159   :  { %2826 = vmatpush.bf16.msrb.mxu2 %v9179_v15  ;;  %v8824_v15 = vld [vmem:[#allocation5 + $0xa0] sm:$0xf0]  ;;  %v9979_v11 = vor.u32 %v13428_v0, %v9976_v1  ;;  %v9094_v18 = vld [vmem:[#allocation5 + $0x260] sm:$0xf]  ;;  %v13362_v57 = vld [vmem:[#allocation5 + $0x734] sm:$0xf] }
 0x15a   :  { %2839 = vmatpush.bf16.msrb.mxu3 %v9883_v22  ;;  %v10150_v22 = vld [vmem:[#allocation5 + $0xaa0] sm:$0xf] }
 0x15b   :  { %2801 = vmatpush.bf16.msrb.mxu0 %v9087_v32  ;;  %v8827_v32 = vor.u32 %v13141_v12, %v8824_v15  ;;  %v10151_v38 = vor.u32 %v13483_v24, %v10150_v22  ;;  %v13417_v12 = vld [vmem:[#allocation5 + $0x8e4] sm:$0xf0]  ;;  %v13406_v15 = vld [vmem:[#allocation5 + $0x894] sm:$0xf]  ;;  %v9798_v24 = vld [vmem:[#allocation5 + $0x7e0] sm:$0xf] }
 0x15c   :  { %2814 = vmatpush.bf16.msrb.mxu1 %v9791_v33  ;;  %v13472_v33 = vld [vmem:[#allocation5 + $0xaa4] sm:$0xf]  ;;  %v8918_v1 = vld [vmem:[#allocation5 + $0x100] sm:$0xf] }
 0x15d   :  { %2827 = vmatpush.bf16.msrb.mxu2 %v9091_v34  ;;  %v10152_v34 = vld [vmem:[#allocation5 + $0xaf8] sm:$0xf0] }
 0x15e   :  { %2840 = vmatpush.bf16.msrb.mxu3 %v9795_v40  ;;  %v9358_v40 = vld [vmem:[#allocation5 + $0x470] sm:$0xf]  ;;  %v10155_v42 = vor.u32 %v13472_v33, %v10152_v34  ;;  %v13208_v33 = vld [vmem:[#allocation5 + $0x264] sm:$0xf]  ;;  %v9096_v34 = vld [vmem:[#allocation5 + $0x2b8] sm:$0xf0] }
 0x15f   :  { %2802 = vmatpush.bf16.msrb.mxu0 %v8999_v49  ;;  %v10064_v49 = vld [vmem:[#allocation5 + $0xa48] sm:$0xf0]  ;;  %v9359_v51 = vor.u32 %v13285_v41, %v9358_v40  ;;  %v9799_v41 = vor.u32 %v13395_v25, %v9798_v24  ;;  %v13318_v25 = vld [vmem:[#allocation5 + $0x5d4] sm:$0xf] }
 0x160   :  { %2815 = vmatpush.bf16.msrb.mxu1 %v9703_v52  ;;  %v10063_v52 = vor.u32 %v13461_v43, %v10062_v26  ;;  %v10067_v60 = vor.u32 %v13450_v47, %v10064_v49  ;;  %v9099_v26 = vor.u32 %v13208_v33, %v9096_v34  ;;  %v13197_v43 = vld [vmem:[#allocation5 + $0x204] sm:$0xf0]  ;;  %v8832_v24 = vld [vmem:[#allocation5 + $0xa8] sm:$0xf0]  ;;  %v10398_v34 = vld [vmem:[#allocation8 + $0x1e0] sm:$0xf] }
 0x161   :  { %2828 = vmatpush.bf16.msrb.mxu2 %v9003_v54  ;;  %v9363_v54 = vor.u32 %v13274_v44, %v9360_v45  ;;  %v9710_v44 = vld [vmem:[#allocation5 + $0x730] sm:$0xf]  ;;  %v13373_v49 = vld [vmem:[#allocation5 + $0x784] sm:$0xf0] }
 0x162   :  { %2841 = vmatpush.bf16.msrb.mxu3 %v9707_v61  ;;  %v13439_v61 = vld [vmem:[#allocation5 + $0x994] sm:$0xf0]  ;;  %v9711_v63 = vor.u32 %v13373_v49, %v9710_v44  ;;  %v13514_v33 = vld [vmem:[#allocation8 + $0xec] sm:$0xf0] }
 0x163   :  { %2803 = vmatpush.bf16.msrb.mxu0 %v8911_v3  ;;  %v9182_v3 = vld [vmem:[#allocation5 + $0x310] sm:$0xf]  ;;  %v9975_v4 = vor.u32 %v13439_v61, %v9974_v58  ;;  %v9712_v58 = vld [vmem:[#allocation5 + $0x788] sm:$0xf0] }
 0x164   :  { %2816 = vmatpush.bf16.msrb.mxu1 %v9615_v6  ;;  %v13241_v6 = vld [vmem:[#allocation5 + $0x364] sm:$0xf0] }
 0x165   :  { %2829 = vmatpush.bf16.msrb.mxu2 %v8915_v7  ;;  %v9886_v7 = vld [vmem:[#allocation5 + $0x890] sm:$0xf]  ;;  %v9183_v17 = vor.u32 %v13241_v6, %v9182_v3  ;;  %v9622_v3 = vld [vmem:[#allocation5 + $0x680] sm:$0xf]  ;;  %v13351_v6 = vld [vmem:[#allocation5 + $0x6d4] sm:$0xf0] }
 0x166   :  { %2842 = vmatpush.bf16.msrb.mxu3 %v9619_v14  ;;  %v9184_v14 = vld [vmem:[#allocation5 + $0x368] sm:$0xf0]  ;;  %v9887_v20 = vor.u32 %v13417_v12, %v9886_v7  ;;  %v13164_v7 = vld [vmem:[#allocation5 + $0x104] sm:$0xf]  ;;  %v9624_v12 = vld [vmem:[#allocation5 + $0x6d8] sm:$0xf0] }
 0x167   :  { %2804 = vmatpush.bf16.msrb.mxu0 %v8823_v23  ;;  %v2598_v19 = vpop.f32.mrf.mxu0  ;;  %v9187_v22 = vor.u32 %v13230_v13, %v9184_v14  ;;  %v13219_v23 = vld [vmem:[#allocation5 + $0x2b4] sm:$0xf0]  ;;  %v8830_v14 = vld [vmem:[#allocation5 + $0x50] sm:$0xf] }
 0x168   :  { %2817 = vmatpush.bf16.msrb.mxu1 %v9527_v29  ;;  %v2599_v27 = vadd.f32 %v2598_v19, %v535_v10  ;;  %v2611_v29 = vpop.f32.mrf.mxu1  ;;  %v9095_v40 = vor.u32 %v13219_v23, %v9094_v18  ;;  %v8920_v10 = vld [vmem:[#allocation5 + $0x158] sm:$0xf0]  ;;  %v9534_v18 = vld [vmem:[#allocation5 + $0x5d0] sm:$0xf]  ;;  %v13329_v19 = vld [vmem:[#allocation5 + $0x624] sm:$0xf0] }
 0x169   :  { %2830 = vmatpush.bf16.msrb.mxu2 %v8827_v32  ;;  %v9891_v32 = vor.u32 %v13406_v15, %v9888_v16  ;;  %v13153_v15 = vld [vmem:[#allocation5 + $0xa4] sm:$0xf0]  ;;  %v9623_v16 = vor.u32 %v13351_v6, %v9622_v3  ;;  %v10238_v3 = vld [vmem:[#allocation8 + $0xa0] sm:$0xf] }
 0x16a   :  { %2843 = vmatpush.bf16.msrb.mxu3 %v9531_v35  ;;  %2805 = vmatmul.bf16.vlgmr.msrb.gmra.mxu0 %v14594_v8  ;;  %v536_v35 = vperm.slane %v14657_v56, 3 }
 0x16b   :  { %2849 = vmatpush.bf16.msra.mxu0 %v9447_v37  ;;  %2818 = vmatmul.bf16.vlgmr.msrb.gmra.mxu1 %v14596_v9  ;;  %v13384_v37 = vld [vmem:[#allocation5 + $0x7e4] sm:$0xf] }
 0x16c   :  { %2862 = vmatpush.bf16.msra.mxu1 %v10151_v38  ;;  %2831 = vmatmul.bf16.vlgmr.msrb.gmra.mxu2 %v14594_v8  ;;  %v9800_v38 = vld [vmem:[#allocation5 + $0x838] sm:$0xf0] }
 0x16d   :  { %2875 = vmatpush.bf16.msra.mxu2 %v9451_v39  ;;  %2844 = vmatmul.bf16.vlgmr.msrb.gmra.mxu3 %v14596_v9  ;;  %v14674_v39 = vadd.f32 %v2611_v29, %v2599_v27  ;;  %v9803_v47 = vor.u32 %v13384_v37, %v9800_v38  ;;  %v9536_v27 = vld [vmem:[#allocation5 + $0x628] sm:$0xf0]  ;;  %v13546_v37 = vld [vmem:[#allocation8 + $0x1ec] sm:$0xf0]  ;;  %v10526_v38 = vld [vmem:[#allocation8 + $0x2e0] sm:$0xf] }
 0x16e   :  { %2888 = vmatpush.bf16.msra.mxu3 %v10155_v42  ;;  %v9006_v42 = vld [vmem:[#allocation5 + $0x1b0] sm:$0xf]  ;;  %v9539_v44 = vor.u32 %v13318_v25, %v9536_v27  ;;  %v13566_v25 = vld [vmem:[#allocation8 + $0x28c] sm:$0xf0]  ;;  %v10606_v27 = vld [vmem:[#allocation8 + $0x380] sm:$0xf] }
 0x16f   :  { %2850 = vmatpush.bf16.msra.mxu0 %v9359_v51  ;;  %v2624_v45 = vpop.f32.mrf.mxu2  ;;  %v13186_v51 = vld [vmem:[#allocation5 + $0x1b4] sm:$0xf]  ;;  %v2600_v62 = vpop.f32.mrf.mxu0 }
 0x170   :  { %2863 = vmatpush.bf16.msra.mxu1 %v10063_v52  ;;  %v9008_v52 = vld [vmem:[#allocation5 + $0x208] sm:$0xf0]  ;;  %v2637_v55 = vpop.f32.mrf.mxu3  ;;  %v10638_v62 = vld [vmem:[#allocation8 + $0x3c0] sm:$0xf] }
 0x171   :  { %2876 = vmatpush.bf16.msra.mxu2 %v9363_v54  ;;  %v2625_v54 = vadd.f32 %v2624_v45, %v536_v35  ;;  %v9011_v0 = vor.u32 %v13186_v51, %v9008_v52  ;;  %v8831_v35 = vor.u32 %v13153_v15, %v8830_v14  ;;  %v10254_v51 = vld [vmem:[#allocation8 + $0xc0] sm:$0xf]  ;;  %v13510_v52 = vld [vmem:[#allocation8 + $0xcc] sm:$0xf0] }
 0x172   :  { %2889 = vmatpush.bf16.msra.mxu3 %v10067_v60  ;;  %v9007_v60 = vor.u32 %v13197_v43, %v9006_v42  ;;  %v10654_v42 = vld [vmem:[#allocation8 + $0x3e0] sm:$0xf]  ;;  %v13610_v43 = vld [vmem:[#allocation8 + $0x3ec] sm:$0xf0] }
 0x173   :  { %2851 = vmatpush.bf16.msra.mxu0 %v9271_v2  ;;  %v14676_v61 = vadd.f32 %v2637_v55, %v2625_v54  ;;  %v13175_v2 = vld [vmem:[#allocation5 + $0x154] sm:$0xf0]  ;;  %v10655_v55 = vor.u32 %v13610_v43, %v10654_v42  ;;  %v13562_v43 = vld [vmem:[#allocation8 + $0x26c] sm:$0xf0] }
 0x174   :  { %2864 = vmatpush.bf16.msra.mxu1 %v9975_v4  ;;  %v2613_v4 = vpop.f32.mrf.mxu1  ;;  %v8919_v13 = vor.u32 %v13175_v2, %v8918_v1  ;;  %v10382_v54 = vld [vmem:[#allocation8 + $0x1c0] sm:$0xf] }
 0x175   :  { %2877 = vmatpush.bf16.msra.mxu2 %v9275_v5  ;;  %v9715_v5 = vor.u32 %v13362_v57, %v9712_v58  ;;  %v13542_v57 = vld [vmem:[#allocation8 + $0x1cc] sm:$0xf0]  ;;  %v10510_v58 = vld [vmem:[#allocation8 + $0x2c0] sm:$0xf] }
 0x176   :  { %2890 = vmatpush.bf16.msra.mxu3 %v9979_v11  ;;  %v13340_v11 = vld [vmem:[#allocation5 + $0x684] sm:$0xf]  ;;  %v10383_v1 = vor.u32 %v13542_v57, %v10382_v54  ;;  %v10222_v15 = vld [vmem:[#allocation8 + $0x80] sm:$0xf] }
 0x177   :  { %2852 = vmatpush.bf16.msra.mxu0 %v9183_v17  ;;  %v8923_v17 = vor.u32 %v13164_v7, %v8920_v10  ;;  %v9627_v23 = vor.u32 %v13340_v11, %v9624_v12  ;;  %v13506_v4 = vld [vmem:[#allocation8 + $0xac] sm:$0xf0]  ;;  %v10494_v10 = vld [vmem:[#allocation8 + $0x2a0] sm:$0xf] }
 0x178   :  { %2865 = vmatpush.bf16.msra.mxu1 %v9887_v20  ;;  %v13142_v20 = vld [vmem:[#allocation5 + $0x54] sm:$0xf]  ;;  %v2639_v29 = vpop.f32.mrf.mxu3  ;;  %v13538_v7 = vld [vmem:[#allocation8 + $0x1ac] sm:$0xf0]  ;;  %v10239_v14 = vor.u32 %v13506_v4, %v10238_v3 }
 0x179   :  { %2878 = vmatpush.bf16.msra.mxu2 %v9187_v22  ;;  %v2626_v22 = vpop.f32.mrf.mxu2  ;;  %v13570_v11 = vld [vmem:[#allocation8 + $0x2ac] sm:$0xf0]  ;;  %v10622_v12 = vld [vmem:[#allocation8 + $0x3a0] sm:$0xf] }
 0x17a   :  { %2891 = vmatpush.bf16.msra.mxu3 %v9891_v32  ;;  %v10270_v32 = vld [vmem:[#allocation8 + $0xe0] sm:$0xf]  ;;  %v13494_v57 = vld [vmem:[#allocation8 + $0x4c] sm:$0xf0] }
 0x17b   :  { %2853 = vmatpush.bf16.msra.mxu0 %v9095_v40  ;;  %v13578_v40 = vld [vmem:[#allocation8 + $0x2ec] sm:$0xf0]  ;;  %v10271_v45 = vor.u32 %v13514_v33, %v10270_v32  ;;  %v10206_v32 = vld [vmem:[#allocation8 + $0x60] sm:$0xf] }
 0x17c   :  { %2866 = vmatpush.bf16.msra.mxu1 %v9799_v41  ;;  %v9535_v41 = vor.u32 %v13329_v19, %v9534_v18  ;;  %v10527_v49 = vor.u32 %v13578_v40, %v10526_v38  ;;  %v13502_v18 = vld [vmem:[#allocation8 + $0x8c] sm:$0xf0]  ;;  %v10350_v19 = vld [vmem:[#allocation8 + $0x180] sm:$0xf] }
 0x17d   :  { %2879 = vmatpush.bf16.msra.mxu2 %v9099_v26  ;;  %v8835_v26 = vor.u32 %v13142_v20, %v8832_v24  ;;  %v537_v20 = vperm.slane %v14657_v56, 4  ;;  %v10478_v24 = vld [vmem:[#allocation8 + $0x280] sm:$0xf]  ;;  %v10223_v29 = vor.u32 %v13502_v18, %v10222_v15  ;;  %v13530_v38 = vld [vmem:[#allocation8 + $0x16c] sm:$0xf0] }
 0x17e   :  { %2892 = vmatpush.bf16.msra.mxu3 %v9803_v47  ;;  %v10399_v47 = vor.u32 %v13546_v37, %v10398_v34  ;;  %v10479_v34 = vor.u32 %v13566_v25, %v10478_v24  ;;  %v10334_v37 = vld [vmem:[#allocation8 + $0x160] sm:$0xf]  ;;  %v13522_v18 = vld [vmem:[#allocation8 + $0x12c] sm:$0xf0] }
 0x17f   :  { %2854 = vmatpush.bf16.msra.mxu0 %v9007_v60  ;;  %v13574_v60 = vld [vmem:[#allocation8 + $0x2cc] sm:$0xf0]  ;;  %v10462_v42 = vld [vmem:[#allocation8 + $0x260] sm:$0xf] }
 0x180   :  { %2867 = vmatpush.bf16.msra.mxu1 %v9711_v63  ;;  %v13606_v63 = vld [vmem:[#allocation8 + $0x3cc] sm:$0xf0]  ;;  %v10511_v2 = vor.u32 %v13574_v60, %v10510_v58  ;;  %v10463_v54 = vor.u32 %v13562_v43, %v10462_v42  ;;  %v10318_v58 = vld [vmem:[#allocation8 + $0x140] sm:$0xf] }
 0x181   :  { %2880 = vmatpush.bf16.msra.mxu2 %v9011_v0  ;;  %v10255_v0 = vor.u32 %v13510_v52, %v10254_v51  ;;  %v10639_v6 = vor.u32 %v13606_v63, %v10638_v62  ;;  %v10335_v52 = vor.u32 %v13530_v38, %v10334_v37  ;;  %v13526_v63 = vld [vmem:[#allocation8 + $0x14c] sm:$0xf0]  ;;  %v10574_v4 = vld [vmem:[#allocation8 + $0x340] sm:$0xf] }
 0x182   :  { %2893 = vmatpush.bf16.msra.mxu3 %v9715_v5  ;;  %v10366_v5 = vld [vmem:[#allocation8 + $0x1a0] sm:$0xf]  ;;  %v13550_v37 = vld [vmem:[#allocation8 + $0x20c] sm:$0xf0] }
 0x183   :  { %2855 = vmatpush.bf16.msra.mxu0 %v8919_v13  ;;  %v13602_v13 = vld [vmem:[#allocation8 + $0x3ac] sm:$0xf0]  ;;  %v10302_v15 = vld [vmem:[#allocation8 + $0x120] sm:$0xf] }
 0x184   :  { %2868 = vmatpush.bf16.msra.mxu1 %v9623_v16  ;;  %v10367_v16 = vor.u32 %v13538_v7, %v10366_v5  ;;  %v10623_v22 = vor.u32 %v13602_v13, %v10622_v12  ;;  %v13590_v5 = vld [vmem:[#allocation8 + $0x34c] sm:$0xf0]  ;;  %v10174_v13 = vld [vmem:[#allocation8 + $0x20] sm:$0xf] }
 0x185   :  { %2881 = vmatpush.bf16.msra.mxu2 %v8923_v17  ;;  %v10495_v17 = vor.u32 %v13570_v11, %v10494_v10  ;;  %v10319_v11 = vor.u32 %v13526_v63, %v10318_v58  ;;  %v10158_v25 = vld [vmem:[#allocation8] sm:$0xf]  ;;  %v13642_v42 = vld [vmem:[#allocation8 + $0x4ec] sm:$0xf0]  ;;  %v2904_v63 = vmax.f32 %v14634_v53, 0.0 }
 0x186   :  { %2894 = vmatpush.bf16.msra.mxu3 %v9627_v23  ;;  %v13534_v23 = vld [vmem:[#allocation8 + $0x18c] sm:$0xf0]  ;;  %v10542_v38 = vld [vmem:[#allocation8 + $0x300] sm:$0xf] }
 0x187   :  { %2856 = vmatpush.bf16.msra.mxu0 %v8831_v35  ;;  %v2650_v33 = vpop.f32.mrf.mxu0  ;;  %v13498_v35 = vld [vmem:[#allocation8 + $0x6c] sm:$0xf0]  ;;  %v10910_v43 = vld [vmem:[#allocation8 + $0x5e0] sm:$0xf] }
 0x188   :  { %2869 = vmatpush.bf16.msra.mxu1 %v9535_v41  ;;  %v2651_v40 = vadd.f32 %v2650_v33, %v537_v20  ;;  %v2663_v41 = vpop.f32.mrf.mxu1  ;;  %v10207_v51 = vor.u32 %v13498_v35, %v10206_v32  ;;  %v13554_v20 = vld [vmem:[#allocation8 + $0x22c] sm:$0xf0]  ;;  %v10286_v32 = vld [vmem:[#allocation8 + $0x100] sm:$0xf] }
 0x189   :  { %2882 = vmatpush.bf16.msra.mxu2 %v8835_v26  ;;  %v13518_v33 = vld [vmem:[#allocation8 + $0x10c] sm:$0xf0]  ;;  %v11166_v58 = vld [vmem:[#allocation8 + $0x7e0] sm:$0xf] }
 0x18a   :  { %2895 = vmatpush.bf16.msra.mxu3 %v9539_v44  ;;  %2857 = vmatmul.bf16.vlgmr.msra.gmra.mxu0 %v14594_v8  ;;  %v538_v44 = vperm.slane %v14657_v56, 5 }
 0x18b   :  { %7179 = vmatpush.bf16.msrb.mxu0 %v10271_v45  ;;  %2870 = vmatmul.bf16.vlgmr.msra.gmra.mxu1 %v14596_v9  ;;  %v10590_v45 = vld [vmem:[#allocation8 + $0x360] sm:$0xf] }
 0x18c   :  { %7192 = vmatpush.bf16.msrb.mxu1 %v10399_v47  ;;  %2883 = vmatmul.bf16.vlgmr.msra.gmra.mxu2 %v14594_v8  ;;  %v13598_v8 = vld [vmem:[#allocation8 + $0x38c] sm:$0xf0] }
 0x18d   :  { %7205 = vmatpush.bf16.msrb.mxu2 %v10527_v49  ;;  %2896 = vmatmul.bf16.vlgmr.msra.gmra.mxu3 %v14596_v9  ;;  %v10351_v9 = vor.u32 %v13534_v23, %v10350_v19  ;;  %v10607_v26 = vor.u32 %v13598_v8, %v10606_v27  ;;  %v13594_v47 = vld [vmem:[#allocation8 + $0x36c] sm:$0xf0]  ;;  %v14684_v49 = vadd.f32 %v2663_v41, %v2651_v40  ;;  %v10430_v19 = vld [vmem:[#allocation8 + $0x220] sm:$0xf] }
 0x18e   :  { %7218 = vmatpush.bf16.msrb.mxu3 %v10655_v55  ;;  %v10190_v55 = vld [vmem:[#allocation8 + $0x40] sm:$0xf]  ;;  %v10591_v62 = vor.u32 %v13594_v47, %v10590_v45  ;;  %v13586_v23 = vld [vmem:[#allocation8 + $0x32c] sm:$0xf0]  ;;  %v10303_v8 = vor.u32 %v13522_v18, %v10302_v15 }
 0x18f   :  { %7180 = vmatpush.bf16.msrb.mxu0 %v10255_v0  ;;  %v2676_v60 = vpop.f32.mrf.mxu2  ;;  %v10446_v0 = vld [vmem:[#allocation8 + $0x240] sm:$0xf]  ;;  %v2652_v10 = vpop.f32.mrf.mxu0  ;;  %v13486_v27 = vld [vmem:[#allocation8 + $0xc] sm:$0xf0] }
 0x190   :  { %7193 = vmatpush.bf16.msrb.mxu1 %v10383_v1  ;;  %v13558_v1 = vld [vmem:[#allocation8 + $0x24c] sm:$0xf0]  ;;  %v2689_v3 = vpop.f32.mrf.mxu3  ;;  %v11038_v47 = vld [vmem:[#allocation8 + $0x6e0] sm:$0xf] }
 0x191   :  { %7206 = vmatpush.bf16.msrb.mxu2 %v10511_v2  ;;  %v2677_v2 = vadd.f32 %v2676_v60, %v538_v44  ;;  %v10447_v12 = vor.u32 %v13558_v1, %v10446_v0  ;;  %v13582_v40 = vld [vmem:[#allocation8 + $0x30c] sm:$0xf0]  ;;  %v10159_v44 = vor.u32 %v13486_v27, %v10158_v25  ;;  %v11022_v10 = vld [vmem:[#allocation8 + $0x6c0] sm:$0xf] }
 0x192   :  { %7219 = vmatpush.bf16.msrb.mxu3 %v10639_v6  ;;  %v10191_v6 = vor.u32 %v13494_v57, %v10190_v55  ;;  %v13674_v45 = vld [vmem:[#allocation8 + $0x5ec] sm:$0xf0]  ;;  %v10287_v55 = vor.u32 %v13518_v33, %v10286_v32  ;;  %v10543_v0 = vor.u32 %v13582_v40, %v10542_v38  ;;  %v10750_v18 = vld [vmem:[#allocation8 + $0x4a0] sm:$0xf]  ;;  %v539_v38 = vperm.slane %v14657_v56, 6 }
 0x193   :  { %7181 = vmatpush.bf16.msrb.mxu0 %v10239_v14  ;;  %v14686_v7 = vadd.f32 %v2689_v3, %v2677_v2  ;;  %v13490_v14 = vld [vmem:[#allocation8 + $0x2c] sm:$0xf0]  ;;  %v10911_v2 = vor.u32 %v13674_v45, %v10910_v43  ;;  %v11006_v25 = vld [vmem:[#allocation8 + $0x6a0] sm:$0xf] }
 0x194   :  { %7194 = vmatpush.bf16.msrb.mxu1 %v10367_v16  ;;  %v2665_v16 = vpop.f32.mrf.mxu1  ;;  %v10175_v24 = vor.u32 %v13490_v14, %v10174_v13  ;;  %v13738_v60 = vld [vmem:[#allocation8 + $0x7ec] sm:$0xf0]  ;;  %v10734_v33 = vld [vmem:[#allocation8 + $0x480] sm:$0xf] }
 0x195   :  { %7207 = vmatpush.bf16.msrb.mxu2 %v10495_v17  ;;  %v10575_v17 = vor.u32 %v13590_v5, %v10574_v4  ;;  %v10766_v4 = vld [vmem:[#allocation8 + $0x4c0] sm:$0xf]  ;;  %v13638_v5 = vld [vmem:[#allocation8 + $0x4cc] sm:$0xf0] }
 0x196   :  { %7220 = vmatpush.bf16.msrb.mxu3 %v10623_v22  ;;  %v10558_v22 = vld [vmem:[#allocation8 + $0x320] sm:$0xf]  ;;  %v13734_v13 = vld [vmem:[#allocation8 + $0x7cc] sm:$0xf0]  ;;  %v10767_v14 = vor.u32 %v13638_v5, %v10766_v4 }
 0x197   :  { %7182 = vmatpush.bf16.msrb.mxu0 %v10223_v29  ;;  %v10431_v29 = vor.u32 %v13554_v20, %v10430_v19  ;;  %v10559_v35 = vor.u32 %v13586_v23, %v10558_v22  ;;  %v13634_v19 = vld [vmem:[#allocation8 + $0x4ac] sm:$0xf0]  ;;  %v10878_v20 = vld [vmem:[#allocation8 + $0x5a0] sm:$0xf]  ;;  %v14698_v22 = vpack.c.bf16 %v2904_v63, %v2904_v63 }
 0x198   :  { %7195 = vmatpush.bf16.msrb.mxu1 %v10351_v9  ;;  %v10414_v9 = vld [vmem:[#allocation8 + $0x200] sm:$0xf]  ;;  %v2691_v41 = vpop.f32.mrf.mxu3  ;;  %v13698_v27 = vld [vmem:[#allocation8 + $0x6ac] sm:$0xf0]  ;;  %v10751_v32 = vor.u32 %v13634_v19, %v10750_v18 }
 0x199   :  { %7208 = vmatpush.bf16.msrb.mxu2 %v10479_v34  ;;  %v2678_v34 = vpop.f32.mrf.mxu2  ;;  %v10415_v57 = vor.u32 %v13550_v37, %v10414_v9  ;;  %v10862_v37 = vld [vmem:[#allocation8 + $0x580] sm:$0xf]  ;;  %v13662_v41 = vld [vmem:[#allocation8 + $0x58c] sm:$0xf0] }
 0x19a   :  { %7221 = vmatpush.bf16.msrb.mxu3 %v10607_v26  ;;  %v10782_v26 = vld [vmem:[#allocation8 + $0x4e0] sm:$0xf]  ;;  %v11007_v34 = vor.u32 %v13698_v27, %v11006_v25  ;;  %v13722_v4 = vld [vmem:[#allocation8 + $0x76c] sm:$0xf0] }
 0x19b   :  { %7183 = vmatpush.bf16.msrb.mxu0 %v10207_v51  ;;  %v13706_v51 = vld [vmem:[#allocation8 + $0x6ec] sm:$0xf0]  ;;  %v10783_v1 = vor.u32 %v13642_v42, %v10782_v26  ;;  %v10990_v26 = vld [vmem:[#allocation8 + $0x680] sm:$0xf] }
 0x19c   :  { %7196 = vmatpush.bf16.msrb.mxu1 %v10335_v52  ;;  %v2901_v52 = vmax.f32 %v14622_v59, 0.0  ;;  %v11039_v3 = vor.u32 %v13706_v51, %v11038_v47  ;;  %v10894_v59 = vld [vmem:[#allocation8 + $0x5c0] sm:$0xf]  ;;  %v13694_v42 = vld [vmem:[#allocation8 + $0x68c] sm:$0xf0] }
 0x19d   :  { %7209 = vmatpush.bf16.msrb.mxu2 %v10463_v54  ;;  %v2902_v54 = vmax.f32 %v14624_v21, 0.0  ;;  %v11167_v21 = vor.u32 %v13738_v60, %v11166_v58  ;;  %v11118_v43 = vld [vmem:[#allocation8 + $0x780] sm:$0xf]  ;;  %v13658_v58 = vld [vmem:[#allocation8 + $0x56c] sm:$0xf0] }
 0x19e   :  { %7222 = vmatpush.bf16.msrb.mxu3 %v10591_v62  ;;  %v2903_v62 = vmax.f32 %v14632_v36, 0.0  ;;  %v14692_v36 = vpack.c.bf16 %v2901_v52, %v2901_v52  ;;  %v10718_v47 = vld [vmem:[#allocation8 + $0x460] sm:$0xf]  ;;  %v10863_v52 = vor.u32 %v13662_v41, %v10862_v37  ;;  %v13686_v18 = vld [vmem:[#allocation8 + $0x64c] sm:$0xf0] }
 0x19f   :  { %7184 = vmatpush.bf16.msrb.mxu0 %v10191_v6  ;;  %v13670_v6 = vld [vmem:[#allocation8 + $0x5cc] sm:$0xf0]  ;;  %v14694_v53 = vpack.c.bf16 %v2902_v54, %v2902_v54  ;;  %v10991_v54 = vor.u32 %v13694_v42, %v10990_v26  ;;  %v11070_v41 = vld [vmem:[#allocation8 + $0x720] sm:$0xf] }
 0x1a0   :  { %7197 = vmatpush.bf16.msrb.mxu1 %v10319_v11  ;;  %v13702_v11 = vld [vmem:[#allocation8 + $0x6cc] sm:$0xf0]  ;;  %v14696_v15 = vpack.c.bf16 %v2903_v62, %v2903_v62  ;;  %v10895_v16 = vor.u32 %v13670_v6, %v10894_v59 }
 0x1a1   :  { %7210 = vmatpush.bf16.msrb.mxu2 %v10447_v12  ;;  %v11150_v12 = vld [vmem:[#allocation8 + $0x7c0] sm:$0xf]  ;;  %v13650_v37 = vld [vmem:[#allocation8 + $0x52c] sm:$0xf0] }
 0x1a2   :  { %7223 = vmatpush.bf16.msrb.mxu3 %v10575_v17  ;;  %v11023_v17 = vor.u32 %v13702_v11, %v11022_v10  ;;  %v11151_v23 = vor.u32 %v13734_v13, %v11150_v12  ;;  %v10702_v10 = vld [vmem:[#allocation8 + $0x440] sm:$0xf]  ;;  %v13622_v11 = vld [vmem:[#allocation8 + $0x44c] sm:$0xf0] }
 0x1a3   :  { %7185 = vmatpush.bf16.msrb.mxu0 %v10175_v24  ;;  %v13666_v24 = vld [vmem:[#allocation8 + $0x5ac] sm:$0xf0]  ;;  %v10830_v12 = vld [vmem:[#allocation8 + $0x540] sm:$0xf] }
 0x1a4   :  { %7198 = vmatpush.bf16.msrb.mxu1 %v10303_v8  ;;  %v11134_v8 = vld [vmem:[#allocation8 + $0x7a0] sm:$0xf]  ;;  %v10879_v9 = vor.u32 %v13666_v24, %v10878_v20  ;;  %v10703_v24 = vor.u32 %v13622_v11, %v10702_v10  ;;  %v13714_v26 = vld [vmem:[#allocation8 + $0x72c] sm:$0xf0]  ;;  %v2906_v10 = vmax.f32 %v14644_v48, 0.0 }
 0x1a5   :  { %7211 = vmatpush.bf16.msrb.mxu2 %v10431_v29  ;;  %v13730_v29 = vld [vmem:[#allocation8 + $0x7ac] sm:$0xf0]  ;;  %v11086_v20 = vld [vmem:[#allocation8 + $0x740] sm:$0xf] }
 0x1a6   :  { %7224 = vmatpush.bf16.msrb.mxu3 %v10559_v35  ;;  %v13630_v35 = vld [vmem:[#allocation8 + $0x48c] sm:$0xf0]  ;;  %v11135_v40 = vor.u32 %v13730_v29, %v11134_v8 }
 0x1a7   :  { %7186 = vmatpush.bf16.msrb.mxu0 %v10159_v44  ;;  %v13726_v44 = vld [vmem:[#allocation8 + $0x78c] sm:$0xf0]  ;;  %v10735_v45 = vor.u32 %v13630_v35, %v10734_v33  ;;  %v2702_v51 = vpop.f32.mrf.mxu0 }
 0x1a8   :  { %7199 = vmatpush.bf16.msrb.mxu1 %v10287_v55  ;;  %v13626_v55 = vld [vmem:[#allocation8 + $0x46c] sm:$0xf0]  ;;  %v2703_v60 = vadd.f32 %v2702_v51, %v539_v38  ;;  %v2715_v62 = vpop.f32.mrf.mxu1  ;;  %v11119_v63 = vor.u32 %v13726_v44, %v11118_v43  ;;  %v10942_v38 = vld [vmem:[#allocation8 + $0x620] sm:$0xf] }
 0x1a9   :  { %7212 = vmatpush.bf16.msrb.mxu2 %v10415_v57  ;;  %v10846_v57 = vld [vmem:[#allocation8 + $0x560] sm:$0xf]  ;;  %v10719_v59 = vor.u32 %v13626_v55, %v10718_v47  ;;  %v13618_v33 = vld [vmem:[#allocation8 + $0x42c] sm:$0xf0] }
 0x1aa   :  { %7225 = vmatpush.bf16.msrb.mxu3 %v10543_v0  ;;  %7187 = vmatmul.bf16.vlgmr.msrb.gmra.mxu0 %v14692_v36  ;;  %v10974_v0 = vld [vmem:[#allocation8 + $0x660] sm:$0xf]  ;;  %v14706_v5 = vadd.f32 %v2715_v62, %v2703_v60  ;;  %v13614_v44 = vld [vmem:[#allocation8 + $0x40c] sm:$0xf0] }
 0x1ab   :  { %7231 = vmatpush.bf16.msra.mxu0 %v10783_v1  ;;  %7200 = vmatmul.bf16.vlgmr.msrb.gmra.mxu1 %v14694_v53  ;;  %v13690_v1 = vld [vmem:[#allocation8 + $0x66c] sm:$0xf0]  ;;  %v10670_v43 = vld [vmem:[#allocation8 + $0x400] sm:$0xf] }
 0x1ac   :  { %7244 = vmatpush.bf16.msra.mxu1 %v10911_v2  ;;  %7213 = vmatmul.bf16.vlgmr.msrb.gmra.mxu2 %v14696_v15  ;;  %v540_v2 = vperm.slane %v14657_v56, 7  ;;  %v10975_v6 = vor.u32 %v13690_v1, %v10974_v0  ;;  %v10798_v51 = vld [vmem:[#allocation8 + $0x500] sm:$0xf]  ;;  %v13710_v62 = vld [vmem:[#allocation8 + $0x70c] sm:$0xf0] }
 0x1ad   :  { %7257 = vmatpush.bf16.msra.mxu2 %v11039_v3  ;;  %7226 = vmatmul.bf16.vlgmr.msrb.gmra.mxu3 %v14698_v22  ;;  %v11102_v3 = vld [vmem:[#allocation8 + $0x760] sm:$0xf]  ;;  %v13770_v1 = vld [vmem:[#allocation8 + $0x8ec] sm:$0xf0] }
 0x1ae   :  { %7270 = vmatpush.bf16.msra.mxu3 %v11167_v21  ;;  %v10847_v21 = vor.u32 %v13658_v58, %v10846_v57  ;;  %v11071_v57 = vor.u32 %v13714_v26, %v11070_v41  ;;  %v13678_v58 = vld [vmem:[#allocation8 + $0x60c] sm:$0xf0]  ;;  %v11054_v60 = vld [vmem:[#allocation8 + $0x700] sm:$0xf] }
 0x1af   :  { %7232 = vmatpush.bf16.msra.mxu0 %v10767_v14  ;;  %v2728_v13 = vpop.f32.mrf.mxu2  ;;  %v11103_v14 = vor.u32 %v13722_v4, %v11102_v3  ;;  %v2704_v27 = vpop.f32.mrf.mxu0  ;;  %v11294_v0 = vld [vmem:[#allocation8 + $0x8e0] sm:$0xf]  ;;  %v10671_v3 = vor.u32 %v13614_v44, %v10670_v43  ;;  %v13802_v4 = vld [vmem:[#allocation8 + $0x9ec] sm:$0xf0] }
 0x1b0   :  { %7245 = vmatpush.bf16.msra.mxu1 %v10895_v16  ;;  %v13654_v16 = vld [vmem:[#allocation8 + $0x54c] sm:$0xf0]  ;;  %v2729_v56 = vadd.f32 %v2728_v13, %v540_v2  ;;  %v2741_v19 = vpop.f32.mrf.mxu3  ;;  %v11422_v2 = vld [vmem:[#allocation8 + $0x9e0] sm:$0xf] }
 0x1b1   :  { %7258 = vmatpush.bf16.msra.mxu2 %v11023_v17  ;;  %v10958_v17 = vld [vmem:[#allocation8 + $0x640] sm:$0xf]  ;;  %v10831_v8 = vor.u32 %v13654_v16, %v10830_v12  ;;  %v2907_v16 = vmax.f32 %v14652_v28, 0.0  ;;  %v13798_v27 = vld [vmem:[#allocation8 + $0x9cc] sm:$0xf0] }
 0x1b2   :  { %7271 = vmatpush.bf16.msra.mxu3 %v11151_v23  ;;  %v13718_v23 = vld [vmem:[#allocation8 + $0x74c] sm:$0xf0]  ;;  %v14708_v25 = vadd.f32 %v2741_v19, %v2729_v56  ;;  %v10959_v29 = vor.u32 %v13686_v18, %v10958_v17  ;;  %v11678_v13 = vld [vmem:[#allocation8 + $0xbe0] sm:$0xf]  ;;  %v2908_v17 = vmax.f32 %v14654_v46, 0.0  ;;  %v11055_v18 = vor.u32 %v13710_v62, %v11054_v60 }
 0x1b3   :  { %7233 = vmatpush.bf16.msra.mxu0 %v10751_v32  ;;  %v10686_v32 = vld [vmem:[#allocation8 + $0x420] sm:$0xf]  ;;  %v11087_v35 = vor.u32 %v13718_v23, %v11086_v20  ;;  %v11295_v56 = vor.u32 %v13770_v1, %v11294_v0  ;;  %v11423_v19 = vor.u32 %v13802_v4, %v11422_v2  ;;  %v14716_v46 = vpack.c.bf16 %v2906_v10, %v2906_v10  ;;  %v13794_v26 = vld [vmem:[#allocation8 + $0x9ac] sm:$0xf0] }
 0x1b4   :  { %7246 = vmatpush.bf16.msra.mxu1 %v10879_v9  ;;  %v10814_v9 = vld [vmem:[#allocation8 + $0x520] sm:$0xf]  ;;  %v10687_v42 = vor.u32 %v13618_v33, %v10686_v32  ;;  %v13862_v33 = vld [vmem:[#allocation8 + $0xbcc] sm:$0xf0] }
 0x1b5   :  { %7259 = vmatpush.bf16.msra.mxu2 %v11007_v34  ;;  %v2717_v34 = vpop.f32.mrf.mxu1  ;;  %v11278_v23 = vld [vmem:[#allocation8 + $0x8c0] sm:$0xf]  ;;  %v13758_v60 = vld [vmem:[#allocation8 + $0x88c] sm:$0xf0] }
 0x1b6   :  { %7272 = vmatpush.bf16.msra.mxu3 %v11135_v40  ;;  %v13682_v40 = vld [vmem:[#allocation8 + $0x62c] sm:$0xf0]  ;;  %v11662_v32 = vld [vmem:[#allocation8 + $0xbc0] sm:$0xf] }
 0x1b7   :  { %7234 = vmatpush.bf16.msra.mxu0 %v10735_v45  ;;  %v10815_v45 = vor.u32 %v13650_v37, %v10814_v9  ;;  %v10943_v47 = vor.u32 %v13682_v40, %v10942_v38  ;;  %v2730_v55 = vpop.f32.mrf.mxu2  ;;  %v11262_v34 = vld [vmem:[#allocation8 + $0x8a0] sm:$0xf]  ;;  %v13762_v40 = vld [vmem:[#allocation8 + $0x8ac] sm:$0xf0]  ;;  %v11663_v43 = vor.u32 %v13862_v33, %v11662_v32 }
 0x1b8   :  { %7247 = vmatpush.bf16.msra.mxu1 %v10863_v52  ;;  %v13646_v52 = vld [vmem:[#allocation8 + $0x50c] sm:$0xf0]  ;;  %v11390_v41 = vld [vmem:[#allocation8 + $0x9a0] sm:$0xf] }
 0x1b9   :  { %7260 = vmatpush.bf16.msra.mxu2 %v10991_v54  ;;  %v10926_v54 = vld [vmem:[#allocation8 + $0x600] sm:$0xf]  ;;  %v10799_v11 = vor.u32 %v13646_v52, %v10798_v51  ;;  %v13858_v52 = vld [vmem:[#allocation8 + $0xbac] sm:$0xf0] }
 0x1ba   :  { %7273 = vmatpush.bf16.msra.mxu3 %v11119_v63  ;;  %v2743_v63 = vpop.f32.mrf.mxu3  ;;  %v10927_v12 = vor.u32 %v13678_v58, %v10926_v54  ;;  %v11518_v44 = vld [vmem:[#allocation8 + $0xaa0] sm:$0xf]  ;;  %v11263_v54 = vor.u32 %v13762_v40, %v11262_v34  ;;  %v13790_v1 = vld [vmem:[#allocation8 + $0x98c] sm:$0xf0] }
 0x1bb   :  { %7235 = vmatpush.bf16.msra.mxu0 %v10719_v59  ;;  %v11550_v59 = vld [vmem:[#allocation8 + $0xae0] sm:$0xf]  ;;  %v13750_v33 = vld [vmem:[#allocation8 + $0x84c] sm:$0xf0] }
 0x1bc   :  { %7248 = vmatpush.bf16.msra.mxu1 %v10847_v21  ;;  %v13834_v21 = vld [vmem:[#allocation8 + $0xaec] sm:$0xf0]  ;;  %v11646_v51 = vld [vmem:[#allocation8 + $0xba0] sm:$0xf] }
 0x1bd   :  { %7261 = vmatpush.bf16.msra.mxu2 %v10975_v6  ;;  %v2905_v6 = vmax.f32 %v14642_v30, 0.0  ;;  %v11551_v20 = vor.u32 %v13834_v21, %v11550_v59  ;;  %v11406_v30 = vld [vmem:[#allocation8 + $0x9c0] sm:$0xf]  ;;  %v11647_v0 = vor.u32 %v13858_v52, %v11646_v51  ;;  %v13854_v59 = vld [vmem:[#allocation8 + $0xb8c] sm:$0xf0] }
 0x1be   :  { %7274 = vmatpush.bf16.msra.mxu3 %v11103_v14  ;;  %v13866_v14 = vld [vmem:[#allocation8 + $0xbec] sm:$0xf0]  ;;  %v11407_v37 = vor.u32 %v13798_v27, %v11406_v30  ;;  %v11246_v55 = vld [vmem:[#allocation8 + $0x880] sm:$0xf] }
 0x1bf   :  { %7236 = vmatpush.bf16.msra.mxu0 %v10703_v24  ;;  %v13766_v24 = vld [vmem:[#allocation8 + $0x8cc] sm:$0xf0]  ;;  %v11679_v48 = vor.u32 %v13866_v14, %v11678_v13  ;;  %v14714_v28 = vpack.c.bf16 %v2905_v6, %v2905_v6  ;;  %v11374_v62 = vld [vmem:[#allocation8 + $0x980] sm:$0xf]  ;;  %v11247_v21 = vor.u32 %v13758_v60, %v11246_v55 }
 0x1c0   :  { %7249 = vmatpush.bf16.msra.mxu1 %v10831_v8  ;;  %v11534_v8 = vld [vmem:[#allocation8 + $0xac0] sm:$0xf]  ;;  %v11279_v9 = vor.u32 %v13766_v24, %v11278_v23  ;;  %v13754_v13 = vld [vmem:[#allocation8 + $0x86c] sm:$0xf0] }
 0x1c1   :  { %7262 = vmatpush.bf16.msra.mxu2 %v10959_v29  ;;  %v13830_v29 = vld [vmem:[#allocation8 + $0xacc] sm:$0xf0]  ;;  %v11502_v2 = vld [vmem:[#allocation8 + $0xa80] sm:$0xf] }
 0x1c2   :  { %7275 = vmatpush.bf16.msra.mxu3 %v11087_v35  ;;  %v14718_v35 = vpack.c.bf16 %v2907_v16, %v2907_v16  ;;  %v11535_v38 = vor.u32 %v13830_v29, %v11534_v8  ;;  %v11630_v4 = vld [vmem:[#allocation8 + $0xb80] sm:$0xf]  ;;  %v13786_v16 = vld [vmem:[#allocation8 + $0x96c] sm:$0xf0] }
 0x1c3   :  { %7237 = vmatpush.bf16.msra.mxu0 %v10687_v42  ;;  %v14720_v42 = vpack.c.bf16 %v2908_v17, %v2908_v17  ;;  %v11230_v6 = vld [vmem:[#allocation8 + $0x860] sm:$0xf]  ;;  %v13850_v30 = vld [vmem:[#allocation8 + $0xb6c] sm:$0xf0] }
 0x1c4   :  { %7250 = vmatpush.bf16.msra.mxu1 %v10815_v45  ;;  %v13826_v45 = vld [vmem:[#allocation8 + $0xaac] sm:$0xf0]  ;;  %v11358_v14 = vld [vmem:[#allocation8 + $0x960] sm:$0xf]  ;;  %v11231_v27 = vor.u32 %v13754_v13, %v11230_v6 }
 0x1c5   :  { %7263 = vmatpush.bf16.msra.mxu2 %v10943_v47  ;;  %v14723_v47 = vld [vmem:[#allocation7 + $0x10] sm:$0x3f]  ;;  %v11519_v58 = vor.u32 %v13826_v45, %v11518_v44  ;;  %v11614_v24 = vld [vmem:[#allocation8 + $0xb60] sm:$0xf]  ;;  %v11359_v8 = vor.u32 %v13786_v16, %v11358_v14  ;;  %v13846_v45 = vld [vmem:[#allocation8 + $0xb4c] sm:$0xf0] }
 0x1c6   :  { %7276 = vmatpush.bf16.msra.mxu3 %v11071_v57  ;;  %v11391_v57 = vor.u32 %v13794_v26, %v11390_v41  ;;  %v541_v63 = vperm.slane %v14723_v47, 0  ;;  %v542_v23 = vperm.slane %v14723_v47, 1  ;;  %v11214_v32 = vld [vmem:[#allocation8 + $0x840] sm:$0xf]  ;;  %v13814_v41 = vld [vmem:[#allocation8 + $0xa4c] sm:$0xf0] }
 0x1c7   :  { %7238 = vmatpush.bf16.msra.mxu0 %v10671_v3  ;;  %v13822_v3 = vld [vmem:[#allocation8 + $0xa8c] sm:$0xf0]  ;;  %v2754_v10 = vpop.f32.mrf.mxu0  ;;  %v11470_v40 = vld [vmem:[#allocation8 + $0xa40] sm:$0xf]  ;;  %v11215_v51 = vor.u32 %v13750_v33, %v11214_v32 }
 0x1c8   :  { %7251 = vmatpush.bf16.msra.mxu1 %v10799_v11  ;;  %v11375_v11 = vor.u32 %v13790_v1, %v11374_v62  ;;  %v2755_v17 = vadd.f32 %v2754_v10, %v541_v63  ;;  %v11598_v44 = vld [vmem:[#allocation8 + $0xb40] sm:$0xf]  ;;  %v13746_v60 = vld [vmem:[#allocation8 + $0x82c] sm:$0xf0] }
 0x1c9   :  { %7264 = vmatpush.bf16.msra.mxu2 %v10927_v12  ;;  %v11503_v12 = vor.u32 %v13822_v3, %v11502_v2  ;;  %v11326_v62 = vld [vmem:[#allocation8 + $0x920] sm:$0xf]  ;;  %v13778_v1 = vld [vmem:[#allocation8 + $0x92c] sm:$0xf0] }
 0x1ca   :  { %7277 = vmatpush.bf16.msra.mxu3 %v11055_v18  ;;  %7239 = vmatmul.bf16.vlgmr.msra.gmra.mxu0 %v14714_v28  ;;  %v2767_v18 = vpop.f32.mrf.mxu1  ;;  %v11454_v2 = vld [vmem:[#allocation8 + $0xa20] sm:$0xf]  ;;  %v13810_v3 = vld [vmem:[#allocation8 + $0xa2c] sm:$0xf0] }
 0x1cb   :  { %7283 = vmatpush.bf16.msrb.mxu0 %v11295_v56  ;;  %7252 = vmatmul.bf16.vlgmr.msra.gmra.mxu1 %v14716_v46  ;;  %v11631_v56 = vor.u32 %v13854_v59, %v11630_v4  ;;  %v11582_v4 = vld [vmem:[#allocation8 + $0xb20] sm:$0xf]  ;;  %v13842_v59 = vld [vmem:[#allocation8 + $0xb2c] sm:$0xf0] }
 0x1cc   :  { %7296 = vmatpush.bf16.msrb.mxu1 %v11423_v19  ;;  %7265 = vmatmul.bf16.vlgmr.msra.gmra.mxu2 %v14718_v35  ;;  %v11486_v19 = vld [vmem:[#allocation8 + $0xa60] sm:$0xf]  ;;  %v13742_v10 = vld [vmem:[#allocation8 + $0x80c] sm:$0xf0] }
 0x1cd   :  { %7309 = vmatpush.bf16.msrb.mxu2 %v11551_v20  ;;  %7278 = vmatmul.bf16.vlgmr.msra.gmra.mxu3 %v14720_v42  ;;  %v13818_v20 = vld [vmem:[#allocation8 + $0xa6c] sm:$0xf0]  ;;  %v11182_v6 = vld [vmem:[#allocation8 + $0x800] sm:$0xf] }
 0x1ce   :  { %7322 = vmatpush.bf16.msrb.mxu3 %v11679_v48  ;;  %v14730_v48 = vadd.f32 %v2767_v18, %v2755_v17  ;;  %v11487_v29 = vor.u32 %v13818_v20, %v11486_v19  ;;  %v11310_v13 = vld [vmem:[#allocation8 + $0x900] sm:$0xf]  ;;  %v13774_v14 = vld [vmem:[#allocation8 + $0x90c] sm:$0xf0]  ;;  %v11583_v18 = vor.u32 %v13842_v59, %v11582_v4 }
 0x1cf   :  { %7284 = vmatpush.bf16.msrb.mxu0 %v11279_v9  ;;  %v11342_v9 = vld [vmem:[#allocation8 + $0x940] sm:$0xf]  ;;  %v2780_v34 = vpop.f32.mrf.mxu2  ;;  %v13838_v20 = vld [vmem:[#allocation8 + $0xb0c] sm:$0xf0] }
 0x1d0   :  { %7297 = vmatpush.bf16.msrb.mxu1 %v11407_v37  ;;  %v11615_v37 = vor.u32 %v13850_v30, %v11614_v24  ;;  %v2781_v26 = vadd.f32 %v2780_v34, %v542_v23  ;;  %v11438_v16 = vld [vmem:[#allocation8 + $0xa00] sm:$0xf]  ;;  %v13898_v30 = vld [vmem:[#allocation8 + $0xcec] sm:$0xf0]  ;;  %v2910_v34 = vmax.f32 %v14666_v50, 0.0 }
 0x1d1   :  { %7310 = vmatpush.bf16.msrb.mxu2 %v11535_v38  ;;  %v13782_v38 = vld [vmem:[#allocation8 + $0x94c] sm:$0xf0]  ;;  %v11566_v19 = vld [vmem:[#allocation8 + $0xb00] sm:$0xf] }
 0x1d2   :  { %7323 = vmatpush.bf16.msrb.mxu3 %v11663_v43  ;;  %v2793_v43 = vpop.f32.mrf.mxu3  ;;  %v11343_v55 = vor.u32 %v13782_v38, %v11342_v9  ;;  %v2769_v63 = vpop.f32.mrf.mxu1  ;;  %v11806_v24 = vld [vmem:[#allocation8 + $0xce0] sm:$0xf]  ;;  %v13962_v33 = vld [vmem:[#allocation8 + $0xeec] sm:$0xf0]  ;;  %v2909_v9 = vmax.f32 %v14664_v31, 0.0 }
 0x1d3   :  { %7285 = vmatpush.bf16.msrb.mxu0 %v11263_v54  ;;  %v14732_v52 = vadd.f32 %v2793_v43, %v2781_v26  ;;  %v2756_v54 = vpop.f32.mrf.mxu0  ;;  %v12062_v32 = vld [vmem:[#allocation8 + $0xee0] sm:$0xf]  ;;  %v2911_v26 = vmax.f32 %v14674_v39, 0.0  ;;  %v2912_v43 = vmax.f32 %v14676_v61, 0.0  ;;  %v14740_v61 = vpack.c.bf16 %v2910_v34, %v2910_v34 }
 0x1d4   :  { %7298 = vmatpush.bf16.msrb.mxu1 %v11391_v57  ;;  %v11471_v57 = vor.u32 %v13814_v41, %v11470_v40  ;;  %v12190_v40 = vld [vmem:[#allocation8 + $0xfe0] sm:$0xf]  ;;  %v13994_v41 = vld [vmem:[#allocation8 + $0xfec] sm:$0xf0]  ;;  %v12063_v54 = vor.u32 %v13962_v33, %v12062_v32  ;;  %v14738_v39 = vpack.c.bf16 %v2909_v9, %v2909_v9 }
 0x1d5   :  { %7311 = vmatpush.bf16.msrb.mxu2 %v11519_v58  ;;  %v11198_v58 = vld [vmem:[#allocation8 + $0x820] sm:$0xf]  ;;  %v12191_v50 = vor.u32 %v13994_v41, %v12190_v40  ;;  %v13982_v33 = vld [vmem:[#allocation8 + $0xf8c] sm:$0xf0] }
 0x1d6   :  { %7324 = vmatpush.bf16.msrb.mxu3 %v11647_v0  ;;  %v11599_v0 = vor.u32 %v13846_v45, %v11598_v44  ;;  %v11567_v44 = vor.u32 %v13838_v20, %v11566_v19  ;;  %v11807_v45 = vor.u32 %v13898_v30, %v11806_v24  ;;  %v11918_v31 = vld [vmem:[#allocation8 + $0xdc0] sm:$0xf]  ;;  %v13882_v41 = vld [vmem:[#allocation8 + $0xc6c] sm:$0xf0] }
 0x1d7   :  { %7286 = vmatpush.bf16.msrb.mxu0 %v11247_v21  ;;  %v11199_v21 = vor.u32 %v13746_v60, %v11198_v58  ;;  %v2782_v17 = vpop.f32.mrf.mxu2  ;;  %v13926_v58 = vld [vmem:[#allocation8 + $0xdcc] sm:$0xf0]  ;;  %v12046_v60 = vld [vmem:[#allocation8 + $0xec0] sm:$0xf] }
 0x1d8   :  { %7299 = vmatpush.bf16.msrb.mxu1 %v11375_v11  ;;  %v11327_v11 = vor.u32 %v13778_v1, %v11326_v62  ;;  %v13958_v62 = vld [vmem:[#allocation8 + $0xecc] sm:$0xf0]  ;;  %v12174_v63 = vld [vmem:[#allocation8 + $0xfc0] sm:$0xf] }
 0x1d9   :  { %7312 = vmatpush.bf16.msrb.mxu2 %v11503_v12  ;;  %v11455_v12 = vor.u32 %v13810_v3, %v11454_v2  ;;  %v14742_v2 = vpack.c.bf16 %v2911_v26, %v2911_v26  ;;  %v11919_v3 = vor.u32 %v13926_v58, %v11918_v31  ;;  %v12047_v4 = vor.u32 %v13958_v62, %v12046_v60  ;;  %v11774_v59 = vld [vmem:[#allocation8 + $0xca0] sm:$0xf]  ;;  %v13986_v17 = vld [vmem:[#allocation8 + $0xfac] sm:$0xf0] }
 0x1da   :  { %7325 = vmatpush.bf16.msrb.mxu3 %v11631_v56  ;;  %v13806_v56 = vld [vmem:[#allocation8 + $0xa0c] sm:$0xf0]  ;;  %v2795_v23 = vpop.f32.mrf.mxu3  ;;  %v11758_v20 = vld [vmem:[#allocation8 + $0xc80] sm:$0xf] }
 0x1db   :  { %7287 = vmatpush.bf16.msrb.mxu0 %v11231_v27  ;;  %v11934_v27 = vld [vmem:[#allocation8 + $0xde0] sm:$0xf]  ;;  %v11439_v38 = vor.u32 %v13806_v56, %v11438_v16  ;;  %v13886_v23 = vld [vmem:[#allocation8 + $0xc8c] sm:$0xf0] }
 0x1dc   :  { %7300 = vmatpush.bf16.msrb.mxu1 %v11359_v8  ;;  %v11183_v8 = vor.u32 %v13742_v10, %v11182_v6  ;;  %v11902_v6 = vld [vmem:[#allocation8 + $0xda0] sm:$0xf]  ;;  %v14744_v10 = vpack.c.bf16 %v2912_v43, %v2912_v43  ;;  %v11759_v9 = vor.u32 %v13886_v23, %v11758_v20  ;;  %v13878_v62 = vld [vmem:[#allocation8 + $0xc4c] sm:$0xf0] }
 0x1dd   :  { %7313 = vmatpush.bf16.msrb.mxu2 %v11487_v29  ;;  %v13930_v29 = vld [vmem:[#allocation8 + $0xdec] sm:$0xf0]  ;;  %v12158_v16 = vld [vmem:[#allocation8 + $0xfa0] sm:$0xf] }
 0x1de   :  { %7326 = vmatpush.bf16.msrb.mxu3 %v11615_v37  ;;  %v11311_v37 = vor.u32 %v13774_v14, %v11310_v13  ;;  %v12030_v13 = vld [vmem:[#allocation8 + $0xea0] sm:$0xf]  ;;  %v13954_v14 = vld [vmem:[#allocation8 + $0xeac] sm:$0xf0]  ;;  %v12159_v30 = vor.u32 %v13986_v17, %v12158_v16 }
 0x1df   :  { %7288 = vmatpush.bf16.msrb.mxu0 %v11215_v51  ;;  %v11935_v51 = vor.u32 %v13930_v29, %v11934_v27  ;;  %v12031_v19 = vor.u32 %v13954_v14, %v12030_v13  ;;  %v11886_v24 = vld [vmem:[#allocation8 + $0xd80] sm:$0xf]  ;;  %v13918_v27 = vld [vmem:[#allocation8 + $0xd8c] sm:$0xf0] }
 0x1e0   :  { %7301 = vmatpush.bf16.msrb.mxu1 %v11343_v55  ;;  %v11790_v55 = vld [vmem:[#allocation8 + $0xcc0] sm:$0xf]  ;;  %v13950_v29 = vld [vmem:[#allocation8 + $0xe8c] sm:$0xf0] }
 0x1e1   :  { %7314 = vmatpush.bf16.msrb.mxu2 %v11471_v57  ;;  %v13894_v57 = vld [vmem:[#allocation8 + $0xccc] sm:$0xf0]  ;;  %v12142_v32 = vld [vmem:[#allocation8 + $0xf80] sm:$0xf] }
 0x1e2   :  { %7327 = vmatpush.bf16.msrb.mxu3 %v11599_v0  ;;  %v13990_v0 = vld [vmem:[#allocation8 + $0xfcc] sm:$0xf0]  ;;  %v11791_v1 = vor.u32 %v13894_v57, %v11790_v55  ;;  %v11742_v40 = vld [vmem:[#allocation8 + $0xc60] sm:$0xf] }
 0x1e3   :  { %7289 = vmatpush.bf16.msrb.mxu0 %v11199_v21  ;;  %v13890_v21 = vld [vmem:[#allocation8 + $0xcac] sm:$0xf0]  ;;  %v11870_v26 = vld [vmem:[#allocation8 + $0xd60] sm:$0xf]  ;;  %v11743_v31 = vor.u32 %v13882_v41, %v11742_v40 }
 0x1e4   :  { %7302 = vmatpush.bf16.msrb.mxu1 %v11327_v11  ;;  %v12175_v11 = vor.u32 %v13990_v0, %v12174_v63  ;;  %v12126_v55 = vld [vmem:[#allocation8 + $0xf60] sm:$0xf]  ;;  %v13978_v57 = vld [vmem:[#allocation8 + $0xf6c] sm:$0xf0] }
 0x1e5   :  { %7315 = vmatpush.bf16.msrb.mxu2 %v11455_v12  ;;  %v13922_v12 = vld [vmem:[#allocation8 + $0xdac] sm:$0xf0]  ;;  %v11726_v60 = vld [vmem:[#allocation8 + $0xc40] sm:$0xf] }
 0x1e6   :  { %7328 = vmatpush.bf16.msrb.mxu3 %v11583_v18  ;;  %v11775_v18 = vor.u32 %v13890_v21, %v11774_v59  ;;  %v11903_v56 = vor.u32 %v13922_v12, %v11902_v6  ;;  %v11854_v63 = vld [vmem:[#allocation8 + $0xd40] sm:$0xf]  ;;  %v13942_v59 = vld [vmem:[#allocation8 + $0xe4c] sm:$0xf0]  ;;  %v11727_v12 = vor.u32 %v13878_v62, %v11726_v60 }
 0x1e7   :  { %7290 = vmatpush.bf16.msrb.mxu0 %v11183_v8  ;;  %v12014_v8 = vld [vmem:[#allocation8 + $0xe80] sm:$0xf]  ;;  %v14750_v34 = vpop.f32.mrf.mxu0  ;;  %v13906_v23 = vld [vmem:[#allocation8 + $0xd2c] sm:$0xf0] }
 0x1e8   :  { %7303 = vmatpush.bf16.msrb.mxu1 %v11311_v37  ;;  %v11887_v37 = vor.u32 %v13918_v27, %v11886_v24  ;;  %v14752_v43 = vpop.f32.mrf.mxu1  ;;  %v12110_v6 = vld [vmem:[#allocation8 + $0xf40] sm:$0xf]  ;;  %v13902_v40 = vld [vmem:[#allocation8 + $0xd0c] sm:$0xf0] }
 0x1e9   :  { %7316 = vmatpush.bf16.msrb.mxu2 %v11439_v38  ;;  %v12015_v38 = vor.u32 %v13950_v29, %v12014_v8  ;;  %v11710_v17 = vld [vmem:[#allocation8 + $0xc20] sm:$0xf]  ;;  %v13970_v8 = vld [vmem:[#allocation8 + $0xf2c] sm:$0xf0] }
 0x1ea   :  { %7329 = vmatpush.bf16.msrb.mxu3 %v11567_v44  ;;  %7291 = vmatmul.bf16.vlgmr.msrb.gmra.mxu0 %v14738_v39  ;;  %v12143_v44 = vor.u32 %v13982_v33, %v12142_v32  ;;  %v11966_v24 = vld [vmem:[#allocation8 + $0xe20] sm:$0xf]  ;;  %v13870_v33 = vld [vmem:[#allocation8 + $0xc0c] sm:$0xf0] }
 0x1eb   :  { %7335 = vmatpush.bf16.msra.mxu0 %v11807_v45  ;;  %7304 = vmatmul.bf16.vlgmr.msrb.gmra.mxu1 %v14740_v61  ;;  %v13914_v45 = vld [vmem:[#allocation8 + $0xd6c] sm:$0xf0]  ;;  %v12094_v27 = vld [vmem:[#allocation8 + $0xf20] sm:$0xf] }
 0x1ec   :  { %7348 = vmatpush.bf16.msra.mxu1 %v11935_v51  ;;  %7317 = vmatmul.bf16.vlgmr.msrb.gmra.mxu2 %v14742_v2  ;;  %v11998_v51 = vld [vmem:[#allocation8 + $0xe60] sm:$0xf]  ;;  %v14058_v60 = vld [vmem:[#allocation8 + $0x11ec] sm:$0xf0] }
 0x1ed   :  { %7361 = vmatpush.bf16.msra.mxu2 %v12063_v54  ;;  %7330 = vmatmul.bf16.vlgmr.msrb.gmra.mxu3 %v14744_v10  ;;  %v13946_v54 = vld [vmem:[#allocation8 + $0xe6c] sm:$0xf0]  ;;  %v11694_v32 = vld [vmem:[#allocation8 + $0xc00] sm:$0xf] }
 0x1ee   :  { %7374 = vmatpush.bf16.msra.mxu3 %v12191_v50  ;;  %v11871_v50 = vor.u32 %v13914_v45, %v11870_v26  ;;  %v11999_v58 = vor.u32 %v13946_v54, %v11998_v51  ;;  %v11950_v41 = vld [vmem:[#allocation8 + $0xe00] sm:$0xf]  ;;  %v13934_v45 = vld [vmem:[#allocation8 + $0xe0c] sm:$0xf0] }
 0x1ef   :  { %7336 = vmatpush.bf16.msra.mxu0 %v11791_v1  ;;  %v14754_v0 = vpop.f32.mrf.mxu2  ;;  %v12127_v1 = vor.u32 %v13978_v57, %v12126_v55  ;;  %v2808_v13 = vpop.f32.mrf.mxu0  ;;  %v12078_v51 = vld [vmem:[#allocation8 + $0xf00] sm:$0xf]  ;;  %v13966_v54 = vld [vmem:[#allocation8 + $0xf0c] sm:$0xf0] }
 0x1f0   :  { %7349 = vmatpush.bf16.msra.mxu1 %v11919_v3  ;;  %v13910_v3 = vld [vmem:[#allocation8 + $0xd4c] sm:$0xf0]  ;;  %v14756_v21 = vpop.f32.mrf.mxu3  ;;  %v12318_v57 = vld [vmem:[#allocation8 + $0x10e0] sm:$0xf]  ;;  %v2916_v13 = vmax.f32 %v14708_v25, 0.0 }
 0x1f1   :  { %7362 = vmatpush.bf16.msra.mxu2 %v12047_v4  ;;  %v11982_v4 = vld [vmem:[#allocation8 + $0xe40] sm:$0xf]  ;;  %v11855_v14 = vor.u32 %v13910_v3, %v11854_v63  ;;  %v14090_v63 = vld [vmem:[#allocation8 + $0x12ec] sm:$0xf0]  ;;  %v2914_v3 = vmax.f32 %v14686_v7, 0.0 }
 0x1f2   :  { %7375 = vmatpush.bf16.msra.mxu3 %v12175_v11  ;;  %v13974_v11 = vld [vmem:[#allocation8 + $0xf4c] sm:$0xf0]  ;;  %v11983_v16 = vor.u32 %v13942_v59, %v11982_v4  ;;  %v12574_v62 = vld [vmem:[#allocation8 + $0x12e0] sm:$0xf]  ;;  %v11951_v59 = vor.u32 %v13934_v45, %v11950_v41 }
 0x1f3   :  { %7337 = vmatpush.bf16.msra.mxu0 %v11775_v18  ;;  %v13874_v18 = vld [vmem:[#allocation8 + $0xc2c] sm:$0xf0]  ;;  %v12111_v20 = vor.u32 %v13974_v11, %v12110_v6  ;;  %v12702_v6 = vld [vmem:[#allocation8 + $0x13e0] sm:$0xf]  ;;  %v14764_v25 = vpack.c.bf16 %v2914_v3, %v2914_v3 }
 0x1f4   :  { %7350 = vmatpush.bf16.msra.mxu1 %v11903_v56  ;;  %v11838_v56 = vld [vmem:[#allocation8 + $0xd20] sm:$0xf]  ;;  %v11711_v29 = vor.u32 %v13874_v18, %v11710_v17  ;;  %v14122_v11 = vld [vmem:[#allocation8 + $0x13ec] sm:$0xf0]  ;;  %v12575_v18 = vor.u32 %v14090_v63, %v12574_v62 }
 0x1f5   :  { %7363 = vmatpush.bf16.msra.mxu2 %v12031_v19  ;;  %v2821_v19 = vpop.f32.mrf.mxu1  ;;  %v12703_v7 = vor.u32 %v14122_v11, %v12702_v6  ;;  %v14082_v45 = vld [vmem:[#allocation8 + $0x12ac] sm:$0xf0] }
 0x1f6   :  { %7376 = vmatpush.bf16.msra.mxu3 %v12159_v30  ;;  %v13938_v30 = vld [vmem:[#allocation8 + $0xe2c] sm:$0xf0] }
 0x1f7   :  { %7338 = vmatpush.bf16.msra.mxu0 %v11759_v9  ;;  %v11839_v9 = vor.u32 %v13906_v23, %v11838_v56  ;;  %v2834_v26 = vpop.f32.mrf.mxu2  ;;  %v12302_v56 = vld [vmem:[#allocation8 + $0x10c0] sm:$0xf]  ;;  %v14022_v19 = vld [vmem:[#allocation8 + $0x10cc] sm:$0xf0] }
 0x1f8   :  { %7351 = vmatpush.bf16.msra.mxu1 %v11887_v37  ;;  %v11967_v37 = vor.u32 %v13938_v30, %v11966_v24  ;;  %v2847_v55 = vpop.f32.mrf.mxu3  ;;  %v12558_v23 = vld [vmem:[#allocation8 + $0x12c0] sm:$0xf]  ;;  %v14086_v24 = vld [vmem:[#allocation8 + $0x12cc] sm:$0xf0] }
 0x1f9   :  { %7364 = vmatpush.bf16.msra.mxu2 %v12015_v38  ;;  %v11822_v38 = vld [vmem:[#allocation8 + $0xd00] sm:$0xf]  ;;  %v14050_v26 = vld [vmem:[#allocation8 + $0x11ac] sm:$0xf0] }
 0x1fa   :  { %7377 = vmatpush.bf16.msra.mxu3 %v12143_v44  ;;  %v12095_v44 = vor.u32 %v13970_v8, %v12094_v27  ;;  %v11823_v4 = vor.u32 %v13902_v40, %v11822_v38  ;;  %v12686_v30 = vld [vmem:[#allocation8 + $0x13c0] sm:$0xf]  ;;  %v14118_v27 = vld [vmem:[#allocation8 + $0x13cc] sm:$0xf0]  ;;  %v12303_v8 = vor.u32 %v14022_v19, %v12302_v56  ;;  %v14768_v40 = vpack.c.bf16 %v2916_v13, %v2916_v13 }
 0x1fb   :  { %7339 = vmatpush.bf16.msra.mxu0 %v11743_v31  ;;  %v14026_v31 = vld [vmem:[#allocation8 + $0x10ec] sm:$0xf0]  ;;  %v12414_v38 = vld [vmem:[#allocation8 + $0x11a0] sm:$0xf]  ;;  %v12687_v41 = vor.u32 %v14118_v27, %v12686_v30  ;;  %v544_v30 = vperm.slane %v14723_v47, 3 }
 0x1fc   :  { %7352 = vmatpush.bf16.msra.mxu1 %v11871_v50  ;;  %v12446_v50 = vld [vmem:[#allocation8 + $0x11e0] sm:$0xf]  ;;  %v14046_v63 = vld [vmem:[#allocation8 + $0x118c] sm:$0xf0] }
 0x1fd   :  { %7365 = vmatpush.bf16.msra.mxu2 %v11999_v58  ;;  %v11695_v58 = vor.u32 %v13870_v33, %v11694_v32  ;;  %v12447_v17 = vor.u32 %v14058_v60, %v12446_v50  ;;  %v12559_v33 = vor.u32 %v14086_v24, %v12558_v23  ;;  %v12270_v50 = vld [vmem:[#allocation8 + $0x1080] sm:$0xf]  ;;  %v14078_v3 = vld [vmem:[#allocation8 + $0x128c] sm:$0xf0]  ;;  %v543_v24 = vperm.slane %v14723_v47, 2 }
 0x1fe   :  { %7378 = vmatpush.bf16.msra.mxu3 %v12127_v1  ;;  %v2913_v1 = vmax.f32 %v14684_v49, 0.0  ;;  %v12430_v49 = vld [vmem:[#allocation8 + $0x11c0] sm:$0xf]  ;;  %v14042_v19 = vld [vmem:[#allocation8 + $0x116c] sm:$0xf0] }
 0x1ff   :  { %7340 = vmatpush.bf16.msra.mxu0 %v11727_v12  ;;  %v2915_v12 = vmax.f32 %v14706_v5, 0.0  ;;  %v12398_v60 = vld [vmem:[#allocation8 + $0x1180] sm:$0xf]  ;;  %v14106_v23 = vld [vmem:[#allocation8 + $0x136c] sm:$0xf0] }
 0x200   :  { %7353 = vmatpush.bf16.msra.mxu1 %v11855_v14  ;;  %v12079_v14 = vor.u32 %v13966_v54, %v12078_v51  ;;  %v14762_v5 = vpack.c.bf16 %v2913_v1, %v2913_v1  ;;  %v12670_v51 = vld [vmem:[#allocation8 + $0x13a0] sm:$0xf]  ;;  %v14114_v54 = vld [vmem:[#allocation8 + $0x13ac] sm:$0xf0]  ;;  %v12399_v13 = vor.u32 %v14046_v63, %v12398_v60 }
 0x201   :  { %7366 = vmatpush.bf16.msra.mxu2 %v11983_v16  ;;  %v12319_v16 = vor.u32 %v14026_v31, %v12318_v57  ;;  %v12415_v57 = vor.u32 %v14050_v26, %v12414_v38  ;;  %v12671_v62 = vor.u32 %v14114_v54, %v12670_v51  ;;  %v12526_v1 = vld [vmem:[#allocation8 + $0x1280] sm:$0xf]  ;;  %v14102_v54 = vld [vmem:[#allocation8 + $0x134c] sm:$0xf0] }
 0x202   :  { %7379 = vmatpush.bf16.msra.mxu3 %v12111_v20  ;;  %v14054_v20 = vld [vmem:[#allocation8 + $0x11cc] sm:$0xf0]  ;;  %v12494_v26 = vld [vmem:[#allocation8 + $0x1240] sm:$0xf] }
 0x203   :  { %7341 = vmatpush.bf16.msra.mxu0 %v11711_v29  ;;  %v14766_v29 = vpack.c.bf16 %v2915_v12, %v2915_v12  ;;  %v12431_v32 = vor.u32 %v14054_v20, %v12430_v49  ;;  %v12510_v49 = vld [vmem:[#allocation8 + $0x1260] sm:$0xf]  ;;  %v14002_v63 = vld [vmem:[#allocation8 + $0x102c] sm:$0xf0] }
 0x204   :  { %7354 = vmatpush.bf16.msra.mxu1 %v11839_v9  ;;  %v12286_v9 = vld [vmem:[#allocation8 + $0x10a0] sm:$0xf] }
 0x205   :  { %7367 = vmatpush.bf16.msra.mxu2 %v11967_v37  ;;  %v14018_v37 = vld [vmem:[#allocation8 + $0x10ac] sm:$0xf0]  ;;  %v12638_v20 = vld [vmem:[#allocation8 + $0x1360] sm:$0xf] }
 0x206   :  { %7380 = vmatpush.bf16.msra.mxu3 %v12095_v44  ;;  %v12542_v44 = vld [vmem:[#allocation8 + $0x12a0] sm:$0xf]  ;;  %v12287_v55 = vor.u32 %v14018_v37, %v12286_v9  ;;  %v14006_v9 = vld [vmem:[#allocation8 + $0x104c] sm:$0xf0]  ;;  %v12639_v38 = vor.u32 %v14106_v23, %v12638_v20 }
 0x207   :  { %7342 = vmatpush.bf16.msra.mxu0 %v11695_v58  ;;  %v12543_v31 = vor.u32 %v14082_v45, %v12542_v44  ;;  %v14014_v58 = vld [vmem:[#allocation8 + $0x108c] sm:$0xf0]  ;;  %v14774_v6 = vpop.f32.mrf.mxu0  ;;  %v12366_v37 = vld [vmem:[#allocation8 + $0x1140] sm:$0xf] }
 0x208   :  { %7355 = vmatpush.bf16.msra.mxu1 %v11823_v4  ;;  %v12654_v4 = vld [vmem:[#allocation8 + $0x1380] sm:$0xf]  ;;  %v12271_v11 = vor.u32 %v14014_v58, %v12270_v50  ;;  %v14776_v12 = vpop.f32.mrf.mxu1  ;;  %v14070_v44 = vld [vmem:[#allocation8 + $0x124c] sm:$0xf0] }
 0x209   :  { %7368 = vmatpush.bf16.msra.mxu2 %v11951_v59  ;;  %v14110_v59 = vld [vmem:[#allocation8 + $0x138c] sm:$0xf0]  ;;  %v12622_v51 = vld [vmem:[#allocation8 + $0x1340] sm:$0xf]  ;;  %v12495_v60 = vor.u32 %v14070_v44, %v12494_v26 }
 0x20a   :  { %7381 = vmatpush.bf16.msra.mxu3 %v12079_v14  ;;  %7343 = vmatmul.bf16.vlgmr.msra.gmra.mxu0 %v14762_v5  ;;  %v12527_v14 = vor.u32 %v14078_v3, %v12526_v1  ;;  %v12655_v56 = vor.u32 %v14110_v59, %v12654_v4  ;;  %v12350_v1 = vld [vmem:[#allocation8 + $0x1120] sm:$0xf]  ;;  %v2807_v3 = vadd.f32 %v14750_v34, %v543_v24  ;;  %v14030_v23 = vld [vmem:[#allocation8 + $0x110c] sm:$0xf0] }
 0x20b   :  { %7387 = vmatpush.bf16.msrb.mxu0 %v12319_v16  ;;  %7356 = vmatmul.bf16.vlgmr.msra.gmra.mxu1 %v14764_v25  ;;  %v12254_v16 = vld [vmem:[#allocation8 + $0x1060] sm:$0xf]  ;;  %v2833_v4 = vadd.f32 %v14754_v0, %v544_v30  ;;  %v12623_v59 = vor.u32 %v14102_v54, %v12622_v51  ;;  %v14186_v44 = vld [vmem:[#allocation8 + $0x15ec] sm:$0xf0]  ;;  %v13512_v51 = vld [vmem:[#allocation8 + $0xe4] sm:$0xf] }
 0x20c   :  { %7400 = vmatpush.bf16.msrb.mxu1 %v12447_v17  ;;  %7369 = vmatmul.bf16.vlgmr.msra.gmra.mxu2 %v14766_v29  ;;  %v14010_v17 = vld [vmem:[#allocation8 + $0x106c] sm:$0xf0]  ;;  %v12334_v20 = vld [vmem:[#allocation8 + $0x1100] sm:$0xf]  ;;  %v2820_v0 = vadd.f32 %v14752_v43, %v2807_v3  ;;  %v10272_v54 = vld [vmem:[#allocation8 + $0xf0] sm:$0xf0] }
 0x20d   :  { %7413 = vmatpush.bf16.msrb.mxu2 %v12575_v18  ;;  %7382 = vmatmul.bf16.vlgmr.msra.gmra.mxu3 %v14768_v40  ;;  %v12382_v18 = vld [vmem:[#allocation8 + $0x1160] sm:$0xf]  ;;  %v12255_v27 = vor.u32 %v14010_v17, %v12254_v16  ;;  %v14098_v17 = vld [vmem:[#allocation8 + $0x132c] sm:$0xf0]  ;;  %v2846_v24 = vadd.f32 %v14756_v21, %v2833_v4  ;;  %v2918_v43 = vmax.f32 %v14732_v52, 0.0  ;;  %v12335_v21 = vor.u32 %v14030_v23, %v12334_v20 }
 0x20e   :  { %7426 = vmatpush.bf16.msrb.mxu3 %v12703_v7  ;;  %v14074_v7 = vld [vmem:[#allocation8 + $0x126c] sm:$0xf0]  ;;  %v12606_v16 = vld [vmem:[#allocation8 + $0x1320] sm:$0xf]  ;;  %v10275_v4 = vor.u32 %v13512_v51, %v10272_v54  ;;  %v13508_v52 = vld [vmem:[#allocation8 + $0xc4] sm:$0xf] }
 0x20f   :  { %7388 = vmatpush.bf16.msrb.mxu0 %v12303_v8  ;;  %v12383_v8 = vor.u32 %v14042_v19, %v12382_v18  ;;  %v14780_v45 = vpop.f32.mrf.mxu2  ;;  %v13998_v19 = vld [vmem:[#allocation8 + $0x100c] sm:$0xf0]  ;;  %v12462_v34 = vld [vmem:[#allocation8 + $0x1200] sm:$0xf]  ;;  %v12607_v30 = vor.u32 %v14098_v17, %v12606_v16  ;;  %v10256_v16 = vld [vmem:[#allocation8 + $0xd0] sm:$0xf0] }
 0x210   :  { %7401 = vmatpush.bf16.msrb.mxu1 %v12431_v32  ;;  %v12511_v32 = vor.u32 %v14074_v7, %v12510_v49  ;;  %v2873_v50 = vpop.f32.mrf.mxu1  ;;  %v13540_v17 = vld [vmem:[#allocation8 + $0x1c4] sm:$0xf]  ;;  %v12782_v54 = vld [vmem:[#allocation8 + $0x1480] sm:$0xf] }
 0x211   :  { %7414 = vmatpush.bf16.msrb.mxu2 %v12559_v33  ;;  %v12238_v33 = vld [vmem:[#allocation8 + $0x1040] sm:$0xf]  ;;  %v13544_v50 = vld [vmem:[#allocation8 + $0x1e4] sm:$0xf] }
 0x212   :  { %7427 = vmatpush.bf16.msrb.mxu3 %v12687_v41  ;;  %v14038_v41 = vld [vmem:[#allocation8 + $0x114c] sm:$0xf0] }
 0x213   :  { %7389 = vmatpush.bf16.msrb.mxu0 %v12287_v55  ;;  %v14782_v55 = vpop.f32.mrf.mxu3  ;;  %v12367_v58 = vor.u32 %v14038_v41, %v12366_v37  ;;  %v14154_v37 = vld [vmem:[#allocation8 + $0x14ec] sm:$0xf0] }
 0x214   :  { %7402 = vmatpush.bf16.msrb.mxu1 %v12415_v57  ;;  %v2860_v57 = vpop.f32.mrf.mxu0 }
 0x215   :  { %7415 = vmatpush.bf16.msrb.mxu2 %v12543_v31  ;;  %v12239_v31 = vor.u32 %v14006_v9, %v12238_v33  ;;  %v12830_v9 = vld [vmem:[#allocation8 + $0x14e0] sm:$0xf]  ;;  %v2917_v57 = vmax.f32 %v14730_v48, 0.0 }
 0x216   :  { %7428 = vmatpush.bf16.msrb.mxu3 %v12671_v62  ;;  %v12222_v62 = vld [vmem:[#allocation8 + $0x1020] sm:$0xf] }
 0x217   :  { %7390 = vmatpush.bf16.msrb.mxu0 %v12271_v11  ;;  %v14034_v11 = vld [vmem:[#allocation8 + $0x112c] sm:$0xf0]  ;;  %v12223_v18 = vor.u32 %v14002_v63, %v12222_v62  ;;  %v2886_v33 = vpop.f32.mrf.mxu2  ;;  %v2920_v62 = vmax.f32 %v2846_v24, 0.0  ;;  %v12926_v24 = vld [vmem:[#allocation8 + $0x15a0] sm:$0xf] }
 0x218   :  { %7403 = vmatpush.bf16.msrb.mxu1 %v12399_v13  ;;  %v12478_v13 = vld [vmem:[#allocation8 + $0x1220] sm:$0xf]  ;;  %v12351_v49 = vor.u32 %v14034_v11, %v12350_v1  ;;  %v12831_v1 = vor.u32 %v14154_v37, %v12830_v9  ;;  %v14150_v11 = vld [vmem:[#allocation8 + $0x14cc] sm:$0xf0]  ;;  %v13504_v33 = vld [vmem:[#allocation8 + $0xa4] sm:$0xf] }
 0x219   :  { %7416 = vmatpush.bf16.msrb.mxu2 %v12527_v14  ;;  %v14066_v14 = vld [vmem:[#allocation8 + $0x122c] sm:$0xf0]  ;;  %v10240_v9 = vld [vmem:[#allocation8 + $0xb0] sm:$0xf0]  ;;  %v13536_v37 = vld [vmem:[#allocation8 + $0x1a4] sm:$0xf] }
 0x21a   :  { %7429 = vmatpush.bf16.msrb.mxu3 %v12655_v56  ;;  %v12206_v56 = vld [vmem:[#allocation8 + $0x1000] sm:$0xf]  ;;  %v12479_v7 = vor.u32 %v14066_v14, %v12478_v13  ;;  %v14182_v14 = vld [vmem:[#allocation8 + $0x15cc] sm:$0xf0]  ;;  %v10243_v51 = vor.u32 %v13504_v33, %v10240_v9 }
 0x21b   :  { %7391 = vmatpush.bf16.msrb.mxu0 %v12255_v27  ;;  %v14062_v27 = vld [vmem:[#allocation8 + $0x120c] sm:$0xf0]  ;;  %v2899_v41 = vpop.f32.mrf.mxu3  ;;  %v12207_v26 = vor.u32 %v13998_v19, %v12206_v56  ;;  %v12942_v13 = vld [vmem:[#allocation8 + $0x15c0] sm:$0xf]  ;;  %v14790_v56 = vpack.c.bf16 %v2917_v57, %v2917_v57  ;;  %v14792_v19 = vpack.c.bf16 %v2918_v43, %v2918_v43 }
 0x21c   :  { %7404 = vmatpush.bf16.msrb.mxu1 %v12383_v8  ;;  %v12590_v8 = vld [vmem:[#allocation8 + $0x1300] sm:$0xf]  ;;  %v12943_v23 = vor.u32 %v14182_v14, %v12942_v13  ;;  %v14142_v57 = vld [vmem:[#allocation8 + $0x148c] sm:$0xf0] }
 0x21d   :  { %7417 = vmatpush.bf16.msrb.mxu2 %v12511_v32  ;;  %v14094_v32 = vld [vmem:[#allocation8 + $0x130c] sm:$0xf0]  ;;  %v12910_v43 = vld [vmem:[#allocation8 + $0x1580] sm:$0xf] }
 0x21e   :  { %7430 = vmatpush.bf16.msrb.mxu3 %v12639_v38  ;;  %v12958_v38 = vld [vmem:[#allocation8 + $0x15e0] sm:$0xf]  ;;  %v12591_v63 = vor.u32 %v14094_v32, %v12590_v8  ;;  %v14178_v32 = vld [vmem:[#allocation8 + $0x15ac] sm:$0xf0] }
 0x21f   :  { %7392 = vmatpush.bf16.msrb.mxu0 %v12239_v31  ;;  %v12463_v31 = vor.u32 %v14062_v27, %v12462_v34  ;;  %v12959_v3 = vor.u32 %v14186_v44, %v12958_v38  ;;  %v10259_v34 = vor.u32 %v13508_v52, %v10256_v16  ;;  %v14796_v27 = vpack.c.bf16 %v2920_v62, %v2920_v62  ;;  %v10368_v38 = vld [vmem:[#allocation8 + $0x1b0] sm:$0xf0]  ;;  %v13532_v62 = vld [vmem:[#allocation8 + $0x184] sm:$0xf]  ;;  %v12766_v13 = vld [vmem:[#allocation8 + $0x1460] sm:$0xf] }
 0x220   :  { %7405 = vmatpush.bf16.msrb.mxu1 %v12367_v58  ;;  %v10400_v58 = vld [vmem:[#allocation8 + $0x1f0] sm:$0xf0]  ;;  %v12927_v44 = vor.u32 %v14178_v32, %v12926_v24  ;;  %v12894_v14 = vld [vmem:[#allocation8 + $0x1560] sm:$0xf]  ;;  %v14134_v33 = vld [vmem:[#allocation8 + $0x144c] sm:$0xf0] }
 0x221   :  { %7418 = vmatpush.bf16.msrb.mxu2 %v12495_v60  ;;  %v2919_v60 = vmax.f32 %v2820_v0, 0.0  ;;  %v10403_v48 = vor.u32 %v13544_v50, %v10400_v58  ;;  %v14146_v0 = vld [vmem:[#allocation8 + $0x14ac] sm:$0xf0]  ;;  %v13500_v50 = vld [vmem:[#allocation8 + $0x84] sm:$0xf] }
 0x222   :  { %7431 = vmatpush.bf16.msrb.mxu3 %v12623_v59  ;;  %v12814_v59 = vld [vmem:[#allocation8 + $0x14c0] sm:$0xf]  ;;  %v10224_v58 = vld [vmem:[#allocation8 + $0x90] sm:$0xf0] }
 0x223   :  { %7393 = vmatpush.bf16.msrb.mxu0 %v12223_v18  ;;  %v10384_v18 = vld [vmem:[#allocation8 + $0x1d0] sm:$0xf0]  ;;  %v14794_v20 = vpack.c.bf16 %v2919_v60, %v2919_v60  ;;  %v12750_v32 = vld [vmem:[#allocation8 + $0x1440] sm:$0xf] }
 0x224   :  { %7406 = vmatpush.bf16.msrb.mxu1 %v12351_v49  ;;  %v12815_v49 = vor.u32 %v14150_v11, %v12814_v59  ;;  %v10387_v8 = vor.u32 %v13540_v17, %v10384_v18  ;;  %v10227_v11 = vor.u32 %v13500_v50, %v10224_v58  ;;  %v14170_v17 = vld [vmem:[#allocation8 + $0x156c] sm:$0xf0]  ;;  %v13496_v18 = vld [vmem:[#allocation8 + $0x64] sm:$0xf]  ;;  %v12878_v9 = vld [vmem:[#allocation8 + $0x1540] sm:$0xf] }
 0x225   :  { %7419 = vmatpush.bf16.msrb.mxu2 %v12479_v7  ;;  %v12798_v7 = vld [vmem:[#allocation8 + $0x14a0] sm:$0xf] }
 0x226   :  { %7432 = vmatpush.bf16.msrb.mxu3 %v12607_v30  ;;  %v3649_v30 = vld [vmem:[#allocation10] sm:$0xf]  ;;  %v12799_v41 = vor.u32 %v14146_v0, %v12798_v7  ;;  %v13528_v7 = vld [vmem:[#allocation8 + $0x164] sm:$0xf]  ;;  %v546_v0 = vperm.slane %v14723_v47, 5 }
 0x227   :  { %7394 = vmatpush.bf16.msrb.mxu0 %v12207_v26  ;;  %v3651_v26 = vperm.slane %v3649_v30, 0  ;;  %v7188_v60 = vpop.f32.mrf.mxu0  ;;  %v12895_v30 = vor.u32 %v14170_v17, %v12894_v14  ;;  %v13520_v14 = vld [vmem:[#allocation8 + $0x124] sm:$0xf]  ;;  %v12718_v17 = vld [vmem:[#allocation8 + $0x1400] sm:$0xf] }
 0x228   :  { %7407 = vmatpush.bf16.msrb.mxu1 %v12335_v21  ;;  %v10371_v21 = vor.u32 %v13536_v37, %v10368_v38 }
 0x229   :  { %7420 = vmatpush.bf16.msrb.mxu2 %v12463_v31  ;;  %v14174_v31 = vld [vmem:[#allocation8 + $0x158c] sm:$0xf0] }
 0x22a   :  { %7433 = vmatpush.bf16.msrb.mxu3 %v12591_v63  ;;  %7395 = vmatmul.bf16.vlgmr.msrb.gmra.mxu0 %v14790_v56  ;;  %v10352_v63 = vld [vmem:[#allocation8 + $0x190] sm:$0xf0]  ;;  %v12911_v59 = vor.u32 %v14174_v31, %v12910_v43  ;;  %v13524_v43 = vld [vmem:[#allocation8 + $0x144] sm:$0xf]  ;;  %v12751_v31 = vor.u32 %v14134_v33, %v12750_v32 }
 0x22b   :  { %7439 = vmatpush.bf16.msra.mxu0 %v12831_v1  ;;  %7408 = vmatmul.bf16.vlgmr.msrb.gmra.mxu1 %v14792_v19  ;;  %v7189_v1 = vadd.f32 %v7188_v60, %v3651_v26  ;;  %v10355_v16 = vor.u32 %v13532_v62, %v10352_v63  ;;  %v13492_v26 = vld [vmem:[#allocation8 + $0x44] sm:$0xf]  ;;  %v12734_v62 = vld [vmem:[#allocation8 + $0x1420] sm:$0xf]  ;;  %v14130_v63 = vld [vmem:[#allocation8 + $0x142c] sm:$0xf0] }
 0x22c   :  { %7452 = vmatpush.bf16.msra.mxu1 %v12959_v3  ;;  %7421 = vmatmul.bf16.vlgmr.msrb.gmra.mxu2 %v14794_v20  ;;  %v7201_v3 = vpop.f32.mrf.mxu1  ;;  %v13516_v32 = vld [vmem:[#allocation8 + $0x104] sm:$0xf]  ;;  %v10288_v33 = vld [vmem:[#allocation8 + $0x110] sm:$0xf0] }
 0x22d   :  { %7465 = vmatpush.bf16.msra.mxu2 %v10275_v4  ;;  %7434 = vmatmul.bf16.vlgmr.msrb.gmra.mxu3 %v14796_v27  ;;  %v12783_v4 = vor.u32 %v14142_v57, %v12782_v54  ;;  %v7202_v52 = vadd.f32 %v7201_v3, %v7189_v1  ;;  %v12862_v1 = vld [vmem:[#allocation8 + $0x1520] sm:$0xf] }
 0x22e   :  { %7478 = vmatpush.bf16.msra.mxu3 %v10403_v48  ;;  %v14138_v48 = vld [vmem:[#allocation8 + $0x146c] sm:$0xf0] }
 0x22f   :  { %7440 = vmatpush.bf16.msra.mxu0 %v12815_v49  ;;  %v10208_v49 = vld [vmem:[#allocation8 + $0x70] sm:$0xf0]  ;;  %v12767_v24 = vor.u32 %v14138_v48, %v12766_v13  ;;  %v7214_v38 = vpop.f32.mrf.mxu2  ;;  %v7190_v57 = vpop.f32.mrf.mxu0  ;;  %v13488_v13 = vld [vmem:[#allocation8 + $0x24] sm:$0xf] }
 0x230   :  { %7453 = vmatpush.bf16.msra.mxu1 %v12943_v23  ;;  %v10336_v23 = vld [vmem:[#allocation8 + $0x170] sm:$0xf0]  ;;  %v7227_v54 = vpop.f32.mrf.mxu3 }
 0x231   :  { %7466 = vmatpush.bf16.msra.mxu2 %v10259_v34  ;;  %v545_v34 = vperm.slane %v14723_v47, 4  ;;  %v10339_v37 = vor.u32 %v13528_v7, %v10336_v23  ;;  %v10320_v47 = vld [vmem:[#allocation8 + $0x150] sm:$0xf0]  ;;  %v12846_v23 = vld [vmem:[#allocation8 + $0x1500] sm:$0xf] }
 0x232   :  { %7479 = vmatpush.bf16.msra.mxu3 %v10387_v8  ;;  %v10211_v8 = vor.u32 %v13496_v18, %v10208_v49  ;;  %v10176_v48 = vld [vmem:[#allocation8 + $0x30] sm:$0xf0]  ;;  %v14126_v18 = vld [vmem:[#allocation8 + $0x140c] sm:$0xf0] }
 0x233   :  { %7441 = vmatpush.bf16.msra.mxu0 %v12799_v41  ;;  %v14166_v41 = vld [vmem:[#allocation8 + $0x154c] sm:$0xf0]  ;;  %v2859_v3 = vadd.f32 %v14774_v6, %v545_v34  ;;  %v10179_v7 = vor.u32 %v13488_v13, %v10176_v48  ;;  %v13484_v6 = vld [vmem:[#allocation8 + $0x4] sm:$0xf]  ;;  %v10768_v13 = vld [vmem:[#allocation8 + $0x4d0] sm:$0xf0] }
 0x234   :  { %7454 = vmatpush.bf16.msra.mxu1 %v12927_v44  ;;  %v10192_v44 = vld [vmem:[#allocation8 + $0x50] sm:$0xf0]  ;;  %v12879_v58 = vor.u32 %v14166_v41, %v12878_v9  ;;  %v13608_v41 = vld [vmem:[#allocation8 + $0x3e4] sm:$0xf] }
 0x235   :  { %7467 = vmatpush.bf16.msra.mxu2 %v10243_v51  ;;  %v7215_v51 = vadd.f32 %v7214_v38, %v7202_v52  ;;  %v10195_v60 = vor.u32 %v13492_v26, %v10192_v44  ;;  %v10304_v52 = vld [vmem:[#allocation8 + $0x130] sm:$0xf0]  ;;  %v12719_v26 = vor.u32 %v14126_v18, %v12718_v17  ;;  %v13668_v48 = vld [vmem:[#allocation8 + $0x5c4] sm:$0xf] }
 0x236   :  { %7480 = vmatpush.bf16.msra.mxu3 %v10371_v21  ;;  %v7203_v21 = vpop.f32.mrf.mxu1  ;;  %v10528_v38 = vld [vmem:[#allocation8 + $0x2f0] sm:$0xf0] }
 0x237   :  { %7442 = vmatpush.bf16.msra.mxu0 %v12783_v4  ;;  %v14804_v50 = vadd.f32 %v7227_v54, %v7215_v51  ;;  %v2885_v4 = vadd.f32 %v14780_v45, %v546_v0  ;;  %v2872_v45 = vadd.f32 %v14776_v12, %v2859_v3  ;;  %v10307_v0 = vor.u32 %v13520_v14, %v10304_v52  ;;  %v10656_v44 = vld [vmem:[#allocation8 + $0x3f0] sm:$0xf0]  ;;  %v13640_v51 = vld [vmem:[#allocation8 + $0x4e4] sm:$0xf] }
 0x238   :  { %7455 = vmatpush.bf16.msra.mxu1 %v12911_v59  ;;  %v10323_v59 = vor.u32 %v13524_v43, %v10320_v47  ;;  %v7229_v9 = vpop.f32.mrf.mxu3  ;;  %v10784_v54 = vld [vmem:[#allocation8 + $0x4f0] sm:$0xf0]  ;;  %v13604_v3 = vld [vmem:[#allocation8 + $0x3c4] sm:$0xf] }
 0x239   :  { %7468 = vmatpush.bf16.msra.mxu2 %v10227_v11  ;;  %v14162_v11 = vld [vmem:[#allocation8 + $0x152c] sm:$0xf0]  ;;  %v2898_v34 = vadd.f32 %v14782_v55, %v2885_v4  ;;  %v13672_v55 = vld [vmem:[#allocation8 + $0x5e4] sm:$0xf]  ;;  %v10912_v43 = vld [vmem:[#allocation8 + $0x5f0] sm:$0xf0] }
 0x23a   :  { %7481 = vmatpush.bf16.msra.mxu3 %v10355_v16  ;;  %v12735_v16 = vor.u32 %v14130_v63, %v12734_v62  ;;  %v12863_v49 = vor.u32 %v14162_v11, %v12862_v1  ;;  %v2921_v47 = vmax.f32 %v2872_v45, 0.0  ;;  %v10787_v62 = vor.u32 %v13640_v51, %v10784_v54  ;;  %v13572_v63 = vld [vmem:[#allocation8 + $0x2c4] sm:$0xf]  ;;  %v10512_v1 = vld [vmem:[#allocation8 + $0x2d0] sm:$0xf0] }
 0x23b   :  { %7443 = vmatpush.bf16.msra.mxu0 %v12767_v24  ;;  %v14158_v24 = vld [vmem:[#allocation8 + $0x150c] sm:$0xf0]  ;;  %v2922_v21 = vmax.f32 %v2898_v34, 0.0  ;;  %v10915_v4 = vor.u32 %v13672_v55, %v10912_v43  ;;  %v13636_v11 = vld [vmem:[#allocation8 + $0x4c4] sm:$0xf] }
 0x23c   :  { %7456 = vmatpush.bf16.msra.mxu1 %v12895_v30  ;;  %v7216_v30 = vpop.f32.mrf.mxu2  ;;  %v12847_v12 = vor.u32 %v14158_v24, %v12846_v23  ;;  %v10896_v14 = vld [vmem:[#allocation8 + $0x5d0] sm:$0xf0]  ;;  %v14810_v52 = vpack.c.bf16 %v2921_v47, %v2921_v47  ;;  %v13600_v24 = vld [vmem:[#allocation8 + $0x3a4] sm:$0xf] }
 0x23d   :  { %7469 = vmatpush.bf16.msra.mxu2 %v10211_v8  ;;  %v10160_v8 = vld [vmem:[#allocation8 + $0x10] sm:$0xf0]  ;;  %v14812_v17 = vpack.c.bf16 %v2922_v21, %v2922_v21  ;;  %v13632_v34 = vld [vmem:[#allocation8 + $0x4a4] sm:$0xf] }
 0x23e   :  { %7482 = vmatpush.bf16.msra.mxu3 %v10339_v37  ;;  %v13576_v37 = vld [vmem:[#allocation8 + $0x2e4] sm:$0xf]  ;;  %v10163_v57 = vor.u32 %v13484_v6, %v10160_v8  ;;  %v10496_v23 = vld [vmem:[#allocation8 + $0x2b0] sm:$0xf0]  ;;  %v10899_v6 = vor.u32 %v13668_v48, %v10896_v14 }
 0x23f   :  { %7444 = vmatpush.bf16.msra.mxu0 %v12751_v31  ;;  %v10291_v31 = vor.u32 %v13516_v32, %v10288_v33  ;;  %v10624_v45 = vld [vmem:[#allocation8 + $0x3b0] sm:$0xf0]  ;;  %v13664_v30 = vld [vmem:[#allocation8 + $0x5a4] sm:$0xf] }
 0x240   :  { %7457 = vmatpush.bf16.msra.mxu1 %v12879_v58  ;;  %v10531_v58 = vor.u32 %v13576_v37, %v10528_v38  ;;  %v10880_v8 = vld [vmem:[#allocation8 + $0x5b0] sm:$0xf0]  ;;  %v10627_v33 = vor.u32 %v13600_v24, %v10624_v45  ;;  %v13564_v37 = vld [vmem:[#allocation8 + $0x284] sm:$0xf] }
 0x241   :  { %7470 = vmatpush.bf16.msra.mxu2 %v10195_v60  ;;  %v10659_v60 = vor.u32 %v13608_v41, %v10656_v44  ;;  %v10480_v38 = vld [vmem:[#allocation8 + $0x290] sm:$0xf0]  ;;  %v13596_v41 = vld [vmem:[#allocation8 + $0x384] sm:$0xf] }
 0x242   :  { %7483 = vmatpush.bf16.msra.mxu3 %v10323_v59  ;;  %v10640_v59 = vld [vmem:[#allocation8 + $0x3d0] sm:$0xf0]  ;;  %v13628_v51 = vld [vmem:[#allocation8 + $0x484] sm:$0xf]  ;;  %v10483_v21 = vor.u32 %v13564_v37, %v10480_v38 }
 0x243   :  { %7445 = vmatpush.bf16.msra.mxu0 %v12735_v16  ;;  %v10515_v16 = vor.u32 %v13572_v63, %v10512_v1  ;;  %v10643_v18 = vor.u32 %v13604_v3, %v10640_v59  ;;  %v10608_v44 = vld [vmem:[#allocation8 + $0x390] sm:$0xf0]  ;;  %v13592_v63 = vld [vmem:[#allocation8 + $0x364] sm:$0xf] }
 0x244   :  { %7458 = vmatpush.bf16.msra.mxu1 %v12863_v49  ;;  %v10771_v49 = vor.u32 %v13636_v11, %v10768_v13  ;;  %v10736_v54 = vld [vmem:[#allocation8 + $0x490] sm:$0xf0]  ;;  %v13624_v59 = vld [vmem:[#allocation8 + $0x464] sm:$0xf] }
 0x245   :  { %7471 = vmatpush.bf16.msra.mxu2 %v10179_v7  ;;  %v13568_v7 = vld [vmem:[#allocation8 + $0x2a4] sm:$0xf]  ;;  %v10864_v55 = vld [vmem:[#allocation8 + $0x590] sm:$0xf0] }
 0x246   :  { %7484 = vmatpush.bf16.msra.mxu3 %v10307_v0  ;;  %v10752_v0 = vld [vmem:[#allocation8 + $0x4b0] sm:$0xf0]  ;;  %v10499_v32 = vor.u32 %v13568_v7, %v10496_v23  ;;  %v13656_v13 = vld [vmem:[#allocation8 + $0x564] sm:$0xf] }
 0x247   :  { %7446 = vmatpush.bf16.msra.mxu0 %v12719_v26  ;;  %v10755_v9 = vor.u32 %v13632_v34, %v10752_v0  ;;  %v10883_v26 = vor.u32 %v13664_v30, %v10880_v8  ;;  %v10720_v11 = vld [vmem:[#allocation8 + $0x470] sm:$0xf0]  ;;  %v13588_v7 = vld [vmem:[#allocation8 + $0x344] sm:$0xf] }
 0x248   :  { %7459 = vmatpush.bf16.msra.mxu1 %v12847_v12  ;;  %v7240_v12 = vpop.f32.mrf.mxu0  ;;  %v7253_v47 = vpop.f32.mrf.mxu1  ;;  %v10848_v48 = vld [vmem:[#allocation8 + $0x570] sm:$0xf0]  ;;  %v13620_v45 = vld [vmem:[#allocation8 + $0x444] sm:$0xf] }
 0x249   :  { %7472 = vmatpush.bf16.msra.mxu2 %v10163_v57  ;;  %v13660_v57 = vld [vmem:[#allocation8 + $0x584] sm:$0xf]  ;;  %v7241_v43 = vadd.f32 %v7240_v12, %v14804_v50  ;;  %v10851_v23 = vor.u32 %v13656_v13, %v10848_v48  ;;  %v10704_v34 = vld [vmem:[#allocation8 + $0x450] sm:$0xf0] }
 0x24a   :  { %7485 = vmatpush.bf16.msra.mxu3 %v10291_v31  ;;  %7447 = vmatmul.bf16.vlgmr.msra.gmra.mxu0 %v14810_v52  ;;  %v10611_v31 = vor.u32 %v13596_v41, %v10608_v44  ;;  %v10867_v3 = vor.u32 %v13660_v57, %v10864_v55  ;;  %v13552_v44 = vld [vmem:[#allocation8 + $0x224] sm:$0xf]  ;;  %v10560_v57 = vld [vmem:[#allocation8 + $0x330] sm:$0xf0] }
 0x24b   :  { %7491 = vmatpush.bf16.msrb.mxu0 %v10531_v58  ;;  %7460 = vmatmul.bf16.vlgmr.msra.gmra.mxu1 %v14812_v17  ;;  %v10739_v58 = vor.u32 %v13628_v51, %v10736_v54  ;;  %v7254_v1 = vadd.f32 %v7253_v47, %v7241_v43  ;;  %v10432_v51 = vld [vmem:[#allocation8 + $0x230] sm:$0xf0]  ;;  %v13584_v54 = vld [vmem:[#allocation8 + $0x324] sm:$0xf] }
 0x24c   :  { %7504 = vmatpush.bf16.msrb.mxu1 %v10659_v60  ;;  %7473 = vmatmul.bf16.vlgmr.msra.gmra.mxu2 %v14692_v36  ;;  %v13560_v60 = vld [vmem:[#allocation8 + $0x264] sm:$0xf]  ;;  %v10688_v43 = vld [vmem:[#allocation8 + $0x430] sm:$0xf0] }
 0x24d   :  { %7517 = vmatpush.bf16.msrb.mxu2 %v10787_v62  ;;  %7486 = vmatmul.bf16.vlgmr.msra.gmra.mxu3 %v14694_v53  ;;  %v10464_v62 = vld [vmem:[#allocation8 + $0x270] sm:$0xf0]  ;;  %v13616_v55 = vld [vmem:[#allocation8 + $0x424] sm:$0xf] }
 0x24e   :  { %7530 = vmatpush.bf16.msrb.mxu3 %v10915_v4  ;;  %v10592_v4 = vld [vmem:[#allocation8 + $0x370] sm:$0xf0]  ;;  %v10467_v14 = vor.u32 %v13560_v60, %v10464_v62  ;;  %v13648_v47 = vld [vmem:[#allocation8 + $0x524] sm:$0xf]  ;;  %v10563_v62 = vor.u32 %v13584_v54, %v10560_v57 }
 0x24f   :  { %7492 = vmatpush.bf16.msrb.mxu0 %v10515_v16  ;;  %v10595_v50 = vor.u32 %v13592_v63, %v10592_v4  ;;  %v10723_v16 = vor.u32 %v13624_v59, %v10720_v11  ;;  %v7266_v24 = vpop.f32.mrf.mxu2  ;;  %v10416_v60 = vld [vmem:[#allocation8 + $0x210] sm:$0xf0]  ;;  %v10691_v63 = vor.u32 %v13616_v55, %v10688_v43  ;;  %v13612_v4 = vld [vmem:[#allocation8 + $0x404] sm:$0xf] }
 0x250   :  { %7505 = vmatpush.bf16.msrb.mxu1 %v10643_v18  ;;  %v13556_v18 = vld [vmem:[#allocation8 + $0x244] sm:$0xf]  ;;  %v7267_v0 = vadd.f32 %v7266_v24, %v7254_v1  ;;  %v7279_v30 = vpop.f32.mrf.mxu3  ;;  %v7242_v8 = vpop.f32.mrf.mxu0  ;;  %v10672_v13 = vld [vmem:[#allocation8 + $0x410] sm:$0xf0] }
 0x251   :  { %7518 = vmatpush.bf16.msrb.mxu2 %v10771_v49  ;;  %v10448_v49 = vld [vmem:[#allocation8 + $0x250] sm:$0xf0]  ;;  %v13580_v1 = vld [vmem:[#allocation8 + $0x304] sm:$0xf] }
 0x252   :  { %7531 = vmatpush.bf16.msrb.mxu3 %v10899_v6  ;;  %v10576_v6 = vld [vmem:[#allocation8 + $0x350] sm:$0xf0]  ;;  %v10451_v37 = vor.u32 %v13556_v18, %v10448_v49  ;;  %v14819_v38 = vadd.f32 %v7279_v30, %v7267_v0  ;;  %v13644_v48 = vld [vmem:[#allocation8 + $0x504] sm:$0xf] }
 0x253   :  { %7493 = vmatpush.bf16.msrb.mxu0 %v10499_v32  ;;  %v13652_v32 = vld [vmem:[#allocation8 + $0x544] sm:$0xf]  ;;  %v10579_v41 = vor.u32 %v13588_v7, %v10576_v6  ;;  %v11040_v18 = vld [vmem:[#allocation8 + $0x6f0] sm:$0xf0] }
 0x254   :  { %7506 = vmatpush.bf16.msrb.mxu1 %v10627_v33  ;;  %v10832_v33 = vld [vmem:[#allocation8 + $0x550] sm:$0xf0]  ;;  %v13736_v49 = vld [vmem:[#allocation8 + $0x7e4] sm:$0xf] }
 0x255   :  { %7519 = vmatpush.bf16.msrb.mxu2 %v10755_v9  ;;  %v7255_v9 = vpop.f32.mrf.mxu1  ;;  %v10835_v12 = vor.u32 %v13652_v32, %v10832_v33  ;;  %v13768_v24 = vld [vmem:[#allocation8 + $0x8e4] sm:$0xf]  ;;  %v11296_v6 = vld [vmem:[#allocation8 + $0x8f0] sm:$0xf0] }
 0x256   :  { %7532 = vmatpush.bf16.msrb.mxu3 %v10883_v26  ;;  %v10707_v26 = vor.u32 %v13620_v45, %v10704_v34  ;;  %v10675_v34 = vor.u32 %v13612_v4, %v10672_v13  ;;  %v13800_v0 = vld [vmem:[#allocation8 + $0x9e4] sm:$0xf]  ;;  %v11424_v30 = vld [vmem:[#allocation8 + $0x9f0] sm:$0xf0]  ;;  %v11299_v9 = vor.u32 %v13768_v24, %v11296_v6 }
 0x257   :  { %7494 = vmatpush.bf16.msrb.mxu0 %v10483_v21  ;;  %v10816_v21 = vld [vmem:[#allocation8 + $0x530] sm:$0xf0]  ;;  %v7268_v11 = vpop.f32.mrf.mxu2  ;;  %v13764_v54 = vld [vmem:[#allocation8 + $0x8c4] sm:$0xf] }
 0x258   :  { %7507 = vmatpush.bf16.msrb.mxu1 %v10611_v31  ;;  %v10435_v31 = vor.u32 %v13552_v44, %v10432_v51  ;;  %v10819_v59 = vor.u32 %v13648_v47, %v10816_v21  ;;  %v11427_v44 = vor.u32 %v13800_v0, %v11424_v30  ;;  %v11152_v51 = vld [vmem:[#allocation8 + $0x7d0] sm:$0xf0]  ;;  %v13796_v57 = vld [vmem:[#allocation8 + $0x9c4] sm:$0xf] }
 0x259   :  { %7520 = vmatpush.bf16.msrb.mxu2 %v10739_v58  ;;  %v13548_v58 = vld [vmem:[#allocation8 + $0x204] sm:$0xf]  ;;  %v11408_v55 = vld [vmem:[#allocation8 + $0x9d0] sm:$0xf0] }
 0x25a   :  { %7533 = vmatpush.bf16.msrb.mxu3 %v10867_v3  ;;  %v10544_v3 = vld [vmem:[#allocation8 + $0x310] sm:$0xf0]  ;;  %v10419_v7 = vor.u32 %v13548_v58, %v10416_v60  ;;  %v13728_v60 = vld [vmem:[#allocation8 + $0x7a4] sm:$0xf] }
 0x25b   :  { %7495 = vmatpush.bf16.msrb.mxu0 %v10467_v14  ;;  %v10800_v14 = vld [vmem:[#allocation8 + $0x510] sm:$0xf0]  ;;  %v10547_v45 = vor.u32 %v13580_v1, %v10544_v3  ;;  %v13760_v1 = vld [vmem:[#allocation8 + $0x8a4] sm:$0xf] }
 0x25c   :  { %7508 = vmatpush.bf16.msrb.mxu1 %v10595_v50  ;;  %v7281_v50 = vpop.f32.mrf.mxu3  ;;  %v10803_v8 = vor.u32 %v13644_v48, %v10800_v14  ;;  %v11008_v58 = vld [vmem:[#allocation8 + $0x6b0] sm:$0xf0]  ;;  %v13792_v4 = vld [vmem:[#allocation8 + $0x9a4] sm:$0xf] }
 0x25d   :  { %7521 = vmatpush.bf16.msrb.mxu2 %v10723_v16  ;;  %v13704_v16 = vld [vmem:[#allocation8 + $0x6e4] sm:$0xf]  ;;  %v11264_v3 = vld [vmem:[#allocation8 + $0x8b0] sm:$0xf0] }
 0x25e   :  { %7534 = vmatpush.bf16.msrb.mxu3 %v10851_v23  ;;  %v11168_v23 = vld [vmem:[#allocation8 + $0x7f0] sm:$0xf0]  ;;  %v11043_v32 = vor.u32 %v13704_v16, %v11040_v18  ;;  %v11267_v48 = vor.u32 %v13760_v1, %v11264_v3  ;;  %v13692_v14 = vld [vmem:[#allocation8 + $0x684] sm:$0xf] }
 0x25f   :  { %7496 = vmatpush.bf16.msrb.mxu0 %v10451_v37  ;;  %v11171_v33 = vor.u32 %v13736_v49, %v11168_v23  ;;  %v13700_v37 = vld [vmem:[#allocation8 + $0x6c4] sm:$0xf]  ;;  %v10992_v50 = vld [vmem:[#allocation8 + $0x690] sm:$0xf0] }
 0x260   :  { %7509 = vmatpush.bf16.msrb.mxu1 %v10579_v41  ;;  %v11024_v41 = vld [vmem:[#allocation8 + $0x6d0] sm:$0xf0]  ;;  %v13724_v16 = vld [vmem:[#allocation8 + $0x784] sm:$0xf]  ;;  %v10995_v30 = vor.u32 %v13692_v14, %v10992_v50 }
 0x261   :  { %7522 = vmatpush.bf16.msrb.mxu2 %v10707_v26  ;;  %v13732_v26 = vld [vmem:[#allocation8 + $0x7c4] sm:$0xf]  ;;  %v11027_v43 = vor.u32 %v13700_v37, %v11024_v41  ;;  %v11120_v49 = vld [vmem:[#allocation8 + $0x790] sm:$0xf0] }
 0x262   :  { %7535 = vmatpush.bf16.msrb.mxu3 %v10835_v12  ;;  %v11280_v12 = vld [vmem:[#allocation8 + $0x8d0] sm:$0xf0]  ;;  %v11155_v47 = vor.u32 %v13732_v26, %v11152_v51  ;;  %v13788_v6 = vld [vmem:[#allocation8 + $0x984] sm:$0xf] }
 0x263   :  { %7497 = vmatpush.bf16.msrb.mxu0 %v10435_v31  ;;  %v11283_v21 = vor.u32 %v13764_v54, %v11280_v12  ;;  %v13696_v31 = vld [vmem:[#allocation8 + $0x6a4] sm:$0xf]  ;;  %v11248_v23 = vld [vmem:[#allocation8 + $0x890] sm:$0xf0] }
 0x264   :  { %7510 = vmatpush.bf16.msrb.mxu1 %v10563_v62  ;;  %v11411_v62 = vor.u32 %v13796_v57, %v11408_v55  ;;  %v11011_v11 = vor.u32 %v13696_v31, %v11008_v58  ;;  %v13720_v37 = vld [vmem:[#allocation8 + $0x764] sm:$0xf]  ;;  %v11232_v54 = vld [vmem:[#allocation8 + $0x870] sm:$0xf0] }
 0x265   :  { %7523 = vmatpush.bf16.msrb.mxu2 %v10691_v63  ;;  %v11136_v63 = vld [vmem:[#allocation8 + $0x7b0] sm:$0xf0]  ;;  %v13752_v51 = vld [vmem:[#allocation8 + $0x864] sm:$0xf] }
 0x266   :  { %7536 = vmatpush.bf16.msrb.mxu3 %v10819_v59  ;;  %v11392_v59 = vld [vmem:[#allocation8 + $0x9b0] sm:$0xf0]  ;;  %v11139_v13 = vor.u32 %v13728_v60, %v11136_v63  ;;  %v13784_v12 = vld [vmem:[#allocation8 + $0x964] sm:$0xf] }
 0x267   :  { %7498 = vmatpush.bf16.msrb.mxu0 %v10419_v7  ;;  %v11395_v18 = vor.u32 %v13792_v4, %v11392_v59  ;;  %v13756_v7 = vld [vmem:[#allocation8 + $0x884] sm:$0xf]  ;;  %v7292_v24 = vpop.f32.mrf.mxu0  ;;  %v11360_v57 = vld [vmem:[#allocation8 + $0x970] sm:$0xf0] }
 0x268   :  { %7511 = vmatpush.bf16.msrb.mxu1 %v10547_v45  ;;  %v11376_v45 = vld [vmem:[#allocation8 + $0x990] sm:$0xf0]  ;;  %v7305_v0 = vpop.f32.mrf.mxu1  ;;  %v13716_v31 = vld [vmem:[#allocation8 + $0x744] sm:$0xf]  ;;  %v11363_v58 = vor.u32 %v13784_v12, %v11360_v57 }
 0x269   :  { %7524 = vmatpush.bf16.msrb.mxu2 %v10675_v34  ;;  %v7293_v34 = vadd.f32 %v7292_v24, %v14819_v38  ;;  %v11379_v26 = vor.u32 %v13788_v6, %v11376_v45  ;;  %v13748_v63 = vld [vmem:[#allocation8 + $0x844] sm:$0xf]  ;;  %v11216_v1 = vld [vmem:[#allocation8 + $0x850] sm:$0xf0] }
 0x26a   :  { %7537 = vmatpush.bf16.msrb.mxu3 %v10803_v8  ;;  %7499 = vmatmul.bf16.vlgmr.msrb.gmra.mxu0 %v14696_v15  ;;  %v11123_v8 = vor.u32 %v13724_v16, %v11120_v49  ;;  %v13680_v49 = vld [vmem:[#allocation8 + $0x624] sm:$0xf]  ;;  %v11072_v6 = vld [vmem:[#allocation8 + $0x730] sm:$0xf0] }
 0x26b   :  { %7543 = vmatpush.bf16.msra.mxu0 %v11043_v32  ;;  %7512 = vmatmul.bf16.vlgmr.msrb.gmra.mxu1 %v14698_v22  ;;  %v11251_v32 = vor.u32 %v13756_v7, %v11248_v23  ;;  %v7306_v41 = vadd.f32 %v7305_v0, %v7293_v34  ;;  %v10944_v7 = vld [vmem:[#allocation8 + $0x630] sm:$0xf0]  ;;  %v13712_v23 = vld [vmem:[#allocation8 + $0x724] sm:$0xf] }
 0x26c   :  { %7556 = vmatpush.bf16.msra.mxu1 %v11171_v33  ;;  %7525 = vmatmul.bf16.vlgmr.msrb.gmra.mxu2 %v14714_v28  ;;  %v13688_v33 = vld [vmem:[#allocation8 + $0x664] sm:$0xf]  ;;  %v11200_v34 = vld [vmem:[#allocation8 + $0x830] sm:$0xf0] }
 0x26d   :  { %7569 = vmatpush.bf16.msra.mxu2 %v11299_v9  ;;  %7538 = vmatmul.bf16.vlgmr.msrb.gmra.mxu3 %v14716_v46  ;;  %v10976_v9 = vld [vmem:[#allocation8 + $0x670] sm:$0xf0]  ;;  %v13744_v45 = vld [vmem:[#allocation8 + $0x824] sm:$0xf] }
 0x26e   :  { %7582 = vmatpush.bf16.msra.mxu3 %v11427_v44  ;;  %v11104_v44 = vld [vmem:[#allocation8 + $0x770] sm:$0xf0]  ;;  %v10979_v55 = vor.u32 %v13688_v33, %v10976_v9  ;;  %v13776_v0 = vld [vmem:[#allocation8 + $0x924] sm:$0xf]  ;;  %v11075_v9 = vor.u32 %v13712_v23, %v11072_v6 }
 0x26f   :  { %7544 = vmatpush.bf16.msra.mxu0 %v11027_v43  ;;  %v11107_v38 = vor.u32 %v13720_v37, %v11104_v44  ;;  %v11235_v43 = vor.u32 %v13752_v51, %v11232_v54  ;;  %v7318_v60 = vpop.f32.mrf.mxu2  ;;  %v7294_v59 = vpop.f32.mrf.mxu0  ;;  %v10928_v33 = vld [vmem:[#allocation8 + $0x610] sm:$0xf0]  ;;  %v11203_v37 = vor.u32 %v13744_v45, %v11200_v34  ;;  %v13740_v44 = vld [vmem:[#allocation8 + $0x804] sm:$0xf] }
 0x270   :  { %7557 = vmatpush.bf16.msra.mxu1 %v11155_v47  ;;  %v13684_v47 = vld [vmem:[#allocation8 + $0x644] sm:$0xf]  ;;  %v7319_v3 = vadd.f32 %v7318_v60, %v7306_v41  ;;  %v7331_v4 = vpop.f32.mrf.mxu3  ;;  %v11184_v12 = vld [vmem:[#allocation8 + $0x810] sm:$0xf0] }
 0x271   :  { %7570 = vmatpush.bf16.msra.mxu2 %v11283_v21  ;;  %v10960_v21 = vld [vmem:[#allocation8 + $0x650] sm:$0xf0]  ;;  %v13708_v41 = vld [vmem:[#allocation8 + $0x704] sm:$0xf] }
 0x272   :  { %7583 = vmatpush.bf16.msra.mxu3 %v11411_v62  ;;  %v11088_v62 = vld [vmem:[#allocation8 + $0x750] sm:$0xf0]  ;;  %v10963_v14 = vor.u32 %v13684_v47, %v10960_v21  ;;  %v14826_v50 = vadd.f32 %v7331_v4, %v7319_v3  ;;  %v13772_v57 = vld [vmem:[#allocation8 + $0x904] sm:$0xf] }
 0x273   :  { %7545 = vmatpush.bf16.msra.mxu0 %v11011_v11  ;;  %v13780_v11 = vld [vmem:[#allocation8 + $0x944] sm:$0xf]  ;;  %v11091_v16 = vor.u32 %v13716_v31, %v11088_v62  ;;  %v11552_v47 = vld [vmem:[#allocation8 + $0xaf0] sm:$0xf0] }
 0x274   :  { %7558 = vmatpush.bf16.msra.mxu1 %v11139_v13  ;;  %v11344_v13 = vld [vmem:[#allocation8 + $0x950] sm:$0xf0]  ;;  %v13864_v21 = vld [vmem:[#allocation8 + $0xbe4] sm:$0xf] }
 0x275   :  { %7571 = vmatpush.bf16.msra.mxu2 %v11267_v48  ;;  %v7307_v48 = vpop.f32.mrf.mxu1  ;;  %v11347_v24 = vor.u32 %v13780_v11, %v11344_v13  ;;  %v13896_v60 = vld [vmem:[#allocation8 + $0xce4] sm:$0xf]  ;;  %v11808_v62 = vld [vmem:[#allocation8 + $0xcf0] sm:$0xf0] }
 0x276   :  { %7584 = vmatpush.bf16.msra.mxu3 %v11395_v18  ;;  %v11219_v18 = vor.u32 %v13748_v63, %v11216_v1  ;;  %v11187_v1 = vor.u32 %v13740_v44, %v11184_v12  ;;  %v13928_v3 = vld [vmem:[#allocation8 + $0xde4] sm:$0xf]  ;;  %v11936_v4 = vld [vmem:[#allocation8 + $0xdf0] sm:$0xf0]  ;;  %v11811_v48 = vor.u32 %v13896_v60, %v11808_v62 }
 0x277   :  { %7546 = vmatpush.bf16.msra.mxu0 %v10995_v30  ;;  %v11328_v30 = vld [vmem:[#allocation8 + $0x930] sm:$0xf0]  ;;  %v7320_v54 = vpop.f32.mrf.mxu2  ;;  %v13892_v23 = vld [vmem:[#allocation8 + $0xcc4] sm:$0xf] }
 0x278   :  { %7559 = vmatpush.bf16.msra.mxu1 %v11123_v8  ;;  %v10947_v8 = vor.u32 %v13680_v49, %v10944_v7  ;;  %v11331_v51 = vor.u32 %v13776_v0, %v11328_v30  ;;  %v11939_v49 = vor.u32 %v13928_v3, %v11936_v4  ;;  %v11664_v7 = vld [vmem:[#allocation8 + $0xbd0] sm:$0xf0]  ;;  %v13924_v6 = vld [vmem:[#allocation8 + $0xdc4] sm:$0xf] }
 0x279   :  { %7572 = vmatpush.bf16.msra.mxu2 %v11251_v32  ;;  %v13676_v32 = vld [vmem:[#allocation8 + $0x604] sm:$0xf]  ;;  %v11920_v45 = vld [vmem:[#allocation8 + $0xdd0] sm:$0xf0] }
 0x27a   :  { %7585 = vmatpush.bf16.msra.mxu3 %v11379_v26  ;;  %v11056_v26 = vld [vmem:[#allocation8 + $0x710] sm:$0xf0]  ;;  %v10931_v31 = vor.u32 %v13676_v32, %v10928_v33  ;;  %v13856_v33 = vld [vmem:[#allocation8 + $0xba4] sm:$0xf] }
 0x27b   :  { %7547 = vmatpush.bf16.msra.mxu0 %v10979_v55  ;;  %v11312_v55 = vld [vmem:[#allocation8 + $0x910] sm:$0xf0]  ;;  %v11059_v63 = vor.u32 %v13708_v41, %v11056_v26  ;;  %v13888_v41 = vld [vmem:[#allocation8 + $0xca4] sm:$0xf] }
 0x27c   :  { %7560 = vmatpush.bf16.msra.mxu1 %v11107_v38  ;;  %v7333_v38 = vpop.f32.mrf.mxu3  ;;  %v11315_v59 = vor.u32 %v13772_v57, %v11312_v55  ;;  %v11520_v32 = vld [vmem:[#allocation8 + $0xab0] sm:$0xf0]  ;;  %v13920_v44 = vld [vmem:[#allocation8 + $0xda4] sm:$0xf] }
 0x27d   :  { %7573 = vmatpush.bf16.msra.mxu2 %v11235_v43  ;;  %v13832_v43 = vld [vmem:[#allocation8 + $0xae4] sm:$0xf]  ;;  %v11776_v26 = vld [vmem:[#allocation8 + $0xcb0] sm:$0xf0] }
 0x27e   :  { %7586 = vmatpush.bf16.msra.mxu3 %v11363_v58  ;;  %v11680_v58 = vld [vmem:[#allocation8 + $0xbf0] sm:$0xf0]  ;;  %v11555_v11 = vor.u32 %v13832_v43, %v11552_v47  ;;  %v11779_v57 = vor.u32 %v13888_v41, %v11776_v26  ;;  %v13820_v55 = vld [vmem:[#allocation8 + $0xa84] sm:$0xf] }
 0x27f   :  { %7548 = vmatpush.bf16.msra.mxu0 %v10963_v14  ;;  %v11683_v13 = vor.u32 %v13864_v21, %v11680_v58  ;;  %v13828_v14 = vld [vmem:[#allocation8 + $0xac4] sm:$0xf]  ;;  %v11504_v38 = vld [vmem:[#allocation8 + $0xa90] sm:$0xf0] }
 0x280   :  { %7561 = vmatpush.bf16.msra.mxu1 %v11091_v16  ;;  %v11536_v16 = vld [vmem:[#allocation8 + $0xad0] sm:$0xf0]  ;;  %v13852_v43 = vld [vmem:[#allocation8 + $0xb84] sm:$0xf]  ;;  %v11507_v4 = vor.u32 %v13820_v55, %v11504_v38 }
 0x281   :  { %7574 = vmatpush.bf16.msra.mxu2 %v11219_v18  ;;  %v13860_v18 = vld [vmem:[#allocation8 + $0xbc4] sm:$0xf]  ;;  %v11539_v34 = vor.u32 %v13828_v14, %v11536_v16  ;;  %v11632_v21 = vld [vmem:[#allocation8 + $0xb90] sm:$0xf0] }
 0x282   :  { %7587 = vmatpush.bf16.msra.mxu3 %v11347_v24  ;;  %v11792_v24 = vld [vmem:[#allocation8 + $0xcd0] sm:$0xf0]  ;;  %v11667_v0 = vor.u32 %v13860_v18, %v11664_v7  ;;  %v13916_v62 = vld [vmem:[#allocation8 + $0xd84] sm:$0xf] }
 0x283   :  { %7549 = vmatpush.bf16.msra.mxu0 %v10947_v8  ;;  %v11795_v30 = vor.u32 %v13892_v23, %v11792_v24  ;;  %v13824_v8 = vld [vmem:[#allocation8 + $0xaa4] sm:$0xf]  ;;  %v11760_v58 = vld [vmem:[#allocation8 + $0xc90] sm:$0xf0] }
 0x284   :  { %7562 = vmatpush.bf16.msra.mxu1 %v11075_v9  ;;  %v11923_v9 = vor.u32 %v13924_v6, %v11920_v45  ;;  %v11523_v54 = vor.u32 %v13824_v8, %v11520_v32  ;;  %v13848_v14 = vld [vmem:[#allocation8 + $0xb64] sm:$0xf]  ;;  %v11744_v23 = vld [vmem:[#allocation8 + $0xc70] sm:$0xf0] }
 0x285   :  { %7575 = vmatpush.bf16.msra.mxu2 %v11203_v37  ;;  %v11648_v37 = vld [vmem:[#allocation8 + $0xbb0] sm:$0xf0]  ;;  %v13880_v7 = vld [vmem:[#allocation8 + $0xc64] sm:$0xf] }
 0x286   :  { %7588 = vmatpush.bf16.msra.mxu3 %v11331_v51  ;;  %v11904_v51 = vld [vmem:[#allocation8 + $0xdb0] sm:$0xf0]  ;;  %v11651_v12 = vor.u32 %v13856_v33, %v11648_v37  ;;  %v13912_v24 = vld [vmem:[#allocation8 + $0xd64] sm:$0xf] }
 0x287   :  { %7550 = vmatpush.bf16.msra.mxu0 %v10931_v31  ;;  %v11907_v47 = vor.u32 %v13920_v44, %v11904_v51  ;;  %v13884_v31 = vld [vmem:[#allocation8 + $0xc84] sm:$0xf]  ;;  %v7344_v60 = vpop.f32.mrf.mxu0  ;;  %v11872_v6 = vld [vmem:[#allocation8 + $0xd70] sm:$0xf0] }
 0x288   :  { %7563 = vmatpush.bf16.msra.mxu1 %v11059_v63  ;;  %v11888_v63 = vld [vmem:[#allocation8 + $0xd90] sm:$0xf0]  ;;  %v7357_v3 = vpop.f32.mrf.mxu1  ;;  %v13844_v8 = vld [vmem:[#allocation8 + $0xb44] sm:$0xf]  ;;  %v11875_v32 = vor.u32 %v13912_v24, %v11872_v6 }
 0x289   :  { %7576 = vmatpush.bf16.msra.mxu2 %v11187_v1  ;;  %v7345_v1 = vadd.f32 %v7344_v60, %v14826_v50  ;;  %v11891_v18 = vor.u32 %v13916_v62, %v11888_v63  ;;  %v13876_v37 = vld [vmem:[#allocation8 + $0xc44] sm:$0xf]  ;;  %v11728_v41 = vld [vmem:[#allocation8 + $0xc50] sm:$0xf0] }
 0x28a   :  { %7589 = vmatpush.bf16.msra.mxu3 %v11315_v59  ;;  %7551 = vmatmul.bf16.vlgmr.msra.gmra.mxu0 %v14718_v35  ;;  %v11635_v59 = vor.u32 %v13852_v43, %v11632_v21  ;;  %v13808_v21 = vld [vmem:[#allocation8 + $0xa24] sm:$0xf]  ;;  %v11584_v62 = vld [vmem:[#allocation8 + $0xb30] sm:$0xf0] }
 0x28b   :  { %7595 = vmatpush.bf16.msrb.mxu0 %v11555_v11  ;;  %7564 = vmatmul.bf16.vlgmr.msra.gmra.mxu1 %v14720_v42  ;;  %v11763_v11 = vor.u32 %v13884_v31, %v11760_v58  ;;  %v7358_v16 = vadd.f32 %v7357_v3, %v7345_v1  ;;  %v11456_v31 = vld [vmem:[#allocation8 + $0xa30] sm:$0xf0]  ;;  %v13840_v58 = vld [vmem:[#allocation8 + $0xb24] sm:$0xf] }
 0x28c   :  { %7608 = vmatpush.bf16.msrb.mxu1 %v11683_v13  ;;  %7577 = vmatmul.bf16.vlgmr.msra.gmra.mxu2 %v14738_v39  ;;  %v13816_v13 = vld [vmem:[#allocation8 + $0xa64] sm:$0xf]  ;;  %v11712_v1 = vld [vmem:[#allocation8 + $0xc30] sm:$0xf0] }
 0x28d   :  { %7621 = vmatpush.bf16.msrb.mxu2 %v11811_v48  ;;  %7590 = vmatmul.bf16.vlgmr.msra.gmra.mxu3 %v14740_v61  ;;  %v11488_v48 = vld [vmem:[#allocation8 + $0xa70] sm:$0xf0]  ;;  %v13872_v63 = vld [vmem:[#allocation8 + $0xc24] sm:$0xf] }
 0x28e   :  { %7634 = vmatpush.bf16.msrb.mxu3 %v11939_v49  ;;  %v11616_v49 = vld [vmem:[#allocation8 + $0xb70] sm:$0xf0]  ;;  %v11491_v45 = vor.u32 %v13816_v13, %v11488_v48  ;;  %v13904_v3 = vld [vmem:[#allocation8 + $0xd24] sm:$0xf]  ;;  %v11587_v48 = vor.u32 %v13840_v58, %v11584_v62 }
 0x28f   :  { %7596 = vmatpush.bf16.msrb.mxu0 %v11539_v34  ;;  %v11619_v50 = vor.u32 %v13848_v14, %v11616_v49  ;;  %v11747_v34 = vor.u32 %v13880_v7, %v11744_v23  ;;  %v7370_v33 = vpop.f32.mrf.mxu2  ;;  %v7346_v51 = vpop.f32.mrf.mxu0  ;;  %v11440_v13 = vld [vmem:[#allocation8 + $0xa10] sm:$0xf0]  ;;  %v11715_v14 = vor.u32 %v13872_v63, %v11712_v1  ;;  %v13868_v49 = vld [vmem:[#allocation8 + $0xc04] sm:$0xf] }
 0x290   :  { %7609 = vmatpush.bf16.msrb.mxu1 %v11667_v0  ;;  %v13812_v0 = vld [vmem:[#allocation8 + $0xa44] sm:$0xf]  ;;  %v7371_v26 = vadd.f32 %v7370_v33, %v7358_v16  ;;  %v7383_v44 = vpop.f32.mrf.mxu3  ;;  %v11696_v24 = vld [vmem:[#allocation8 + $0xc10] sm:$0xf0] }
 0x291   :  { %7622 = vmatpush.bf16.msrb.mxu2 %v11795_v30  ;;  %v11472_v30 = vld [vmem:[#allocation8 + $0xa50] sm:$0xf0]  ;;  %v13836_v16 = vld [vmem:[#allocation8 + $0xb04] sm:$0xf] }
 0x292   :  { %7635 = vmatpush.bf16.msrb.mxu3 %v11923_v9  ;;  %v11600_v9 = vld [vmem:[#allocation8 + $0xb50] sm:$0xf0]  ;;  %v11475_v55 = vor.u32 %v13812_v0, %v11472_v30  ;;  %v14833_v38 = vadd.f32 %v7383_v44, %v7371_v26  ;;  %v13900_v6 = vld [vmem:[#allocation8 + $0xd04] sm:$0xf] }
 0x293   :  { %7597 = vmatpush.bf16.msrb.mxu0 %v11523_v54  ;;  %v13908_v54 = vld [vmem:[#allocation8 + $0xd44] sm:$0xf]  ;;  %v11603_v43 = vor.u32 %v13844_v8, %v11600_v9  ;;  %v12064_v0 = vld [vmem:[#allocation8 + $0xef0] sm:$0xf0] }
 0x294   :  { %7610 = vmatpush.bf16.msrb.mxu1 %v11651_v12  ;;  %v11856_v12 = vld [vmem:[#allocation8 + $0xd50] sm:$0xf0]  ;;  %v13992_v30 = vld [vmem:[#allocation8 + $0xfe4] sm:$0xf] }
 0x295   :  { %7623 = vmatpush.bf16.msrb.mxu2 %v11779_v57  ;;  %v7359_v57 = vpop.f32.mrf.mxu1  ;;  %v11859_v60 = vor.u32 %v13908_v54, %v11856_v12  ;;  %v14024_v33 = vld [vmem:[#allocation8 + $0x10e4] sm:$0xf]  ;;  %v12320_v9 = vld [vmem:[#allocation8 + $0x10f0] sm:$0xf0] }
 0x296   :  { %7636 = vmatpush.bf16.msrb.mxu3 %v11907_v47  ;;  %v11731_v47 = vor.u32 %v13876_v37, %v11728_v41  ;;  %v11699_v41 = vor.u32 %v13868_v49, %v11696_v24  ;;  %v14056_v26 = vld [vmem:[#allocation8 + $0x11e4] sm:$0xf]  ;;  %v12448_v44 = vld [vmem:[#allocation8 + $0x11f0] sm:$0xf0]  ;;  %v12323_v57 = vor.u32 %v14024_v33, %v12320_v9 }
 0x297   :  { %7598 = vmatpush.bf16.msrb.mxu0 %v11507_v4  ;;  %v11840_v4 = vld [vmem:[#allocation8 + $0xd30] sm:$0xf0]  ;;  %v7372_v23 = vpop.f32.mrf.mxu2  ;;  %v14020_v58 = vld [vmem:[#allocation8 + $0x10c4] sm:$0xf] }
 0x298   :  { %7611 = vmatpush.bf16.msrb.mxu1 %v11635_v59  ;;  %v11459_v59 = vor.u32 %v13808_v21, %v11456_v31  ;;  %v11843_v7 = vor.u32 %v13904_v3, %v11840_v4  ;;  %v12451_v21 = vor.u32 %v14056_v26, %v12448_v44  ;;  %v12176_v31 = vld [vmem:[#allocation8 + $0xfd0] sm:$0xf0]  ;;  %v14052_v62 = vld [vmem:[#allocation8 + $0x11c4] sm:$0xf] }
 0x299   :  { %7624 = vmatpush.bf16.msrb.mxu2 %v11763_v11  ;;  %v13804_v11 = vld [vmem:[#allocation8 + $0xa04] sm:$0xf]  ;;  %v12432_v63 = vld [vmem:[#allocation8 + $0x11d0] sm:$0xf0] }
 0x29a   :  { %7637 = vmatpush.bf16.msrb.mxu3 %v11891_v18  ;;  %v11568_v18 = vld [vmem:[#allocation8 + $0xb10] sm:$0xf0]  ;;  %v11443_v8 = vor.u32 %v13804_v11, %v11440_v13  ;;  %v13984_v13 = vld [vmem:[#allocation8 + $0xfa4] sm:$0xf] }
 0x29b   :  { %7599 = vmatpush.bf16.msrb.mxu0 %v11491_v45  ;;  %v11824_v45 = vld [vmem:[#allocation8 + $0xd10] sm:$0xf0]  ;;  %v11571_v37 = vor.u32 %v13836_v16, %v11568_v18  ;;  %v14016_v16 = vld [vmem:[#allocation8 + $0x10a4] sm:$0xf] }
 0x29c   :  { %7612 = vmatpush.bf16.msrb.mxu1 %v11619_v50  ;;  %v7385_v50 = vpop.f32.mrf.mxu3  ;;  %v11827_v51 = vor.u32 %v13900_v6, %v11824_v45  ;;  %v12032_v11 = vld [vmem:[#allocation8 + $0xeb0] sm:$0xf0]  ;;  %v14048_v49 = vld [vmem:[#allocation8 + $0x11a4] sm:$0xf] }
 0x29d   :  { %7625 = vmatpush.bf16.msrb.mxu2 %v11747_v34  ;;  %v13960_v34 = vld [vmem:[#allocation8 + $0xee4] sm:$0xf]  ;;  %v12288_v18 = vld [vmem:[#allocation8 + $0x10b0] sm:$0xf0] }
 0x29e   :  { %7638 = vmatpush.bf16.msrb.mxu3 %v11875_v32  ;;  %v12192_v32 = vld [vmem:[#allocation8 + $0xff0] sm:$0xf0]  ;;  %v12067_v54 = vor.u32 %v13960_v34, %v12064_v0  ;;  %v12291_v6 = vor.u32 %v14016_v16, %v12288_v18  ;;  %v13948_v45 = vld [vmem:[#allocation8 + $0xe84] sm:$0xf] }
 0x29f   :  { %7600 = vmatpush.bf16.msrb.mxu0 %v11475_v55  ;;  %v12195_v12 = vor.u32 %v13992_v30, %v12192_v32  ;;  %v13956_v55 = vld [vmem:[#allocation8 + $0xec4] sm:$0xf]  ;;  %v12016_v50 = vld [vmem:[#allocation8 + $0xe90] sm:$0xf0] }
 0x2a0   :  { %7613 = vmatpush.bf16.msrb.mxu1 %v11603_v43  ;;  %v12048_v43 = vld [vmem:[#allocation8 + $0xed0] sm:$0xf0]  ;;  %v13980_v34 = vld [vmem:[#allocation8 + $0xf84] sm:$0xf]  ;;  %v12019_v44 = vor.u32 %v13948_v45, %v12016_v50 }
 0x2a1   :  { %7626 = vmatpush.bf16.msrb.mxu2 %v11731_v47  ;;  %v13988_v47 = vld [vmem:[#allocation8 + $0xfc4] sm:$0xf]  ;;  %v12051_v1 = vor.u32 %v13956_v55, %v12048_v43  ;;  %v12144_v30 = vld [vmem:[#allocation8 + $0xf90] sm:$0xf0] }
 0x2a2   :  { %7639 = vmatpush.bf16.msrb.mxu3 %v11859_v60  ;;  %v12304_v60 = vld [vmem:[#allocation8 + $0x10d0] sm:$0xf0]  ;;  %v12179_v3 = vor.u32 %v13988_v47, %v12176_v31  ;;  %v14044_v9 = vld [vmem:[#allocation8 + $0x1184] sm:$0xf] }
 0x2a3   :  { %7601 = vmatpush.bf16.msrb.mxu0 %v11459_v59  ;;  %v12307_v4 = vor.u32 %v14020_v58, %v12304_v60  ;;  %v13952_v59 = vld [vmem:[#allocation8 + $0xea4] sm:$0xf]  ;;  %v12272_v32 = vld [vmem:[#allocation8 + $0x1090] sm:$0xf0] }
 0x2a4   :  { %7614 = vmatpush.bf16.msrb.mxu1 %v11587_v48  ;;  %v12435_v48 = vor.u32 %v14052_v62, %v12432_v63  ;;  %v12035_v23 = vor.u32 %v13952_v59, %v12032_v11  ;;  %v13976_v55 = vld [vmem:[#allocation8 + $0xf64] sm:$0xf]  ;;  %v12256_v58 = vld [vmem:[#allocation8 + $0x1070] sm:$0xf0] }
 0x2a5   :  { %7627 = vmatpush.bf16.msrb.mxu2 %v11715_v14  ;;  %v12160_v14 = vld [vmem:[#allocation8 + $0xfb0] sm:$0xf0]  ;;  %v14008_v31 = vld [vmem:[#allocation8 + $0x1064] sm:$0xf] }
 0x2a6   :  { %7640 = vmatpush.bf16.msrb.mxu3 %v11843_v7  ;;  %v12416_v7 = vld [vmem:[#allocation8 + $0x11b0] sm:$0xf0]  ;;  %v12163_v24 = vor.u32 %v13984_v13, %v12160_v14  ;;  %v14040_v60 = vld [vmem:[#allocation8 + $0x1164] sm:$0xf] }
 0x2a7   :  { %7602 = vmatpush.bf16.msrb.mxu0 %v11443_v8  ;;  %v12419_v0 = vor.u32 %v14048_v49, %v12416_v7  ;;  %v14012_v8 = vld [vmem:[#allocation8 + $0x1084] sm:$0xf]  ;;  %v7396_v33 = vpop.f32.mrf.mxu0  ;;  %v12384_v62 = vld [vmem:[#allocation8 + $0x1170] sm:$0xf0] }
 0x2a8   :  { %7615 = vmatpush.bf16.msrb.mxu1 %v11571_v37  ;;  %v12400_v37 = vld [vmem:[#allocation8 + $0x1190] sm:$0xf0]  ;;  %v7409_v26 = vpop.f32.mrf.mxu1  ;;  %v13972_v59 = vld [vmem:[#allocation8 + $0xf44] sm:$0xf]  ;;  %v12387_v11 = vor.u32 %v14040_v60, %v12384_v62 }
 0x2a9   :  { %7628 = vmatpush.bf16.msrb.mxu2 %v11699_v41  ;;  %v7397_v41 = vadd.f32 %v7396_v33, %v14833_v38  ;;  %v12403_v47 = vor.u32 %v14044_v9, %v12400_v37  ;;  %v14004_v14 = vld [vmem:[#allocation8 + $0x1044] sm:$0xf]  ;;  %v12240_v16 = vld [vmem:[#allocation8 + $0x1050] sm:$0xf0] }
 0x2aa   :  { %7641 = vmatpush.bf16.msrb.mxu3 %v11827_v51  ;;  %7603 = vmatmul.bf16.vlgmr.msrb.gmra.mxu0 %v14742_v2  ;;  %v12147_v51 = vor.u32 %v13980_v34, %v12144_v30  ;;  %v13936_v30 = vld [vmem:[#allocation8 + $0xe24] sm:$0xf]  ;;  %v12096_v9 = vld [vmem:[#allocation8 + $0xf30] sm:$0xf0] }
 0x2ab   :  { %7647 = vmatpush.bf16.msra.mxu0 %v12067_v54  ;;  %7616 = vmatmul.bf16.vlgmr.msrb.gmra.mxu1 %v14744_v10  ;;  %v12275_v54 = vor.u32 %v14012_v8, %v12272_v32  ;;  %v7410_v43 = vadd.f32 %v7409_v26, %v7397_v41  ;;  %v11968_v8 = vld [vmem:[#allocation8 + $0xe30] sm:$0xf0]  ;;  %v13968_v32 = vld [vmem:[#allocation8 + $0xf24] sm:$0xf] }
 0x2ac   :  { %7660 = vmatpush.bf16.msra.mxu1 %v12195_v12  ;;  %7629 = vmatmul.bf16.vlgmr.msrb.gmra.mxu2 %v14762_v5  ;;  %v13944_v12 = vld [vmem:[#allocation8 + $0xe64] sm:$0xf]  ;;  %v12224_v41 = vld [vmem:[#allocation8 + $0x1030] sm:$0xf0] }
 0x2ad   :  { %7673 = vmatpush.bf16.msra.mxu2 %v12323_v57  ;;  %7642 = vmatmul.bf16.vlgmr.msrb.gmra.mxu3 %v14764_v25  ;;  %v12000_v57 = vld [vmem:[#allocation8 + $0xe70] sm:$0xf0]  ;;  %v14000_v37 = vld [vmem:[#allocation8 + $0x1024] sm:$0xf] }
 0x2ae   :  { %7686 = vmatpush.bf16.msra.mxu3 %v12451_v21  ;;  %v12128_v21 = vld [vmem:[#allocation8 + $0xf70] sm:$0xf0]  ;;  %v12003_v63 = vor.u32 %v13944_v12, %v12000_v57  ;;  %v14032_v26 = vld [vmem:[#allocation8 + $0x1124] sm:$0xf]  ;;  %v12099_v57 = vor.u32 %v13968_v32, %v12096_v9 }
 0x2af   :  { %7648 = vmatpush.bf16.msra.mxu0 %v12051_v1  ;;  %v12131_v38 = vor.u32 %v13976_v55, %v12128_v21  ;;  %v12259_v1 = vor.u32 %v14008_v31, %v12256_v58  ;;  %v7422_v13 = vpop.f32.mrf.mxu2  ;;  %v7398_v7 = vpop.f32.mrf.mxu0  ;;  %v11952_v12 = vld [vmem:[#allocation8 + $0xe10] sm:$0xf0]  ;;  %v12227_v55 = vor.u32 %v14000_v37, %v12224_v41  ;;  %v13996_v21 = vld [vmem:[#allocation8 + $0x1004] sm:$0xf] }
 0x2b0   :  { %7661 = vmatpush.bf16.msra.mxu1 %v12179_v3  ;;  %v13940_v3 = vld [vmem:[#allocation8 + $0xe44] sm:$0xf]  ;;  %v7423_v18 = vadd.f32 %v7422_v13, %v7410_v43  ;;  %v7435_v49 = vpop.f32.mrf.mxu3  ;;  %v12208_v60 = vld [vmem:[#allocation8 + $0x1010] sm:$0xf0] }
 0x2b1   :  { %7674 = vmatpush.bf16.msra.mxu2 %v12307_v4  ;;  %v11984_v4 = vld [vmem:[#allocation8 + $0xe50] sm:$0xf0]  ;;  %v13964_v43 = vld [vmem:[#allocation8 + $0xf04] sm:$0xf] }
 0x2b2   :  { %7687 = vmatpush.bf16.msra.mxu3 %v12435_v48  ;;  %v12112_v48 = vld [vmem:[#allocation8 + $0xf50] sm:$0xf0]  ;;  %v11987_v45 = vor.u32 %v13940_v3, %v11984_v4  ;;  %v14840_v50 = vadd.f32 %v7435_v49, %v7423_v18  ;;  %v14028_v62 = vld [vmem:[#allocation8 + $0x1104] sm:$0xf] }
 0x2b3   :  { %7649 = vmatpush.bf16.msra.mxu0 %v12035_v23  ;;  %v14036_v23 = vld [vmem:[#allocation8 + $0x1144] sm:$0xf]  ;;  %v12115_v34 = vor.u32 %v13972_v59, %v12112_v48  ;;  %v12576_v3 = vld [vmem:[#allocation8 + $0x12f0] sm:$0xf0] }
 0x2b4   :  { %7662 = vmatpush.bf16.msra.mxu1 %v12163_v24  ;;  %v12368_v24 = vld [vmem:[#allocation8 + $0x1150] sm:$0xf0]  ;;  %v14120_v4 = vld [vmem:[#allocation8 + $0x13e4] sm:$0xf] }
 0x2b5   :  { %7675 = vmatpush.bf16.msra.mxu2 %v12291_v6  ;;  %v7411_v6 = vpop.f32.mrf.mxu1  ;;  %v12371_v33 = vor.u32 %v14036_v23, %v12368_v24  ;;  %v14152_v13 = vld [vmem:[#allocation8 + $0x14e4] sm:$0xf]  ;;  %v12832_v48 = vld [vmem:[#allocation8 + $0x14f0] sm:$0xf0] }
 0x2b6   :  { %7688 = vmatpush.bf16.msra.mxu3 %v12419_v0  ;;  %v12243_v0 = vor.u32 %v14004_v14, %v12240_v16  ;;  %v12211_v16 = vor.u32 %v13996_v21, %v12208_v60  ;;  %v14184_v18 = vld [vmem:[#allocation8 + $0x15e4] sm:$0xf]  ;;  %v12960_v49 = vld [vmem:[#allocation8 + $0x15f0] sm:$0xf0]  ;;  %v12835_v6 = vor.u32 %v14152_v13, %v12832_v48 }
 0x2b7   :  { %7650 = vmatpush.bf16.msra.mxu0 %v12019_v44  ;;  %v12352_v44 = vld [vmem:[#allocation8 + $0x1130] sm:$0xf0]  ;;  %v7424_v58 = vpop.f32.mrf.mxu2  ;;  %v14148_v32 = vld [vmem:[#allocation8 + $0x14c4] sm:$0xf] }
 0x2b8   :  { %7663 = vmatpush.bf16.msra.mxu1 %v12147_v51  ;;  %v11971_v51 = vor.u32 %v13936_v30, %v11968_v8  ;;  %v12355_v31 = vor.u32 %v14032_v26, %v12352_v44  ;;  %v12963_v30 = vor.u32 %v14184_v18, %v12960_v49  ;;  %v12688_v8 = vld [vmem:[#allocation8 + $0x13d0] sm:$0xf0]  ;;  %v14180_v9 = vld [vmem:[#allocation8 + $0x15c4] sm:$0xf] }
 0x2b9   :  { %7676 = vmatpush.bf16.msra.mxu2 %v12275_v54  ;;  %v13932_v54 = vld [vmem:[#allocation8 + $0xe04] sm:$0xf]  ;;  %v12944_v37 = vld [vmem:[#allocation8 + $0x15d0] sm:$0xf0] }
 0x2ba   :  { %7689 = vmatpush.bf16.msra.mxu3 %v12403_v47  ;;  %v12080_v47 = vld [vmem:[#allocation8 + $0xf10] sm:$0xf0]  ;;  %v11955_v59 = vor.u32 %v13932_v54, %v11952_v12  ;;  %v14112_v12 = vld [vmem:[#allocation8 + $0x13a4] sm:$0xf] }
 0x2bb   :  { %7651 = vmatpush.bf16.msra.mxu0 %v12003_v63  ;;  %v12336_v63 = vld [vmem:[#allocation8 + $0x1110] sm:$0xf0]  ;;  %v12083_v14 = vor.u32 %v13964_v43, %v12080_v47  ;;  %v14144_v43 = vld [vmem:[#allocation8 + $0x14a4] sm:$0xf] }
 0x2bc   :  { %7664 = vmatpush.bf16.msra.mxu1 %v12131_v38  ;;  %v7437_v38 = vpop.f32.mrf.mxu3  ;;  %v12339_v7 = vor.u32 %v14028_v62, %v12336_v63  ;;  %v12544_v54 = vld [vmem:[#allocation8 + $0x12b0] sm:$0xf0]  ;;  %v14176_v21 = vld [vmem:[#allocation8 + $0x15a4] sm:$0xf] }
 0x2bd   :  { %7677 = vmatpush.bf16.msra.mxu2 %v12259_v1  ;;  %v14088_v1 = vld [vmem:[#allocation8 + $0x12e4] sm:$0xf]  ;;  %v12800_v47 = vld [vmem:[#allocation8 + $0x14b0] sm:$0xf0] }
 0x2be   :  { %7690 = vmatpush.bf16.msra.mxu3 %v12387_v11  ;;  %v12704_v11 = vld [vmem:[#allocation8 + $0x13f0] sm:$0xf0]  ;;  %v12579_v23 = vor.u32 %v14088_v1, %v12576_v3  ;;  %v12803_v62 = vor.u32 %v14144_v43, %v12800_v47  ;;  %v14076_v63 = vld [vmem:[#allocation8 + $0x1284] sm:$0xf] }
 0x2bf   :  { %7652 = vmatpush.bf16.msra.mxu0 %v11987_v45  ;;  %v12707_v24 = vor.u32 %v14120_v4, %v12704_v11  ;;  %v14084_v45 = vld [vmem:[#allocation8 + $0x12c4] sm:$0xf]  ;;  %v12528_v38 = vld [vmem:[#allocation8 + $0x1290] sm:$0xf0] }
 0x2c0   :  { %7665 = vmatpush.bf16.msra.mxu1 %v12115_v34  ;;  %v12560_v34 = vld [vmem:[#allocation8 + $0x12d0] sm:$0xf0]  ;;  %v14108_v1 = vld [vmem:[#allocation8 + $0x1384] sm:$0xf]  ;;  %v12531_v49 = vor.u32 %v14076_v63, %v12528_v38 }
 0x2c1   :  { %7678 = vmatpush.bf16.msra.mxu2 %v12243_v0  ;;  %v14116_v0 = vld [vmem:[#allocation8 + $0x13c4] sm:$0xf]  ;;  %v12563_v41 = vor.u32 %v14084_v45, %v12560_v34  ;;  %v12656_v4 = vld [vmem:[#allocation8 + $0x1390] sm:$0xf0] }
 0x2c2   :  { %7691 = vmatpush.bf16.msra.mxu3 %v12371_v33  ;;  %v12816_v33 = vld [vmem:[#allocation8 + $0x14d0] sm:$0xf0]  ;;  %v12691_v26 = vor.u32 %v14116_v0, %v12688_v8  ;;  %v14172_v48 = vld [vmem:[#allocation8 + $0x1584] sm:$0xf] }
 0x2c3   :  { %7653 = vmatpush.bf16.msra.mxu0 %v11971_v51  ;;  %v12819_v44 = vor.u32 %v14148_v32, %v12816_v33  ;;  %v14080_v51 = vld [vmem:[#allocation8 + $0x12a4] sm:$0xf]  ;;  %v12784_v11 = vld [vmem:[#allocation8 + $0x1490] sm:$0xf0] }
 0x2c4   :  { %7666 = vmatpush.bf16.msra.mxu1 %v12099_v57  ;;  %v12947_v57 = vor.u32 %v14180_v9, %v12944_v37  ;;  %v12547_v58 = vor.u32 %v14080_v51, %v12544_v54  ;;  %v14104_v45 = vld [vmem:[#allocation8 + $0x1364] sm:$0xf]  ;;  %v12768_v32 = vld [vmem:[#allocation8 + $0x1470] sm:$0xf0]  ;;  %v14246_v37 = vld [vmem:[#allocation10] sm:$0xf] }
 0x2c5   :  { %7679 = vmatpush.bf16.msra.mxu2 %v12227_v55  ;;  %v12672_v55 = vld [vmem:[#allocation8 + $0x13b0] sm:$0xf0]  ;;  %v14136_v8 = vld [vmem:[#allocation8 + $0x1464] sm:$0xf] }
 0x2c6   :  { %7692 = vmatpush.bf16.msra.mxu3 %v12355_v31  ;;  %v12928_v31 = vld [vmem:[#allocation8 + $0x15b0] sm:$0xf0]  ;;  %v12675_v60 = vor.u32 %v14112_v12, %v12672_v55  ;;  %v14168_v33 = vld [vmem:[#allocation8 + $0x1564] sm:$0xf] }
 0x2c7   :  { %7654 = vmatpush.bf16.msra.mxu0 %v11955_v59  ;;  %v12931_v3 = vor.u32 %v14176_v21, %v12928_v31  ;;  %v14140_v59 = vld [vmem:[#allocation8 + $0x1484] sm:$0xf]  ;;  %v7448_v13 = vpop.f32.mrf.mxu0  ;;  %v12896_v9 = vld [vmem:[#allocation8 + $0x1570] sm:$0xf0] }
 0x2c8   :  { %7667 = vmatpush.bf16.msra.mxu1 %v12083_v14  ;;  %v12912_v14 = vld [vmem:[#allocation8 + $0x1590] sm:$0xf0]  ;;  %v7461_v18 = vpop.f32.mrf.mxu1  ;;  %v14068_v51 = vld [vmem:[#allocation8 + $0x1244] sm:$0xf] }
 0x2c9   :  { %7680 = vmatpush.bf16.msra.mxu2 %v12211_v16  ;;  %v7449_v16 = vadd.f32 %v7448_v13, %v14840_v50  ;;  %v12915_v0 = vor.u32 %v14172_v48, %v12912_v14  ;;  %v3652_v50 = vperm.slane %v14246_v37, 1  ;;  %v12496_v54 = vld [vmem:[#allocation8 + $0x1250] sm:$0xf0]  ;;  %v14100_v12 = vld [vmem:[#allocation8 + $0x1344] sm:$0xf] }
 0x2ca   :  { %7693 = vmatpush.bf16.msra.mxu3 %v12339_v7  ;;  %7655 = vmatmul.bf16.vlgmr.msra.gmra.mxu0 %v14766_v29  ;;  %v12659_v7 = vor.u32 %v14108_v1, %v12656_v4  ;;  %v12624_v43 = vld [vmem:[#allocation8 + $0x1350] sm:$0xf0]  ;;  %v14132_v47 = vld [vmem:[#allocation8 + $0x1444] sm:$0xf]  ;;  %v12499_v1 = vor.u32 %v14068_v51, %v12496_v54  ;;  %v10278_v51 = vld [vmem:[#allocation8 + $0xe8] sm:$0xf] }
 0x2cb   :  { %7699 = vmatpush.bf16.msrb.mxu0 %v12579_v23  ;;  %7668 = vmatmul.bf16.vlgmr.msra.gmra.mxu1 %v14768_v40  ;;  %v12787_v23 = vor.u32 %v14140_v59, %v12784_v11  ;;  %v14847_v34 = vadd.f32 %v7461_v18, %v7449_v16  ;;  %v12752_v21 = vld [vmem:[#allocation8 + $0x1450] sm:$0xf0]  ;;  %v12627_v4 = vor.u32 %v14100_v12, %v12624_v43  ;;  %v14064_v11 = vld [vmem:[#allocation8 + $0x1224] sm:$0xf]  ;;  %v13515_v54 = vld [vmem:[#allocation8 + $0xf4] sm:$0xf0] }
 0x2cc   :  { %7712 = vmatpush.bf16.msrb.mxu1 %v12707_v24  ;;  %7681 = vmatmul.bf16.vlgmr.msra.gmra.mxu2 %v14790_v56  ;;  %v14072_v24 = vld [vmem:[#allocation8 + $0x1264] sm:$0xf]  ;;  %v12880_v63 = vld [vmem:[#allocation8 + $0x1550] sm:$0xf0]  ;;  %v12755_v59 = vor.u32 %v14132_v47, %v12752_v21  ;;  %v10406_v12 = vld [vmem:[#allocation8 + $0x1e8] sm:$0xf] }
 0x2cd   :  { %7725 = vmatpush.bf16.msrb.mxu2 %v12835_v6  ;;  %7694 = vmatmul.bf16.vlgmr.msra.gmra.mxu3 %v14792_v19  ;;  %v12512_v6 = vld [vmem:[#allocation8 + $0x1270] sm:$0xf0]  ;;  %v14096_v48 = vld [vmem:[#allocation8 + $0x1324] sm:$0xf]  ;;  %v10534_v43 = vld [vmem:[#allocation8 + $0x2e8] sm:$0xf] }
 0x2ce   :  { %7738 = vmatpush.bf16.msrb.mxu3 %v12963_v30  ;;  %v12640_v30 = vld [vmem:[#allocation8 + $0x1370] sm:$0xf0]  ;;  %v14128_v18 = vld [vmem:[#allocation8 + $0x1424] sm:$0xf]  ;;  %v13579_v47 = vld [vmem:[#allocation8 + $0x2f4] sm:$0xf0] }
 0x2cf   :  { %7700 = vmatpush.bf16.msrb.mxu0 %v12563_v41  ;;  %v12515_v41 = vor.u32 %v14072_v24, %v12512_v6  ;;  %v7474_v55 = vpop.f32.mrf.mxu2  ;;  %v12480_v13 = vld [vmem:[#allocation8 + $0x1230] sm:$0xf0]  ;;  %v14060_v6 = vld [vmem:[#allocation8 + $0x1204] sm:$0xf] }
 0x2d0   :  { %7713 = vmatpush.bf16.msrb.mxu1 %v12691_v26  ;;  %v12643_v26 = vor.u32 %v14104_v45, %v12640_v30  ;;  %v7475_v31 = vadd.f32 %v7474_v55, %v3652_v50  ;;  %v7463_v38 = vpop.f32.mrf.mxu1  ;;  %v12608_v16 = vld [vmem:[#allocation8 + $0x1330] sm:$0xf0]  ;;  %v12483_v24 = vor.u32 %v14064_v11, %v12480_v13  ;;  %v13547_v55 = vld [vmem:[#allocation8 + $0x1f4] sm:$0xf0]  ;;  %v10390_v11 = vld [vmem:[#allocation8 + $0x1c8] sm:$0xf] }
 0x2d1   :  { %7726 = vmatpush.bf16.msrb.mxu2 %v12819_v44  ;;  %v12771_v44 = vor.u32 %v14136_v8, %v12768_v32  ;;  %v12464_v45 = vld [vmem:[#allocation8 + $0x1210] sm:$0xf0]  ;;  %v14092_v8 = vld [vmem:[#allocation8 + $0x1304] sm:$0xf]  ;;  %v10407_v38 = vor.u32 %v13547_v55, %v10406_v12  ;;  %v10486_v55 = vld [vmem:[#allocation8 + $0x288] sm:$0xf] }
 0x2d2   :  { %7739 = vmatpush.bf16.msrb.mxu3 %v12947_v57  ;;  %v12899_v57 = vor.u32 %v14168_v33, %v12896_v9  ;;  %v12592_v32 = vld [vmem:[#allocation8 + $0x1310] sm:$0xf0]  ;;  %v14124_v33 = vld [vmem:[#allocation8 + $0x1404] sm:$0xf] }
 0x2d3   :  { %7701 = vmatpush.bf16.msrb.mxu0 %v12547_v58  ;;  %v7487_v58 = vpop.f32.mrf.mxu3  ;;  %v12720_v50 = vld [vmem:[#allocation8 + $0x1410] sm:$0xf0]  ;;  %v12595_v21 = vor.u32 %v14092_v8, %v12592_v32  ;;  %v13539_v8 = vld [vmem:[#allocation8 + $0x1b4] sm:$0xf0]  ;;  %v10502_v32 = vld [vmem:[#allocation8 + $0x2a8] sm:$0xf] }
 0x2d4   :  { %7714 = vmatpush.bf16.msrb.mxu1 %v12675_v60  ;;  %v7450_v60 = vpop.f32.mrf.mxu0 }
 0x2d5   :  { %7727 = vmatpush.bf16.msrb.mxu2 %v12803_v62  ;;  %v14164_v62 = vld [vmem:[#allocation8 + $0x1544] sm:$0xf]  ;;  %v13611_v60 = vld [vmem:[#allocation8 + $0x3f4] sm:$0xf0] }
 0x2d6   :  { %7740 = vmatpush.bf16.msrb.mxu3 %v12931_v3  ;;  %v14849_v3 = vadd.f32 %v7487_v58, %v7475_v31  ;;  %v12883_v14 = vor.u32 %v14164_v62, %v12880_v63  ;;  %v12723_v31 = vor.u32 %v14124_v33, %v12720_v50  ;;  %v10662_v58 = vld [vmem:[#allocation8 + $0x3e8] sm:$0xf]  ;;  %v10279_v63 = vor.u32 %v13515_v54, %v10278_v51  ;;  %v13571_v33 = vld [vmem:[#allocation8 + $0x2b4] sm:$0xf0] }
 0x2d7   :  { %7702 = vmatpush.bf16.msrb.mxu0 %v12531_v49  ;;  %v12736_v49 = vld [vmem:[#allocation8 + $0x1430] sm:$0xf0]  ;;  %v7476_v37 = vpop.f32.mrf.mxu2  ;;  %v10663_v13 = vor.u32 %v13611_v60, %v10662_v58  ;;  %v13503_v51 = vld [vmem:[#allocation8 + $0x94] sm:$0xf0]  ;;  %v10358_v54 = vld [vmem:[#allocation8 + $0x188] sm:$0xf] }
 0x2d8   :  { %7715 = vmatpush.bf16.msrb.mxu1 %v12659_v7  ;;  %v14160_v7 = vld [vmem:[#allocation8 + $0x1524] sm:$0xf]  ;;  %v12739_v30 = vor.u32 %v14128_v18, %v12736_v49  ;;  %v10646_v18 = vld [vmem:[#allocation8 + $0x3c8] sm:$0xf]  ;;  %v13607_v49 = vld [vmem:[#allocation8 + $0x3d4] sm:$0xf0] }
 0x2d9   :  { %7728 = vmatpush.bf16.msrb.mxu2 %v12787_v23  ;;  %v12864_v23 = vld [vmem:[#allocation8 + $0x1530] sm:$0xf0]  ;;  %v13603_v37 = vld [vmem:[#allocation8 + $0x3b4] sm:$0xf0] }
 0x2da   :  { %7741 = vmatpush.bf16.msrb.mxu3 %v12915_v0  ;;  %v12611_v0 = vor.u32 %v14096_v48, %v12608_v16  ;;  %v12867_v9 = vor.u32 %v14160_v7, %v12864_v23  ;;  %v13543_v48 = vld [vmem:[#allocation8 + $0x1d4] sm:$0xf0] }
 0x2db   :  { %7703 = vmatpush.bf16.msrb.mxu0 %v12515_v41  ;;  %v14156_v41 = vld [vmem:[#allocation8 + $0x1504] sm:$0xf]  ;;  %v13575_v16 = vld [vmem:[#allocation8 + $0x2d4] sm:$0xf0]  ;;  %v10391_v23 = vor.u32 %v13543_v48, %v10390_v11 }
 0x2dc   :  { %7716 = vmatpush.bf16.msrb.mxu1 %v12643_v26  ;;  %v12848_v26 = vld [vmem:[#allocation8 + $0x1510] sm:$0xf0]  ;;  %v13531_v48 = vld [vmem:[#allocation8 + $0x174] sm:$0xf0] }
 0x2dd   :  { %7729 = vmatpush.bf16.msrb.mxu2 %v12771_v44  ;;  %v7489_v44 = vpop.f32.mrf.mxu3  ;;  %v12851_v62 = vor.u32 %v14156_v41, %v12848_v26  ;;  %v10503_v26 = vor.u32 %v13571_v33, %v10502_v32  ;;  %v10454_v32 = vld [vmem:[#allocation8 + $0x248] sm:$0xf]  ;;  %v13559_v33 = vld [vmem:[#allocation8 + $0x254] sm:$0xf0] }
 0x2de   :  { %7742 = vmatpush.bf16.msrb.mxu3 %v12899_v57  ;;  %v12467_v57 = vor.u32 %v14060_v6, %v12464_v45  ;;  %v10246_v6 = vld [vmem:[#allocation8 + $0xa8] sm:$0xf]  ;;  %v13507_v45 = vld [vmem:[#allocation8 + $0xb4] sm:$0xf0] }
 0x2df   :  { %7704 = vmatpush.bf16.msrb.mxu0 %v12499_v1  ;;  %v10535_v1 = vor.u32 %v13579_v47, %v10534_v43  ;;  %v10247_v50 = vor.u32 %v13507_v45, %v10246_v6  ;;  %v10230_v44 = vld [vmem:[#allocation8 + $0x88] sm:$0xf]  ;;  %v13567_v43 = vld [vmem:[#allocation8 + $0x294] sm:$0xf0] }
 0x2e0   :  { %7717 = vmatpush.bf16.msrb.mxu1 %v12627_v4  ;;  %v10262_v4 = vld [vmem:[#allocation8 + $0xc8] sm:$0xf]  ;;  %v13495_v6 = vld [vmem:[#allocation8 + $0x54] sm:$0xf0] }
 0x2e1   :  { %7730 = vmatpush.bf16.msrb.mxu2 %v12755_v59  ;;  %v13511_v59 = vld [vmem:[#allocation8 + $0xd4] sm:$0xf0]  ;;  %v10326_v45 = vld [vmem:[#allocation8 + $0x148] sm:$0xf] }
 0x2e2   :  { %7743 = vmatpush.bf16.msrb.mxu3 %v12883_v14  ;;  %v10518_v14 = vld [vmem:[#allocation8 + $0x2c8] sm:$0xf]  ;;  %v10263_v7 = vor.u32 %v13511_v59, %v10262_v4  ;;  %v13499_v4 = vld [vmem:[#allocation8 + $0x74] sm:$0xf0] }
 0x2e3   :  { %7705 = vmatpush.bf16.msrb.mxu0 %v12483_v24  ;;  %v10519_v24 = vor.u32 %v13575_v16, %v10518_v14  ;;  %v10342_v59 = vld [vmem:[#allocation8 + $0x168] sm:$0xf]  ;;  %v13563_v16 = vld [vmem:[#allocation8 + $0x274] sm:$0xf0] }
 0x2e4   :  { %7718 = vmatpush.bf16.msrb.mxu1 %v12611_v0  ;;  %v10374_v0 = vld [vmem:[#allocation8 + $0x1a8] sm:$0xf] }
 0x2e5   :  { %7731 = vmatpush.bf16.msrb.mxu2 %v12739_v30  ;;  %v10647_v30 = vor.u32 %v13607_v49, %v10646_v18  ;;  %v10375_v41 = vor.u32 %v13539_v8, %v10374_v0  ;;  %v10470_v14 = vld [vmem:[#allocation8 + $0x268] sm:$0xf]  ;;  %v13595_v49 = vld [vmem:[#allocation8 + $0x374] sm:$0xf0] }
 0x2e6   :  { %7744 = vmatpush.bf16.msrb.mxu3 %v12867_v9  ;;  %v10630_v9 = vld [vmem:[#allocation8 + $0x3a8] sm:$0xf]  ;;  %v13527_v8 = vld [vmem:[#allocation8 + $0x154] sm:$0xf0] }
 0x2e7   :  { %7706 = vmatpush.bf16.msrb.mxu0 %v12467_v57  ;;  %v10631_v12 = vor.u32 %v13603_v37, %v10630_v9  ;;  %v13535_v57 = vld [vmem:[#allocation8 + $0x194] sm:$0xf0]  ;;  %v7500_v47 = vpop.f32.mrf.mxu0  ;;  %v10598_v18 = vld [vmem:[#allocation8 + $0x368] sm:$0xf] }
 0x2e8   :  { %7719 = vmatpush.bf16.msrb.mxu1 %v12595_v21  ;;  %v10614_v21 = vld [vmem:[#allocation8 + $0x388] sm:$0xf]  ;;  %v7501_v58 = vadd.f32 %v7500_v47, %v14849_v3  ;;  %v7513_v60 = vpop.f32.mrf.mxu1  ;;  %v10343_v3 = vor.u32 %v13531_v48, %v10342_v59  ;;  %v10599_v0 = vor.u32 %v13595_v49, %v10598_v18  ;;  %v13519_v48 = vld [vmem:[#allocation8 + $0x114] sm:$0xf0] }
 0x2e9   :  { %7732 = vmatpush.bf16.msrb.mxu2 %v12723_v31  ;;  %v13599_v31 = vld [vmem:[#allocation8 + $0x394] sm:$0xf0]  ;;  %v10310_v47 = vld [vmem:[#allocation8 + $0x128] sm:$0xf] }
 0x2ea   :  { %7745 = vmatpush.bf16.msrb.mxu3 %v12851_v62  ;;  %7707 = vmatmul.bf16.vlgmr.msrb.gmra.mxu0 %v14794_v20  ;;  %v10231_v62 = vor.u32 %v13503_v51, %v10230_v44  ;;  %v7514_v11 = vadd.f32 %v7513_v60, %v7501_v58  ;;  %v10438_v58 = vld [vmem:[#allocation8 + $0x228] sm:$0xf]  ;;  %v13555_v60 = vld [vmem:[#allocation8 + $0x234] sm:$0xf0] }
 0x2eb   :  { %7751 = vmatpush.bf16.msra.mxu0 %v10279_v63  ;;  %7720 = vmatmul.bf16.vlgmr.msrb.gmra.mxu1 %v14796_v27  ;;  %v10359_v63 = vor.u32 %v13535_v57, %v10358_v54  ;;  %v10455_v57 = vor.u32 %v13559_v33, %v10454_v32  ;;  %v13551_v49 = vld [vmem:[#allocation8 + $0x214] sm:$0xf0] }
 0x2ec   :  { %7764 = vmatpush.bf16.msra.mxu1 %v10407_v38  ;;  %7733 = vmatmul.bf16.vlgmr.msrb.gmra.mxu2 %v14810_v52  ;;  %v10487_v38 = vor.u32 %v13567_v43, %v10486_v55  ;;  %v10182_v55 = vld [vmem:[#allocation8 + $0x28] sm:$0xf]  ;;  %v13491_v43 = vld [vmem:[#allocation8 + $0x34] sm:$0xf0] }
 0x2ed   :  { %7777 = vmatpush.bf16.msra.mxu2 %v10535_v1  ;;  %7746 = vmatmul.bf16.vlgmr.msrb.gmra.mxu3 %v14812_v17  ;;  %v10214_v1 = vld [vmem:[#allocation8 + $0x68] sm:$0xf]  ;;  %v13707_v32 = vld [vmem:[#allocation8 + $0x6f4] sm:$0xf0] }
 0x2ee   :  { %7790 = vmatpush.bf16.msra.mxu3 %v10663_v13  ;;  %v10615_v13 = vor.u32 %v13599_v31, %v10614_v21  ;;  %v13523_v31 = vld [vmem:[#allocation8 + $0x134] sm:$0xf0] }
 0x2ef   :  { %7752 = vmatpush.bf16.msra.mxu0 %v10263_v7  ;;  %v10215_v7 = vor.u32 %v13499_v4, %v10214_v1  ;;  %v10166_v1 = vld [vmem:[#allocation8 + $0x8] sm:$0xf]  ;;  %v13487_v4 = vld [vmem:[#allocation8 + $0x14] sm:$0xf0]  ;;  %v10311_v59 = vor.u32 %v13523_v31, %v10310_v47 }
 0x2f0   :  { %7765 = vmatpush.bf16.msra.mxu1 %v10391_v23  ;;  %v10471_v23 = vor.u32 %v13563_v16, %v10470_v14  ;;  %v7539_v37 = vpop.f32.mrf.mxu3  ;;  %v7515_v44 = vpop.f32.mrf.mxu1  ;;  %v10422_v14 = vld [vmem:[#allocation8 + $0x208] sm:$0xf]  ;;  %v13671_v47 = vld [vmem:[#allocation8 + $0x5d4] sm:$0xf0] }
 0x2f1   :  { %7778 = vmatpush.bf16.msra.mxu2 %v10519_v24  ;;  %v10198_v24 = vld [vmem:[#allocation8 + $0x48] sm:$0xf]  ;;  %v13703_v31 = vld [vmem:[#allocation8 + $0x6d4] sm:$0xf0] }
 0x2f2   :  { %7791 = vmatpush.bf16.msra.mxu3 %v10647_v30  ;;  %v7526_v30 = vpop.f32.mrf.mxu2  ;;  %v10199_v51 = vor.u32 %v13495_v6, %v10198_v24  ;;  %v10790_v24 = vld [vmem:[#allocation8 + $0x4e8] sm:$0xf]  ;;  %v13643_v6 = vld [vmem:[#allocation8 + $0x4f4] sm:$0xf0] }
 0x2f3   :  { %7753 = vmatpush.bf16.msra.mxu0 %v10247_v50  ;;  %v7527_v9 = vadd.f32 %v7526_v30, %v7514_v11  ;;  %v7502_v50 = vpop.f32.mrf.mxu0  ;;  %v10439_v11 = vor.u32 %v13555_v60, %v10438_v58  ;;  %v13675_v30 = vld [vmem:[#allocation8 + $0x5f4] sm:$0xf0]  ;;  %v11158_v58 = vld [vmem:[#allocation8 + $0x7c8] sm:$0xf] }
 0x2f4   :  { %7766 = vmatpush.bf16.msra.mxu1 %v10375_v41  ;;  %v10582_v41 = vld [vmem:[#allocation8 + $0x348] sm:$0xf]  ;;  %v13739_v50 = vld [vmem:[#allocation8 + $0x7f4] sm:$0xf0] }
 0x2f5   :  { %7779 = vmatpush.bf16.msra.mxu2 %v10503_v26  ;;  %v13591_v26 = vld [vmem:[#allocation8 + $0x354] sm:$0xf0]  ;;  %v14856_v54 = vadd.f32 %v7539_v37, %v7527_v9  ;;  %v10423_v9 = vor.u32 %v13551_v49, %v10422_v14  ;;  %v11174_v37 = vld [vmem:[#allocation8 + $0x7e8] sm:$0xf] }
 0x2f6   :  { %7792 = vmatpush.bf16.msra.mxu3 %v10631_v12  ;;  %v10327_v12 = vor.u32 %v13527_v8, %v10326_v45  ;;  %v10583_v21 = vor.u32 %v13591_v26, %v10582_v41  ;;  %v10918_v45 = vld [vmem:[#allocation8 + $0x5e8] sm:$0xf]  ;;  %v10791_v26 = vor.u32 %v13643_v6, %v10790_v24  ;;  %v13735_v60 = vld [vmem:[#allocation8 + $0x7d4] sm:$0xf0] }
 0x2f7   :  { %7754 = vmatpush.bf16.msra.mxu0 %v10231_v62  ;;  %v10566_v62 = vld [vmem:[#allocation8 + $0x328] sm:$0xf]  ;;  %v10919_v44 = vor.u32 %v13675_v30, %v10918_v45  ;;  %v13699_v14 = vld [vmem:[#allocation8 + $0x6b4] sm:$0xf0] }
 0x2f8   :  { %7767 = vmatpush.bf16.msra.mxu1 %v10359_v63  ;;  %v13587_v63 = vld [vmem:[#allocation8 + $0x334] sm:$0xf0]  ;;  %v11046_v8 = vld [vmem:[#allocation8 + $0x6e8] sm:$0xf] }
 0x2f9   :  { %7780 = vmatpush.bf16.msra.mxu2 %v10487_v38  ;;  %v10183_v38 = vor.u32 %v13491_v43, %v10182_v55  ;;  %v10567_v16 = vor.u32 %v13587_v63, %v10566_v62  ;;  %v10902_v55 = vld [vmem:[#allocation8 + $0x5c8] sm:$0xf]  ;;  %v11175_v43 = vor.u32 %v13739_v50, %v11174_v37  ;;  %v13631_v24 = vld [vmem:[#allocation8 + $0x494] sm:$0xf0] }
 0x2fa   :  { %7793 = vmatpush.bf16.msra.mxu3 %v10615_v13  ;;  %v10294_v13 = vld [vmem:[#allocation8 + $0x108] sm:$0xf]  ;;  %v7528_v18 = vpop.f32.mrf.mxu2  ;;  %v10903_v63 = vor.u32 %v13671_v47, %v10902_v55  ;;  %v13659_v47 = vld [vmem:[#allocation8 + $0x574] sm:$0xf0] }
 0x2fb   :  { %7755 = vmatpush.bf16.msra.mxu0 %v10215_v7  ;;  %v10550_v7 = vld [vmem:[#allocation8 + $0x308] sm:$0xf]  ;;  %v10295_v33 = vor.u32 %v13519_v48, %v10294_v13  ;;  %v13667_v13 = vld [vmem:[#allocation8 + $0x5b4] sm:$0xf0] }
 0x2fc   :  { %7768 = vmatpush.bf16.msra.mxu1 %v10343_v3  ;;  %v13583_v3 = vld [vmem:[#allocation8 + $0x314] sm:$0xf0]  ;;  %v11014_v48 = vld [vmem:[#allocation8 + $0x6a8] sm:$0xf] }
 0x2fd   :  { %7781 = vmatpush.bf16.msra.mxu2 %v10471_v23  ;;  %v7541_v23 = vpop.f32.mrf.mxu3  ;;  %v10551_v41 = vor.u32 %v13583_v3, %v10550_v7  ;;  %v13731_v18 = vld [vmem:[#allocation8 + $0x7b4] sm:$0xf0]  ;;  %v11015_v3 = vor.u32 %v13699_v14, %v11014_v48  ;;  %v10870_v6 = vld [vmem:[#allocation8 + $0x588] sm:$0xf] }
 0x2fe   :  { %7794 = vmatpush.bf16.msra.mxu3 %v10599_v0  ;;  %v10167_v0 = vor.u32 %v13487_v4, %v10166_v1  ;;  %v10758_v1 = vld [vmem:[#allocation8 + $0x4a8] sm:$0xf]  ;;  %v13635_v4 = vld [vmem:[#allocation8 + $0x4b4] sm:$0xf0] }
 0x2ff   :  { %7756 = vmatpush.bf16.msra.mxu0 %v10199_v51  ;;  %v11047_v51 = vor.u32 %v13707_v32, %v11046_v8  ;;  %v10759_v49 = vor.u32 %v13635_v4, %v10758_v1  ;;  %v10742_v23 = vld [vmem:[#allocation8 + $0x488] sm:$0xf]  ;;  %v13695_v8 = vld [vmem:[#allocation8 + $0x694] sm:$0xf0] }
 0x300   :  { %7769 = vmatpush.bf16.msra.mxu1 %v10327_v12  ;;  %v10774_v12 = vld [vmem:[#allocation8 + $0x4c8] sm:$0xf]  ;;  %v13623_v1 = vld [vmem:[#allocation8 + $0x454] sm:$0xf0] }
 0x301   :  { %7782 = vmatpush.bf16.msra.mxu2 %v10455_v57  ;;  %v13639_v57 = vld [vmem:[#allocation8 + $0x4d4] sm:$0xf0]  ;;  %v10998_v30 = vld [vmem:[#allocation8 + $0x688] sm:$0xf] }
 0x302   :  { %7795 = vmatpush.bf16.msra.mxu3 %v10583_v21  ;;  %v11030_v21 = vld [vmem:[#allocation8 + $0x6c8] sm:$0xf]  ;;  %v10775_v62 = vor.u32 %v13639_v57, %v10774_v12  ;;  %v13627_v12 = vld [vmem:[#allocation8 + $0x474] sm:$0xf0] }
 0x303   :  { %7757 = vmatpush.bf16.msra.mxu0 %v10183_v38  ;;  %v11031_v38 = vor.u32 %v13703_v31, %v11030_v21  ;;  %v10854_v57 = vld [vmem:[#allocation8 + $0x568] sm:$0xf]  ;;  %v13691_v31 = vld [vmem:[#allocation8 + $0x674] sm:$0xf0] }
 0x304   :  { %7770 = vmatpush.bf16.msra.mxu1 %v10311_v59  ;;  %v10886_v59 = vld [vmem:[#allocation8 + $0x5a8] sm:$0xf]  ;;  %v13687_v14 = vld [vmem:[#allocation8 + $0x654] sm:$0xf0] }
 0x305   :  { %7783 = vmatpush.bf16.msra.mxu2 %v10439_v11  ;;  %v11159_v11 = vor.u32 %v13735_v60, %v11158_v58  ;;  %v10887_v7 = vor.u32 %v13667_v13, %v10886_v59  ;;  %v10982_v21 = vld [vmem:[#allocation8 + $0x668] sm:$0xf]  ;;  %v13723_v60 = vld [vmem:[#allocation8 + $0x774] sm:$0xf0] }
 0x306   :  { %7796 = vmatpush.bf16.msra.mxu3 %v10567_v16  ;;  %v11142_v16 = vld [vmem:[#allocation8 + $0x7a8] sm:$0xf]  ;;  %v13655_v13 = vld [vmem:[#allocation8 + $0x554] sm:$0xf0] }
 0x307   :  { %7758 = vmatpush.bf16.msra.mxu0 %v10167_v0  ;;  %v11143_v45 = vor.u32 %v13731_v18, %v11142_v16  ;;  %v13663_v0 = vld [vmem:[#allocation8 + $0x594] sm:$0xf0]  ;;  %v7552_v32 = vpop.f32.mrf.mxu0  ;;  %v11110_v58 = vld [vmem:[#allocation8 + $0x768] sm:$0xf] }
 0x308   :  { %7771 = vmatpush.bf16.msra.mxu1 %v10295_v33  ;;  %v11126_v33 = vld [vmem:[#allocation8 + $0x788] sm:$0xf]  ;;  %v7553_v37 = vadd.f32 %v7552_v32, %v14856_v54  ;;  %v7565_v50 = vpop.f32.mrf.mxu1  ;;  %v10855_v54 = vor.u32 %v13659_v47, %v10854_v57  ;;  %v11111_v59 = vor.u32 %v13723_v60, %v11110_v58  ;;  %v13647_v47 = vld [vmem:[#allocation8 + $0x514] sm:$0xf0] }
 0x309   :  { %7784 = vmatpush.bf16.msra.mxu2 %v10423_v9  ;;  %v13727_v9 = vld [vmem:[#allocation8 + $0x794] sm:$0xf0]  ;;  %v10838_v4 = vld [vmem:[#allocation8 + $0x548] sm:$0xf] }
 0x30a   :  { %7797 = vmatpush.bf16.msra.mxu3 %v10551_v41  ;;  %7759 = vmatmul.bf16.vlgmr.msra.gmra.mxu0 %v14692_v36  ;;  %v10743_v41 = vor.u32 %v13631_v24, %v10742_v23  ;;  %v7566_v55 = vadd.f32 %v7565_v50, %v7553_v37  ;;  %v10966_v48 = vld [vmem:[#allocation8 + $0x648] sm:$0xf]  ;;  %v13683_v50 = vld [vmem:[#allocation8 + $0x634] sm:$0xf0] }
 0x30b   :  { %7803 = vmatpush.bf16.msrb.mxu0 %v10791_v26  ;;  %7772 = vmatmul.bf16.vlgmr.msra.gmra.mxu1 %v14694_v53  ;;  %v10871_v26 = vor.u32 %v13663_v0, %v10870_v6  ;;  %v10967_v0 = vor.u32 %v13687_v14, %v10966_v48  ;;  %v10822_v32 = vld [vmem:[#allocation8 + $0x528] sm:$0xf]  ;;  %v13679_v60 = vld [vmem:[#allocation8 + $0x614] sm:$0xf0] }
 0x30c   :  { %7816 = vmatpush.bf16.msrb.mxu1 %v10919_v44  ;;  %7785 = vmatmul.bf16.vlgmr.msra.gmra.mxu2 %v14696_v15  ;;  %v10999_v44 = vor.u32 %v13695_v8, %v10998_v30  ;;  %v10694_v30 = vld [vmem:[#allocation8 + $0x428] sm:$0xf]  ;;  %v13619_v8 = vld [vmem:[#allocation8 + $0x434] sm:$0xf0] }
 0x30d   :  { %7829 = vmatpush.bf16.msrb.mxu2 %v11047_v51  ;;  %7798 = vmatmul.bf16.vlgmr.msra.gmra.mxu3 %v14698_v22  ;;  %v10726_v51 = vld [vmem:[#allocation8 + $0x468] sm:$0xf]  ;;  %v13835_v48 = vld [vmem:[#allocation8 + $0xaf4] sm:$0xf0] }
 0x30e   :  { %7842 = vmatpush.bf16.msrb.mxu3 %v11175_v43  ;;  %v11127_v43 = vor.u32 %v13727_v9, %v11126_v33  ;;  %v13651_v9 = vld [vmem:[#allocation8 + $0x534] sm:$0xf0]  ;;  %v10950_v37 = vld [vmem:[#allocation8 + $0x628] sm:$0xf] }
 0x30f   :  { %7804 = vmatpush.bf16.msrb.mxu0 %v10775_v62  ;;  %v10727_v62 = vor.u32 %v13627_v12, %v10726_v51  ;;  %v10678_v51 = vld [vmem:[#allocation8 + $0x408] sm:$0xf]  ;;  %v13615_v12 = vld [vmem:[#allocation8 + $0x414] sm:$0xf0]  ;;  %v10823_v57 = vor.u32 %v13651_v9, %v10822_v32 }
 0x310   :  { %7817 = vmatpush.bf16.msrb.mxu1 %v10903_v63  ;;  %v10983_v63 = vor.u32 %v13691_v31, %v10982_v21  ;;  %v7591_v18 = vpop.f32.mrf.mxu3  ;;  %v7567_v23 = vpop.f32.mrf.mxu1  ;;  %v10934_v21 = vld [vmem:[#allocation8 + $0x608] sm:$0xf]  ;;  %v13799_v32 = vld [vmem:[#allocation8 + $0x9d4] sm:$0xf0] }
 0x311   :  { %7830 = vmatpush.bf16.msrb.mxu2 %v11031_v38  ;;  %v10710_v38 = vld [vmem:[#allocation8 + $0x448] sm:$0xf]  ;;  %v13831_v9 = vld [vmem:[#allocation8 + $0xad4] sm:$0xf0] }
 0x312   :  { %7843 = vmatpush.bf16.msrb.mxu3 %v11159_v11  ;;  %v7578_v11 = vpop.f32.mrf.mxu2  ;;  %v10711_v24 = vor.u32 %v13623_v1, %v10710_v38  ;;  %v11302_v38 = vld [vmem:[#allocation8 + $0x8e8] sm:$0xf]  ;;  %v13771_v1 = vld [vmem:[#allocation8 + $0x8f4] sm:$0xf0] }
 0x313   :  { %7805 = vmatpush.bf16.msrb.mxu0 %v10759_v49  ;;  %v7579_v16 = vadd.f32 %v7578_v11, %v7566_v55  ;;  %v7554_v49 = vpop.f32.mrf.mxu0  ;;  %v10951_v55 = vor.u32 %v13683_v50, %v10950_v37  ;;  %v13803_v11 = vld [vmem:[#allocation8 + $0x9f4] sm:$0xf0]  ;;  %v11670_v37 = vld [vmem:[#allocation8 + $0xbc8] sm:$0xf] }
 0x314   :  { %7818 = vmatpush.bf16.msrb.mxu1 %v10887_v7  ;;  %v11094_v7 = vld [vmem:[#allocation8 + $0x748] sm:$0xf]  ;;  %v13867_v49 = vld [vmem:[#allocation8 + $0xbf4] sm:$0xf0] }
 0x315   :  { %7831 = vmatpush.bf16.msrb.mxu2 %v11015_v3  ;;  %v13719_v3 = vld [vmem:[#allocation8 + $0x754] sm:$0xf0]  ;;  %v14863_v6 = vadd.f32 %v7591_v18, %v7579_v16  ;;  %v10935_v16 = vor.u32 %v13679_v60, %v10934_v21  ;;  %v11686_v18 = vld [vmem:[#allocation8 + $0xbe8] sm:$0xf] }
 0x316   :  { %7844 = vmatpush.bf16.msrb.mxu3 %v11143_v45  ;;  %v10839_v45 = vor.u32 %v13655_v13, %v10838_v4  ;;  %v11095_v33 = vor.u32 %v13719_v3, %v11094_v7  ;;  %v11430_v4 = vld [vmem:[#allocation8 + $0x9e8] sm:$0xf]  ;;  %v11303_v3 = vor.u32 %v13771_v1, %v11302_v38  ;;  %v13863_v50 = vld [vmem:[#allocation8 + $0xbd4] sm:$0xf0] }
 0x317   :  { %7806 = vmatpush.bf16.msrb.mxu0 %v10743_v41  ;;  %v11078_v41 = vld [vmem:[#allocation8 + $0x728] sm:$0xf]  ;;  %v11431_v23 = vor.u32 %v13803_v11, %v11430_v4  ;;  %v13827_v21 = vld [vmem:[#allocation8 + $0xab4] sm:$0xf0] }
 0x318   :  { %7819 = vmatpush.bf16.msrb.mxu1 %v10871_v26  ;;  %v13715_v26 = vld [vmem:[#allocation8 + $0x734] sm:$0xf0]  ;;  %v11558_v13 = vld [vmem:[#allocation8 + $0xae8] sm:$0xf] }
 0x319   :  { %7832 = vmatpush.bf16.msrb.mxu2 %v10999_v44  ;;  %v10695_v44 = vor.u32 %v13619_v8, %v10694_v30  ;;  %v11079_v31 = vor.u32 %v13715_v26, %v11078_v41  ;;  %v11414_v30 = vld [vmem:[#allocation8 + $0x9c8] sm:$0xf]  ;;  %v11687_v8 = vor.u32 %v13867_v49, %v11686_v18  ;;  %v13759_v38 = vld [vmem:[#allocation8 + $0x894] sm:$0xf0] }
 0x31a   :  { %7845 = vmatpush.bf16.msrb.mxu3 %v11127_v43  ;;  %v10806_v43 = vld [vmem:[#allocation8 + $0x508] sm:$0xf]  ;;  %v7580_v58 = vpop.f32.mrf.mxu2  ;;  %v11415_v26 = vor.u32 %v13799_v32, %v11414_v30  ;;  %v13787_v32 = vld [vmem:[#allocation8 + $0x974] sm:$0xf0] }
 0x31b   :  { %7807 = vmatpush.bf16.msrb.mxu0 %v10727_v62  ;;  %v11062_v62 = vld [vmem:[#allocation8 + $0x708] sm:$0xf]  ;;  %v10807_v14 = vor.u32 %v13647_v47, %v10806_v43  ;;  %v13795_v43 = vld [vmem:[#allocation8 + $0x9b4] sm:$0xf0] }
 0x31c   :  { %7820 = vmatpush.bf16.msrb.mxu1 %v10855_v54  ;;  %v13711_v54 = vld [vmem:[#allocation8 + $0x714] sm:$0xf0]  ;;  %v11526_v47 = vld [vmem:[#allocation8 + $0xaa8] sm:$0xf] }
 0x31d   :  { %7833 = vmatpush.bf16.msrb.mxu2 %v10983_v63  ;;  %v7593_v63 = vpop.f32.mrf.mxu3  ;;  %v11063_v7 = vor.u32 %v13711_v54, %v11062_v62  ;;  %v13859_v58 = vld [vmem:[#allocation8 + $0xbb4] sm:$0xf0]  ;;  %v11527_v54 = vor.u32 %v13827_v21, %v11526_v47  ;;  %v11382_v1 = vld [vmem:[#allocation8 + $0x988] sm:$0xf] }
 0x31e   :  { %7846 = vmatpush.bf16.msrb.mxu3 %v11111_v59  ;;  %v10679_v59 = vor.u32 %v13615_v12, %v10678_v51  ;;  %v11270_v51 = vld [vmem:[#allocation8 + $0x8a8] sm:$0xf]  ;;  %v13763_v12 = vld [vmem:[#allocation8 + $0x8b4] sm:$0xf0] }
 0x31f   :  { %7808 = vmatpush.bf16.msrb.mxu0 %v10711_v24  ;;  %v11559_v24 = vor.u32 %v13835_v48, %v11558_v13  ;;  %v11271_v60 = vor.u32 %v13763_v12, %v11270_v51  ;;  %v11254_v63 = vld [vmem:[#allocation8 + $0x888] sm:$0xf]  ;;  %v13823_v13 = vld [vmem:[#allocation8 + $0xa94] sm:$0xf0] }
 0x320   :  { %7821 = vmatpush.bf16.msrb.mxu1 %v10839_v45  ;;  %v11286_v45 = vld [vmem:[#allocation8 + $0x8c8] sm:$0xf]  ;;  %v13751_v51 = vld [vmem:[#allocation8 + $0x854] sm:$0xf0] }
 0x321   :  { %7834 = vmatpush.bf16.msrb.mxu2 %v10967_v0  ;;  %v13767_v0 = vld [vmem:[#allocation8 + $0x8d4] sm:$0xf0]  ;;  %v11510_v11 = vld [vmem:[#allocation8 + $0xa88] sm:$0xf] }
 0x322   :  { %7847 = vmatpush.bf16.msrb.mxu3 %v11095_v33  ;;  %v11542_v33 = vld [vmem:[#allocation8 + $0xac8] sm:$0xf]  ;;  %v11287_v41 = vor.u32 %v13767_v0, %v11286_v45  ;;  %v13755_v45 = vld [vmem:[#allocation8 + $0x874] sm:$0xf0] }
 0x323   :  { %7809 = vmatpush.bf16.msrb.mxu0 %v10695_v44  ;;  %v11543_v44 = vor.u32 %v13831_v9, %v11542_v33  ;;  %v11366_v0 = vld [vmem:[#allocation8 + $0x968] sm:$0xf]  ;;  %v13819_v9 = vld [vmem:[#allocation8 + $0xa74] sm:$0xf0] }
 0x324   :  { %7822 = vmatpush.bf16.msrb.mxu1 %v10823_v57  ;;  %v11398_v57 = vld [vmem:[#allocation8 + $0x9a8] sm:$0xf]  ;;  %v13815_v21 = vld [vmem:[#allocation8 + $0xa54] sm:$0xf0] }
 0x325   :  { %7835 = vmatpush.bf16.msrb.mxu2 %v10951_v55  ;;  %v11671_v55 = vor.u32 %v13863_v50, %v11670_v37  ;;  %v11399_v62 = vor.u32 %v13795_v43, %v11398_v57  ;;  %v11494_v33 = vld [vmem:[#allocation8 + $0xa68] sm:$0xf]  ;;  %v13851_v50 = vld [vmem:[#allocation8 + $0xb74] sm:$0xf0] }
 0x326   :  { %7848 = vmatpush.bf16.msrb.mxu3 %v11079_v31  ;;  %v11654_v31 = vld [vmem:[#allocation8 + $0xba8] sm:$0xf]  ;;  %v13783_v43 = vld [vmem:[#allocation8 + $0x954] sm:$0xf0] }
 0x327   :  { %7810 = vmatpush.bf16.msrb.mxu0 %v10679_v59  ;;  %v11655_v4 = vor.u32 %v13859_v58, %v11654_v31  ;;  %v13791_v59 = vld [vmem:[#allocation8 + $0x994] sm:$0xf0]  ;;  %v7604_v48 = vpop.f32.mrf.mxu0  ;;  %v11622_v37 = vld [vmem:[#allocation8 + $0xb68] sm:$0xf] }
 0x328   :  { %7823 = vmatpush.bf16.msrb.mxu1 %v10807_v14  ;;  %v11638_v14 = vld [vmem:[#allocation8 + $0xb88] sm:$0xf]  ;;  %v7605_v18 = vadd.f32 %v7604_v48, %v14863_v6  ;;  %v7617_v49 = vpop.f32.mrf.mxu1  ;;  %v11367_v6 = vor.u32 %v13787_v32, %v11366_v0  ;;  %v11623_v57 = vor.u32 %v13851_v50, %v11622_v37  ;;  %v13775_v32 = vld [vmem:[#allocation8 + $0x914] sm:$0xf0] }
 0x329   :  { %7836 = vmatpush.bf16.msrb.mxu2 %v10935_v16  ;;  %v13855_v16 = vld [vmem:[#allocation8 + $0xb94] sm:$0xf0]  ;;  %v11350_v12 = vld [vmem:[#allocation8 + $0x948] sm:$0xf] }
 0x32a   :  { %7849 = vmatpush.bf16.msrb.mxu3 %v11063_v7  ;;  %7811 = vmatmul.bf16.vlgmr.msrb.gmra.mxu0 %v14714_v28  ;;  %v11255_v7 = vor.u32 %v13759_v38, %v11254_v63  ;;  %v7618_v30 = vadd.f32 %v7617_v49, %v7605_v18  ;;  %v11478_v47 = vld [vmem:[#allocation8 + $0xa48] sm:$0xf]  ;;  %v13811_v49 = vld [vmem:[#allocation8 + $0xa34] sm:$0xf0] }
 0x32b   :  { %7855 = vmatpush.bf16.msra.mxu0 %v11303_v3  ;;  %7824 = vmatmul.bf16.vlgmr.msrb.gmra.mxu1 %v14716_v46  ;;  %v11383_v3 = vor.u32 %v13791_v59, %v11382_v1  ;;  %v11479_v59 = vor.u32 %v13815_v21, %v11478_v47  ;;  %v11334_v48 = vld [vmem:[#allocation8 + $0x928] sm:$0xf]  ;;  %v13807_v50 = vld [vmem:[#allocation8 + $0xa14] sm:$0xf0] }
 0x32c   :  { %7868 = vmatpush.bf16.msra.mxu1 %v11431_v23  ;;  %7837 = vmatmul.bf16.vlgmr.msrb.gmra.mxu2 %v14718_v35  ;;  %v11511_v23 = vor.u32 %v13823_v13, %v11510_v11  ;;  %v11206_v11 = vld [vmem:[#allocation8 + $0x828] sm:$0xf]  ;;  %v13747_v13 = vld [vmem:[#allocation8 + $0x834] sm:$0xf0] }
 0x32d   :  { %7881 = vmatpush.bf16.msra.mxu2 %v11559_v24  ;;  %7850 = vmatmul.bf16.vlgmr.msrb.gmra.mxu3 %v14720_v42  ;;  %v11238_v24 = vld [vmem:[#allocation8 + $0x868] sm:$0xf]  ;;  %v13963_v47 = vld [vmem:[#allocation8 + $0xef4] sm:$0xf0] }
 0x32e   :  { %7894 = vmatpush.bf16.msra.mxu3 %v11687_v8  ;;  %v11639_v8 = vor.u32 %v13855_v16, %v11638_v14  ;;  %v13779_v16 = vld [vmem:[#allocation8 + $0x934] sm:$0xf0]  ;;  %v11462_v18 = vld [vmem:[#allocation8 + $0xa28] sm:$0xf] }
 0x32f   :  { %7856 = vmatpush.bf16.msra.mxu0 %v11287_v41  ;;  %v11239_v41 = vor.u32 %v13755_v45, %v11238_v24  ;;  %v11190_v24 = vld [vmem:[#allocation8 + $0x808] sm:$0xf]  ;;  %v13743_v45 = vld [vmem:[#allocation8 + $0x814] sm:$0xf0]  ;;  %v11335_v0 = vor.u32 %v13779_v16, %v11334_v48 }
 0x330   :  { %7869 = vmatpush.bf16.msra.mxu1 %v11415_v26  ;;  %v11495_v26 = vor.u32 %v13819_v9, %v11494_v33  ;;  %v7643_v58 = vpop.f32.mrf.mxu3  ;;  %v7619_v63 = vpop.f32.mrf.mxu1  ;;  %v11446_v33 = vld [vmem:[#allocation8 + $0xa08] sm:$0xf]  ;;  %v13927_v48 = vld [vmem:[#allocation8 + $0xdd4] sm:$0xf0] }
 0x331   :  { %7882 = vmatpush.bf16.msra.mxu2 %v11543_v44  ;;  %v11222_v44 = vld [vmem:[#allocation8 + $0x848] sm:$0xf]  ;;  %v13959_v16 = vld [vmem:[#allocation8 + $0xed4] sm:$0xf0] }
 0x332   :  { %7895 = vmatpush.bf16.msra.mxu3 %v11671_v55  ;;  %v7630_v55 = vpop.f32.mrf.mxu2  ;;  %v11223_v38 = vor.u32 %v13751_v51, %v11222_v44  ;;  %v11814_v44 = vld [vmem:[#allocation8 + $0xce8] sm:$0xf]  ;;  %v13899_v51 = vld [vmem:[#allocation8 + $0xcf4] sm:$0xf0] }
 0x333   :  { %7857 = vmatpush.bf16.msra.mxu0 %v11271_v60  ;;  %v7631_v31 = vadd.f32 %v7630_v55, %v7618_v30  ;;  %v7606_v60 = vpop.f32.mrf.mxu0  ;;  %v11463_v30 = vor.u32 %v13811_v49, %v11462_v18  ;;  %v13931_v55 = vld [vmem:[#allocation8 + $0xdf4] sm:$0xf0]  ;;  %v12182_v18 = vld [vmem:[#allocation8 + $0xfc8] sm:$0xf] }
 0x334   :  { %7870 = vmatpush.bf16.msra.mxu1 %v11399_v62  ;;  %v11606_v62 = vld [vmem:[#allocation8 + $0xb48] sm:$0xf]  ;;  %v13995_v60 = vld [vmem:[#allocation8 + $0xff4] sm:$0xf0] }
 0x335   :  { %7883 = vmatpush.bf16.msra.mxu2 %v11527_v54  ;;  %v13847_v54 = vld [vmem:[#allocation8 + $0xb54] sm:$0xf0]  ;;  %v14870_v1 = vadd.f32 %v7643_v58, %v7631_v31  ;;  %v11447_v31 = vor.u32 %v13807_v50, %v11446_v33  ;;  %v12198_v58 = vld [vmem:[#allocation8 + $0xfe8] sm:$0xf] }
 0x336   :  { %7896 = vmatpush.bf16.msra.mxu3 %v11655_v4  ;;  %v11351_v4 = vor.u32 %v13783_v43, %v11350_v12  ;;  %v11607_v14 = vor.u32 %v13847_v54, %v11606_v62  ;;  %v11942_v12 = vld [vmem:[#allocation8 + $0xde8] sm:$0xf]  ;;  %v11815_v54 = vor.u32 %v13899_v51, %v11814_v44  ;;  %v13991_v49 = vld [vmem:[#allocation8 + $0xfd4] sm:$0xf0] }
 0x337   :  { %7858 = vmatpush.bf16.msra.mxu0 %v11255_v7  ;;  %v11590_v7 = vld [vmem:[#allocation8 + $0xb28] sm:$0xf]  ;;  %v11943_v63 = vor.u32 %v13931_v55, %v11942_v12  ;;  %v13955_v33 = vld [vmem:[#allocation8 + $0xeb4] sm:$0xf0] }
 0x338   :  { %7871 = vmatpush.bf16.msra.mxu1 %v11383_v3  ;;  %v13843_v3 = vld [vmem:[#allocation8 + $0xb34] sm:$0xf0]  ;;  %v12070_v43 = vld [vmem:[#allocation8 + $0xee8] sm:$0xf] }
 0x339   :  { %7884 = vmatpush.bf16.msra.mxu2 %v11511_v23  ;;  %v11207_v23 = vor.u32 %v13747_v13, %v11206_v11  ;;  %v11591_v9 = vor.u32 %v13843_v3, %v11590_v7  ;;  %v11926_v11 = vld [vmem:[#allocation8 + $0xdc8] sm:$0xf]  ;;  %v12199_v13 = vor.u32 %v13995_v60, %v12198_v58  ;;  %v13887_v44 = vld [vmem:[#allocation8 + $0xc94] sm:$0xf0] }
 0x33a   :  { %7897 = vmatpush.bf16.msra.mxu3 %v11639_v8  ;;  %v11318_v8 = vld [vmem:[#allocation8 + $0x908] sm:$0xf]  ;;  %v7632_v37 = vpop.f32.mrf.mxu2  ;;  %v11927_v3 = vor.u32 %v13927_v48, %v11926_v11  ;;  %v13915_v48 = vld [vmem:[#allocation8 + $0xd74] sm:$0xf0] }
 0x33b   :  { %7859 = vmatpush.bf16.msra.mxu0 %v11239_v41  ;;  %v11574_v41 = vld [vmem:[#allocation8 + $0xb08] sm:$0xf]  ;;  %v11319_v21 = vor.u32 %v13775_v32, %v11318_v8  ;;  %v13923_v8 = vld [vmem:[#allocation8 + $0xdb4] sm:$0xf0] }
 0x33c   :  { %7872 = vmatpush.bf16.msra.mxu1 %v11367_v6  ;;  %v13839_v6 = vld [vmem:[#allocation8 + $0xb14] sm:$0xf0]  ;;  %v12038_v32 = vld [vmem:[#allocation8 + $0xea8] sm:$0xf] }
 0x33d   :  { %7885 = vmatpush.bf16.msra.mxu2 %v11495_v26  ;;  %v7645_v26 = vpop.f32.mrf.mxu3  ;;  %v11575_v62 = vor.u32 %v13839_v6, %v11574_v41  ;;  %v13987_v37 = vld [vmem:[#allocation8 + $0xfb4] sm:$0xf0]  ;;  %v12039_v6 = vor.u32 %v13955_v33, %v12038_v32  ;;  %v11894_v51 = vld [vmem:[#allocation8 + $0xd88] sm:$0xf] }
 0x33e   :  { %7898 = vmatpush.bf16.msra.mxu3 %v11623_v57  ;;  %v11191_v57 = vor.u32 %v13743_v45, %v11190_v24  ;;  %v11782_v24 = vld [vmem:[#allocation8 + $0xca8] sm:$0xf]  ;;  %v13891_v45 = vld [vmem:[#allocation8 + $0xcb4] sm:$0xf0] }
 0x33f   :  { %7860 = vmatpush.bf16.msra.mxu0 %v11223_v38  ;;  %v12071_v38 = vor.u32 %v13963_v47, %v12070_v43  ;;  %v11783_v50 = vor.u32 %v13891_v45, %v11782_v24  ;;  %v11766_v26 = vld [vmem:[#allocation8 + $0xc88] sm:$0xf]  ;;  %v13951_v43 = vld [vmem:[#allocation8 + $0xe94] sm:$0xf0] }
 0x340   :  { %7873 = vmatpush.bf16.msra.mxu1 %v11351_v4  ;;  %v11798_v4 = vld [vmem:[#allocation8 + $0xcc8] sm:$0xf]  ;;  %v13879_v24 = vld [vmem:[#allocation8 + $0xc54] sm:$0xf0] }
 0x341   :  { %7886 = vmatpush.bf16.msra.mxu2 %v11479_v59  ;;  %v13895_v59 = vld [vmem:[#allocation8 + $0xcd4] sm:$0xf0]  ;;  %v12022_v55 = vld [vmem:[#allocation8 + $0xe88] sm:$0xf] }
 0x342   :  { %7899 = vmatpush.bf16.msra.mxu3 %v11607_v14  ;;  %v12054_v14 = vld [vmem:[#allocation8 + $0xec8] sm:$0xf]  ;;  %v11799_v7 = vor.u32 %v13895_v59, %v11798_v4  ;;  %v13883_v4 = vld [vmem:[#allocation8 + $0xc74] sm:$0xf0] }
 0x343   :  { %7861 = vmatpush.bf16.msra.mxu0 %v11207_v23  ;;  %v12055_v23 = vor.u32 %v13959_v16, %v12054_v14  ;;  %v11878_v59 = vld [vmem:[#allocation8 + $0xd68] sm:$0xf]  ;;  %v13947_v16 = vld [vmem:[#allocation8 + $0xe74] sm:$0xf0] }
 0x344   :  { %7874 = vmatpush.bf16.msra.mxu1 %v11335_v0  ;;  %v11910_v0 = vld [vmem:[#allocation8 + $0xda8] sm:$0xf]  ;;  %v13943_v33 = vld [vmem:[#allocation8 + $0xe54] sm:$0xf0] }
 0x345   :  { %7887 = vmatpush.bf16.msra.mxu2 %v11463_v30  ;;  %v12183_v30 = vor.u32 %v13991_v49, %v12182_v18  ;;  %v11911_v41 = vor.u32 %v13923_v8, %v11910_v0  ;;  %v12006_v14 = vld [vmem:[#allocation8 + $0xe68] sm:$0xf]  ;;  %v13979_v49 = vld [vmem:[#allocation8 + $0xf74] sm:$0xf0] }
 0x346   :  { %7900 = vmatpush.bf16.msra.mxu3 %v11591_v9  ;;  %v12166_v9 = vld [vmem:[#allocation8 + $0xfa8] sm:$0xf]  ;;  %v13911_v8 = vld [vmem:[#allocation8 + $0xd54] sm:$0xf0] }
 0x347   :  { %7862 = vmatpush.bf16.msra.mxu0 %v11191_v57  ;;  %v12167_v12 = vor.u32 %v13987_v37, %v12166_v9  ;;  %v13919_v57 = vld [vmem:[#allocation8 + $0xd94] sm:$0xf0]  ;;  %v7656_v47 = vpop.f32.mrf.mxu0  ;;  %v12134_v18 = vld [vmem:[#allocation8 + $0xf68] sm:$0xf] }
 0x348   :  { %7875 = vmatpush.bf16.msra.mxu1 %v11319_v21  ;;  %v12150_v21 = vld [vmem:[#allocation8 + $0xf88] sm:$0xf]  ;;  %v7657_v58 = vadd.f32 %v7656_v47, %v14870_v1  ;;  %v7669_v60 = vpop.f32.mrf.mxu1  ;;  %v11879_v1 = vor.u32 %v13915_v48, %v11878_v59  ;;  %v12135_v0 = vor.u32 %v13979_v49, %v12134_v18  ;;  %v13903_v48 = vld [vmem:[#allocation8 + $0xd14] sm:$0xf0] }
 0x349   :  { %7888 = vmatpush.bf16.msra.mxu2 %v11447_v31  ;;  %v13983_v31 = vld [vmem:[#allocation8 + $0xf94] sm:$0xf0]  ;;  %v11862_v45 = vld [vmem:[#allocation8 + $0xd48] sm:$0xf] }
 0x34a   :  { %7901 = vmatpush.bf16.msra.mxu3 %v11575_v62  ;;  %7863 = vmatmul.bf16.vlgmr.msra.gmra.mxu0 %v14738_v39  ;;  %v11767_v62 = vor.u32 %v13887_v44, %v11766_v26  ;;  %v7670_v11 = vadd.f32 %v7669_v60, %v7657_v58  ;;  %v11990_v32 = vld [vmem:[#allocation8 + $0xe48] sm:$0xf]  ;;  %v13939_v60 = vld [vmem:[#allocation8 + $0xe34] sm:$0xf0] }
 0x34b   :  { %7907 = vmatpush.bf16.msrb.mxu0 %v11815_v54  ;;  %7876 = vmatmul.bf16.vlgmr.msra.gmra.mxu1 %v14740_v61  ;;  %v11895_v54 = vor.u32 %v13919_v57, %v11894_v51  ;;  %v11991_v57 = vor.u32 %v13943_v33, %v11990_v32  ;;  %v11846_v47 = vld [vmem:[#allocation8 + $0xd28] sm:$0xf]  ;;  %v13935_v49 = vld [vmem:[#allocation8 + $0xe14] sm:$0xf0] }
 0x34c   :  { %7920 = vmatpush.bf16.msrb.mxu1 %v11943_v63  ;;  %7889 = vmatmul.bf16.vlgmr.msra.gmra.mxu2 %v14742_v2  ;;  %v12023_v63 = vor.u32 %v13951_v43, %v12022_v55  ;;  %v11718_v55 = vld [vmem:[#allocation8 + $0xc28] sm:$0xf]  ;;  %v13875_v43 = vld [vmem:[#allocation8 + $0xc34] sm:$0xf0] }
 0x34d   :  { %7933 = vmatpush.bf16.msrb.mxu2 %v12071_v38  ;;  %7902 = vmatmul.bf16.vlgmr.msra.gmra.mxu3 %v14744_v10  ;;  %v11750_v38 = vld [vmem:[#allocation8 + $0xc68] sm:$0xf]  ;;  %v14091_v32 = vld [vmem:[#allocation8 + $0x12f4] sm:$0xf0] }
 0x34e   :  { %7946 = vmatpush.bf16.msrb.mxu3 %v12199_v13  ;;  %v12151_v13 = vor.u32 %v13983_v31, %v12150_v21  ;;  %v13907_v31 = vld [vmem:[#allocation8 + $0xd34] sm:$0xf0]  ;;  %v11974_v58 = vld [vmem:[#allocation8 + $0xe28] sm:$0xf] }
 0x34f   :  { %7908 = vmatpush.bf16.msrb.mxu0 %v11799_v7  ;;  %v11751_v7 = vor.u32 %v13883_v4, %v11750_v38  ;;  %v11702_v38 = vld [vmem:[#allocation8 + $0xc08] sm:$0xf]  ;;  %v13871_v4 = vld [vmem:[#allocation8 + $0xc14] sm:$0xf0]  ;;  %v11847_v59 = vor.u32 %v13907_v31, %v11846_v47 }
 0x350   :  { %7921 = vmatpush.bf16.msrb.mxu1 %v11927_v3  ;;  %v12007_v3 = vor.u32 %v13947_v16, %v12006_v14  ;;  %v7695_v37 = vpop.f32.mrf.mxu3  ;;  %v7671_v26 = vpop.f32.mrf.mxu1  ;;  %v11958_v14 = vld [vmem:[#allocation8 + $0xe08] sm:$0xf]  ;;  %v14055_v47 = vld [vmem:[#allocation8 + $0x11d4] sm:$0xf0] }
 0x351   :  { %7934 = vmatpush.bf16.msrb.mxu2 %v12055_v23  ;;  %v11734_v23 = vld [vmem:[#allocation8 + $0xc48] sm:$0xf]  ;;  %v14087_v31 = vld [vmem:[#allocation8 + $0x12d4] sm:$0xf0] }
 0x352   :  { %7947 = vmatpush.bf16.msrb.mxu3 %v12183_v30  ;;  %v7682_v30 = vpop.f32.mrf.mxu2  ;;  %v11735_v44 = vor.u32 %v13879_v24, %v11734_v23  ;;  %v12326_v23 = vld [vmem:[#allocation8 + $0x10e8] sm:$0xf]  ;;  %v14027_v24 = vld [vmem:[#allocation8 + $0x10f4] sm:$0xf0] }
 0x353   :  { %7909 = vmatpush.bf16.msrb.mxu0 %v11783_v50  ;;  %v7683_v9 = vadd.f32 %v7682_v30, %v7670_v11  ;;  %v7658_v50 = vpop.f32.mrf.mxu0  ;;  %v11975_v11 = vor.u32 %v13939_v60, %v11974_v58  ;;  %v14059_v30 = vld [vmem:[#allocation8 + $0x11f4] sm:$0xf0]  ;;  %v12694_v58 = vld [vmem:[#allocation8 + $0x13c8] sm:$0xf] }
 0x354   :  { %7922 = vmatpush.bf16.msrb.mxu1 %v11911_v41  ;;  %v12118_v41 = vld [vmem:[#allocation8 + $0xf48] sm:$0xf]  ;;  %v14123_v50 = vld [vmem:[#allocation8 + $0x13f4] sm:$0xf0] }
 0x355   :  { %7935 = vmatpush.bf16.msrb.mxu2 %v12039_v6  ;;  %v13975_v6 = vld [vmem:[#allocation8 + $0xf54] sm:$0xf0]  ;;  %v14877_v51 = vadd.f32 %v7695_v37, %v7683_v9  ;;  %v11959_v9 = vor.u32 %v13935_v49, %v11958_v14  ;;  %v12710_v37 = vld [vmem:[#allocation8 + $0x13e8] sm:$0xf] }
 0x356   :  { %7948 = vmatpush.bf16.msrb.mxu3 %v12167_v12  ;;  %v11863_v12 = vor.u32 %v13911_v8, %v11862_v45  ;;  %v12119_v21 = vor.u32 %v13975_v6, %v12118_v41  ;;  %v12454_v45 = vld [vmem:[#allocation8 + $0x11e8] sm:$0xf]  ;;  %v12327_v6 = vor.u32 %v14027_v24, %v12326_v23  ;;  %v14119_v60 = vld [vmem:[#allocation8 + $0x13d4] sm:$0xf0] }
 0x357   :  { %7910 = vmatpush.bf16.msrb.mxu0 %v11767_v62  ;;  %v12102_v62 = vld [vmem:[#allocation8 + $0xf28] sm:$0xf]  ;;  %v12455_v26 = vor.u32 %v14059_v30, %v12454_v45  ;;  %v14083_v14 = vld [vmem:[#allocation8 + $0x12b4] sm:$0xf0] }
 0x358   :  { %7923 = vmatpush.bf16.msrb.mxu1 %v11895_v54  ;;  %v13971_v54 = vld [vmem:[#allocation8 + $0xf34] sm:$0xf0]  ;;  %v12582_v8 = vld [vmem:[#allocation8 + $0x12e8] sm:$0xf] }
 0x359   :  { %7936 = vmatpush.bf16.msrb.mxu2 %v12023_v63  ;;  %v11719_v63 = vor.u32 %v13875_v43, %v11718_v55  ;;  %v12103_v16 = vor.u32 %v13971_v54, %v12102_v62  ;;  %v12438_v55 = vld [vmem:[#allocation8 + $0x11c8] sm:$0xf]  ;;  %v12711_v43 = vor.u32 %v14123_v50, %v12710_v37  ;;  %v14015_v23 = vld [vmem:[#allocation8 + $0x1094] sm:$0xf0] }
 0x35a   :  { %7949 = vmatpush.bf16.msrb.mxu3 %v12151_v13  ;;  %v11830_v13 = vld [vmem:[#allocation8 + $0xd08] sm:$0xf]  ;;  %v7684_v18 = vpop.f32.mrf.mxu2  ;;  %v12439_v54 = vor.u32 %v14055_v47, %v12438_v55  ;;  %v14043_v47 = vld [vmem:[#allocation8 + $0x1174] sm:$0xf0] }
 0x35b   :  { %7911 = vmatpush.bf16.msrb.mxu0 %v11751_v7  ;;  %v12086_v7 = vld [vmem:[#allocation8 + $0xf08] sm:$0xf]  ;;  %v11831_v33 = vor.u32 %v13903_v48, %v11830_v13  ;;  %v14051_v13 = vld [vmem:[#allocation8 + $0x11b4] sm:$0xf0] }
 0x35c   :  { %7924 = vmatpush.bf16.msrb.mxu1 %v11879_v1  ;;  %v13967_v1 = vld [vmem:[#allocation8 + $0xf14] sm:$0xf0]  ;;  %v12550_v48 = vld [vmem:[#allocation8 + $0x12a8] sm:$0xf] }
 0x35d   :  { %7937 = vmatpush.bf16.msrb.mxu2 %v12007_v3  ;;  %v7697_v3 = vpop.f32.mrf.mxu3  ;;  %v12087_v41 = vor.u32 %v13967_v1, %v12086_v7  ;;  %v14115_v18 = vld [vmem:[#allocation8 + $0x13b4] sm:$0xf0]  ;;  %v12551_v1 = vor.u32 %v14083_v14, %v12550_v48  ;;  %v12406_v24 = vld [vmem:[#allocation8 + $0x1188] sm:$0xf] }
 0x35e   :  { %7950 = vmatpush.bf16.msrb.mxu3 %v12135_v0  ;;  %v11703_v0 = vor.u32 %v13871_v4, %v11702_v38  ;;  %v12294_v38 = vld [vmem:[#allocation8 + $0x10a8] sm:$0xf]  ;;  %v14019_v4 = vld [vmem:[#allocation8 + $0x10b4] sm:$0xf0] }
 0x35f   :  { %7912 = vmatpush.bf16.msrb.mxu0 %v11735_v44  ;;  %v12583_v44 = vor.u32 %v14091_v32, %v12582_v8  ;;  %v12295_v49 = vor.u32 %v14019_v4, %v12294_v38  ;;  %v12278_v3 = vld [vmem:[#allocation8 + $0x1088] sm:$0xf]  ;;  %v14079_v8 = vld [vmem:[#allocation8 + $0x1294] sm:$0xf0] }
 0x360   :  { %7925 = vmatpush.bf16.msrb.mxu1 %v11863_v12  ;;  %v12310_v12 = vld [vmem:[#allocation8 + $0x10c8] sm:$0xf]  ;;  %v14007_v38 = vld [vmem:[#allocation8 + $0x1054] sm:$0xf0] }
 0x361   :  { %7938 = vmatpush.bf16.msrb.mxu2 %v11991_v57  ;;  %v14023_v57 = vld [vmem:[#allocation8 + $0x10d4] sm:$0xf0]  ;;  %v12534_v30 = vld [vmem:[#allocation8 + $0x1288] sm:$0xf] }
 0x362   :  { %7951 = vmatpush.bf16.msrb.mxu3 %v12119_v21  ;;  %v12566_v21 = vld [vmem:[#allocation8 + $0x12c8] sm:$0xf]  ;;  %v12311_v62 = vor.u32 %v14023_v57, %v12310_v12  ;;  %v14011_v12 = vld [vmem:[#allocation8 + $0x1074] sm:$0xf0] }
 0x363   :  { %7913 = vmatpush.bf16.msrb.mxu0 %v11719_v63  ;;  %v12567_v63 = vor.u32 %v14087_v31, %v12566_v21  ;;  %v12390_v57 = vld [vmem:[#allocation8 + $0x1168] sm:$0xf]  ;;  %v14075_v31 = vld [vmem:[#allocation8 + $0x1274] sm:$0xf0] }
 0x364   :  { %7926 = vmatpush.bf16.msrb.mxu1 %v11847_v59  ;;  %v12422_v59 = vld [vmem:[#allocation8 + $0x11a8] sm:$0xf]  ;;  %v14071_v14 = vld [vmem:[#allocation8 + $0x1254] sm:$0xf0] }
 0x365   :  { %7939 = vmatpush.bf16.msrb.mxu2 %v11975_v11  ;;  %v12695_v11 = vor.u32 %v14119_v60, %v12694_v58  ;;  %v12423_v7 = vor.u32 %v14051_v13, %v12422_v59  ;;  %v12518_v21 = vld [vmem:[#allocation8 + $0x1268] sm:$0xf]  ;;  %v14107_v60 = vld [vmem:[#allocation8 + $0x1374] sm:$0xf0] }
 0x366   :  { %7952 = vmatpush.bf16.msrb.mxu3 %v12103_v16  ;;  %v12678_v16 = vld [vmem:[#allocation8 + $0x13a8] sm:$0xf]  ;;  %v14039_v13 = vld [vmem:[#allocation8 + $0x1154] sm:$0xf0] }
 0x367   :  { %7914 = vmatpush.bf16.msrb.mxu0 %v11703_v0  ;;  %v12679_v45 = vor.u32 %v14115_v18, %v12678_v16  ;;  %v14047_v0 = vld [vmem:[#allocation8 + $0x1194] sm:$0xf0]  ;;  %v7708_v32 = vpop.f32.mrf.mxu0  ;;  %v12646_v58 = vld [vmem:[#allocation8 + $0x1368] sm:$0xf] }
 0x368   :  { %7927 = vmatpush.bf16.msrb.mxu1 %v11831_v33  ;;  %v12662_v33 = vld [vmem:[#allocation8 + $0x1388] sm:$0xf]  ;;  %v7709_v37 = vadd.f32 %v7708_v32, %v14877_v51  ;;  %v7721_v50 = vpop.f32.mrf.mxu1  ;;  %v12391_v51 = vor.u32 %v14043_v47, %v12390_v57  ;;  %v12647_v59 = vor.u32 %v14107_v60, %v12646_v58  ;;  %v14031_v47 = vld [vmem:[#allocation8 + $0x1114] sm:$0xf0] }
 0x369   :  { %7940 = vmatpush.bf16.msrb.mxu2 %v11959_v9  ;;  %v14111_v9 = vld [vmem:[#allocation8 + $0x1394] sm:$0xf0]  ;;  %v12374_v4 = vld [vmem:[#allocation8 + $0x1148] sm:$0xf] }
 0x36a   :  { %7953 = vmatpush.bf16.msrb.mxu3 %v12087_v41  ;;  %7915 = vmatmul.bf16.vlgmr.msrb.gmra.mxu0 %v14762_v5  ;;  %v12279_v41 = vor.u32 %v14015_v23, %v12278_v3  ;;  %v7722_v55 = vadd.f32 %v7721_v50, %v7709_v37  ;;  %v12502_v48 = vld [vmem:[#allocation8 + $0x1248] sm:$0xf]  ;;  %v14067_v50 = vld [vmem:[#allocation8 + $0x1234] sm:$0xf0] }
 0x36b   :  { %7959 = vmatpush.bf16.msra.mxu0 %v12327_v6  ;;  %7928 = vmatmul.bf16.vlgmr.msrb.gmra.mxu1 %v14764_v25  ;;  %v12407_v6 = vor.u32 %v14047_v0, %v12406_v24  ;;  %v12503_v0 = vor.u32 %v14071_v14, %v12502_v48  ;;  %v12358_v32 = vld [vmem:[#allocation8 + $0x1128] sm:$0xf]  ;;  %v14063_v60 = vld [vmem:[#allocation8 + $0x1214] sm:$0xf0]  ;;  %v10280_v48 = vld [vmem:[#allocation8 + $0xf8] sm:$0xf0] }
 0x36c   :  { %7972 = vmatpush.bf16.msra.mxu1 %v12455_v26  ;;  %7941 = vmatmul.bf16.vlgmr.msrb.gmra.mxu2 %v14766_v29  ;;  %v12535_v26 = vor.u32 %v14079_v8, %v12534_v30  ;;  %v12230_v30 = vld [vmem:[#allocation8 + $0x1028] sm:$0xf]  ;;  %v14003_v8 = vld [vmem:[#allocation8 + $0x1034] sm:$0xf0] }
 0x36d   :  { %7985 = vmatpush.bf16.msra.mxu2 %v12583_v44  ;;  %7954 = vmatmul.bf16.vlgmr.msrb.gmra.mxu3 %v14768_v40  ;;  %v12262_v44 = vld [vmem:[#allocation8 + $0x1068] sm:$0xf] }
 0x36e   :  { %7998 = vmatpush.bf16.msra.mxu3 %v12711_v43  ;;  %v12663_v43 = vor.u32 %v14111_v9, %v12662_v33  ;;  %v14035_v9 = vld [vmem:[#allocation8 + $0x1134] sm:$0xf0]  ;;  %v12486_v37 = vld [vmem:[#allocation8 + $0x1228] sm:$0xf] }
 0x36f   :  { %7960 = vmatpush.bf16.msra.mxu0 %v12311_v62  ;;  %v12263_v62 = vor.u32 %v14011_v12, %v12262_v44  ;;  %v12214_v44 = vld [vmem:[#allocation8 + $0x1008] sm:$0xf]  ;;  %v13999_v12 = vld [vmem:[#allocation8 + $0x1014] sm:$0xf0]  ;;  %v12359_v57 = vor.u32 %v14035_v9, %v12358_v32  ;;  %v10264_v9 = vld [vmem:[#allocation8 + $0xd8] sm:$0xf0] }
 0x370   :  { %7973 = vmatpush.bf16.msra.mxu1 %v12439_v54  ;;  %v12519_v54 = vor.u32 %v14075_v31, %v12518_v21  ;;  %v7747_v18 = vpop.f32.mrf.mxu3  ;;  %v7723_v3 = vpop.f32.mrf.mxu1  ;;  %v12470_v21 = vld [vmem:[#allocation8 + $0x1208] sm:$0xf]  ;;  %v14183_v32 = vld [vmem:[#allocation8 + $0x15d4] sm:$0xf0] }
 0x371   :  { %7986 = vmatpush.bf16.msra.mxu2 %v12567_v63  ;;  %v12246_v63 = vld [vmem:[#allocation8 + $0x1048] sm:$0xf] }
 0x372   :  { %7999 = vmatpush.bf16.msra.mxu3 %v12695_v11  ;;  %v7734_v11 = vpop.f32.mrf.mxu2  ;;  %v12247_v23 = vor.u32 %v14007_v38, %v12246_v63  ;;  %v12838_v63 = vld [vmem:[#allocation8 + $0x14e8] sm:$0xf]  ;;  %v14155_v38 = vld [vmem:[#allocation8 + $0x14f4] sm:$0xf0] }
 0x373   :  { %7961 = vmatpush.bf16.msra.mxu0 %v12295_v49  ;;  %v7735_v16 = vadd.f32 %v7734_v11, %v7722_v55  ;;  %v7710_v49 = vpop.f32.mrf.mxu0  ;;  %v12487_v55 = vor.u32 %v14067_v50, %v12486_v37  ;;  %v14187_v11 = vld [vmem:[#allocation8 + $0x15f4] sm:$0xf0]  ;;  %v13541_v37 = vld [vmem:[#allocation8 + $0x1cc] sm:$0xf]  ;;  %v10392_v50 = vld [vmem:[#allocation8 + $0x1d8] sm:$0xf0] }
 0x374   :  { %7974 = vmatpush.bf16.msra.mxu1 %v12423_v7  ;;  %v12630_v7 = vld [vmem:[#allocation8 + $0x1348] sm:$0xf]  ;;  %v10408_v49 = vld [vmem:[#allocation8 + $0x1f8] sm:$0xf0] }
 0x375   :  { %7987 = vmatpush.bf16.msra.mxu2 %v12551_v1  ;;  %v14103_v1 = vld [vmem:[#allocation8 + $0x1354] sm:$0xf0]  ;;  %v14884_v24 = vadd.f32 %v7747_v18, %v7735_v16  ;;  %v12471_v16 = vor.u32 %v14063_v60, %v12470_v21  ;;  %v13545_v18 = vld [vmem:[#allocation8 + $0x1ec] sm:$0xf]  ;;  %v10248_v21 = vld [vmem:[#allocation8 + $0xb8] sm:$0xf0] }
 0x376   :  { %8000 = vmatpush.bf16.msra.mxu3 %v12679_v45  ;;  %v12375_v45 = vor.u32 %v14039_v13, %v12374_v4  ;;  %v12631_v33 = vor.u32 %v14103_v1, %v12630_v7  ;;  %v12966_v4 = vld [vmem:[#allocation8 + $0x15e8] sm:$0xf]  ;;  %v13513_v13 = vld [vmem:[#allocation8 + $0xec] sm:$0xf]  ;;  %v12839_v1 = vor.u32 %v14155_v38, %v12838_v63 }
 0x377   :  { %7962 = vmatpush.bf16.msra.mxu0 %v12279_v41  ;;  %v12614_v41 = vld [vmem:[#allocation8 + $0x1328] sm:$0xf]  ;;  %v12967_v3 = vor.u32 %v14187_v11, %v12966_v4  ;;  %v14143_v4 = vld [vmem:[#allocation8 + $0x1494] sm:$0xf0] }
 0x378   :  { %7975 = vmatpush.bf16.msra.mxu1 %v12407_v6  ;;  %v14099_v6 = vld [vmem:[#allocation8 + $0x1334] sm:$0xf0]  ;;  %v12790_v38 = vld [vmem:[#allocation8 + $0x1488] sm:$0xf] }
 0x379   :  { %7988 = vmatpush.bf16.msra.mxu2 %v12535_v26  ;;  %v12231_v26 = vor.u32 %v14003_v8, %v12230_v30  ;;  %v12615_v31 = vor.u32 %v14099_v6, %v12614_v41  ;;  %v12950_v30 = vld [vmem:[#allocation8 + $0x15c8] sm:$0xf]  ;;  %v10411_v8 = vor.u32 %v13545_v18, %v10408_v49  ;;  %v13533_v18 = vld [vmem:[#allocation8 + $0x18c] sm:$0xf]  ;;  %v10360_v49 = vld [vmem:[#allocation8 + $0x198] sm:$0xf0] }
 0x37a   :  { %8001 = vmatpush.bf16.msra.mxu3 %v12663_v43  ;;  %v12342_v43 = vld [vmem:[#allocation8 + $0x1108] sm:$0xf]  ;;  %v7736_v58 = vpop.f32.mrf.mxu2  ;;  %v12951_v6 = vor.u32 %v14183_v32, %v12950_v30  ;;  %v14139_v30 = vld [vmem:[#allocation8 + $0x1474] sm:$0xf0] }
 0x37b   :  { %7963 = vmatpush.bf16.msra.mxu0 %v12263_v62  ;;  %v12598_v62 = vld [vmem:[#allocation8 + $0x1308] sm:$0xf]  ;;  %v12343_v14 = vor.u32 %v14031_v47, %v12342_v43  ;;  %v14179_v43 = vld [vmem:[#allocation8 + $0x15b4] sm:$0xf0]  ;;  %v13505_v47 = vld [vmem:[#allocation8 + $0xac] sm:$0xf] }
 0x37c   :  { %7976 = vmatpush.bf16.msra.mxu1 %v12391_v51  ;;  %v14095_v51 = vld [vmem:[#allocation8 + $0x1314] sm:$0xf0]  ;;  %v10376_v58 = vld [vmem:[#allocation8 + $0x1b8] sm:$0xf0]  ;;  %v10251_v63 = vor.u32 %v13505_v47, %v10248_v21 }
 0x37d   :  { %7989 = vmatpush.bf16.msra.mxu2 %v12519_v54  ;;  %v7749_v54 = vpop.f32.mrf.mxu3  ;;  %v12599_v7 = vor.u32 %v14095_v51, %v12598_v62  ;;  %v14247_v62 = vld [vmem:[#allocation10] sm:$0xf] }
 0x37e   :  { %8002 = vmatpush.bf16.msra.mxu3 %v12647_v59  ;;  %v12215_v59 = vor.u32 %v13999_v12, %v12214_v44  ;;  %v12806_v44 = vld [vmem:[#allocation8 + $0x14a8] sm:$0xf]  ;;  %v14147_v12 = vld [vmem:[#allocation8 + $0x14b4] sm:$0xf0]  ;;  %v3653_v51 = vperm.slane %v14247_v62, 2 }
 0x37f   :  { %7964 = vmatpush.bf16.msra.mxu0 %v12247_v23  ;;  %v10283_v23 = vor.u32 %v13513_v13, %v10280_v48  ;;  %v12807_v60 = vor.u32 %v14147_v12, %v12806_v44  ;;  %v14175_v13 = vld [vmem:[#allocation8 + $0x1594] sm:$0xf0]  ;;  %v13501_v48 = vld [vmem:[#allocation8 + $0x8c] sm:$0xf] }
 0x380   :  { %7977 = vmatpush.bf16.msra.mxu1 %v12375_v45  ;;  %v12822_v45 = vld [vmem:[#allocation8 + $0x14c8] sm:$0xf] }
 0x381   :  { %7990 = vmatpush.bf16.msra.mxu2 %v12503_v0  ;;  %v14151_v0 = vld [vmem:[#allocation8 + $0x14d4] sm:$0xf0] }
 0x382   :  { %8003 = vmatpush.bf16.msra.mxu3 %v12631_v33  ;;  %v13509_v33 = vld [vmem:[#allocation8 + $0xcc] sm:$0xf]  ;;  %v12823_v41 = vor.u32 %v14151_v0, %v12822_v45  ;;  %v12774_v0 = vld [vmem:[#allocation8 + $0x1468] sm:$0xf] }
 0x383   :  { %7965 = vmatpush.bf16.msra.mxu0 %v12231_v26  ;;  %v10267_v26 = vor.u32 %v13509_v33, %v10264_v9  ;;  %v10363_v33 = vor.u32 %v13533_v18, %v10360_v49  ;;  %v14171_v9 = vld [vmem:[#allocation8 + $0x1574] sm:$0xf0]  ;;  %v12870_v18 = vld [vmem:[#allocation8 + $0x1528] sm:$0xf] }
 0x384   :  { %7978 = vmatpush.bf16.msra.mxu1 %v12359_v57  ;;  %v12934_v57 = vld [vmem:[#allocation8 + $0x15a8] sm:$0xf] }
 0x385   :  { %7991 = vmatpush.bf16.msra.mxu2 %v12487_v55  ;;  %v10395_v55 = vor.u32 %v13541_v37, %v10392_v50  ;;  %v12935_v54 = vor.u32 %v14179_v43, %v12934_v57  ;;  %v13497_v37 = vld [vmem:[#allocation8 + $0x6c] sm:$0xf]  ;;  %v10216_v50 = vld [vmem:[#allocation8 + $0x78] sm:$0xf0]  ;;  %v12758_v57 = vld [vmem:[#allocation8 + $0x1448] sm:$0xf] }
 0x386   :  { %8004 = vmatpush.bf16.msra.mxu3 %v12615_v31  ;;  %v13537_v31 = vld [vmem:[#allocation8 + $0x1ac] sm:$0xf]  ;;  %v10219_v12 = vor.u32 %v13497_v37, %v10216_v50  ;;  %v12886_v43 = vld [vmem:[#allocation8 + $0x1548] sm:$0xf]  ;;  %v14159_v37 = vld [vmem:[#allocation8 + $0x1514] sm:$0xf0] }
 0x387   :  { %7966 = vmatpush.bf16.msra.mxu0 %v12215_v59  ;;  %v12918_v59 = vld [vmem:[#allocation8 + $0x1588] sm:$0xf]  ;;  %v10379_v11 = vor.u32 %v13537_v31, %v10376_v58  ;;  %v14167_v31 = vld [vmem:[#allocation8 + $0x1554] sm:$0xf0]  ;;  %v13493_v58 = vld [vmem:[#allocation8 + $0x4c] sm:$0xf] }
 0x388   :  { %7979 = vmatpush.bf16.msra.mxu1 %v12343_v14  ;;  %v10232_v14 = vld [vmem:[#allocation8 + $0x98] sm:$0xf0]  ;;  %v13485_v50 = vld [vmem:[#allocation8 + $0xc] sm:$0xf] }
 0x389   :  { %7992 = vmatpush.bf16.msra.mxu2 %v12471_v16  ;;  %v7760_v16 = vpop.f32.mrf.mxu0  ;;  %v10235_v45 = vor.u32 %v13501_v48, %v10232_v14  ;;  %v12742_v14 = vld [vmem:[#allocation8 + $0x1428] sm:$0xf] }
 0x38a   :  { %8005 = vmatpush.bf16.msra.mxu3 %v12599_v7  ;;  %7967 = vmatmul.bf16.vlgmr.msra.gmra.mxu0 %v14790_v56  ;;  %v7761_v7 = vadd.f32 %v7760_v16, %v3653_v51  ;;  %v14131_v16 = vld [vmem:[#allocation8 + $0x1434] sm:$0xf0] }
 0x38b   :  { %8011 = vmatpush.bf16.msrb.mxu0 %v12839_v1  ;;  %7980 = vmatmul.bf16.vlgmr.msra.gmra.mxu1 %v14792_v19  ;;  %v7773_v1 = vpop.f32.mrf.mxu1 }
 0x38c   :  { %8024 = vmatpush.bf16.msrb.mxu1 %v12967_v3  ;;  %7993 = vmatmul.bf16.vlgmr.msra.gmra.mxu2 %v14794_v20  ;;  %v12791_v3 = vor.u32 %v14143_v4, %v12790_v38  ;;  %v7774_v32 = vadd.f32 %v7773_v1, %v7761_v7  ;;  %v10328_v38 = vld [vmem:[#allocation8 + $0x158] sm:$0xf0]  ;;  %v14163_v7 = vld [vmem:[#allocation8 + $0x1534] sm:$0xf0]  ;;  %v13489_v1 = vld [vmem:[#allocation8 + $0x2c] sm:$0xf] }
 0x38d   :  { %8037 = vmatpush.bf16.msrb.mxu2 %v10283_v23  ;;  %8006 = vmatmul.bf16.vlgmr.msra.gmra.mxu3 %v14796_v27  ;;  %v12919_v23 = vor.u32 %v14175_v13, %v12918_v59  ;;  %v12887_v13 = vor.u32 %v14167_v31, %v12886_v43  ;;  %v10536_v43 = vld [vmem:[#allocation8 + $0x2f8] sm:$0xf0] }
 0x38e   :  { %8050 = vmatpush.bf16.msrb.mxu3 %v10411_v8  ;;  %v12902_v8 = vld [vmem:[#allocation8 + $0x1568] sm:$0xf]  ;;  %v10664_v31 = vld [vmem:[#allocation8 + $0x3f8] sm:$0xf0] }
 0x38f   :  { %8012 = vmatpush.bf16.msrb.mxu0 %v12823_v41  ;;  %v13529_v41 = vld [vmem:[#allocation8 + $0x16c] sm:$0xf]  ;;  %v12903_v44 = vor.u32 %v14171_v9, %v12902_v8  ;;  %v7786_v21 = vpop.f32.mrf.mxu2  ;;  %v14127_v8 = vld [vmem:[#allocation8 + $0x1414] sm:$0xf0]  ;;  %v12854_v9 = vld [vmem:[#allocation8 + $0x1508] sm:$0xf] }
 0x390   :  { %8025 = vmatpush.bf16.msrb.mxu1 %v12951_v6  ;;  %v10344_v6 = vld [vmem:[#allocation8 + $0x178] sm:$0xf0]  ;;  %v7787_v62 = vadd.f32 %v7786_v21, %v7774_v32  ;;  %v7799_v51 = vpop.f32.mrf.mxu3  ;;  %v12871_v32 = vor.u32 %v14163_v7, %v12870_v18  ;;  %v13637_v7 = vld [vmem:[#allocation8 + $0x4cc] sm:$0xf] }
 0x391   :  { %8038 = vmatpush.bf16.msrb.mxu2 %v10267_v26  ;;  %v12775_v26 = vor.u32 %v14139_v30, %v12774_v0  ;;  %v10347_v47 = vor.u32 %v13529_v41, %v10344_v6  ;;  %v12743_v0 = vor.u32 %v14131_v16, %v12742_v14  ;;  %v12726_v30 = vld [vmem:[#allocation8 + $0x1408] sm:$0xf]  ;;  %v10520_v14 = vld [vmem:[#allocation8 + $0x2d8] sm:$0xf0]  ;;  %v13605_v16 = vld [vmem:[#allocation8 + $0x3cc] sm:$0xf] }
 0x392   :  { %8051 = vmatpush.bf16.msrb.mxu3 %v10395_v55  ;;  %v14135_v55 = vld [vmem:[#allocation8 + $0x1454] sm:$0xf0]  ;;  %v12727_v21 = vor.u32 %v14127_v8, %v12726_v30  ;;  %v13569_v8 = vld [vmem:[#allocation8 + $0x2ac] sm:$0xf] }
 0x393   :  { %8013 = vmatpush.bf16.msrb.mxu0 %v12807_v60  ;;  %v10200_v60 = vld [vmem:[#allocation8 + $0x58] sm:$0xf0]  ;;  %v7775_v4 = vpop.f32.mrf.mxu1  ;;  %v12759_v59 = vor.u32 %v14135_v55, %v12758_v57  ;;  %v13577_v55 = vld [vmem:[#allocation8 + $0x2ec] sm:$0xf] }
 0x394   :  { %8026 = vmatpush.bf16.msrb.mxu1 %v12935_v54  ;;  %v7762_v54 = vpop.f32.mrf.mxu0  ;;  %v10203_v48 = vor.u32 %v13493_v58, %v10200_v60  ;;  %v13641_v58 = vld [vmem:[#allocation8 + $0x4ec] sm:$0xf]  ;;  %v10792_v60 = vld [vmem:[#allocation8 + $0x4f8] sm:$0xf0]  ;;  %v10539_v4 = vor.u32 %v13577_v55, %v10536_v43 }
 0x395   :  { %8039 = vmatpush.bf16.msrb.mxu2 %v10251_v63  ;;  %v13525_v63 = vld [vmem:[#allocation8 + $0x14c] sm:$0xf]  ;;  %v10488_v43 = vld [vmem:[#allocation8 + $0x298] sm:$0xf0] }
 0x396   :  { %8052 = vmatpush.bf16.msrb.mxu3 %v10379_v11  ;;  %v14890_v11 = vadd.f32 %v7799_v51, %v7787_v62  ;;  %v10331_v49 = vor.u32 %v13525_v63, %v10328_v38  ;;  %v12855_v62 = vor.u32 %v14159_v37, %v12854_v9  ;;  %v13673_v54 = vld [vmem:[#allocation8 + $0x5ec] sm:$0xf]  ;;  %v10920_v63 = vld [vmem:[#allocation8 + $0x5f8] sm:$0xf0] }
 0x397   :  { %8014 = vmatpush.bf16.msrb.mxu0 %v12791_v3  ;;  %v10184_v3 = vld [vmem:[#allocation8 + $0x38] sm:$0xf0]  ;;  %v7788_v6 = vpop.f32.mrf.mxu2  ;;  %v10923_v18 = vor.u32 %v13673_v54, %v10920_v63  ;;  %v13565_v55 = vld [vmem:[#allocation8 + $0x28c] sm:$0xf] }
 0x398   :  { %8027 = vmatpush.bf16.msrb.mxu1 %v12919_v23  ;;  %v13521_v23 = vld [vmem:[#allocation8 + $0x12c] sm:$0xf]  ;;  %v7801_v57 = vpop.f32.mrf.mxu3  ;;  %v10632_v37 = vld [vmem:[#allocation8 + $0x3b8] sm:$0xf0]  ;;  %v10491_v63 = vor.u32 %v13565_v55, %v10488_v43 }
 0x399   :  { %8040 = vmatpush.bf16.msrb.mxu2 %v10235_v45  ;;  %v10312_v45 = vld [vmem:[#allocation8 + $0x138] sm:$0xf0]  ;;  %v13665_v6 = vld [vmem:[#allocation8 + $0x5ac] sm:$0xf] }
 0x39a   :  { %8053 = vmatpush.bf16.msrb.mxu3 %v10363_v33  ;;  %v10187_v33 = vor.u32 %v13489_v1, %v10184_v3  ;;  %v10315_v41 = vor.u32 %v13521_v23, %v10312_v45  ;;  %v10776_v1 = vld [vmem:[#allocation8 + $0x4d8] sm:$0xf0]  ;;  %v13669_v3 = vld [vmem:[#allocation8 + $0x5cc] sm:$0xf] }
 0x39b   :  { %8015 = vmatpush.bf16.msrb.mxu0 %v12775_v26  ;;  %v10168_v26 = vld [vmem:[#allocation8 + $0x18] sm:$0xf0]  ;;  %v10779_v30 = vor.u32 %v13637_v7, %v10776_v1  ;;  %v13657_v1 = vld [vmem:[#allocation8 + $0x56c] sm:$0xf] }
 0x39c   :  { %8028 = vmatpush.bf16.msrb.mxu1 %v12903_v44  ;;  %v13517_v44 = vld [vmem:[#allocation8 + $0x10c] sm:$0xf]  ;;  %v10171_v51 = vor.u32 %v13485_v50, %v10168_v26  ;;  %v10904_v23 = vld [vmem:[#allocation8 + $0x5d8] sm:$0xf0] }
 0x39d   :  { %8041 = vmatpush.bf16.msrb.mxu2 %v10219_v12  ;;  %v10296_v12 = vld [vmem:[#allocation8 + $0x118] sm:$0xf0]  ;;  %v10907_v9 = vor.u32 %v13669_v3, %v10904_v23  ;;  %v13633_v50 = vld [vmem:[#allocation8 + $0x4ac] sm:$0xf] }
 0x39e   :  { %8054 = vmatpush.bf16.msrb.mxu3 %v10347_v47  ;;  %v13609_v47 = vld [vmem:[#allocation8 + $0x3ec] sm:$0xf]  ;;  %v10299_v38 = vor.u32 %v13517_v44, %v10296_v12  ;;  %v10888_v26 = vld [vmem:[#allocation8 + $0x5b8] sm:$0xf0] }
 0x39f   :  { %8016 = vmatpush.bf16.msrb.mxu0 %v12759_v59  ;;  %v10667_v59 = vor.u32 %v13609_v47, %v10664_v31  ;;  %v13597_v47 = vld [vmem:[#allocation8 + $0x38c] sm:$0xf]  ;;  %v10616_v31 = vld [vmem:[#allocation8 + $0x398] sm:$0xf0] }
 0x3a0   :  { %8029 = vmatpush.bf16.msrb.mxu1 %v12887_v13  ;;  %v10795_v13 = vor.u32 %v13641_v58, %v10792_v60  ;;  %v13629_v58 = vld [vmem:[#allocation8 + $0x48c] sm:$0xf]  ;;  %v10744_v60 = vld [vmem:[#allocation8 + $0x498] sm:$0xf0] }
 0x3a1   :  { %8042 = vmatpush.bf16.msrb.mxu2 %v10203_v48  ;;  %v13573_v48 = vld [vmem:[#allocation8 + $0x2cc] sm:$0xf]  ;;  %v10728_v7 = vld [vmem:[#allocation8 + $0x478] sm:$0xf0] }
 0x3a2   :  { %8055 = vmatpush.bf16.msrb.mxu3 %v10331_v49  ;;  %v10648_v49 = vld [vmem:[#allocation8 + $0x3d8] sm:$0xf0]  ;;  %v10523_v45 = vor.u32 %v13573_v48, %v10520_v14  ;;  %v13593_v48 = vld [vmem:[#allocation8 + $0x36c] sm:$0xf] }
 0x3a3   :  { %8017 = vmatpush.bf16.msrb.mxu0 %v12743_v0  ;;  %v10651_v0 = vor.u32 %v13605_v16, %v10648_v49  ;;  %v13625_v49 = vld [vmem:[#allocation8 + $0x46c] sm:$0xf]  ;;  %v10856_v3 = vld [vmem:[#allocation8 + $0x578] sm:$0xf0] }
 0x3a4   :  { %8030 = vmatpush.bf16.msrb.mxu1 %v12871_v32  ;;  %v10504_v32 = vld [vmem:[#allocation8 + $0x2b8] sm:$0xf0] }
 0x3a5   :  { %8043 = vmatpush.bf16.msrb.mxu2 %v10187_v33  ;;  %v13601_v33 = vld [vmem:[#allocation8 + $0x3ac] sm:$0xf]  ;;  %v10507_v44 = vor.u32 %v13569_v8, %v10504_v32  ;;  %v10859_v32 = vor.u32 %v13657_v1, %v10856_v3  ;;  %v10680_v1 = vld [vmem:[#allocation8 + $0x418] sm:$0xf0] }
 0x3a6   :  { %8056 = vmatpush.bf16.msrb.mxu3 %v10315_v41  ;;  %v10760_v41 = vld [vmem:[#allocation8 + $0x4b8] sm:$0xf0]  ;;  %v10635_v12 = vor.u32 %v13601_v33, %v10632_v37  ;;  %v13589_v8 = vld [vmem:[#allocation8 + $0x34c] sm:$0xf] }
 0x3a7   :  { %8018 = vmatpush.bf16.msrb.mxu0 %v12727_v21  ;;  %v10763_v57 = vor.u32 %v13633_v50, %v10760_v41  ;;  %v10891_v21 = vor.u32 %v13665_v6, %v10888_v26  ;;  %v13621_v37 = vld [vmem:[#allocation8 + $0x44c] sm:$0xf]  ;;  %v10712_v50 = vld [vmem:[#allocation8 + $0x458] sm:$0xf0] }
 0x3a8   :  { %8031 = vmatpush.bf16.msrb.mxu1 %v12855_v62  ;;  %v7812_v62 = vpop.f32.mrf.mxu0  ;;  %v7825_v54 = vpop.f32.mrf.mxu1  ;;  %v13645_v3 = vld [vmem:[#allocation8 + $0x50c] sm:$0xf] }
 0x3a9   :  { %8044 = vmatpush.bf16.msrb.mxu2 %v10171_v51  ;;  %v10872_v51 = vld [vmem:[#allocation8 + $0x598] sm:$0xf0] }
 0x3aa   :  { %8057 = vmatpush.bf16.msrb.mxu3 %v10299_v38  ;;  %8019 = vmatmul.bf16.vlgmr.msrb.gmra.mxu0 %v14810_v52  ;;  %v10619_v38 = vor.u32 %v13597_v47, %v10616_v31  ;;  %v13553_v31 = vld [vmem:[#allocation8 + $0x22c] sm:$0xf] }
 0x3ab   :  { %8063 = vmatpush.bf16.msra.mxu0 %v10539_v4  ;;  %8032 = vmatmul.bf16.vlgmr.msrb.gmra.mxu1 %v14812_v17  ;;  %v10747_v4 = vor.u32 %v13629_v58, %v10744_v60  ;;  %v10440_v58 = vld [vmem:[#allocation8 + $0x238] sm:$0xf0]  ;;  %v13585_v60 = vld [vmem:[#allocation8 + $0x32c] sm:$0xf] }
 0x3ac   :  { %8076 = vmatpush.bf16.msra.mxu1 %v10667_v59  ;;  %8045 = vmatmul.bf16.vlgmr.msrb.gmra.mxu2 %v14692_v36  ;;  %v13661_v36 = vld [vmem:[#allocation8 + $0x58c] sm:$0xf] }
 0x3ad   :  { %8089 = vmatpush.bf16.msra.mxu2 %v10795_v13  ;;  %8058 = vmatmul.bf16.vlgmr.msrb.gmra.mxu3 %v14694_v53  ;;  %v7813_v53 = vadd.f32 %v7812_v62, %v14890_v11  ;;  %v13561_v59 = vld [vmem:[#allocation8 + $0x26c] sm:$0xf]  ;;  %v10472_v13 = vld [vmem:[#allocation8 + $0x278] sm:$0xf0]  ;;  %v10875_v16 = vor.u32 %v13661_v36, %v10872_v51 }
 0x3ae   :  { %8102 = vmatpush.bf16.msra.mxu3 %v10923_v18  ;;  %v10600_v18 = vld [vmem:[#allocation8 + $0x378] sm:$0xf0]  ;;  %v10475_v23 = vor.u32 %v13561_v59, %v10472_v13  ;;  %v13617_v51 = vld [vmem:[#allocation8 + $0x42c] sm:$0xf] }
 0x3af   :  { %8064 = vmatpush.bf16.msra.mxu0 %v10523_v45  ;;  %v7826_v14 = vadd.f32 %v7825_v54, %v7813_v53  ;;  %v10603_v11 = vor.u32 %v13593_v48, %v10600_v18  ;;  %v10731_v45 = vor.u32 %v13625_v49, %v10728_v7  ;;  %v7838_v33 = vpop.f32.mrf.mxu2  ;;  %v10568_v36 = vld [vmem:[#allocation8 + $0x338] sm:$0xf0]  ;;  %v13649_v54 = vld [vmem:[#allocation8 + $0x52c] sm:$0xf] }
 0x3b0   :  { %8077 = vmatpush.bf16.msra.mxu1 %v10651_v0  ;;  %v13557_v0 = vld [vmem:[#allocation8 + $0x24c] sm:$0xf]  ;;  %v7851_v6 = vpop.f32.mrf.mxu3  ;;  %v7814_v26 = vpop.f32.mrf.mxu0  ;;  %v10696_v53 = vld [vmem:[#allocation8 + $0x438] sm:$0xf0]  ;;  %v10571_v13 = vor.u32 %v13585_v60, %v10568_v36 }
 0x3b1   :  { %8090 = vmatpush.bf16.msra.mxu2 %v10779_v30  ;;  %v10456_v30 = vld [vmem:[#allocation8 + $0x258] sm:$0xf0]  ;;  %v7839_v41 = vadd.f32 %v7838_v33, %v7826_v14  ;;  %v10699_v48 = vor.u32 %v13617_v51, %v10696_v53  ;;  %v13581_v14 = vld [vmem:[#allocation8 + $0x30c] sm:$0xf] }
 0x3b2   :  { %8103 = vmatpush.bf16.msra.mxu3 %v10907_v9  ;;  %v10584_v9 = vld [vmem:[#allocation8 + $0x358] sm:$0xf0]  ;;  %v10459_v55 = vor.u32 %v13557_v0, %v10456_v30  ;;  %v13613_v18 = vld [vmem:[#allocation8 + $0x40c] sm:$0xf] }
 0x3b3   :  { %8065 = vmatpush.bf16.msra.mxu0 %v10507_v44  ;;  %v13653_v44 = vld [vmem:[#allocation8 + $0x54c] sm:$0xf]  ;;  %v14897_v43 = vadd.f32 %v7851_v6, %v7839_v41  ;;  %v10587_v47 = vor.u32 %v13589_v8, %v10584_v9  ;;  %v10424_v59 = vld [vmem:[#allocation8 + $0x218] sm:$0xf0] }
 0x3b4   :  { %8078 = vmatpush.bf16.msra.mxu1 %v10635_v12  ;;  %v10840_v12 = vld [vmem:[#allocation8 + $0x558] sm:$0xf0]  ;;  %v13737_v30 = vld [vmem:[#allocation8 + $0x7ec] sm:$0xf] }
 0x3b5   :  { %8091 = vmatpush.bf16.msra.mxu2 %v10763_v57  ;;  %v7827_v57 = vpop.f32.mrf.mxu1  ;;  %v10843_v62 = vor.u32 %v13653_v44, %v10840_v12  ;;  %v11048_v0 = vld [vmem:[#allocation8 + $0x6f8] sm:$0xf0]  ;;  %v13769_v33 = vld [vmem:[#allocation8 + $0x8ec] sm:$0xf] }
 0x3b6   :  { %8104 = vmatpush.bf16.msra.mxu3 %v10891_v21  ;;  %v10715_v21 = vor.u32 %v13621_v37, %v10712_v50  ;;  %v11304_v9 = vld [vmem:[#allocation8 + $0x8f8] sm:$0xf0]  ;;  %v10683_v50 = vor.u32 %v13613_v18, %v10680_v1  ;;  %v13801_v41 = vld [vmem:[#allocation8 + $0x9ec] sm:$0xf] }
 0x3b7   :  { %8066 = vmatpush.bf16.msra.mxu0 %v10491_v63  ;;  %v10824_v63 = vld [vmem:[#allocation8 + $0x538] sm:$0xf0]  ;;  %v7840_v7 = vpop.f32.mrf.mxu2  ;;  %v11307_v57 = vor.u32 %v13769_v33, %v11304_v9  ;;  %v13765_v60 = vld [vmem:[#allocation8 + $0x8cc] sm:$0xf] }
 0x3b8   :  { %8079 = vmatpush.bf16.msra.mxu1 %v10619_v38  ;;  %v10443_v38 = vor.u32 %v13553_v31, %v10440_v58  ;;  %v10827_v49 = vor.u32 %v13649_v54, %v10824_v63  ;;  %v11432_v6 = vld [vmem:[#allocation8 + $0x9f8] sm:$0xf0]  ;;  %v13797_v36 = vld [vmem:[#allocation8 + $0x9cc] sm:$0xf] }
 0x3b9   :  { %8092 = vmatpush.bf16.msra.mxu2 %v10747_v4  ;;  %v13549_v4 = vld [vmem:[#allocation8 + $0x20c] sm:$0xf]  ;;  %v11435_v31 = vor.u32 %v13801_v41, %v11432_v6  ;;  %v11160_v58 = vld [vmem:[#allocation8 + $0x7d8] sm:$0xf0] }
 0x3ba   :  { %8105 = vmatpush.bf16.msra.mxu3 %v10875_v16  ;;  %v10552_v16 = vld [vmem:[#allocation8 + $0x318] sm:$0xf0]  ;;  %v10427_v8 = vor.u32 %v13549_v4, %v10424_v59  ;;  %v13729_v59 = vld [vmem:[#allocation8 + $0x7ac] sm:$0xf] }
 0x3bb   :  { %8067 = vmatpush.bf16.msra.mxu0 %v10475_v23  ;;  %v10808_v23 = vld [vmem:[#allocation8 + $0x518] sm:$0xf0]  ;;  %v10555_v37 = vor.u32 %v13581_v14, %v10552_v16  ;;  %v13761_v14 = vld [vmem:[#allocation8 + $0x8ac] sm:$0xf] }
 0x3bc   :  { %8080 = vmatpush.bf16.msra.mxu1 %v10603_v11  ;;  %v7853_v11 = vpop.f32.mrf.mxu3  ;;  %v10811_v26 = vor.u32 %v13645_v3, %v10808_v23  ;;  %v11416_v51 = vld [vmem:[#allocation8 + $0x9d8] sm:$0xf0]  ;;  %v13793_v18 = vld [vmem:[#allocation8 + $0x9ac] sm:$0xf] }
 0x3bd   :  { %8093 = vmatpush.bf16.msra.mxu2 %v10731_v45  ;;  %v13705_v45 = vld [vmem:[#allocation8 + $0x6ec] sm:$0xf]  ;;  %v11016_v4 = vld [vmem:[#allocation8 + $0x6b8] sm:$0xf0] }
 0x3be   :  { %8106 = vmatpush.bf16.msra.mxu3 %v10859_v32  ;;  %v11176_v32 = vld [vmem:[#allocation8 + $0x7f8] sm:$0xf0]  ;;  %v11051_v44 = vor.u32 %v13705_v45, %v11048_v0  ;;  %v13693_v23 = vld [vmem:[#allocation8 + $0x68c] sm:$0xf] }
 0x3bf   :  { %8068 = vmatpush.bf16.msra.mxu0 %v10459_v55  ;;  %v11179_v12 = vor.u32 %v13737_v30, %v11176_v32  ;;  %v13701_v55 = vld [vmem:[#allocation8 + $0x6cc] sm:$0xf]  ;;  %v11272_v16 = vld [vmem:[#allocation8 + $0x8b8] sm:$0xf0] }
 0x3c0   :  { %8081 = vmatpush.bf16.msra.mxu1 %v10587_v47  ;;  %v11032_v47 = vld [vmem:[#allocation8 + $0x6d8] sm:$0xf0]  ;;  %v11275_v3 = vor.u32 %v13761_v14, %v11272_v16  ;;  %v13725_v11 = vld [vmem:[#allocation8 + $0x78c] sm:$0xf] }
 0x3c1   :  { %8094 = vmatpush.bf16.msra.mxu2 %v10715_v21  ;;  %v13733_v21 = vld [vmem:[#allocation8 + $0x7cc] sm:$0xf]  ;;  %v11035_v53 = vor.u32 %v13701_v55, %v11032_v47  ;;  %v11128_v0 = vld [vmem:[#allocation8 + $0x798] sm:$0xf0] }
 0x3c2   :  { %8107 = vmatpush.bf16.msra.mxu3 %v10843_v62  ;;  %v11288_v62 = vld [vmem:[#allocation8 + $0x8d8] sm:$0xf0]  ;;  %v11163_v54 = vor.u32 %v13733_v21, %v11160_v58  ;;  %v13757_v30 = vld [vmem:[#allocation8 + $0x88c] sm:$0xf] }
 0x3c3   :  { %8069 = vmatpush.bf16.msra.mxu0 %v10443_v38  ;;  %v11291_v63 = vor.u32 %v13765_v60, %v11288_v62  ;;  %v13697_v38 = vld [vmem:[#allocation8 + $0x6ac] sm:$0xf]  ;;  %v11384_v32 = vld [vmem:[#allocation8 + $0x998] sm:$0xf0] }
 0x3c4   :  { %8082 = vmatpush.bf16.msra.mxu1 %v10571_v13  ;;  %v11419_v13 = vor.u32 %v13797_v36, %v11416_v51  ;;  %v11019_v7 = vor.u32 %v13697_v38, %v11016_v4  ;;  %v13689_v41 = vld [vmem:[#allocation8 + $0x66c] sm:$0xf]  ;;  %v10984_v6 = vld [vmem:[#allocation8 + $0x678] sm:$0xf0] }
 0x3c5   :  { %8095 = vmatpush.bf16.msra.mxu2 %v10699_v48  ;;  %v11144_v48 = vld [vmem:[#allocation8 + $0x7b8] sm:$0xf0]  ;;  %v13753_v55 = vld [vmem:[#allocation8 + $0x86c] sm:$0xf]  ;;  %v10987_v58 = vor.u32 %v13689_v41, %v10984_v6 }
 0x3c6   :  { %8108 = vmatpush.bf16.msra.mxu3 %v10827_v49  ;;  %v11400_v49 = vld [vmem:[#allocation8 + $0x9b8] sm:$0xf0]  ;;  %v11147_v1 = vor.u32 %v13729_v59, %v11144_v48  ;;  %v13785_v21 = vld [vmem:[#allocation8 + $0x96c] sm:$0xf] }
 0x3c7   :  { %8070 = vmatpush.bf16.msra.mxu0 %v10427_v8  ;;  %v11403_v45 = vor.u32 %v13793_v18, %v11400_v49  ;;  %v7864_v8 = vpop.f32.mrf.mxu0  ;;  %v11240_v47 = vld [vmem:[#allocation8 + $0x878] sm:$0xf0]  ;;  %v13685_v62 = vld [vmem:[#allocation8 + $0x64c] sm:$0xf] }
 0x3c8   :  { %8083 = vmatpush.bf16.msra.mxu1 %v10555_v37  ;;  %v7877_v33 = vpop.f32.mrf.mxu1  ;;  %v11131_v37 = vor.u32 %v13725_v11, %v11128_v0  ;;  %v11243_v60 = vor.u32 %v13753_v55, %v11240_v47  ;;  %v10968_v36 = vld [vmem:[#allocation8 + $0x658] sm:$0xf0]  ;;  %v13717_v51 = vld [vmem:[#allocation8 + $0x74c] sm:$0xf] }
 0x3c9   :  { %8096 = vmatpush.bf16.msra.mxu2 %v10683_v50  ;;  %v13749_v38 = vld [vmem:[#allocation8 + $0x84c] sm:$0xf]  ;;  %v11224_v4 = vld [vmem:[#allocation8 + $0x858] sm:$0xf0]  ;;  %v10971_v49 = vor.u32 %v13685_v62, %v10968_v36 }
 0x3ca   :  { %8109 = vmatpush.bf16.msra.mxu3 %v10811_v26  ;;  %8071 = vmatmul.bf16.vlgmr.msra.gmra.mxu0 %v14696_v15  ;;  %v11000_v15 = vld [vmem:[#allocation8 + $0x698] sm:$0xf0]  ;;  %v13721_v26 = vld [vmem:[#allocation8 + $0x76c] sm:$0xf] }
 0x3cb   :  { %8115 = vmatpush.bf16.msrb.mxu0 %v11051_v44  ;;  %8084 = vmatmul.bf16.vlgmr.msra.gmra.mxu1 %v14698_v22  ;;  %v11256_v22 = vld [vmem:[#allocation8 + $0x898] sm:$0xf0]  ;;  %v11003_v9 = vor.u32 %v13693_v23, %v11000_v15  ;;  %v13781_v14 = vld [vmem:[#allocation8 + $0x94c] sm:$0xf] }
 0x3cc   :  { %8128 = vmatpush.bf16.msrb.mxu1 %v11179_v12  ;;  %8097 = vmatmul.bf16.vlgmr.msra.gmra.mxu2 %v14714_v28  ;;  %v13789_v28 = vld [vmem:[#allocation8 + $0x98c] sm:$0xf]  ;;  %v11259_v50 = vor.u32 %v13757_v30, %v11256_v22  ;;  %v11352_v16 = vld [vmem:[#allocation8 + $0x958] sm:$0xf0] }
 0x3cd   :  { %8141 = vmatpush.bf16.msrb.mxu2 %v11307_v57  ;;  %8110 = vmatmul.bf16.vlgmr.msra.gmra.mxu3 %v14716_v46  ;;  %v7865_v46 = vadd.f32 %v7864_v8, %v14897_v43  ;;  %v11387_v12 = vor.u32 %v13789_v28, %v11384_v32  ;;  %v11112_v57 = vld [vmem:[#allocation8 + $0x778] sm:$0xf0]  ;;  %v13681_v23 = vld [vmem:[#allocation8 + $0x62c] sm:$0xf] }
 0x3ce   :  { %8154 = vmatpush.bf16.msrb.mxu3 %v11435_v31  ;;  %v11368_v31 = vld [vmem:[#allocation8 + $0x978] sm:$0xf0]  ;;  %v11115_v43 = vor.u32 %v13721_v26, %v11112_v57  ;;  %v13713_v11 = vld [vmem:[#allocation8 + $0x72c] sm:$0xf] }
 0x3cf   :  { %8116 = vmatpush.bf16.msrb.mxu0 %v11035_v53  ;;  %v7878_v44 = vadd.f32 %v7877_v33, %v7865_v46  ;;  %v11371_v53 = vor.u32 %v13785_v21, %v11368_v31  ;;  %v7866_v48 = vpop.f32.mrf.mxu0  ;;  %v10952_v15 = vld [vmem:[#allocation8 + $0x638] sm:$0xf0]  ;;  %v13745_v30 = vld [vmem:[#allocation8 + $0x82c] sm:$0xf] }
 0x3d0   :  { %8129 = vmatpush.bf16.msrb.mxu1 %v11163_v54  ;;  %v7890_v54 = vpop.f32.mrf.mxu2  ;;  %v7879_v18 = vpop.f32.mrf.mxu1  ;;  %v11080_v0 = vld [vmem:[#allocation8 + $0x738] sm:$0xf0]  ;;  %v13777_v8 = vld [vmem:[#allocation8 + $0x92c] sm:$0xf]  ;;  %v10955_v32 = vor.u32 %v13681_v23, %v10952_v15 }
 0x3d1   :  { %8142 = vmatpush.bf16.msrb.mxu2 %v11291_v63  ;;  %v11096_v63 = vld [vmem:[#allocation8 + $0x758] sm:$0xf0]  ;;  %v7891_v59 = vadd.f32 %v7890_v54, %v7878_v44  ;;  %v13677_v46 = vld [vmem:[#allocation8 + $0x60c] sm:$0xf] }
 0x3d2   :  { %8155 = vmatpush.bf16.msrb.mxu3 %v11419_v13  ;;  %v7903_v13 = vpop.f32.mrf.mxu3  ;;  %v11208_v22 = vld [vmem:[#allocation8 + $0x838] sm:$0xf0]  ;;  %v13741_v6 = vld [vmem:[#allocation8 + $0x80c] sm:$0xf] }
 0x3d3   :  { %8117 = vmatpush.bf16.msrb.mxu0 %v11019_v7  ;;  %v14904_v7 = vadd.f32 %v7903_v13, %v7891_v59  ;;  %v11336_v28 = vld [vmem:[#allocation8 + $0x938] sm:$0xf0]  ;;  %v13773_v57 = vld [vmem:[#allocation8 + $0x90c] sm:$0xf] }
 0x3d4   :  { %8130 = vmatpush.bf16.msrb.mxu1 %v11147_v1  ;;  %v11099_v1 = vor.u32 %v13717_v51, %v11096_v63  ;;  %v10936_v33 = vld [vmem:[#allocation8 + $0x618] sm:$0xf0]  ;;  %v11339_v26 = vor.u32 %v13777_v8, %v11336_v28  ;;  %v13833_v21 = vld [vmem:[#allocation8 + $0xaec] sm:$0xf] }
 0x3d5   :  { %8143 = vmatpush.bf16.msrb.mxu2 %v11275_v3  ;;  %v11227_v3 = vor.u32 %v13749_v38, %v11224_v4  ;;  %v11064_v41 = vld [vmem:[#allocation8 + $0x718] sm:$0xf0]  ;;  %v13897_v62 = vld [vmem:[#allocation8 + $0xcec] sm:$0xf] }
 0x3d6   :  { %8156 = vmatpush.bf16.msrb.mxu3 %v11403_v45  ;;  %v11355_v45 = vor.u32 %v13781_v14, %v11352_v16  ;;  %v11320_v55 = vld [vmem:[#allocation8 + $0x918] sm:$0xf0]  ;;  %v13929_v54 = vld [vmem:[#allocation8 + $0xdec] sm:$0xf] }
 0x3d7   :  { %8118 = vmatpush.bf16.msrb.mxu0 %v11003_v9  ;;  %v11083_v9 = vor.u32 %v13713_v11, %v11080_v0  ;;  %v11560_v31 = vld [vmem:[#allocation8 + $0xaf8] sm:$0xf0]  ;;  %v11323_v38 = vor.u32 %v13773_v57, %v11320_v55  ;;  %v13829_v48 = vld [vmem:[#allocation8 + $0xacc] sm:$0xf] }
 0x3d8   :  { %8131 = vmatpush.bf16.msrb.mxu1 %v11131_v37  ;;  %v11211_v37 = vor.u32 %v13745_v30, %v11208_v22  ;;  %v7892_v44 = vpop.f32.mrf.mxu2  ;;  %v11816_v36 = vld [vmem:[#allocation8 + $0xcf8] sm:$0xf0]  ;;  %v11563_v4 = vor.u32 %v13833_v21, %v11560_v31  ;;  %v13861_v16 = vld [vmem:[#allocation8 + $0xbcc] sm:$0xf] }
 0x3d9   :  { %8144 = vmatpush.bf16.msrb.mxu2 %v11259_v50  ;;  %v13709_v50 = vld [vmem:[#allocation8 + $0x70c] sm:$0xf]  ;;  %v11944_v63 = vld [vmem:[#allocation8 + $0xdf8] sm:$0xf0]  ;;  %v11819_v13 = vor.u32 %v13897_v62, %v11816_v36 }
 0x3da   :  { %8157 = vmatpush.bf16.msrb.mxu3 %v11387_v12  ;;  %v11192_v12 = vld [vmem:[#allocation8 + $0x818] sm:$0xf0]  ;;  %v7905_v47 = vpop.f32.mrf.mxu3  ;;  %v11067_v51 = vor.u32 %v13709_v50, %v11064_v41  ;;  %v11947_v18 = vor.u32 %v13929_v54, %v11944_v63  ;;  %v13925_v23 = vld [vmem:[#allocation8 + $0xdcc] sm:$0xf] }
 0x3db   :  { %8119 = vmatpush.bf16.msrb.mxu0 %v10987_v58  ;;  %v13865_v58 = vld [vmem:[#allocation8 + $0xbec] sm:$0xf]  ;;  %v11544_v14 = vld [vmem:[#allocation8 + $0xad8] sm:$0xf0] }
 0x3dc   :  { %8132 = vmatpush.bf16.msrb.mxu1 %v11115_v43  ;;  %v10939_v43 = vor.u32 %v13677_v46, %v10936_v33  ;;  %v11928_v15 = vld [vmem:[#allocation8 + $0xdd8] sm:$0xf0]  ;;  %v11547_v11 = vor.u32 %v13829_v48, %v11544_v14  ;;  %v13825_v30 = vld [vmem:[#allocation8 + $0xaac] sm:$0xf] }
 0x3dd   :  { %8145 = vmatpush.bf16.msrb.mxu2 %v11243_v60  ;;  %v11688_v60 = vld [vmem:[#allocation8 + $0xbf8] sm:$0xf0]  ;;  %v13857_v8 = vld [vmem:[#allocation8 + $0xbac] sm:$0xf]  ;;  %v11931_v28 = vor.u32 %v13925_v23, %v11928_v15 }
 0x3de   :  { %8158 = vmatpush.bf16.msrb.mxu3 %v11371_v53  ;;  %v11195_v53 = vor.u32 %v13741_v6, %v11192_v12  ;;  %v11691_v59 = vor.u32 %v13865_v58, %v11688_v60  ;;  %v11528_v22 = vld [vmem:[#allocation8 + $0xab8] sm:$0xf0]  ;;  %v13889_v46 = vld [vmem:[#allocation8 + $0xcac] sm:$0xf] }
 0x3df   :  { %8120 = vmatpush.bf16.msrb.mxu0 %v10971_v49  ;;  %v11672_v49 = vld [vmem:[#allocation8 + $0xbd8] sm:$0xf0]  ;;  %v11531_v50 = vor.u32 %v13825_v30, %v11528_v22  ;;  %v13853_v44 = vld [vmem:[#allocation8 + $0xb8c] sm:$0xf] }
 0x3e0   :  { %8133 = vmatpush.bf16.msrb.mxu1 %v11099_v1  ;;  %v13893_v1 = vld [vmem:[#allocation8 + $0xccc] sm:$0xf]  ;;  %v11784_v33 = vld [vmem:[#allocation8 + $0xcb8] sm:$0xf0] }
 0x3e1   :  { %8146 = vmatpush.bf16.msrb.mxu2 %v11227_v3  ;;  %v11800_v3 = vld [vmem:[#allocation8 + $0xcd8] sm:$0xf0]  ;;  %v11787_v6 = vor.u32 %v13889_v46, %v11784_v33  ;;  %v13885_v55 = vld [vmem:[#allocation8 + $0xc8c] sm:$0xf] }
 0x3e2   :  { %8159 = vmatpush.bf16.msrb.mxu3 %v11355_v45  ;;  %v11675_v45 = vor.u32 %v13861_v16, %v11672_v49  ;;  %v11803_v0 = vor.u32 %v13893_v1, %v11800_v3  ;;  %v11640_v57 = vld [vmem:[#allocation8 + $0xb98] sm:$0xf0]  ;;  %v13817_v62 = vld [vmem:[#allocation8 + $0xa6c] sm:$0xf] }
 0x3e3   :  { %8121 = vmatpush.bf16.msrb.mxu0 %v10955_v32  ;;  %v11656_v32 = vld [vmem:[#allocation8 + $0xbb8] sm:$0xf0]  ;;  %v13813_v16 = vld [vmem:[#allocation8 + $0xa4c] sm:$0xf] }
 0x3e4   :  { %8134 = vmatpush.bf16.msrb.mxu1 %v11083_v9  ;;  %v13921_v9 = vld [vmem:[#allocation8 + $0xdac] sm:$0xf]  ;;  %v11659_v41 = vor.u32 %v13857_v8, %v11656_v32  ;;  %v11896_v21 = vld [vmem:[#allocation8 + $0xd98] sm:$0xf0] }
 0x3e5   :  { %8147 = vmatpush.bf16.msrb.mxu2 %v11211_v37  ;;  %v11912_v37 = vld [vmem:[#allocation8 + $0xdb8] sm:$0xf0]  ;;  %v13845_v49 = vld [vmem:[#allocation8 + $0xb4c] sm:$0xf] }
 0x3e6   :  { %8160 = vmatpush.bf16.msrb.mxu3 %v11339_v26  ;;  %v13821_v26 = vld [vmem:[#allocation8 + $0xa8c] sm:$0xf]  ;;  %v11915_v12 = vor.u32 %v13921_v9, %v11912_v37  ;;  %v11496_v36 = vld [vmem:[#allocation8 + $0xa78] sm:$0xf0] }
 0x3e7   :  { %8122 = vmatpush.bf16.msrb.mxu0 %v10939_v43  ;;  %v7916_v47 = vpop.f32.mrf.mxu0  ;;  %v11643_v43 = vor.u32 %v13853_v44, %v11640_v57  ;;  %v11624_v63 = vld [vmem:[#allocation8 + $0xb78] sm:$0xf0]  ;;  %v11499_v48 = vor.u32 %v13817_v62, %v11496_v36  ;;  %v13877_v15 = vld [vmem:[#allocation8 + $0xc4c] sm:$0xf] }
 0x3e8   :  { %8135 = vmatpush.bf16.msrb.mxu1 %v11067_v51  ;;  %v7929_v31 = vpop.f32.mrf.mxu1  ;;  %v13849_v51 = vld [vmem:[#allocation8 + $0xb6c] sm:$0xf]  ;;  %v11608_v23 = vld [vmem:[#allocation8 + $0xb58] sm:$0xf0] }
 0x3e9   :  { %8148 = vmatpush.bf16.msrb.mxu2 %v11195_v53  ;;  %v13909_v22 = vld [vmem:[#allocation8 + $0xd4c] sm:$0xf]  ;;  %v11864_v8 = vld [vmem:[#allocation8 + $0xd58] sm:$0xf0]  ;;  %v11611_v33 = vor.u32 %v13845_v49, %v11608_v23 }
 0x3ea   :  { %8161 = vmatpush.bf16.msrb.mxu3 %v11323_v38  ;;  %8123 = vmatmul.bf16.vlgmr.msrb.gmra.mxu0 %v14718_v35  ;;  %v11512_v35 = vld [vmem:[#allocation8 + $0xa98] sm:$0xf0]  ;;  %v13881_v38 = vld [vmem:[#allocation8 + $0xc6c] sm:$0xf] }
 0x3eb   :  { %8167 = vmatpush.bf16.msra.mxu0 %v11563_v4  ;;  %8136 = vmatmul.bf16.vlgmr.msrb.gmra.mxu1 %v14720_v42  ;;  %v11768_v42 = vld [vmem:[#allocation8 + $0xc98] sm:$0xf0]  ;;  %v11515_v58 = vor.u32 %v13821_v26, %v11512_v35  ;;  %v13809_v37 = vld [vmem:[#allocation8 + $0xa2c] sm:$0xf] }
 0x3ec   :  { %8180 = vmatpush.bf16.msra.mxu1 %v11691_v59  ;;  %8149 = vmatmul.bf16.vlgmr.msrb.gmra.mxu2 %v14738_v39  ;;  %v13917_v39 = vld [vmem:[#allocation8 + $0xd8c] sm:$0xf]  ;;  %v11771_v60 = vor.u32 %v13885_v55, %v11768_v42  ;;  %v11752_v4 = vld [vmem:[#allocation8 + $0xc78] sm:$0xf0] }
 0x3ed   :  { %8193 = vmatpush.bf16.msra.mxu2 %v11819_v13  ;;  %8162 = vmatmul.bf16.vlgmr.msrb.gmra.mxu3 %v14740_v61  ;;  %v7917_v61 = vadd.f32 %v7916_v47, %v14904_v7  ;;  %v11899_v54 = vor.u32 %v13917_v39, %v11896_v21  ;;  %v13913_v59 = vld [vmem:[#allocation8 + $0xd6c] sm:$0xf]  ;;  %v11880_v13 = vld [vmem:[#allocation8 + $0xd78] sm:$0xf0]  ;;  %v11627_v7 = vor.u32 %v13849_v51, %v11624_v63 }
 0x3ee   :  { %8206 = vmatpush.bf16.msra.mxu3 %v11947_v18  ;;  %v11755_v14 = vor.u32 %v13881_v38, %v11752_v4  ;;  %v11480_v18 = vld [vmem:[#allocation8 + $0xa58] sm:$0xf0]  ;;  %v11883_v1 = vor.u32 %v13913_v59, %v11880_v13  ;;  %v13873_v35 = vld [vmem:[#allocation8 + $0xc2c] sm:$0xf] }
 0x3ef   :  { %8168 = vmatpush.bf16.msra.mxu0 %v11547_v11  ;;  %v7930_v53 = vadd.f32 %v7929_v31, %v7917_v61  ;;  %v7942_v3 = vpop.f32.mrf.mxu2  ;;  %v11736_v11 = vld [vmem:[#allocation8 + $0xc58] sm:$0xf0]  ;;  %v7918_v30 = vpop.f32.mrf.mxu0  ;;  %v11483_v32 = vor.u32 %v13813_v16, %v11480_v18  ;;  %v13805_v42 = vld [vmem:[#allocation8 + $0xa0c] sm:$0xf] }
 0x3f0   :  { %8181 = vmatpush.bf16.msra.mxu1 %v11675_v45  ;;  %v11739_v9 = vor.u32 %v13877_v15, %v11736_v11  ;;  %v11592_v26 = vld [vmem:[#allocation8 + $0xb38] sm:$0xf0]  ;;  %v13837_v61 = vld [vmem:[#allocation8 + $0xb0c] sm:$0xf] }
 0x3f1   :  { %8194 = vmatpush.bf16.msra.mxu2 %v11803_v0  ;;  %v7943_v45 = vadd.f32 %v7942_v3, %v7930_v53  ;;  %v7955_v0 = vpop.f32.mrf.mxu3  ;;  %v11720_v44 = vld [vmem:[#allocation8 + $0xc38] sm:$0xf0]  ;;  %v13901_v36 = vld [vmem:[#allocation8 + $0xd0c] sm:$0xf] }
 0x3f2   :  { %8207 = vmatpush.bf16.msra.mxu3 %v11931_v28  ;;  %v7931_v28 = vpop.f32.mrf.mxu1  ;;  %v11848_v57 = vld [vmem:[#allocation8 + $0xd38] sm:$0xf0]  ;;  %v11723_v21 = vor.u32 %v13873_v35, %v11720_v44  ;;  %v13993_v38 = vld [vmem:[#allocation8 + $0xfec] sm:$0xf] }
 0x3f3   :  { %8169 = vmatpush.bf16.msra.mxu0 %v11531_v50  ;;  %v14911_v46 = vadd.f32 %v7955_v0, %v7943_v45  ;;  %v11464_v50 = vld [vmem:[#allocation8 + $0xa38] sm:$0xf0]  ;;  %v14025_v13 = vld [vmem:[#allocation8 + $0x10ec] sm:$0xf] }
 0x3f4   :  { %8182 = vmatpush.bf16.msra.mxu1 %v11659_v41  ;;  %v13841_v41 = vld [vmem:[#allocation8 + $0xb2c] sm:$0xf]  ;;  %v11467_v55 = vor.u32 %v13809_v37, %v11464_v50  ;;  %v11448_v47 = vld [vmem:[#allocation8 + $0xa18] sm:$0xf0] }
 0x3f5   :  { %8195 = vmatpush.bf16.msra.mxu2 %v11787_v6  ;;  %v11867_v6 = vor.u32 %v13909_v22, %v11864_v8  ;;  %v11595_v39 = vor.u32 %v13841_v41, %v11592_v26  ;;  %v11576_v31 = vld [vmem:[#allocation8 + $0xb18] sm:$0xf0]  ;;  %v11451_v4 = vor.u32 %v13805_v42, %v11448_v47  ;;  %v14057_v16 = vld [vmem:[#allocation8 + $0x11ec] sm:$0xf] }
 0x3f6   :  { %8208 = vmatpush.bf16.msra.mxu3 %v11915_v12  ;;  %v13905_v12 = vld [vmem:[#allocation8 + $0xd2c] sm:$0xf]  ;;  %v11704_v62 = vld [vmem:[#allocation8 + $0xc18] sm:$0xf0] }
 0x3f7   :  { %8170 = vmatpush.bf16.msra.mxu0 %v11515_v58  ;;  %v13869_v58 = vld [vmem:[#allocation8 + $0xc0c] sm:$0xf]  ;;  %v11832_v51 = vld [vmem:[#allocation8 + $0xd18] sm:$0xf0] }
 0x3f8   :  { %8183 = vmatpush.bf16.msra.mxu1 %v11643_v43  ;;  %v11851_v43 = vor.u32 %v13905_v12, %v11848_v57  ;;  %v12072_v63 = vld [vmem:[#allocation8 + $0xef8] sm:$0xf0]  ;;  %v11835_v49 = vor.u32 %v13901_v36, %v11832_v51  ;;  %v13957_v15 = vld [vmem:[#allocation8 + $0xecc] sm:$0xf] }
 0x3f9   :  { %8196 = vmatpush.bf16.msra.mxu2 %v11771_v60  ;;  %v7944_v60 = vpop.f32.mrf.mxu2  ;;  %v7957_v53 = vpop.f32.mrf.mxu3  ;;  %v12200_v59 = vld [vmem:[#allocation8 + $0xff8] sm:$0xf0]  ;;  %v13989_v45 = vld [vmem:[#allocation8 + $0xfcc] sm:$0xf] }
 0x3fa   :  { %8209 = vmatpush.bf16.msra.mxu3 %v11899_v54  ;;  %v13961_v54 = vld [vmem:[#allocation8 + $0xeec] sm:$0xf]  ;;  %v12456_v18 = vld [vmem:[#allocation8 + $0x11f8] sm:$0xf0]  ;;  %v12203_v3 = vor.u32 %v13993_v38, %v12200_v59 }
 0x3fb   :  { %8171 = vmatpush.bf16.msra.mxu0 %v11499_v48  ;;  %v12328_v48 = vld [vmem:[#allocation8 + $0x10f8] sm:$0xf0]  ;;  %v12459_v0 = vor.u32 %v14057_v16, %v12456_v18  ;;  %v14021_v22 = vld [vmem:[#allocation8 + $0x10cc] sm:$0xf] }
 0x3fc   :  { %8184 = vmatpush.bf16.msra.mxu1 %v11627_v7  ;;  %v11579_v7 = vor.u32 %v13837_v61, %v11576_v31  ;;  %v12331_v23 = vor.u32 %v14025_v13, %v12328_v48  ;;  %v12056_v11 = vld [vmem:[#allocation8 + $0xed8] sm:$0xf0]  ;;  %v14053_v28 = vld [vmem:[#allocation8 + $0x11cc] sm:$0xf] }
 0x3fd   :  { %8197 = vmatpush.bf16.msra.mxu2 %v11755_v14  ;;  %v11707_v14 = vor.u32 %v13869_v58, %v11704_v62  ;;  %v12184_v30 = vld [vmem:[#allocation8 + $0xfd8] sm:$0xf0]  ;;  %v13953_v50 = vld [vmem:[#allocation8 + $0xeac] sm:$0xf] }
 0x3fe   :  { %8210 = vmatpush.bf16.msra.mxu3 %v11883_v1  ;;  %v12075_v1 = vor.u32 %v13961_v54, %v12072_v63  ;;  %v12312_v8 = vld [vmem:[#allocation8 + $0x10d8] sm:$0xf0]  ;;  %v14017_v44 = vld [vmem:[#allocation8 + $0x10ac] sm:$0xf] }
 0x3ff   :  { %8172 = vmatpush.bf16.msra.mxu0 %v11483_v32  ;;  %v12440_v32 = vld [vmem:[#allocation8 + $0x11d8] sm:$0xf0]  ;;  %v12315_v37 = vor.u32 %v14021_v22, %v12312_v8  ;;  %v14049_v57 = vld [vmem:[#allocation8 + $0x11ac] sm:$0xf] }
 0x400   :  { %8185 = vmatpush.bf16.msra.mxu1 %v11611_v33  ;;  %v12059_v33 = vor.u32 %v13957_v15, %v12056_v11  ;;  %v12040_v41 = vld [vmem:[#allocation8 + $0xeb8] sm:$0xf0]  ;;  %v12443_v26 = vor.u32 %v14053_v28, %v12440_v32  ;;  %v13981_v61 = vld [vmem:[#allocation8 + $0xf8c] sm:$0xf] }
 0x401   :  { %8198 = vmatpush.bf16.msra.mxu2 %v11739_v9  ;;  %v12187_v9 = vor.u32 %v13989_v45, %v12184_v30  ;;  %v12168_v35 = vld [vmem:[#allocation8 + $0xfb8] sm:$0xf0]  ;;  %v12043_v42 = vor.u32 %v13953_v50, %v12040_v41  ;;  %v13945_v63 = vld [vmem:[#allocation8 + $0xe6c] sm:$0xf] }
 0x402   :  { %8211 = vmatpush.bf16.msra.mxu3 %v11867_v6  ;;  %v13985_v6 = vld [vmem:[#allocation8 + $0xfac] sm:$0xf]  ;;  %v12296_v12 = vld [vmem:[#allocation8 + $0x10b8] sm:$0xf0] }
 0x403   :  { %8173 = vmatpush.bf16.msra.mxu0 %v11467_v55  ;;  %v12424_v55 = vld [vmem:[#allocation8 + $0x11b8] sm:$0xf0]  ;;  %v12171_v47 = vor.u32 %v13985_v6, %v12168_v35  ;;  %v14041_v16 = vld [vmem:[#allocation8 + $0x116c] sm:$0xf] }
 0x404   :  { %8186 = vmatpush.bf16.msra.mxu1 %v11595_v39  ;;  %v12299_v39 = vor.u32 %v14017_v44, %v12296_v12  ;;  %v12427_v31 = vor.u32 %v14049_v57, %v12424_v55  ;;  %v12152_v58 = vld [vmem:[#allocation8 + $0xf98] sm:$0xf0]  ;;  %v13973_v15 = vld [vmem:[#allocation8 + $0xf4c] sm:$0xf] }
 0x405   :  { %8199 = vmatpush.bf16.msra.mxu2 %v11723_v21  ;;  %v13949_v21 = vld [vmem:[#allocation8 + $0xe8c] sm:$0xf]  ;;  %v12408_v62 = vld [vmem:[#allocation8 + $0x1198] sm:$0xf0]  ;;  %v12155_v53 = vor.u32 %v13981_v61, %v12152_v58 }
 0x406   :  { %8212 = vmatpush.bf16.msra.mxu3 %v11851_v43  ;;  %v14013_v43 = vld [vmem:[#allocation8 + $0x108c] sm:$0xf]  ;;  %v12008_v38 = vld [vmem:[#allocation8 + $0xe78] sm:$0xf0] }
 0x407   :  { %8174 = vmatpush.bf16.msra.mxu0 %v11451_v4  ;;  %v7968_v60 = vpop.f32.mrf.mxu0  ;;  %v13977_v4 = vld [vmem:[#allocation8 + $0xf6c] sm:$0xf]  ;;  %v12136_v48 = vld [vmem:[#allocation8 + $0xf78] sm:$0xf0] }
 0x408   :  { %8187 = vmatpush.bf16.msra.mxu1 %v11579_v7  ;;  %v7981_v36 = vpop.f32.mrf.mxu1  ;;  %v14009_v7 = vld [vmem:[#allocation8 + $0x106c] sm:$0xf]  ;;  %v12392_v18 = vld [vmem:[#allocation8 + $0x1178] sm:$0xf0] }
 0x409   :  { %8200 = vmatpush.bf16.msra.mxu2 %v11707_v14  ;;  %v12264_v14 = vld [vmem:[#allocation8 + $0x1078] sm:$0xf0]  ;;  %v12395_v11 = vor.u32 %v14041_v16, %v12392_v18  ;;  %v14005_v30 = vld [vmem:[#allocation8 + $0x104c] sm:$0xf] }
 0x40a   :  { %8213 = vmatpush.bf16.msra.mxu3 %v11835_v49  ;;  %8175 = vmatmul.bf16.vlgmr.msra.gmra.mxu0 %v14742_v2  ;;  %v12024_v2 = vld [vmem:[#allocation8 + $0xe98] sm:$0xf0]  ;;  %v12011_v49 = vor.u32 %v13945_v63, %v12008_v38  ;;  %v13937_v35 = vld [vmem:[#allocation8 + $0xe2c] sm:$0xf] }
 0x40b   :  { %8219 = vmatpush.bf16.msrb.mxu0 %v12075_v1  ;;  %8188 = vmatmul.bf16.vlgmr.msra.gmra.mxu1 %v14744_v10  ;;  %v12280_v10 = vld [vmem:[#allocation8 + $0x1098] sm:$0xf0]  ;;  %v12027_v51 = vor.u32 %v13949_v21, %v12024_v2  ;;  %v12267_v1 = vor.u32 %v14009_v7, %v12264_v14  ;;  %v13969_v12 = vld [vmem:[#allocation8 + $0xf2c] sm:$0xf] }
 0x40c   :  { %8232 = vmatpush.bf16.msrb.mxu1 %v12203_v3  ;;  %8201 = vmatmul.bf16.vlgmr.msra.gmra.mxu2 %v14762_v5  ;;  %v14045_v5 = vld [vmem:[#allocation8 + $0x118c] sm:$0xf]  ;;  %v12283_v54 = vor.u32 %v14013_v43, %v12280_v10  ;;  %v12248_v22 = vld [vmem:[#allocation8 + $0x1058] sm:$0xf0] }
 0x40d   :  { %8245 = vmatpush.bf16.msrb.mxu2 %v12331_v23  ;;  %8214 = vmatmul.bf16.vlgmr.msra.gmra.mxu3 %v14764_v25  ;;  %v7969_v25 = vadd.f32 %v7968_v60, %v14911_v46  ;;  %v12411_v13 = vor.u32 %v14045_v5, %v12408_v62  ;;  %v12139_v46 = vor.u32 %v13977_v4, %v12136_v48  ;;  %v13941_v3 = vld [vmem:[#allocation8 + $0xe4c] sm:$0xf]  ;;  %v11992_v23 = vld [vmem:[#allocation8 + $0xe58] sm:$0xf0] }
 0x40e   :  { %8258 = vmatpush.bf16.msrb.mxu3 %v12459_v0  ;;  %v12120_v0 = vld [vmem:[#allocation8 + $0xf58] sm:$0xf0]  ;;  %v11995_v50 = vor.u32 %v13941_v3, %v11992_v23  ;;  %v13933_v61 = vld [vmem:[#allocation8 + $0xe0c] sm:$0xf] }
 0x40f   :  { %8220 = vmatpush.bf16.msrb.mxu0 %v12059_v33  ;;  %v7982_v59 = vadd.f32 %v7981_v36, %v7969_v25  ;;  %v7994_v45 = vpop.f32.mrf.mxu2  ;;  %v7970_v32 = vpop.f32.mrf.mxu0  ;;  %v14037_v33 = vld [vmem:[#allocation8 + $0x114c] sm:$0xf]  ;;  %v12123_v6 = vor.u32 %v13973_v15, %v12120_v0  ;;  %v11976_v44 = vld [vmem:[#allocation8 + $0xe38] sm:$0xf0] }
 0x410   :  { %8233 = vmatpush.bf16.msrb.mxu1 %v12187_v9  ;;  %v8007_v28 = vpop.f32.mrf.mxu3  ;;  %v12376_v9 = vld [vmem:[#allocation8 + $0x1158] sm:$0xf0]  ;;  %v11979_v2 = vor.u32 %v13937_v35, %v11976_v44  ;;  %v13965_v10 = vld [vmem:[#allocation8 + $0xf0c] sm:$0xf] }
 0x411   :  { %8246 = vmatpush.bf16.msrb.mxu2 %v12315_v37  ;;  %v7995_v8 = vadd.f32 %v7994_v45, %v7982_v59  ;;  %v7983_v37 = vpop.f32.mrf.mxu1  ;;  %v12379_v57 = vor.u32 %v14037_v33, %v12376_v9  ;;  %v12104_v55 = vld [vmem:[#allocation8 + $0xf38] sm:$0xf0]  ;;  %v13997_v5 = vld [vmem:[#allocation8 + $0x100c] sm:$0xf] }
 0x412   :  { %8259 = vmatpush.bf16.msrb.mxu3 %v12443_v26  ;;  %v12251_v26 = vor.u32 %v14005_v30, %v12248_v22  ;;  %v12360_v21 = vld [vmem:[#allocation8 + $0x1138] sm:$0xf0]  ;;  %v12107_v58 = vor.u32 %v13969_v12, %v12104_v55  ;;  %v14089_v63 = vld [vmem:[#allocation8 + $0x12ec] sm:$0xf] }
 0x413   :  { %8221 = vmatpush.bf16.msrb.mxu0 %v12043_v42  ;;  %v14918_v41 = vadd.f32 %v8007_v28, %v7995_v8  ;;  %v14001_v42 = vld [vmem:[#allocation8 + $0x102c] sm:$0xf]  ;;  %v12088_v60 = vld [vmem:[#allocation8 + $0xf18] sm:$0xf0] }
 0x414   :  { %8234 = vmatpush.bf16.msrb.mxu1 %v12171_v47  ;;  %v12232_v47 = vld [vmem:[#allocation8 + $0x1038] sm:$0xf0]  ;;  %v14121_v4 = vld [vmem:[#allocation8 + $0x13ec] sm:$0xf]  ;;  %v12091_v14 = vor.u32 %v13965_v10, %v12088_v60 }
 0x415   :  { %8247 = vmatpush.bf16.msrb.mxu2 %v12299_v39  ;;  %v14033_v39 = vld [vmem:[#allocation8 + $0x112c] sm:$0xf]  ;;  %v12235_v43 = vor.u32 %v14001_v42, %v12232_v47  ;;  %v12216_v36 = vld [vmem:[#allocation8 + $0x1018] sm:$0xf0] }
 0x416   :  { %8260 = vmatpush.bf16.msrb.mxu3 %v12427_v31  ;;  %v11960_v31 = vld [vmem:[#allocation8 + $0xe18] sm:$0xf0]  ;;  %v12363_v62 = vor.u32 %v14033_v39, %v12360_v21  ;;  %v14153_v48 = vld [vmem:[#allocation8 + $0x14ec] sm:$0xf]  ;;  %v12219_v16 = vor.u32 %v13997_v5, %v12216_v36 }
 0x417   :  { %8222 = vmatpush.bf16.msrb.mxu0 %v12027_v51  ;;  %v7996_v25 = vpop.f32.mrf.mxu2  ;;  %v14029_v51 = vld [vmem:[#allocation8 + $0x110c] sm:$0xf]  ;;  %v12584_v38 = vld [vmem:[#allocation8 + $0x12f8] sm:$0xf0]  ;;  %v11963_v59 = vor.u32 %v13933_v61, %v11960_v31 }
 0x418   :  { %8235 = vmatpush.bf16.msrb.mxu1 %v12155_v53  ;;  %v12344_v53 = vld [vmem:[#allocation8 + $0x1118] sm:$0xf0]  ;;  %v14185_v18 = vld [vmem:[#allocation8 + $0x15ec] sm:$0xf] }
 0x419   :  { %8248 = vmatpush.bf16.msrb.mxu2 %v12283_v54  ;;  %v8009_v54 = vpop.f32.mrf.mxu3  ;;  %v12840_v7 = vld [vmem:[#allocation8 + $0x14f8] sm:$0xf0]  ;;  %v14085_v15 = vld [vmem:[#allocation8 + $0x12cc] sm:$0xf] }
 0x41a   :  { %8261 = vmatpush.bf16.msrb.mxu3 %v12411_v13  ;;  %v12712_v13 = vld [vmem:[#allocation8 + $0x13f8] sm:$0xf0]  ;;  %v12843_v23 = vor.u32 %v14153_v48, %v12840_v7  ;;  %v14117_v45 = vld [vmem:[#allocation8 + $0x13cc] sm:$0xf]  ;;  %v14248_v48 = vld [vmem:[#allocation10] sm:$0xf] }
 0x41b   :  { %8223 = vmatpush.bf16.msrb.mxu0 %v12011_v49  ;;  %v12968_v49 = vld [vmem:[#allocation8 + $0x15f8] sm:$0xf0]  ;;  %v12715_v3 = vor.u32 %v14121_v4, %v12712_v13  ;;  %v14149_v22 = vld [vmem:[#allocation8 + $0x14cc] sm:$0xf]  ;;  %v3654_v7 = vperm.slane %v14248_v48, 3  ;;  %v14210_v48 = vld [vmem:[#allocation11 + $0xb0] sm:$0xff] }
 0x41c   :  { %8236 = vmatpush.bf16.msrb.mxu1 %v12139_v46  ;;  %v12347_v46 = vor.u32 %v14029_v51, %v12344_v53  ;;  %v12971_v0 = vor.u32 %v14185_v18, %v12968_v49  ;;  %v12696_v30 = vld [vmem:[#allocation8 + $0x13d8] sm:$0xf0]  ;;  %v14181_v28 = vld [vmem:[#allocation8 + $0x15cc] sm:$0xf] }
 0x41d   :  { %8249 = vmatpush.bf16.msrb.mxu2 %v12267_v1  ;;  %v12587_v1 = vor.u32 %v14089_v63, %v12584_v38  ;;  %v12824_v8 = vld [vmem:[#allocation8 + $0x14d8] sm:$0xf0]  ;;  %v12699_v9 = vor.u32 %v14117_v45, %v12696_v30  ;;  %v14145_v12 = vld [vmem:[#allocation8 + $0x14ac] sm:$0xf] }
 0x41e   :  { %8262 = vmatpush.bf16.msrb.mxu3 %v12395_v11  ;;  %v12568_v11 = vld [vmem:[#allocation8 + $0x12d8] sm:$0xf0]  ;;  %v12827_v37 = vor.u32 %v14149_v22, %v12824_v8  ;;  %v14177_v55 = vld [vmem:[#allocation8 + $0x15ac] sm:$0xf] }
 0x41f   :  { %8224 = vmatpush.bf16.msrb.mxu0 %v11995_v50  ;;  %v12952_v32 = vld [vmem:[#allocation8 + $0x15d8] sm:$0xf0]  ;;  %v12571_v33 = vor.u32 %v14085_v15, %v12568_v11  ;;  %v14081_v50 = vld [vmem:[#allocation8 + $0x12ac] sm:$0xf] }
 0x420   :  { %8237 = vmatpush.bf16.msrb.mxu1 %v12123_v6  ;;  %v12552_v6 = vld [vmem:[#allocation8 + $0x12b8] sm:$0xf0]  ;;  %v12955_v35 = vor.u32 %v14181_v28, %v12952_v32  ;;  %v14109_v61 = vld [vmem:[#allocation8 + $0x138c] sm:$0xf] }
 0x421   :  { %8250 = vmatpush.bf16.msrb.mxu2 %v12251_v26  ;;  %v14113_v26 = vld [vmem:[#allocation8 + $0x13ac] sm:$0xf]  ;;  %v12680_v44 = vld [vmem:[#allocation8 + $0x13b8] sm:$0xf0]  ;;  %v12555_v47 = vor.u32 %v14081_v50, %v12552_v6 }
 0x422   :  { %8263 = vmatpush.bf16.msrb.mxu3 %v12379_v57  ;;  %v12808_v57 = vld [vmem:[#allocation8 + $0x14b8] sm:$0xf0]  ;;  %v12683_v39 = vor.u32 %v14113_v26, %v12680_v44  ;;  %v14073_v36 = vld [vmem:[#allocation8 + $0x126c] sm:$0xf] }
 0x423   :  { %8225 = vmatpush.bf16.msrb.mxu0 %v11979_v2  ;;  %v12936_v42 = vld [vmem:[#allocation8 + $0x15b8] sm:$0xf0]  ;;  %v12811_v21 = vor.u32 %v14145_v12, %v12808_v57  ;;  %v14077_v2 = vld [vmem:[#allocation8 + $0x128c] sm:$0xf] }
 0x424   :  { %8238 = vmatpush.bf16.msrb.mxu1 %v12107_v58  ;;  %v12939_v31 = vor.u32 %v14177_v55, %v12936_v42  ;;  %v12664_v58 = vld [vmem:[#allocation8 + $0x1398] sm:$0xf0]  ;;  %v14105_v53 = vld [vmem:[#allocation8 + $0x136c] sm:$0xf] }
 0x425   :  { %8251 = vmatpush.bf16.msrb.mxu2 %v12235_v43  ;;  %v14141_v43 = vld [vmem:[#allocation8 + $0x148c] sm:$0xf]  ;;  %v12920_v60 = vld [vmem:[#allocation8 + $0x1598] sm:$0xf0] }
 0x426   :  { %8264 = vmatpush.bf16.msrb.mxu3 %v12363_v62  ;;  %v12667_v62 = vor.u32 %v14109_v61, %v12664_v58  ;;  %v12520_v51 = vld [vmem:[#allocation8 + $0x1278] sm:$0xf0]  ;;  %v14137_v38 = vld [vmem:[#allocation8 + $0x146c] sm:$0xf] }
 0x427   :  { %8226 = vmatpush.bf16.msrb.mxu0 %v11963_v59  ;;  %v14924_v10 = vpop.f32.mrf.mxu0  ;;  %v12648_v63 = vld [vmem:[#allocation8 + $0x1378] sm:$0xf0]  ;;  %v14169_v59 = vld [vmem:[#allocation8 + $0x156c] sm:$0xf] }
 0x428   :  { %8239 = vmatpush.bf16.msrb.mxu1 %v12091_v14  ;;  %v12776_v4 = vld [vmem:[#allocation8 + $0x1478] sm:$0xf0]  ;;  %v12523_v14 = vor.u32 %v14073_v36, %v12520_v51  ;;  %v14069_v49 = vld [vmem:[#allocation8 + $0x124c] sm:$0xf] }
 0x429   :  { %8252 = vmatpush.bf16.msrb.mxu2 %v12219_v16  ;;  %v12904_v13 = vld [vmem:[#allocation8 + $0x1578] sm:$0xf0]  ;;  %v12651_v16 = vor.u32 %v14105_v53, %v12648_v63  ;;  %v12779_v18 = vor.u32 %v14137_v38, %v12776_v4  ;;  %v14133_v11 = vld [vmem:[#allocation8 + $0x144c] sm:$0xf] }
 0x42a   :  { %8265 = vmatpush.bf16.msrb.mxu3 %v12347_v46  ;;  %8227 = vmatmul.bf16.vlgmr.msrb.gmra.mxu0 %v14766_v29  ;;  %v12536_v29 = vld [vmem:[#allocation8 + $0x1298] sm:$0xf0]  ;;  %v14165_v8 = vld [vmem:[#allocation8 + $0x154c] sm:$0xf] }
 0x42b   :  { %8271 = vmatpush.bf16.msra.mxu0 %v12587_v1  ;;  %8240 = vmatmul.bf16.vlgmr.msrb.gmra.mxu1 %v14768_v40  ;;  %v12792_v40 = vld [vmem:[#allocation8 + $0x1498] sm:$0xf0]  ;;  %v12539_v5 = vor.u32 %v14077_v2, %v12536_v29  ;;  %v14101_v1 = vld [vmem:[#allocation8 + $0x134c] sm:$0xf] }
 0x42c   :  { %8284 = vmatpush.bf16.msra.mxu1 %v12715_v3  ;;  %8253 = vmatmul.bf16.vlgmr.msrb.gmra.mxu2 %v14790_v56  ;;  %v14173_v56 = vld [vmem:[#allocation8 + $0x158c] sm:$0xf]  ;;  %v12795_v25 = vor.u32 %v14141_v43, %v12792_v40  ;;  %v12504_v46 = vld [vmem:[#allocation8 + $0x1258] sm:$0xf0]  ;;  %v12907_v3 = vor.u32 %v14169_v59, %v12904_v13  ;;  %v14194_v59 = vld [vmem:[#allocation11 + $0x30] sm:$0xff] }
 0x42d   :  { %8297 = vmatpush.bf16.msra.mxu2 %v12843_v23  ;;  %8266 = vmatmul.bf16.vlgmr.msrb.gmra.mxu3 %v14792_v19  ;;  %v14926_v19 = vpop.f32.mrf.mxu1  ;;  %v12923_v54 = vor.u32 %v14173_v56, %v12920_v60  ;;  %v12632_v15 = vld [vmem:[#allocation8 + $0x1358] sm:$0xf0]  ;;  %v14065_v6 = vld [vmem:[#allocation8 + $0x122c] sm:$0xf]  ;;  %v14202_v13 = vld [vmem:[#allocation11 + $0x70] sm:$0xff] }
 0x42e   :  { %8310 = vmatpush.bf16.msra.mxu3 %v12971_v0  ;;  %v12760_v45 = vld [vmem:[#allocation8 + $0x1458] sm:$0xf0]  ;;  %v14129_v57 = vld [vmem:[#allocation8 + $0x142c] sm:$0xf] }
 0x42f   :  { %8272 = vmatpush.bf16.msra.mxu0 %v12571_v33  ;;  %v8046_v23 = vpop.f32.mrf.mxu2  ;;  %v8022_v22 = vpop.f32.mrf.mxu0  ;;  %v12888_v28 = vld [vmem:[#allocation8 + $0x1558] sm:$0xf0]  ;;  %v12507_v33 = vor.u32 %v14069_v49, %v12504_v46  ;;  %v12763_v50 = vor.u32 %v14133_v11, %v12760_v45  ;;  %v14161_v42 = vld [vmem:[#allocation8 + $0x152c] sm:$0xf] }
 0x430   :  { %8285 = vmatpush.bf16.msra.mxu1 %v12699_v9  ;;  %v8047_v0 = vadd.f32 %v8046_v23, %v3654_v7  ;;  %v8059_v30 = vpop.f32.mrf.mxu3  ;;  %v12488_v26 = vld [vmem:[#allocation8 + $0x1238] sm:$0xf0]  ;;  %v12891_v44 = vor.u32 %v14165_v8, %v12888_v28  ;;  %v14061_v29 = vld [vmem:[#allocation8 + $0x120c] sm:$0xf]  ;;  %v14190_v22 = vld [vmem:[#allocation11 + $0x10] sm:$0xff] }
 0x431   :  { %8298 = vmatpush.bf16.msra.mxu2 %v12827_v37  ;;  %v12635_v37 = vor.u32 %v14101_v1, %v12632_v15  ;;  %v12616_v12 = vld [vmem:[#allocation8 + $0x1338] sm:$0xf0]  ;;  %v14125_v56 = vld [vmem:[#allocation8 + $0x140c] sm:$0xf]  ;;  %v14192_v1 = vld [vmem:[#allocation11 + $0x20] sm:$0xff] }
 0x432   :  { %8311 = vmatpush.bf16.msra.mxu3 %v12955_v35  ;;  %v14928_v9 = vadd.f32 %v8059_v30, %v8047_v0  ;;  %v14097_v35 = vld [vmem:[#allocation8 + $0x132c] sm:$0xf]  ;;  %v12744_v55 = vld [vmem:[#allocation8 + $0x1438] sm:$0xf0]  ;;  %v14198_v28 = vld [vmem:[#allocation11 + $0x50] sm:$0xff] }
 0x433   :  { %8273 = vmatpush.bf16.msra.mxu0 %v12555_v47  ;;  %v12872_v47 = vld [vmem:[#allocation8 + $0x1538] sm:$0xf0]  ;;  %v12747_v2 = vor.u32 %v14129_v57, %v12744_v55  ;;  %v14193_v7 = vld [vmem:[#allocation11 + $0x28] sm:$0xff]  ;;  %v14196_v57 = vld [vmem:[#allocation11 + $0x40] sm:$0xff] }
 0x434   :  { %8286 = vmatpush.bf16.msra.mxu1 %v12683_v39  ;;  %v12491_v39 = vor.u32 %v14065_v6, %v12488_v26  ;;  %v12472_v61 = vld [vmem:[#allocation8 + $0x1218] sm:$0xf0]  ;;  %v12875_v58 = vor.u32 %v14161_v42, %v12872_v47  ;;  %v14204_v55 = vld [vmem:[#allocation11 + $0x80] sm:$0xff] }
 0x435   :  { %8299 = vmatpush.bf16.msra.mxu2 %v12811_v21  ;;  %v8035_v32 = vpop.f32.mrf.mxu1  ;;  %v12619_v21 = vor.u32 %v14097_v35, %v12616_v12  ;;  %v12600_v40 = vld [vmem:[#allocation8 + $0x1318] sm:$0xf0]  ;;  %v12475_v36 = vor.u32 %v14061_v29, %v12472_v61  ;;  %v8323_v12 = vmax.f32 %v14847_v34, 0.0 }
 0x436   :  { %8312 = vmatpush.bf16.msra.mxu3 %v12939_v31  ;;  %v14093_v31 = vld [vmem:[#allocation8 + $0x130c] sm:$0xf]  ;;  %v12728_v60 = vld [vmem:[#allocation8 + $0x1418] sm:$0xf0]  ;;  %v14206_v32 = vld [vmem:[#allocation11 + $0x90] sm:$0xff] }
 0x437   :  { %8274 = vmatpush.bf16.msra.mxu0 %v12539_v5  ;;  %v8048_v43 = vpop.f32.mrf.mxu2  ;;  %v12603_v51 = vor.u32 %v14093_v31, %v12600_v40  ;;  %v12731_v53 = vor.u32 %v14125_v56, %v12728_v60  ;;  %v14195_v63 = vld [vmem:[#allocation11 + $0x38] sm:$0xff]  ;;  %v8327_v42 = vpack.c.bf16 %v8323_v12, %v8323_v12 }
 0x438   :  { %8287 = vmatpush.bf16.msra.mxu1 %v12667_v62  ;;  %v8061_v5 = vpop.f32.mrf.mxu3  ;;  %v14157_v62 = vld [vmem:[#allocation8 + $0x150c] sm:$0xf]  ;;  %v14203_v38 = vld [vmem:[#allocation11 + $0x78] sm:$0xff] }
 0x439   :  { %8300 = vmatpush.bf16.msra.mxu2 %v12795_v25  ;;  %v12856_v25 = vld [vmem:[#allocation8 + $0x1518] sm:$0xf0] }
 0x43a   :  { %8313 = vmatpush.bf16.msra.mxu3 %v12923_v54  ;;  %v12859_v54 = vor.u32 %v14157_v62, %v12856_v25  ;;  %v14211_v4 = vld [vmem:[#allocation11 + $0xb8] sm:$0xff] }
 0x43b   :  { %8275 = vmatpush.bf16.msra.mxu0 %v12523_v14  ;;  %v14201_v14 = vld [vmem:[#allocation11 + $0x68] sm:$0xff]  ;;  %v14207_v23 = vld [vmem:[#allocation11 + $0x98] sm:$0xff] }
 0x43c   :  { %8288 = vmatpush.bf16.msra.mxu1 %v12651_v16  ;;  %v14209_v16 = vld [vmem:[#allocation11 + $0xa8] sm:$0xff] }
 0x43d   :  { %8301 = vmatpush.bf16.msra.mxu2 %v12779_v18 }
 0x43e   :  { %8314 = vmatpush.bf16.msra.mxu3 %v12907_v3 }
 0x43f   :  { %8276 = vmatpush.bf16.msra.mxu0 %v12507_v33  ;;  %v8021_v33 = vadd.f32 %v14924_v10, %v14918_v41  ;;  %v8324_v41 = vmax.f32 %v14884_v24, 0.0 }
 0x440   :  { %8289 = vmatpush.bf16.msra.mxu1 %v12635_v37  ;;  %v14197_v37 = vld [vmem:[#allocation11 + $0x48] sm:$0xff] }
 0x441   :  { %8302 = vmatpush.bf16.msra.mxu2 %v12763_v50  ;;  %v14205_v50 = vld [vmem:[#allocation11 + $0x88] sm:$0xff]  ;;  %v8034_v6 = vadd.f32 %v14926_v19, %v8021_v33  ;;  %v8328_v47 = vpack.c.bf16 %v8324_v41, %v8324_v41 }
 0x442   :  { %8315 = vmatpush.bf16.msra.mxu3 %v12891_v44  ;;  %v14188_v44 = vld [vmem:[#allocation11] sm:$0xff] }
 0x443   :  { %8277 = vmatpush.bf16.msra.mxu0 %v12491_v39  ;;  %v8325_v10 = vmax.f32 %v8034_v6, 0.0 }
 0x444   :  { %8290 = vmatpush.bf16.msra.mxu1 %v12619_v21 }
 0x445   :  { %8303 = vmatpush.bf16.msra.mxu2 %v12747_v2  ;;  %v8329_v39 = vpack.c.bf16 %v8325_v10, %v8325_v10  ;;  %v14225_v10 = vld [vmem:[#allocation14 + $0x28] sm:$0xff] }
 0x446   :  { %8316 = vmatpush.bf16.msra.mxu3 %v12875_v58 }
 0x447   :  { %8278 = vmatpush.bf16.msra.mxu0 %v12475_v36  ;;  %v8072_v18 = vpop.f32.mrf.mxu0 }
 0x448   :  { %8291 = vmatpush.bf16.msra.mxu1 %v12603_v51  ;;  %v8073_v49 = vadd.f32 %v8072_v18, %v14928_v9  ;;  %v8085_v46 = vpop.f32.mrf.mxu1  ;;  %v14189_v9 = vld [vmem:[#allocation11 + $0x8] sm:$0xff]  ;;  %v14219_v51 = vld [vmem:[#allocation11 + $0xf8] sm:$0xff] }
 0x449   :  { %8304 = vmatpush.bf16.msra.mxu2 %v12731_v53 }
 0x44a   :  { %8317 = vmatpush.bf16.msra.mxu3 %v12859_v54  ;;  %8279 = vmatmul.bf16.vlgmr.msra.gmra.mxu0 %v14794_v20  ;;  %v14200_v20 = vld [vmem:[#allocation11 + $0x60] sm:$0xff]  ;;  %v8086_v3 = vadd.f32 %v8085_v46, %v8073_v49  ;;  %v14218_v54 = vld [vmem:[#allocation11 + $0xf0] sm:$0xff] }
 0x44b   :  { %8591 = vmatpush.bf16.msrb.mxu0 %v14195_v63  ;;  %8292 = vmatmul.bf16.vlgmr.msra.gmra.mxu1 %v14796_v27  ;;  %v14208_v27 = vld [vmem:[#allocation11 + $0xa0] sm:$0xff] }
 0x44c   :  { %8604 = vmatpush.bf16.msrb.mxu1 %v14203_v38  ;;  %8305 = vmatmul.bf16.vlgmr.msra.gmra.mxu2 %v14810_v52  ;;  %v14191_v52 = vld [vmem:[#allocation11 + $0x18] sm:$0xff] }
 0x44d   :  { %8617 = vmatpush.bf16.msrb.mxu2 %v14211_v4  ;;  %8318 = vmatmul.bf16.vlgmr.msra.gmra.mxu3 %v14812_v17  ;;  %v14199_v17 = vld [vmem:[#allocation11 + $0x58] sm:$0xff]  ;;  %v14217_v4 = vld [vmem:[#allocation11 + $0xe8] sm:$0xff] }
 0x44e   :  { %8630 = vmatpush.bf16.msrb.mxu3 %v14219_v51  ;;  %v14245_v51 = vld [vmem:[#allocation16] ss:$0 sm:$0xff] }
 0x44f   :  { %8592 = vmatpush.bf16.msrb.mxu0 %v14194_v59  ;;  %v8098_v15 = vpop.f32.mrf.mxu2  ;;  %v8074_v0 = vpop.f32.mrf.mxu0  ;;  %v14216_v59 = vld [vmem:[#allocation11 + $0xe0] sm:$0xff] }
 0x450   :  { %8605 = vmatpush.bf16.msrb.mxu1 %v14202_v13  ;;  %v8099_v11 = vadd.f32 %v8098_v15, %v8086_v3  ;;  %v8111_v45 = vpop.f32.mrf.mxu3  ;;  %v8087_v30 = vpop.f32.mrf.mxu1  ;;  %v14215_v13 = vld [vmem:[#allocation11 + $0xd8] sm:$0xff] }
 0x451   :  { %8618 = vmatpush.bf16.msrb.mxu2 %v14210_v48 }
 0x452   :  { %v8112_v8 = vadd.f32 %v8111_v45, %v8099_v11  ;;  %8631 = vmatpush.bf16.msrb.mxu3 %v14218_v54 }
 0x453   :  { %8593 = vmatpush.bf16.msrb.mxu0 %v14193_v7 }
 0x454   :  { %8606 = vmatpush.bf16.msrb.mxu1 %v14201_v14  ;;  %v14214_v14 = vld [vmem:[#allocation11 + $0xd0] sm:$0xff] }
 0x455   :  { %8619 = vmatpush.bf16.msrb.mxu2 %v14209_v16  ;;  %v14213_v16 = vld [vmem:[#allocation11 + $0xc8] sm:$0xff] }
 0x456   :  { %8632 = vmatpush.bf16.msrb.mxu3 %v14217_v4 }
 0x457   :  { %8594 = vmatpush.bf16.msrb.mxu0 %v14192_v1  ;;  %v8100_v26 = vpop.f32.mrf.mxu2 }
 0x458   :  { %8607 = vmatpush.bf16.msrb.mxu1 %v14200_v20  ;;  %v8113_v35 = vpop.f32.mrf.mxu3 }
 0x459   :  { %8620 = vmatpush.bf16.msrb.mxu2 %v14208_v27  ;;  %v14212_v27 = vld [vmem:[#allocation11 + $0xc0] sm:$0xff] }
 0x45a   :  { %8633 = vmatpush.bf16.msrb.mxu3 %v14216_v59 }
 0x45b   :  { %8595 = vmatpush.bf16.msrb.mxu0 %v14191_v52 }
 0x45c   :  { %8608 = vmatpush.bf16.msrb.mxu1 %v14199_v17 }
 0x45d   :  { %8621 = vmatpush.bf16.msrb.mxu2 %v14207_v23 }
 0x45e   :  { %8634 = vmatpush.bf16.msrb.mxu3 %v14215_v13 }
 0x45f   :  { %8596 = vmatpush.bf16.msrb.mxu0 %v14190_v22 }
 0x460   :  { %8609 = vmatpush.bf16.msrb.mxu1 %v14198_v28 }
 0x461   :  { %8622 = vmatpush.bf16.msrb.mxu2 %v14206_v32 }
 0x462   :  { %8635 = vmatpush.bf16.msrb.mxu3 %v14214_v14 }
 0x463   :  { %8597 = vmatpush.bf16.msrb.mxu0 %v14189_v9 }
 0x464   :  { %8610 = vmatpush.bf16.msrb.mxu1 %v14197_v37 }
 0x465   :  { %8623 = vmatpush.bf16.msrb.mxu2 %v14205_v50 }
 0x466   :  { %8636 = vmatpush.bf16.msrb.mxu3 %v14213_v16 }
 0x467   :  { %8598 = vmatpush.bf16.msrb.mxu0 %v14188_v44  ;;  %v8124_v19 = vpop.f32.mrf.mxu0  ;;  %v14227_v44 = vld [vmem:[#allocation14 + $0x38] sm:$0xff] }
 0x468   :  { %8611 = vmatpush.bf16.msrb.mxu1 %v14196_v57  ;;  %v8125_v21 = vadd.f32 %v8124_v19, %v8112_v8  ;;  %v8137_v2 = vpop.f32.mrf.mxu1  ;;  %v14226_v57 = vld [vmem:[#allocation14 + $0x30] sm:$0xff] }
 0x469   :  { %8624 = vmatpush.bf16.msrb.mxu2 %v14204_v55 }
 0x46a   :  { %8599 = vmatmul.bf16.vlgmr.msrb.gmra.mxu0 %v8327_v42  ;;  %v8138_v34 = vadd.f32 %v8137_v2, %v8125_v21  ;;  %8637 = vmatpush.bf16.msrb.mxu3 %v14212_v27  ;;  %v14224_v42 = vld [vmem:[#allocation14 + $0x20] sm:$0xff] }
 0x46b   :  { %8612 = vmatmul.bf16.vlgmr.msrb.gmra.mxu1 %v8328_v47  ;;  %8713 = vmatpush.bf16.msra.mxu0 %v14227_v44  ;;  %v14244_v47 = vld [vmem:[#allocation13] ss:$0 sm:$0xff] }
 0x46c   :  { %8625 = vmatmul.bf16.vlgmr.msrb.gmra.mxu2 %v8329_v39  ;;  %v14223_v39 = vld [vmem:[#allocation14 + $0x18] sm:$0xff] }
 0x46f   :  { %v8150_v29 = vpop.f32.mrf.mxu2  ;;  %v8126_v58 = vpop.f32.mrf.mxu0  ;;  %8714 = vmatpush.bf16.msra.mxu0 %v14226_v57 }
 0x470   :  { %v8151_v61 = vadd.f32 %v8150_v29, %v8138_v34  ;;  %v8163_v31 = vpop.f32.mrf.mxu3  ;;  %v8139_v43 = vpop.f32.mrf.mxu1  ;;  %v14222_v34 = vld [vmem:[#allocation14 + $0x10] sm:$0xff] }
 0x472   :  { %v8164_v24 = vadd.f32 %v8163_v31, %v8151_v61 }
 0x473   :  { %8715 = vmatpush.bf16.msra.mxu0 %v14225_v10 }
 0x477   :  { %v8152_v40 = vpop.f32.mrf.mxu2  ;;  %8716 = vmatpush.bf16.msra.mxu0 %v14224_v42 }
 0x478   :  { %v8165_v56 = vpop.f32.mrf.mxu3  ;;  %v14221_v40 = vld [vmem:[#allocation14 + $0x8] sm:$0xff] }
 0x479   :  { %v14220_v56 = vld [vmem:[#allocation14] sm:$0xff] }
 0x47b   :  { %8717 = vmatpush.bf16.msra.mxu0 %v14223_v39 }
 0x47f   :  { %8718 = vmatpush.bf16.msra.mxu0 %v14222_v34 }
 0x483   :  { %8719 = vmatpush.bf16.msra.mxu0 %v14221_v40 }
 0x487   :  { %v8176_v60 = vpop.f32.mrf.mxu0  ;;  %8720 = vmatpush.bf16.msra.mxu0 %v14220_v56 }
 0x488   :  { %v8189_v5 = vpop.f32.mrf.mxu1  ;;  %v8177_v49 = vadd.f32 %v8176_v60, %v8164_v24 }
 0x48a   :  { %v8190_v3 = vadd.f32 %v8189_v5, %v8177_v49 }
 0x48f   :  { %v8202_v62 = vpop.f32.mrf.mxu2  ;;  %v8178_v36 = vpop.f32.mrf.mxu0 }
 0x490   :  { %v8215_v25 = vpop.f32.mrf.mxu3  ;;  %v8191_v53 = vpop.f32.mrf.mxu1  ;;  %v8203_v52 = vadd.f32 %v8202_v62, %v8190_v3 }
 0x492   :  { %v8216_v15 = vadd.f32 %v8215_v25, %v8203_v52 }
 0x497   :  { %v8204_v63 = vpop.f32.mrf.mxu2 }
 0x498   :  { %v8217_v38 = vpop.f32.mrf.mxu3 }
 0x4a7   :  { %v8228_v48 = vpop.f32.mrf.mxu0 }
 0x4a8   :  { %v8241_v7 = vpop.f32.mrf.mxu1  ;;  %v8229_v11 = vadd.f32 %v8228_v48, %v8216_v15 }
 0x4aa   :  { %v8242_v45 = vadd.f32 %v8241_v7, %v8229_v11 }
 0x4af   :  { %v8254_v18 = vpop.f32.mrf.mxu2  ;;  %v8230_v1 = vpop.f32.mrf.mxu0 }
 0x4b0   :  { %v8267_v46 = vpop.f32.mrf.mxu3  ;;  %v8243_v20 = vpop.f32.mrf.mxu1  ;;  %v8255_v0 = vadd.f32 %v8254_v18, %v8242_v45 }
 0x4b2   :  { %v8268_v30 = vadd.f32 %v8267_v46, %v8255_v0 }
 0x4b7   :  { %v8256_v17 = vpop.f32.mrf.mxu2 }
 0x4b8   :  { %v8269_v23 = vpop.f32.mrf.mxu3 }
 0x4c7   :  { %v8280_v22 = vpop.f32.mrf.mxu0 }
 0x4c8   :  { %v8293_v8 = vpop.f32.mrf.mxu1  ;;  %v8281_v28 = vadd.f32 %v8280_v22, %v8268_v30 }
 0x4ca   :  { %v8294_v32 = vadd.f32 %v8293_v8, %v8281_v28 }
 0x4cf   :  { %v8306_v33 = vpop.f32.mrf.mxu2  ;;  %v8282_v50 = vpop.f32.mrf.mxu0 }
 0x4d0   :  { %v8319_v9 = vpop.f32.mrf.mxu3  ;;  %v8307_v37 = vadd.f32 %v8306_v33, %v8294_v32  ;;  %v8295_v6 = vpop.f32.mrf.mxu1 }
 0x4d2   :  { %v8320_v26 = vadd.f32 %v8319_v9, %v8307_v37 }
 0x4d4   :  { %v8326_v35 = vmax.f32 %v8320_v26, 0.0 }
 0x4d6   :  { %v8330_v12 = vpack.c.bf16 %v8326_v35, %v8326_v35 }
 0x4d7   :  { %v8308_v55 = vpop.f32.mrf.mxu2 }
 0x4d8   :  { %v8321_v41 = vpop.f32.mrf.mxu3  ;;  %8638 = vmatmul.bf16.vlgmr.msrb.gmra.mxu3 %v8330_v12 }
 0x4e7   :  { %v8600_v19 = vpop.f32.mrf.mxu0 }
 0x4e8   :  { %v8601_v21 = vadd.f32 %v14244_v47, %v8600_v19  ;;  %v8613_v2 = vpop.f32.mrf.mxu1 }
 0x4ea   :  { %v8614_v29 = vadd.f32 %v8613_v2, %v8601_v21 }
 0x4ef   :  { %v8626_v61 = vpop.f32.mrf.mxu2  ;;  %v8602_v58 = vpop.f32.mrf.mxu0 }
 0x4f0   :  { %v8627_v31 = vadd.f32 %v8626_v61, %v8614_v29  ;;  %v8615_v43 = vpop.f32.mrf.mxu1 }
 0x4f7   :  { %v8628_v24 = vpop.f32.mrf.mxu2 }
 0x55b   :  { %v8639_v60 = vpop.f32.mrf.mxu3 }
 0x55c   :  { %v8640_v5 = vadd.f32 %v8639_v60, %v8627_v31 }
 0x55e   :  { %v8643_v62 = vmax.f32 %v8640_v5, 0.0 }
 0x560   :  { %v8644_v25 = vpack.c.bf16 %v8643_v62, %v8643_v62 }
 0x562   :  { %8721 = vmatmul.bf16.vlgmr.msra.gmra.mxu0 %v8644_v25 }
 0x563   :  { %v8641_v36 = vpop.f32.mrf.mxu3 }
 0x5df   :  { %v8722_v53 = vpop.f32.mrf.mxu0 }
 0x5e0   :  { %v8723_v54 = vadd.f32 %v14245_v51, %v8722_v53 }
 0x5e2   :  { %8726 = vst [vmem:[#allocation17] sm:$0xff] %v8723_v54 }
 0x5e3   :  { %8737 = dma.vmem_to_hbm [thread:$0]  %s8733_s8, 128, %s8735_s11, [#allocation4]  }
 0x5e7   :  { %v8724_v63 = vpop.f32.mrf.mxu0 }
 0x5e8   :  { %14499 = dma.done.wait [#allocation4], 128  }
 0x5e9   :  { %14500 = vsyncadd [#allocation4], 4294967168 }
 0x5ea   :  { %8742 = vsyncpa [#allocation3], 1 }
 0x5eb   :  { %8743 = vsyncpa [#allocation6], 1 }
 0x5ec   :  { %8744 = vsyncpa [#allocation9], 1 }
 0x5ed   :  { %8745 = vsyncpa [#allocation12], 1 }
 0x5ee   :  { %8746 = vsyncpa [#allocation15], 1 }
 0x5ef   :  { %8747 = vsyncpa [#allocation4], 1 }

</bundles_post_ra>
